<compile_context>
chip_gen: v7x
topology: tpu7x:2x2x1
jax: 0.10.0
libtpu: 0.0.40
codegen_flags: <defaults>
</compile_context>

<pallas_src>
import functools

import jax
import jax.numpy as jnp
from jax import lax
from jax.experimental import pallas as pl
from jax.experimental.pallas import tpu as pltpu


# ----------------------------------------------------------------------------
# Helpers
# ----------------------------------------------------------------------------

def _round_up(x, m):
    return (x + m - 1) // m * m


def _pick_tile(m, tile, align):
    """Pick a tile size: `tile` when there is plenty of work, otherwise split M into
    ~2 grid steps so both TensorCores (v7x) get work."""
    if m >= 2 * tile:
        return tile
    half = _round_up(-(-m // 2), align)
    return max(align, min(half, _round_up(m, align)))


def _apply_act(y, act):
    if act == "relu":
        return jnp.maximum(y, 0.0)
    if act == "leaky":                       # LeakyReLU(negative_slope=0.2)
        return jnp.where(y >= 0.0, y, 0.2 * y)
    return y


# ----------------------------------------------------------------------------
# Pallas kernels
# ----------------------------------------------------------------------------

def _dlinear_kernel(act1, act2, x_ref, w1_ref, b1_ref, w2_ref, b2_ref, o_ref):
    """Fused two chained 1x1 convs:  act2(act1(x @ w1 + b1) @ w2 + b2)."""
    x = x_ref[...]
    h = jnp.dot(x.astype(w1_ref.dtype), w1_ref[...],
                preferred_element_type=jnp.float32) + b1_ref[...]
    h = _apply_act(h, act1)
    h = jnp.dot(h.astype(w2_ref.dtype), w2_ref[...],
                preferred_element_type=jnp.float32) + b2_ref[...]
    o_ref[...] = _apply_act(h, act2)


def _local_kernel(x_ref, w1_ref, b1_ref, w2_ref, b2_ref, o_ref):
    """Local_op: two 1x1 convs + ReLU on flat (TG*K, Din) rows, max over the K neighbours."""
    tg, cout = o_ref.shape
    rows = x_ref.shape[0]
    k = rows // tg
    x = x_ref[...]                                            # bf16 rows
    h = jnp.dot(x, w1_ref[...], preferred_element_type=jnp.float32) + b1_ref[...]
    h = jnp.maximum(h, 0.0)
    h = jnp.dot(h.astype(w2_ref.dtype), w2_ref[...],
                preferred_element_type=jnp.float32) + b2_ref[...]
    h = jnp.maximum(h, 0.0)
    o_ref[...] = jnp.max(h.reshape(tg, k, cout), axis=1)      # neighbour max (epilogue)


def _sa_fuse_head_kernel(x_ref, f1_ref, wqv_ref, bqv_ref, wt_ref, bt_ref,
                         fw_ref, fb_ref, w1_ref, b1_ref, w2_ref, b2_ref,
                         w3_ref, b3_ref, o_ref, cat_ref):
    """One batch element: 4 fused SA layers -> concat (VMEM scratch) -> conv_fuse (leaky)
    -> global max pool over points -> 3-layer MLP head (dropout = identity)."""
    s = x_ref.shape[1]
    c = x_ref.shape[2]
    n_layers = wqv_ref.shape[0]

    x = x_ref[0]                                               # (S, C) f32 residual stream
    ones_col = jnp.ones((s, 1), jnp.bfloat16)

    for l in range(n_layers):                                  # static unroll
        xb = x.astype(jnp.bfloat16)
        # fused [v | q(zero-padded to 128)] projection; q_conv has no bias (zeros in bqv).
        qv = jnp.dot(xb, wqv_ref[l], preferred_element_type=jnp.float32) + bqv_ref[l]
        v = qv[:, :c]                                          # (S, C)
        q = qv[:, c:].astype(jnp.bfloat16)                     # (S, 128), last cols zero
        # energy = q @ k^T (shared q/k weights); zero-padded columns contribute nothing.
        energy = lax.dot_general(q, q, (((1,), (1,)), ((), ())),
                                 preferred_element_type=jnp.float32)       # (S, S)
        energy = energy - jnp.max(energy, axis=-1, keepdims=True)
        e = jnp.exp(energy)
        attn = e * pl.reciprocal(jnp.sum(e, axis=-1, keepdims=True), approx=True)
        attn_b = attn.astype(jnp.bfloat16)
        # torch: x_r = bmm(x_v, attention) -> point-major xr[j] = sum_i attn[i,j] v[i]
        xr = lax.dot_general(attn_b, v.astype(jnp.bfloat16), (((0,), (0,)), ((), ())),
                             preferred_element_type=jnp.float32)           # (S, C)
        # PCT column renorm applied after the matmul (diag scaling commutes); exact divide.
        colsum = lax.dot_general(attn_b, ones_col, (((0,), (0,)), ((), ())),
                                 preferred_element_type=jnp.float32)       # (S, 1)
        xr = xr * pl.reciprocal(1e-9 + colsum)
        d = (x - xr).astype(jnp.bfloat16)
        t = jnp.dot(d, wt_ref[l], preferred_element_type=jnp.float32) + bt_ref[l]
        t = jnp.maximum(t, 0.0)
        x = x + t
        cat_ref[:, l * c:(l + 1) * c] = x.astype(jnp.bfloat16)

    cat_ref[:, n_layers * c:] = f1_ref[0].astype(jnp.bfloat16)

    # conv_fuse + LeakyReLU + global max pool over points
    h = jnp.dot(cat_ref[...], fw_ref[...], preferred_element_type=jnp.float32) + fb_ref[...]
    h = jnp.where(h >= 0.0, h, 0.2 * h)
    g = jnp.max(h, axis=0, keepdims=True)                      # (1, 1024)

    # MLP head: lin1(leaky) -> lin2(leaky) -> lin3 (lane-padded output)
    h1 = jnp.dot(g.astype(jnp.bfloat16), w1_ref[...],
                 preferred_element_type=jnp.float32) + b1_ref[...]
    h1 = jnp.where(h1 >= 0.0, h1, 0.2 * h1)
    h2 = jnp.dot(h1.astype(jnp.bfloat16), w2_ref[...],
                 preferred_element_type=jnp.float32) + b2_ref[...]
    h2 = jnp.where(h2 >= 0.0, h2, 0.2 * h2)
    o_ref[0] = jnp.dot(h2.astype(jnp.bfloat16), w3_ref[...],
                       preferred_element_type=jnp.float32) + b3_ref[...]


# ----------------------------------------------------------------------------
# Pallas wrappers (tiling / grids)
# ----------------------------------------------------------------------------

def double_linear(x, w1, b1, w2, b2, act1="relu", act2="relu", tile_m=512):
    """Fused pair of 1x1 convs / Linears with folded BN bias. x: (M, K) -> (M, Cout)."""
    M, K = x.shape
    Chid = w1.shape[1]
    Cout = w2.shape[1]
    TM = _pick_tile(M, tile_m, 16)
    Mp = _round_up(M, TM)
    if Mp != M:
        x = jnp.pad(x, ((0, Mp - M), (0, 0)))
    out = pl.pallas_call(
        functools.partial(_dlinear_kernel, act1, act2),
        out_shape=jax.ShapeDtypeStruct((Mp, Cout), jnp.float32),
        grid=(Mp // TM,),
        in_specs=[
            pl.BlockSpec((TM, K), lambda i: (i, 0)),
            pl.BlockSpec((K, Chid), lambda i: (0, 0)),
            pl.BlockSpec((1, Chid), lambda i: (0, 0)),
            pl.BlockSpec((Chid, Cout), lambda i: (0, 0)),
            pl.BlockSpec((1, Cout), lambda i: (0, 0)),
        ],
        out_specs=pl.BlockSpec((TM, Cout), lambda i: (i, 0)),
        compiler_params=pltpu.CompilerParams(dimension_semantics=("parallel",)),
    )(x, w1, b1, w2, b2)
    return out[:M] if Mp != M else out


def local_op(feat, p, tile_g=256):
    """Local_op: (B, S, K, Din) bf16 -> (B, S, Cout) f32. Two convs + neighbour max, fused.
    Input is presented as flat lane-dense (G*K, Din) rows; only the output side is 3-D."""
    B, S, K, Din = feat.shape
    Cout = p["w2"].shape[1]
    G = B * S
    TG = _pick_tile(G, tile_g, 8)
    Gp = _round_up(G, TG)
    x = feat.reshape(G * K, Din)
    if Gp != G:
        x = jnp.pad(x, ((0, (Gp - G) * K), (0, 0)))
    out = pl.pallas_call(
        _local_kernel,
        out_shape=jax.ShapeDtypeStruct((Gp, Cout), jnp.float32),
        grid=(Gp // TG,),
        in_specs=[
            pl.BlockSpec((TG * K, Din), lambda i: (i, 0)),
            pl.BlockSpec((Din, Cout), lambda i: (0, 0)),
            pl.BlockSpec((1, Cout), lambda i: (0, 0)),
            pl.BlockSpec((Cout, Cout), lambda i: (0, 0)),
            pl.BlockSpec((1, Cout), lambda i: (0, 0)),
        ],
        out_specs=pl.BlockSpec((TG, Cout), lambda i: (i, 0)),
        compiler_params=pltpu.CompilerParams(dimension_semantics=("parallel",)),
    )(x, p["w1"], p["b1"], p["w2"], p["b2"])
    return out[:G].reshape(B, S, Cout)


def sa_fuse_head(x, f1, p):
    """4 SA layers + concat + conv_fuse + global max pool + MLP head, one grid step / batch."""
    B, S, C = x.shape
    L = p["sa_wqv"].shape[0]
    CQV = p["sa_wqv"].shape[-1]
    CCAT = (L + 1) * C
    PADC = p["lin3_w"].shape[1]
    out = pl.pallas_call(
        _sa_fuse_head_kernel,
        out_shape=jax.ShapeDtypeStruct((B, 1, PADC), jnp.float32),
        grid=(B,),
        in_specs=[
            pl.BlockSpec((1, S, C), lambda b: (b, 0, 0)),
            pl.BlockSpec((1, S, C), lambda b: (b, 0, 0)),
            pl.BlockSpec((L, C, CQV), lambda b: (0, 0, 0)),
            pl.BlockSpec((L, 1, CQV), lambda b: (0, 0, 0)),
            pl.BlockSpec((L, C, C), lambda b: (0, 0, 0)),
            pl.BlockSpec((L, 1, C), lambda b: (0, 0, 0)),
            pl.BlockSpec((CCAT, 1024), lambda b: (0, 0)),
            pl.BlockSpec((1, 1024), lambda b: (0, 0)),
            pl.BlockSpec((1024, 512), lambda b: (0, 0)),
            pl.BlockSpec((1, 512), lambda b: (0, 0)),
            pl.BlockSpec((512, 256), lambda b: (0, 0)),
            pl.BlockSpec((1, 256), lambda b: (0, 0)),
            pl.BlockSpec((256, PADC), lambda b: (0, 0)),
            pl.BlockSpec((1, PADC), lambda b: (0, 0)),
        ],
        out_specs=pl.BlockSpec((1, 1, PADC), lambda b: (b, 0, 0)),
        scratch_shapes=[pltpu.VMEM((S, CCAT), jnp.bfloat16)],
        compiler_params=pltpu.CompilerParams(
            dimension_semantics=("parallel",),
            vmem_limit_bytes=32 * 1024 * 1024),   # weights ~5 MiB bf16 (x2 buffers) + scratch
    )(x, f1, p["sa_wqv"], p["sa_bqv"], p["sa_wt"], p["sa_bt"],
      p["fuse_w"], p["fuse_b"],
      p["lin1_w"], p["lin1_b"], p["lin2_w"], p["lin2_b"],
      p["lin3_w"], p["lin3_b"])
    return out[:, 0, :]


# ----------------------------------------------------------------------------
# Sampling / grouping glue (data-dependent gathers -> plain JAX)
# ----------------------------------------------------------------------------

def index_points(points, idx):
    return jax.vmap(lambda p, i: p[i])(points, idx)


def farthest_point_sample(xyz, npoint):
    B, N, _ = xyz.shape

    def body(i, state):
        centroids, distance, farthest = state
        centroids = centroids.at[:, i].set(farthest)
        centroid = jax.vmap(lambda p, f: p[f])(xyz, farthest)[:, None, :]   # (B,1,3)
        dist = jnp.sum((xyz - centroid) ** 2, axis=-1)                      # (B,N)
        distance = jnp.minimum(distance, dist)
        farthest = jnp.argmax(distance, axis=-1).astype(jnp.int32)
        return centroids, distance, farthest

    centroids = jnp.zeros((B, npoint), jnp.int32)
    distance = jnp.full((B, N), 1e10, jnp.float32)
    farthest = jnp.zeros((B,), jnp.int32)   # TODO(synk): torch uses a random start index
    centroids, _, _ = lax.fori_loop(0, npoint, body, (centroids, distance, farthest))
    return centroids


def square_distance(src, dst):
    return (jnp.sum(src ** 2, -1, keepdims=True)
            - 2.0 * jnp.einsum("bsc,bnc->bsn", src, dst)
            + jnp.sum(dst ** 2, -1)[:, None, :])


def knn_point(nsample, xyz, new_xyz):
    d = square_distance(new_xyz, xyz)                 # (B, S, N)
    _, idx = lax.top_k(-d, nsample)                   # smallest distances
    return idx


def sample_and_group(npoint, nsample, xyz, points):
    fps_idx = farthest_point_sample(xyz, npoint)      # (B, S)
    new_xyz = index_points(xyz, fps_idx)              # (B, S, 3)
    new_points = index_points(points, fps_idx)        # (B, S, D)
    idx = knn_point(nsample, xyz, new_xyz)            # (B, S, K)
    grouped = index_points(points, idx)               # (B, S, K, D)
    grouped_norm = grouped - new_points[:, :, None, :]
    center = jnp.broadcast_to(new_points[:, :, None, :], grouped.shape)
    # materialise the grouped-feature tensor (the largest XLA intermediate) in bf16
    new_feature = jnp.concatenate([grouped_norm.astype(jnp.bfloat16),
                                   center.astype(jnp.bfloat16)], axis=-1)   # (B, S, K, 2D)
    return new_xyz, new_feature


# ----------------------------------------------------------------------------
# Model forward
# ----------------------------------------------------------------------------

NPOINT1, NPOINT2, NSAMPLE = 32, 16, 8   # scaled-down (orig: 512/256 with 32 neighbours)


def pct_forward(params, pc, *, num_classes):
    """Pct forward. pc: (B, N, 3). Returns logits (B, num_classes)."""
    B, N, _ = pc.shape
    xyz = pc

    # input embedding: conv1/bn1/relu -> conv2/bn2/relu (fused, M-tiled, >=2 grid steps)
    x = double_linear(pc.reshape(B * N, 3),
                      params["conv1_w"], params["conv1_b"],
                      params["conv2_w"], params["conv2_b"], "relu", "relu")
    x = x.reshape(B, N, 64)

    # two sample-and-group + Local_op stages (fused convs + neighbour max)
    new_xyz, feat = sample_and_group(NPOINT1, NSAMPLE, xyz, x)          # (B, S1, K, 128)
    f0 = local_op(feat, params["local0"])                               # (B, S1, 128)
    new_xyz, feat = sample_and_group(NPOINT2, NSAMPLE, new_xyz, f0)     # (B, S2, K, 256)
    f1 = local_op(feat, params["local1"])                               # (B, S2, 256)

    # Point_Transformer_Last prologue: pt_conv1 -> pt_conv2 (fused; cast happens in-kernel)
    B2, S2, C = f1.shape
    x = double_linear(f1.reshape(B2 * S2, C),
                      params["pt_conv1_w"], params["pt_conv1_b"],
                      params["pt_conv2_w"], params["pt_conv2_b"], "relu", "relu")
    x = x.reshape(B2, S2, C)

    # 4 SA layers + concat + conv_fuse + global max pool + MLP head: one fused kernel
    logit = sa_fuse_head(x, f1, params)[:, :num_classes]
    return logit


# ----------------------------------------------------------------------------
# Deterministic parameter initialisation (synthetic; no checkpoint load)
# BN scale is folded into the weights; weights stored bf16, biases f32 (1, C).
# ----------------------------------------------------------------------------

def init_params(key, num_classes=40):
    keys = iter(jax.random.split(key, 128))

    def nk():
        return next(keys)

    def w_init(cin, cout):
        return jax.random.normal(nk(), (cin, cout), jnp.float32) * (cin ** -0.5)

    def b_init(c):
        return jax.random.normal(nk(), (c,), jnp.float32) * 0.02

    def bn_init(c):
        gamma = 1.0 + 0.1 * jax.random.normal(nk(), (c,), jnp.float32)
        beta = 0.1 * jax.random.normal(nk(), (c,), jnp.float32)
        mean = 0.1 * jax.random.normal(nk(), (c,), jnp.float32)
        var = 1.0 + 0.1 * jax.random.uniform(nk(), (c,), jnp.float32)
        return gamma, beta, mean, var

    def fold(bn, conv_bias=None, eps=1e-5):
        gamma, beta, mean, var = bn
        s = gamma / jnp.sqrt(var + eps)
        b = beta - mean * s
        if conv_bias is not None:
            b = b + conv_bias * s
        return s, b

    def folded(w, bn, conv_bias=None, w_dtype=jnp.bfloat16):
        s, b = fold(bn, conv_bias=conv_bias)
        return (w * s[None, :]).astype(w_dtype), b.reshape(1, -1)

    p = {}
    # conv1 operates on a K=3 contraction: keep its weight in f32 (tiny MXU pass).
    p["conv1_w"], p["conv1_b"] = folded(w_init(3, 64), bn_init(64), w_dtype=jnp.float32)
    p["conv2_w"], p["conv2_b"] = folded(w_init(64, 64), bn_init(64))

    def local(cin, cout):
        d = {}
        d["w1"], d["b1"] = folded(w_init(cin, cout), bn_init(cout))
        d["w2"], d["b2"] = folded(w_init(cout, cout), bn_init(cout))
        return d

    p["local0"] = local(128, 128)
    p["local1"] = local(256, 256)

    p["pt_conv1_w"], p["pt_conv1_b"] = folded(w_init(256, 256), bn_init(256))
    p["pt_conv2_w"], p["pt_conv2_b"] = folded(w_init(256, 256), bn_init(256))

    # SA layers: fused [v | q(zero-padded to 128 lanes)] projection, stacked over the 4 layers.
    C = 256
    CQPAD = 128
    wqv_l, bqv_l, wt_l, bt_l = [], [], [], []
    for _ in range(4):
        wqk = w_init(C, C // 4)                      # shared q/k weights, no bias, no BN
        wv = w_init(C, C)                            # v_conv has bias, no BN
        bv = b_init(C)
        wqv = jnp.zeros((C, C + CQPAD), jnp.float32)
        wqv = wqv.at[:, :C].set(wv).at[:, C:C + C // 4].set(wqk)
        bqv = jnp.zeros((1, C + CQPAD), jnp.float32).at[0, :C].set(bv)
        wt_raw = w_init(C, C)
        bt_conv = b_init(C)
        wt, bt = folded(wt_raw, bn_init(C), conv_bias=bt_conv)   # trans_conv + after_norm
        wqv_l.append(wqv.astype(jnp.bfloat16))
        bqv_l.append(bqv)
        wt_l.append(wt)
        bt_l.append(bt)
    p["sa_wqv"] = jnp.stack(wqv_l)                   # (4, 256, 384) bf16
    p["sa_bqv"] = jnp.stack(bqv_l)                   # (4, 1, 384)   f32
    p["sa_wt"] = jnp.stack(wt_l)                     # (4, 256, 256) bf16
    p["sa_bt"] = jnp.stack(bt_l)                     # (4, 1, 256)   f32

    p["fuse_w"], p["fuse_b"] = folded(w_init(1280, 1024), bn_init(1024))
    p["lin1_w"], p["lin1_b"] = folded(w_init(1024, 512), bn_init(512))          # bias=False
    p["lin2_w"], p["lin2_b"] = folded(w_init(512, 256), bn_init(256),
                                      conv_bias=b_init(256))

    # lin3: no BN; pad output channels to a 128-lane multiple for dense stores.
    w3 = w_init(256, num_classes)
    b3 = b_init(num_classes)
    pad_c = _round_up(num_classes, 128)
    w3p = jnp.zeros((256, pad_c), jnp.float32).at[:, :num_classes].set(w3)
    b3p = jnp.zeros((1, pad_c), jnp.float32).at[0, :num_classes].set(b3)
    p["lin3_w"] = w3p.astype(jnp.bfloat16)
    p["lin3_b"] = b3p
    return p


# ----------------------------------------------------------------------------

if __name__ == "__main__":
    num_classes = 40                      # DATASET_NUM_CLASS['modelnet40']
    key = jax.random.PRNGKey(0)
    kp, kd = jax.random.split(key)
    params = init_params(kp, num_classes=num_classes)

    # data = {'pc': ..., 'normal': None, 'cls': None}
    pc = jax.random.normal(kd, (2, 64, 3), jnp.float32)

    fwd = jax.jit(functools.partial(pct_forward, num_classes=num_classes))
    logit = fwd(params, pc)
    jax.block_until_ready(logit)
    out = {"logit": logit}
    assert out["logit"].shape == (2, num_classes)
    assert out["logit"].dtype == jnp.float32
    print("KERNEL_OK")
</pallas_src>

<mosaic_0001>
module attributes {stable_mosaic.version = 11 : i64} {
  func.func @_dlinear_kernel(%arg0: i32, %arg1: memref<64x3xf32, #tpu.memory_space<vmem>>, %arg2: memref<3x64xf32, #tpu.memory_space<vmem>>, %arg3: memref<1x64xf32, #tpu.memory_space<vmem>>, %arg4: memref<64x64xbf16, #tpu.memory_space<vmem>>, %arg5: memref<1x64xf32, #tpu.memory_space<vmem>>, %arg6: memref<64x64xf32, #tpu.memory_space<vmem>>) attributes {dimension_semantics = [#tpu.dimension_semantics<parallel>], iteration_bounds = array<i64: 2>, scalar_prefetch = 0 : i64, scratch_operands = 0 : i64, tpu.core_type = #tpu.core_type<tc>, window_params = [{transform_indices = @transform_0, window_bounds = array<i64: 64, 3>}, {pipeline_mode = #tpu.pipeline_mode<synchronous>, transform_indices = @transform_1, window_bounds = array<i64: 3, 64>}, {pipeline_mode = #tpu.pipeline_mode<synchronous>, transform_indices = @transform_2, window_bounds = array<i64: 1, 64>}, {pipeline_mode = #tpu.pipeline_mode<synchronous>, transform_indices = @transform_3, window_bounds = array<i64: 64, 64>}, {pipeline_mode = #tpu.pipeline_mode<synchronous>, transform_indices = @transform_4, window_bounds = array<i64: 1, 64>}, {transform_indices = @transform_5, window_bounds = array<i64: 64, 64>}]} {
    %c0 = arith.constant 0 : index
    %c0_0 = arith.constant 0 : index
    %0 = vector.load %arg1[%c0, %c0_0] : memref<64x3xf32, #tpu.memory_space<vmem>>, vector<64x3xf32>
    %c0_1 = arith.constant 0 : index
    %c0_2 = arith.constant 0 : index
    %1 = vector.load %arg2[%c0_1, %c0_2] : memref<3x64xf32, #tpu.memory_space<vmem>>, vector<3x64xf32>
    %cst = arith.constant dense<0.000000e+00> : vector<64x64xf32>
    %2 = tpu.matmul %0, %1, %cst {dimension_numbers = #tpu.dot_dimension_numbers<[1], [0], [0], [1], [0, 0, 1, 1], [], []>} : vector<64x3xf32>, vector<3x64xf32>, vector<64x64xf32> -> vector<64x64xf32>
    %c0_3 = arith.constant 0 : index
    %c0_4 = arith.constant 0 : index
    %3 = vector.load %arg3[%c0_3, %c0_4] : memref<1x64xf32, #tpu.memory_space<vmem>>, vector<1x64xf32>
    %4 = vector.broadcast %3 : vector<1x64xf32> to vector<64x64xf32>
    %5 = arith.addf %2, %4 : vector<64x64xf32>
    %cst_5 = arith.constant 0.000000e+00 : f32
    %6 = vector.broadcast %cst_5 : f32 to vector<64x64xf32>
    %7 = arith.maximumf %5, %6 : vector<64x64xf32>
    %8 = arith.truncf %7 : vector<64x64xf32> to vector<64x64xbf16>
    %c0_6 = arith.constant 0 : index
    %c0_7 = arith.constant 0 : index
    %9 = vector.load %arg4[%c0_6, %c0_7] : memref<64x64xbf16, #tpu.memory_space<vmem>>, vector<64x64xbf16>
    %cst_8 = arith.constant dense<0.000000e+00> : vector<64x64xf32>
    %10 = tpu.matmul %8, %9, %cst_8 {dimension_numbers = #tpu.dot_dimension_numbers<[1], [0], [0], [1], [0, 0, 1, 1], [], []>} : vector<64x64xbf16>, vector<64x64xbf16>, vector<64x64xf32> -> vector<64x64xf32>
    %c0_9 = arith.constant 0 : index
    %c0_10 = arith.constant 0 : index
    %11 = vector.load %arg5[%c0_9, %c0_10] : memref<1x64xf32, #tpu.memory_space<vmem>>, vector<1x64xf32>
    %12 = vector.broadcast %11 : vector<1x64xf32> to vector<64x64xf32>
    %13 = arith.addf %10, %12 : vector<64x64xf32>
    %cst_11 = arith.constant 0.000000e+00 : f32
    %14 = vector.broadcast %cst_11 : f32 to vector<64x64xf32>
    %15 = arith.maximumf %13, %14 : vector<64x64xf32>
    %c0_12 = arith.constant 0 : index
    %c0_13 = arith.constant 0 : index
    %16 = vector.load %arg6[%c0_12, %c0_13] : memref<64x64xf32, #tpu.memory_space<vmem>>, vector<64x64xf32>
    tpu.vector_store %arg6[%c0_12, %c0_13], %15 {strides = array<i32>} : memref<64x64xf32, #tpu.memory_space<vmem>>, vector<64x64xf32>,
    return
  }
  func.func @transform_0(%arg0: i32) -> (i32, i32) {
    %c0_i32 = arith.constant 0 : i32
    %c0_i32_0 = arith.constant 0 : i32
    return %arg0, %c0_i32 : i32, i32
  }
  func.func @transform_1(%arg0: i32) -> (i32, i32) {
    %c0_i32 = arith.constant 0 : i32
    %c0_i32_0 = arith.constant 0 : i32
    %c0_i32_1 = arith.constant 0 : i32
    return %c0_i32, %c0_i32_0 : i32, i32
  }
  func.func @transform_2(%arg0: i32) -> (i32, i32) {
    %c0_i32 = arith.constant 0 : i32
    %c0_i32_0 = arith.constant 0 : i32
    %c0_i32_1 = arith.constant 0 : i32
    return %c0_i32, %c0_i32_0 : i32, i32
  }
  func.func @transform_3(%arg0: i32) -> (i32, i32) {
    %c0_i32 = arith.constant 0 : i32
    %c0_i32_0 = arith.constant 0 : i32
    %c0_i32_1 = arith.constant 0 : i32
    return %c0_i32, %c0_i32_0 : i32, i32
  }
  func.func @transform_4(%arg0: i32) -> (i32, i32) {
    %c0_i32 = arith.constant 0 : i32
    %c0_i32_0 = arith.constant 0 : i32
    %c0_i32_1 = arith.constant 0 : i32
    return %c0_i32, %c0_i32_0 : i32, i32
  }
  func.func @transform_5(%arg0: i32) -> (i32, i32) {
    %c0_i32 = arith.constant 0 : i32
    %c0_i32_0 = arith.constant 0 : i32
    return %arg0, %c0_i32 : i32, i32
  }
}

module attributes {stable_mosaic.version = 11 : i64} {
  func.func @_local_kernel(%arg0: i32, %arg1: memref<256x128xbf16, #tpu.memory_space<vmem>>, %arg2: memref<128x128xbf16, #tpu.memory_space<vmem>>, %arg3: memref<1x128xf32, #tpu.memory_space<vmem>>, %arg4: memref<128x128xbf16, #tpu.memory_space<vmem>>, %arg5: memref<1x128xf32, #tpu.memory_space<vmem>>, %arg6: memref<32x128xf32, #tpu.memory_space<vmem>>) attributes {dimension_semantics = [#tpu.dimension_semantics<parallel>], iteration_bounds = array<i64: 2>, scalar_prefetch = 0 : i64, scratch_operands = 0 : i64, tpu.core_type = #tpu.core_type<tc>, window_params = [{transform_indices = @transform_0, window_bounds = array<i64: 256, 128>}, {pipeline_mode = #tpu.pipeline_mode<synchronous>, transform_indices = @transform_1, window_bounds = array<i64: 128, 128>}, {pipeline_mode = #tpu.pipeline_mode<synchronous>, transform_indices = @transform_2, window_bounds = array<i64: 1, 128>}, {pipeline_mode = #tpu.pipeline_mode<synchronous>, transform_indices = @transform_3, window_bounds = array<i64: 128, 128>}, {pipeline_mode = #tpu.pipeline_mode<synchronous>, transform_indices = @transform_4, window_bounds = array<i64: 1, 128>}, {transform_indices = @transform_5, window_bounds = array<i64: 32, 128>}]} {
    %c0 = arith.constant 0 : index
    %c0_0 = arith.constant 0 : index
    %0 = vector.load %arg1[%c0, %c0_0] : memref<256x128xbf16, #tpu.memory_space<vmem>>, vector<256x128xbf16>
    %c0_1 = arith.constant 0 : index
    %c0_2 = arith.constant 0 : index
    %1 = vector.load %arg2[%c0_1, %c0_2] : memref<128x128xbf16, #tpu.memory_space<vmem>>, vector<128x128xbf16>
    %cst = arith.constant dense<0.000000e+00> : vector<256x128xf32>
    %2 = tpu.matmul %0, %1, %cst {dimension_numbers = #tpu.dot_dimension_numbers<[1], [0], [0], [1], [0, 0, 1, 1], [], []>} : vector<256x128xbf16>, vector<128x128xbf16>, vector<256x128xf32> -> vector<256x128xf32>
    %c0_3 = arith.constant 0 : index
    %c0_4 = arith.constant 0 : index
    %3 = vector.load %arg3[%c0_3, %c0_4] : memref<1x128xf32, #tpu.memory_space<vmem>>, vector<1x128xf32>
    %4 = vector.broadcast %3 : vector<1x128xf32> to vector<256x128xf32>
    %5 = arith.addf %2, %4 : vector<256x128xf32>
    %cst_5 = arith.constant 0.000000e+00 : f32
    %6 = vector.broadcast %cst_5 : f32 to vector<256x128xf32>
    %7 = arith.maximumf %5, %6 : vector<256x128xf32>
    %8 = arith.truncf %7 : vector<256x128xf32> to vector<256x128xbf16>
    %c0_6 = arith.constant 0 : index
    %c0_7 = arith.constant 0 : index
    %9 = vector.load %arg4[%c0_6, %c0_7] : memref<128x128xbf16, #tpu.memory_space<vmem>>, vector<128x128xbf16>
    %cst_8 = arith.constant dense<0.000000e+00> : vector<256x128xf32>
    %10 = tpu.matmul %8, %9, %cst_8 {dimension_numbers = #tpu.dot_dimension_numbers<[1], [0], [0], [1], [0, 0, 1, 1], [], []>} : vector<256x128xbf16>, vector<128x128xbf16>, vector<256x128xf32> -> vector<256x128xf32>
    %c0_9 = arith.constant 0 : index
    %c0_10 = arith.constant 0 : index
    %11 = vector.load %arg5[%c0_9, %c0_10] : memref<1x128xf32, #tpu.memory_space<vmem>>, vector<1x128xf32>
    %12 = vector.broadcast %11 : vector<1x128xf32> to vector<256x128xf32>
    %13 = arith.addf %10, %12 : vector<256x128xf32>
    %cst_11 = arith.constant 0.000000e+00 : f32
    %14 = vector.broadcast %cst_11 : f32 to vector<256x128xf32>
    %15 = arith.maximumf %13, %14 : vector<256x128xf32>
    %16 = vector.shape_cast %15 : vector<256x128xf32> to vector<32x8x128xf32>
    %cst_12 = arith.constant dense<0xFF800000> : vector<32x128xf32>
    %17 = vector.multi_reduction <maximumf>, %16, %cst_12 [1] : vector<32x8x128xf32> to vector<32x128xf32>
    %c0_13 = arith.constant 0 : index
    %c0_14 = arith.constant 0 : index
    %18 = vector.load %arg6[%c0_13, %c0_14] : memref<32x128xf32, #tpu.memory_space<vmem>>, vector<32x128xf32>
    tpu.vector_store %arg6[%c0_13, %c0_14], %17 {strides = array<i32>} : memref<32x128xf32, #tpu.memory_space<vmem>>, vector<32x128xf32>,
    return
  }
  func.func @transform_0(%arg0: i32) -> (i32, i32) {
    %c0_i32 = arith.constant 0 : i32
    %c0_i32_0 = arith.constant 0 : i32
    return %arg0, %c0_i32 : i32, i32
  }
  func.func @transform_1(%arg0: i32) -> (i32, i32) {
    %c0_i32 = arith.constant 0 : i32
    %c0_i32_0 = arith.constant 0 : i32
    %c0_i32_1 = arith.constant 0 : i32
    return %c0_i32, %c0_i32_0 : i32, i32
  }
  func.func @transform_2(%arg0: i32) -> (i32, i32) {
    %c0_i32 = arith.constant 0 : i32
    %c0_i32_0 = arith.constant 0 : i32
    %c0_i32_1 = arith.constant 0 : i32
    return %c0_i32, %c0_i32_0 : i32, i32
  }
  func.func @transform_3(%arg0: i32) -> (i32, i32) {
    %c0_i32 = arith.constant 0 : i32
    %c0_i32_0 = arith.constant 0 : i32
    %c0_i32_1 = arith.constant 0 : i32
    return %c0_i32, %c0_i32_0 : i32, i32
  }
  func.func @transform_4(%arg0: i32) -> (i32, i32) {
    %c0_i32 = arith.constant 0 : i32
    %c0_i32_0 = arith.constant 0 : i32
    %c0_i32_1 = arith.constant 0 : i32
    return %c0_i32, %c0_i32_0 : i32, i32
  }
  func.func @transform_5(%arg0: i32) -> (i32, i32) {
    %c0_i32 = arith.constant 0 : i32
    %c0_i32_0 = arith.constant 0 : i32
    return %arg0, %c0_i32 : i32, i32
  }
}

module attributes {stable_mosaic.version = 11 : i64} {
  func.func @_local_kernel(%arg0: i32, %arg1: memref<128x256xbf16, #tpu.memory_space<vmem>>, %arg2: memref<256x256xbf16, #tpu.memory_space<vmem>>, %arg3: memref<1x256xf32, #tpu.memory_space<vmem>>, %arg4: memref<256x256xbf16, #tpu.memory_space<vmem>>, %arg5: memref<1x256xf32, #tpu.memory_space<vmem>>, %arg6: memref<16x256xf32, #tpu.memory_space<vmem>>) attributes {dimension_semantics = [#tpu.dimension_semantics<parallel>], iteration_bounds = array<i64: 2>, scalar_prefetch = 0 : i64, scratch_operands = 0 : i64, tpu.core_type = #tpu.core_type<tc>, window_params = [{transform_indices = @transform_0, window_bounds = array<i64: 128, 256>}, {pipeline_mode = #tpu.pipeline_mode<synchronous>, transform_indices = @transform_1, window_bounds = array<i64: 256, 256>}, {pipeline_mode = #tpu.pipeline_mode<synchronous>, transform_indices = @transform_2, window_bounds = array<i64: 1, 256>}, {pipeline_mode = #tpu.pipeline_mode<synchronous>, transform_indices = @transform_3, window_bounds = array<i64: 256, 256>}, {pipeline_mode = #tpu.pipeline_mode<synchronous>, transform_indices = @transform_4, window_bounds = array<i64: 1, 256>}, {transform_indices = @transform_5, window_bounds = array<i64: 16, 256>}]} {
    %c0 = arith.constant 0 : index
    %c0_0 = arith.constant 0 : index
    %0 = vector.load %arg1[%c0, %c0_0] : memref<128x256xbf16, #tpu.memory_space<vmem>>, vector<128x256xbf16>
    %c0_1 = arith.constant 0 : index
    %c0_2 = arith.constant 0 : index
    %1 = vector.load %arg2[%c0_1, %c0_2] : memref<256x256xbf16, #tpu.memory_space<vmem>>, vector<256x256xbf16>
    %cst = arith.constant dense<0.000000e+00> : vector<128x256xf32>
    %2 = tpu.matmul %0, %1, %cst {dimension_numbers = #tpu.dot_dimension_numbers<[1], [0], [0], [1], [0, 0, 1, 1], [], []>} : vector<128x256xbf16>, vector<256x256xbf16>, vector<128x256xf32> -> vector<128x256xf32>
    %c0_3 = arith.constant 0 : index
    %c0_4 = arith.constant 0 : index
    %3 = vector.load %arg3[%c0_3, %c0_4] : memref<1x256xf32, #tpu.memory_space<vmem>>, vector<1x256xf32>
    %4 = vector.broadcast %3 : vector<1x256xf32> to vector<128x256xf32>
    %5 = arith.addf %2, %4 : vector<128x256xf32>
    %cst_5 = arith.constant 0.000000e+00 : f32
    %6 = vector.broadcast %cst_5 : f32 to vector<128x256xf32>
    %7 = arith.maximumf %5, %6 : vector<128x256xf32>
    %8 = arith.truncf %7 : vector<128x256xf32> to vector<128x256xbf16>
    %c0_6 = arith.constant 0 : index
    %c0_7 = arith.constant 0 : index
    %9 = vector.load %arg4[%c0_6, %c0_7] : memref<256x256xbf16, #tpu.memory_space<vmem>>, vector<256x256xbf16>
    %cst_8 = arith.constant dense<0.000000e+00> : vector<128x256xf32>
    %10 = tpu.matmul %8, %9, %cst_8 {dimension_numbers = #tpu.dot_dimension_numbers<[1], [0], [0], [1], [0, 0, 1, 1], [], []>} : vector<128x256xbf16>, vector<256x256xbf16>, vector<128x256xf32> -> vector<128x256xf32>
    %c0_9 = arith.constant 0 : index
    %c0_10 = arith.constant 0 : index
    %11 = vector.load %arg5[%c0_9, %c0_10] : memref<1x256xf32, #tpu.memory_space<vmem>>, vector<1x256xf32>
    %12 = vector.broadcast %11 : vector<1x256xf32> to vector<128x256xf32>
    %13 = arith.addf %10, %12 : vector<128x256xf32>
    %cst_11 = arith.constant 0.000000e+00 : f32
    %14 = vector.broadcast %cst_11 : f32 to vector<128x256xf32>
    %15 = arith.maximumf %13, %14 : vector<128x256xf32>
    %16 = vector.shape_cast %15 : vector<128x256xf32> to vector<16x8x256xf32>
    %cst_12 = arith.constant dense<0xFF800000> : vector<16x256xf32>
    %17 = vector.multi_reduction <maximumf>, %16, %cst_12 [1] : vector<16x8x256xf32> to vector<16x256xf32>
    %c0_13 = arith.constant 0 : index
    %c0_14 = arith.constant 0 : index
    %18 = vector.load %arg6[%c0_13, %c0_14] : memref<16x256xf32, #tpu.memory_space<vmem>>, vector<16x256xf32>
    tpu.vector_store %arg6[%c0_13, %c0_14], %17 {strides = array<i32>} : memref<16x256xf32, #tpu.memory_space<vmem>>, vector<16x256xf32>,
    return
  }
  func.func @transform_0(%arg0: i32) -> (i32, i32) {
    %c0_i32 = arith.constant 0 : i32
    %c0_i32_0 = arith.constant 0 : i32
    return %arg0, %c0_i32 : i32, i32
  }
  func.func @transform_1(%arg0: i32) -> (i32, i32) {
    %c0_i32 = arith.constant 0 : i32
    %c0_i32_0 = arith.constant 0 : i32
    %c0_i32_1 = arith.constant 0 : i32
    return %c0_i32, %c0_i32_0 : i32, i32
  }
  func.func @transform_2(%arg0: i32) -> (i32, i32) {
    %c0_i32 = arith.constant 0 : i32
    %c0_i32_0 = arith.constant 0 : i32
    %c0_i32_1 = arith.constant 0 : i32
    return %c0_i32, %c0_i32_0 : i32, i32
  }
  func.func @transform_3(%arg0: i32) -> (i32, i32) {
    %c0_i32 = arith.constant 0 : i32
    %c0_i32_0 = arith.constant 0 : i32
    %c0_i32_1 = arith.constant 0 : i32
    return %c0_i32, %c0_i32_0 : i32, i32
  }
  func.func @transform_4(%arg0: i32) -> (i32, i32) {
    %c0_i32 = arith.constant 0 : i32
    %c0_i32_0 = arith.constant 0 : i32
    %c0_i32_1 = arith.constant 0 : i32
    return %c0_i32, %c0_i32_0 : i32, i32
  }
  func.func @transform_5(%arg0: i32) -> (i32, i32) {
    %c0_i32 = arith.constant 0 : i32
    %c0_i32_0 = arith.constant 0 : i32
    return %arg0, %c0_i32 : i32, i32
  }
}

module attributes {stable_mosaic.version = 11 : i64} {
  func.func @_dlinear_kernel(%arg0: i32, %arg1: memref<16x256xf32, #tpu.memory_space<vmem>>, %arg2: memref<256x256xbf16, #tpu.memory_space<vmem>>, %arg3: memref<1x256xf32, #tpu.memory_space<vmem>>, %arg4: memref<256x256xbf16, #tpu.memory_space<vmem>>, %arg5: memref<1x256xf32, #tpu.memory_space<vmem>>, %arg6: memref<16x256xf32, #tpu.memory_space<vmem>>) attributes {dimension_semantics = [#tpu.dimension_semantics<parallel>], iteration_bounds = array<i64: 2>, scalar_prefetch = 0 : i64, scratch_operands = 0 : i64, tpu.core_type = #tpu.core_type<tc>, window_params = [{transform_indices = @transform_0, window_bounds = array<i64: 16, 256>}, {pipeline_mode = #tpu.pipeline_mode<synchronous>, transform_indices = @transform_1, window_bounds = array<i64: 256, 256>}, {pipeline_mode = #tpu.pipeline_mode<synchronous>, transform_indices = @transform_2, window_bounds = array<i64: 1, 256>}, {pipeline_mode = #tpu.pipeline_mode<synchronous>, transform_indices = @transform_3, window_bounds = array<i64: 256, 256>}, {pipeline_mode = #tpu.pipeline_mode<synchronous>, transform_indices = @transform_4, window_bounds = array<i64: 1, 256>}, {transform_indices = @transform_5, window_bounds = array<i64: 16, 256>}]} {
    %c0 = arith.constant 0 : index
    %c0_0 = arith.constant 0 : index
    %0 = vector.load %arg1[%c0, %c0_0] : memref<16x256xf32, #tpu.memory_space<vmem>>, vector<16x256xf32>
    %1 = arith.truncf %0 : vector<16x256xf32> to vector<16x256xbf16>
    %c0_1 = arith.constant 0 : index
    %c0_2 = arith.constant 0 : index
    %2 = vector.load %arg2[%c0_1, %c0_2] : memref<256x256xbf16, #tpu.memory_space<vmem>>, vector<256x256xbf16>
    %cst = arith.constant dense<0.000000e+00> : vector<16x256xf32>
    %3 = tpu.matmul %1, %2, %cst {dimension_numbers = #tpu.dot_dimension_numbers<[1], [0], [0], [1], [0, 0, 1, 1], [], []>} : vector<16x256xbf16>, vector<256x256xbf16>, vector<16x256xf32> -> vector<16x256xf32>
    %c0_3 = arith.constant 0 : index
    %c0_4 = arith.constant 0 : index
    %4 = vector.load %arg3[%c0_3, %c0_4] : memref<1x256xf32, #tpu.memory_space<vmem>>, vector<1x256xf32>
    %5 = vector.broadcast %4 : vector<1x256xf32> to vector<16x256xf32>
    %6 = arith.addf %3, %5 : vector<16x256xf32>
    %cst_5 = arith.constant 0.000000e+00 : f32
    %7 = vector.broadcast %cst_5 : f32 to vector<16x256xf32>
    %8 = arith.maximumf %6, %7 : vector<16x256xf32>
    %9 = arith.truncf %8 : vector<16x256xf32> to vector<16x256xbf16>
    %c0_6 = arith.constant 0 : index
    %c0_7 = arith.constant 0 : index
    %10 = vector.load %arg4[%c0_6, %c0_7] : memref<256x256xbf16, #tpu.memory_space<vmem>>, vector<256x256xbf16>
    %cst_8 = arith.constant dense<0.000000e+00> : vector<16x256xf32>
    %11 = tpu.matmul %9, %10, %cst_8 {dimension_numbers = #tpu.dot_dimension_numbers<[1], [0], [0], [1], [0, 0, 1, 1], [], []>} : vector<16x256xbf16>, vector<256x256xbf16>, vector<16x256xf32> -> vector<16x256xf32>
    %c0_9 = arith.constant 0 : index
    %c0_10 = arith.constant 0 : index
    %12 = vector.load %arg5[%c0_9, %c0_10] : memref<1x256xf32, #tpu.memory_space<vmem>>, vector<1x256xf32>
    %13 = vector.broadcast %12 : vector<1x256xf32> to vector<16x256xf32>
    %14 = arith.addf %11, %13 : vector<16x256xf32>
    %cst_11 = arith.constant 0.000000e+00 : f32
    %15 = vector.broadcast %cst_11 : f32 to vector<16x256xf32>
    %16 = arith.maximumf %14, %15 : vector<16x256xf32>
    %c0_12 = arith.constant 0 : index
    %c0_13 = arith.constant 0 : index
    %17 = vector.load %arg6[%c0_12, %c0_13] : memref<16x256xf32, #tpu.memory_space<vmem>>, vector<16x256xf32>
    tpu.vector_store %arg6[%c0_12, %c0_13], %16 {strides = array<i32>} : memref<16x256xf32, #tpu.memory_space<vmem>>, vector<16x256xf32>,
    return
  }
  func.func @transform_0(%arg0: i32) -> (i32, i32) {
    %c0_i32 = arith.constant 0 : i32
    %c0_i32_0 = arith.constant 0 : i32
    return %arg0, %c0_i32 : i32, i32
  }
  func.func @transform_1(%arg0: i32) -> (i32, i32) {
    %c0_i32 = arith.constant 0 : i32
    %c0_i32_0 = arith.constant 0 : i32
    %c0_i32_1 = arith.constant 0 : i32
    return %c0_i32, %c0_i32_0 : i32, i32
  }
  func.func @transform_2(%arg0: i32) -> (i32, i32) {
    %c0_i32 = arith.constant 0 : i32
    %c0_i32_0 = arith.constant 0 : i32
    %c0_i32_1 = arith.constant 0 : i32
    return %c0_i32, %c0_i32_0 : i32, i32
  }
  func.func @transform_3(%arg0: i32) -> (i32, i32) {
    %c0_i32 = arith.constant 0 : i32
    %c0_i32_0 = arith.constant 0 : i32
    %c0_i32_1 = arith.constant 0 : i32
    return %c0_i32, %c0_i32_0 : i32, i32
  }
  func.func @transform_4(%arg0: i32) -> (i32, i32) {
    %c0_i32 = arith.constant 0 : i32
    %c0_i32_0 = arith.constant 0 : i32
    %c0_i32_1 = arith.constant 0 : i32
    return %c0_i32, %c0_i32_0 : i32, i32
  }
  func.func @transform_5(%arg0: i32) -> (i32, i32) {
    %c0_i32 = arith.constant 0 : i32
    %c0_i32_0 = arith.constant 0 : i32
    return %arg0, %c0_i32 : i32, i32
  }
}

module attributes {stable_mosaic.version = 11 : i64} {
  func.func @_sa_fuse_head_kernel(%arg0: i32, %arg1: memref<1x16x256xf32, #tpu.memory_space<vmem>>, %arg2: memref<1x16x256xf32, #tpu.memory_space<vmem>>, %arg3: memref<4x256x384xbf16, #tpu.memory_space<vmem>>, %arg4: memref<4x1x384xf32, #tpu.memory_space<vmem>>, %arg5: memref<4x256x256xbf16, #tpu.memory_space<vmem>>, %arg6: memref<4x1x256xf32, #tpu.memory_space<vmem>>, %arg7: memref<1280x1024xbf16, #tpu.memory_space<vmem>>, %arg8: memref<1x1024xf32, #tpu.memory_space<vmem>>, %arg9: memref<1024x512xbf16, #tpu.memory_space<vmem>>, %arg10: memref<1x512xf32, #tpu.memory_space<vmem>>, %arg11: memref<512x256xbf16, #tpu.memory_space<vmem>>, %arg12: memref<1x256xf32, #tpu.memory_space<vmem>>, %arg13: memref<256x128xbf16, #tpu.memory_space<vmem>>, %arg14: memref<1x128xf32, #tpu.memory_space<vmem>>, %arg15: memref<1x1x128xf32, #tpu.memory_space<vmem>>, %arg16: memref<16x1280xbf16, #tpu.memory_space<vmem>>) attributes {dimension_semantics = [#tpu.dimension_semantics<parallel>], iteration_bounds = array<i64: 2>, scalar_prefetch = 0 : i64, scratch_operands = 1 : i64, tpu.core_type = #tpu.core_type<tc>, window_params = [{transform_indices = @transform_0, window_bounds = array<i64: 1, 16, 256>}, {transform_indices = @transform_1, window_bounds = array<i64: 1, 16, 256>}, {pipeline_mode = #tpu.pipeline_mode<synchronous>, transform_indices = @transform_2, window_bounds = array<i64: 4, 256, 384>}, {pipeline_mode = #tpu.pipeline_mode<synchronous>, transform_indices = @transform_3, window_bounds = array<i64: 4, 1, 384>}, {pipeline_mode = #tpu.pipeline_mode<synchronous>, transform_indices = @transform_4, window_bounds = array<i64: 4, 256, 256>}, {pipeline_mode = #tpu.pipeline_mode<synchronous>, transform_indices = @transform_5, window_bounds = array<i64: 4, 1, 256>}, {pipeline_mode = #tpu.pipeline_mode<synchronous>, transform_indices = @transform_6, window_bounds = array<i64: 1280, 1024>}, {pipeline_mode = #tpu.pipeline_mode<synchronous>, transform_indices = @transform_7, window_bounds = array<i64: 1, 1024>}, {pipeline_mode = #tpu.pipeline_mode<synchronous>, transform_indices = @transform_8, window_bounds = array<i64: 1024, 512>}, {pipeline_mode = #tpu.pipeline_mode<synchronous>, transform_indices = @transform_9, window_bounds = array<i64: 1, 512>}, {pipeline_mode = #tpu.pipeline_mode<synchronous>, transform_indices = @transform_10, window_bounds = array<i64: 512, 256>}, {pipeline_mode = #tpu.pipeline_mode<synchronous>, transform_indices = @transform_11, window_bounds = array<i64: 1, 256>}, {pipeline_mode = #tpu.pipeline_mode<synchronous>, transform_indices = @transform_12, window_bounds = array<i64: 256, 128>}, {pipeline_mode = #tpu.pipeline_mode<synchronous>, transform_indices = @transform_13, window_bounds = array<i64: 1, 128>}, {transform_indices = @transform_14, window_bounds = array<i64: 1, 1, 128>}]} {
    %c0 = arith.constant 0 : index
    %c0_0 = arith.constant 0 : index
    %c0_1 = arith.constant 0 : index
    %0 = vector.load %arg1[%c0, %c0_0, %c0_1] : memref<1x16x256xf32, #tpu.memory_space<vmem>>, vector<1x16x256xf32>
    %1 = vector.shape_cast %0 : vector<1x16x256xf32> to vector<16x256xf32>
    %cst = arith.constant 1.000000e+00 : bf16
    %2 = vector.broadcast %cst : bf16 to vector<16x1xbf16>
    %3 = arith.truncf %1 : vector<16x256xf32> to vector<16x256xbf16>
    %c0_2 = arith.constant 0 : index
    %c0_3 = arith.constant 0 : index
    %c0_4 = arith.constant 0 : index
    %4 = vector.load %arg3[%c0_2, %c0_3, %c0_4] : memref<4x256x384xbf16, #tpu.memory_space<vmem>>, vector<1x256x384xbf16>
    %5 = vector.shape_cast %4 : vector<1x256x384xbf16> to vector<256x384xbf16>
    %cst_5 = arith.constant dense<0.000000e+00> : vector<16x384xf32>
    %6 = tpu.matmul %3, %5, %cst_5 {dimension_numbers = #tpu.dot_dimension_numbers<[1], [0], [0], [1], [0, 0, 1, 1], [], []>} : vector<16x256xbf16>, vector<256x384xbf16>, vector<16x384xf32> -> vector<16x384xf32>
    %c0_6 = arith.constant 0 : index
    %c0_7 = arith.constant 0 : index
    %c0_8 = arith.constant 0 : index
    %7 = vector.load %arg4[%c0_6, %c0_7, %c0_8] : memref<4x1x384xf32, #tpu.memory_space<vmem>>, vector<1x1x384xf32>
    %8 = vector.shape_cast %7 : vector<1x1x384xf32> to vector<1x384xf32>
    %9 = vector.broadcast %8 : vector<1x384xf32> to vector<16x384xf32>
    %10 = arith.addf %6, %9 : vector<16x384xf32>
    %11 = vector.extract_strided_slice %10 {offsets = [0, 0], sizes = [16, 256], strides = [1, 1]} : vector<16x384xf32> to vector<16x256xf32>
    %12 = vector.extract_strided_slice %10 {offsets = [0, 256], sizes = [16, 128], strides = [1, 1]} : vector<16x384xf32> to vector<16x128xf32>
    %13 = arith.truncf %12 : vector<16x128xf32> to vector<16x128xbf16>
    %cst_9 = arith.constant dense<0.000000e+00> : vector<16x16xf32>
    %14 = tpu.matmul %13, %13, %cst_9 {dimension_numbers = #tpu.dot_dimension_numbers<[1], [1], [0], [0], [0, 0, 1, 0], [], []>} : vector<16x128xbf16>, vector<16x128xbf16>, vector<16x16xf32> -> vector<16x16xf32>
    %cst_10 = arith.constant dense<0xFF800000> : vector<16xf32>
    %15 = vector.multi_reduction <maximumf>, %14, %cst_10 [1] : vector<16x16xf32> to vector<16xf32>
    %16 = vector.shape_cast %15 : vector<16xf32> to vector<16x1xf32>
    %17 = vector.broadcast %16 : vector<16x1xf32> to vector<16x16xf32>
    %18 = arith.subf %14, %17 : vector<16x16xf32>
    %19 = math.exp %18 : vector<16x16xf32>
    %cst_11 = arith.constant dense<0.000000e+00> : vector<16xf32>
    %20 = vector.multi_reduction <add>, %19, %cst_11 [1] : vector<16x16xf32> to vector<16xf32>
    %21 = vector.shape_cast %20 : vector<16xf32> to vector<16x1xf32>
    %22 = tpu.reciprocal %21 {approx = true} : vector<16x1xf32> -> vector<16x1xf32>
    %23 = vector.broadcast %22 : vector<16x1xf32> to vector<16x16xf32>
    %24 = arith.mulf %19, %23 : vector<16x16xf32>
    %25 = arith.truncf %24 : vector<16x16xf32> to vector<16x16xbf16>
    %26 = arith.truncf %11 : vector<16x256xf32> to vector<16x256xbf16>
    %cst_12 = arith.constant dense<0.000000e+00> : vector<16x256xf32>
    %27 = tpu.matmul %25, %26, %cst_12 {dimension_numbers = #tpu.dot_dimension_numbers<[0], [0], [1], [1], [0, 1, 1, 1], [], []>} : vector<16x16xbf16>, vector<16x256xbf16>, vector<16x256xf32> -> vector<16x256xf32>
    %cst_13 = arith.constant dense<0.000000e+00> : vector<16x1xf32>
    %28 = tpu.matmul %25, %2, %cst_13 {dimension_numbers = #tpu.dot_dimension_numbers<[0], [0], [1], [1], [0, 1, 1, 1], [], []>} : vector<16x16xbf16>, vector<16x1xbf16>, vector<16x1xf32> -> vector<16x1xf32>
    %cst_14 = arith.constant 9.99999971E-10 : f32
    %29 = vector.broadcast %cst_14 : f32 to vector<16x1xf32>
    %30 = arith.addf %29, %28 : vector<16x1xf32>
    %31 = tpu.reciprocal %30 : vector<16x1xf32> -> vector<16x1xf32>
    %32 = vector.broadcast %31 : vector<16x1xf32> to vector<16x256xf32>
    %33 = arith.mulf %27, %32 : vector<16x256xf32>
    %34 = arith.subf %1, %33 : vector<16x256xf32>
    %35 = arith.truncf %34 : vector<16x256xf32> to vector<16x256xbf16>
    %c0_15 = arith.constant 0 : index
    %c0_16 = arith.constant 0 : index
    %c0_17 = arith.constant 0 : index
    %36 = vector.load %arg5[%c0_15, %c0_16, %c0_17] : memref<4x256x256xbf16, #tpu.memory_space<vmem>>, vector<1x256x256xbf16>
    %37 = vector.shape_cast %36 : vector<1x256x256xbf16> to vector<256x256xbf16>
    %cst_18 = arith.constant dense<0.000000e+00> : vector<16x256xf32>
    %38 = tpu.matmul %35, %37, %cst_18 {dimension_numbers = #tpu.dot_dimension_numbers<[1], [0], [0], [1], [0, 0, 1, 1], [], []>} : vector<16x256xbf16>, vector<256x256xbf16>, vector<16x256xf32> -> vector<16x256xf32>
    %c0_19 = arith.constant 0 : index
    %c0_20 = arith.constant 0 : index
    %c0_21 = arith.constant 0 : index
    %39 = vector.load %arg6[%c0_19, %c0_20, %c0_21] : memref<4x1x256xf32, #tpu.memory_space<vmem>>, vector<1x1x256xf32>
    %40 = vector.shape_cast %39 : vector<1x1x256xf32> to vector<1x256xf32>
    %41 = vector.broadcast %40 : vector<1x256xf32> to vector<16x256xf32>
    %42 = arith.addf %38, %41 : vector<16x256xf32>
    %cst_22 = arith.constant 0.000000e+00 : f32
    %43 = vector.broadcast %cst_22 : f32 to vector<16x256xf32>
    %44 = arith.maximumf %42, %43 : vector<16x256xf32>
    %45 = arith.addf %1, %44 : vector<16x256xf32>
    %46 = arith.truncf %45 : vector<16x256xf32> to vector<16x256xbf16>
    %c0_23 = arith.constant 0 : index
    %c0_24 = arith.constant 0 : index
    %47 = vector.load %arg16[%c0_23, %c0_24] : memref<16x1280xbf16, #tpu.memory_space<vmem>>, vector<16x256xbf16>
    tpu.vector_store %arg16[%c0_23, %c0_24], %46 {strides = array<i32>} : memref<16x1280xbf16, #tpu.memory_space<vmem>>, vector<16x256xbf16>,
    %48 = arith.truncf %45 : vector<16x256xf32> to vector<16x256xbf16>
    %c1 = arith.constant 1 : index
    %c0_25 = arith.constant 0 : index
    %c0_26 = arith.constant 0 : index
    %49 = vector.load %arg3[%c1, %c0_25, %c0_26] : memref<4x256x384xbf16, #tpu.memory_space<vmem>>, vector<1x256x384xbf16>
    %50 = vector.shape_cast %49 : vector<1x256x384xbf16> to vector<256x384xbf16>
    %cst_27 = arith.constant dense<0.000000e+00> : vector<16x384xf32>
    %51 = tpu.matmul %48, %50, %cst_27 {dimension_numbers = #tpu.dot_dimension_numbers<[1], [0], [0], [1], [0, 0, 1, 1], [], []>} : vector<16x256xbf16>, vector<256x384xbf16>, vector<16x384xf32> -> vector<16x384xf32>
    %c1_28 = arith.constant 1 : index
    %c0_29 = arith.constant 0 : index
    %c0_30 = arith.constant 0 : index
    %52 = vector.load %arg4[%c1_28, %c0_29, %c0_30] : memref<4x1x384xf32, #tpu.memory_space<vmem>>, vector<1x1x384xf32>
    %53 = vector.shape_cast %52 : vector<1x1x384xf32> to vector<1x384xf32>
    %54 = vector.broadcast %53 : vector<1x384xf32> to vector<16x384xf32>
    %55 = arith.addf %51, %54 : vector<16x384xf32>
    %56 = vector.extract_strided_slice %55 {offsets = [0, 0], sizes = [16, 256], strides = [1, 1]} : vector<16x384xf32> to vector<16x256xf32>
    %57 = vector.extract_strided_slice %55 {offsets = [0, 256], sizes = [16, 128], strides = [1, 1]} : vector<16x384xf32> to vector<16x128xf32>
    %58 = arith.truncf %57 : vector<16x128xf32> to vector<16x128xbf16>
    %cst_31 = arith.constant dense<0.000000e+00> : vector<16x16xf32>
    %59 = tpu.matmul %58, %58, %cst_31 {dimension_numbers = #tpu.dot_dimension_numbers<[1], [1], [0], [0], [0, 0, 1, 0], [], []>} : vector<16x128xbf16>, vector<16x128xbf16>, vector<16x16xf32> -> vector<16x16xf32>
    %cst_32 = arith.constant dense<0xFF800000> : vector<16xf32>
    %60 = vector.multi_reduction <maximumf>, %59, %cst_32 [1] : vector<16x16xf32> to vector<16xf32>
    %61 = vector.shape_cast %60 : vector<16xf32> to vector<16x1xf32>
    %62 = vector.broadcast %61 : vector<16x1xf32> to vector<16x16xf32>
    %63 = arith.subf %59, %62 : vector<16x16xf32>
    %64 = math.exp %63 : vector<16x16xf32>
    %cst_33 = arith.constant dense<0.000000e+00> : vector<16xf32>
    %65 = vector.multi_reduction <add>, %64, %cst_33 [1] : vector<16x16xf32> to vector<16xf32>
    %66 = vector.shape_cast %65 : vector<16xf32> to vector<16x1xf32>
    %67 = tpu.reciprocal %66 {approx = true} : vector<16x1xf32> -> vector<16x1xf32>
    %68 = vector.broadcast %67 : vector<16x1xf32> to vector<16x16xf32>
    %69 = arith.mulf %64, %68 : vector<16x16xf32>
    %70 = arith.truncf %69 : vector<16x16xf32> to vector<16x16xbf16>
    %71 = arith.truncf %56 : vector<16x256xf32> to vector<16x256xbf16>
    %cst_34 = arith.constant dense<0.000000e+00> : vector<16x256xf32>
    %72 = tpu.matmul %70, %71, %cst_34 {dimension_numbers = #tpu.dot_dimension_numbers<[0], [0], [1], [1], [0, 1, 1, 1], [], []>} : vector<16x16xbf16>, vector<16x256xbf16>, vector<16x256xf32> -> vector<16x256xf32>
    %cst_35 = arith.constant dense<0.000000e+00> : vector<16x1xf32>
    %73 = tpu.matmul %70, %2, %cst_35 {dimension_numbers = #tpu.dot_dimension_numbers<[0], [0], [1], [1], [0, 1, 1, 1], [], []>} : vector<16x16xbf16>, vector<16x1xbf16>, vector<16x1xf32> -> vector<16x1xf32>
    %cst_36 = arith.constant 9.99999971E-10 : f32
    %74 = vector.broadcast %cst_36 : f32 to vector<16x1xf32>
    %75 = arith.addf %74, %73 : vector<16x1xf32>
    %76 = tpu.reciprocal %75 : vector<16x1xf32> -> vector<16x1xf32>
    %77 = vector.broadcast %76 : vector<16x1xf32> to vector<16x256xf32>
    %78 = arith.mulf %72, %77 : vector<16x256xf32>
    %79 = arith.subf %45, %78 : vector<16x256xf32>
    %80 = arith.truncf %79 : vector<16x256xf32> to vector<16x256xbf16>
    %c1_37 = arith.constant 1 : index
    %c0_38 = arith.constant 0 : index
    %c0_39 = arith.constant 0 : index
    %81 = vector.load %arg5[%c1_37, %c0_38, %c0_39] : memref<4x256x256xbf16, #tpu.memory_space<vmem>>, vector<1x256x256xbf16>
    %82 = vector.shape_cast %81 : vector<1x256x256xbf16> to vector<256x256xbf16>
    %cst_40 = arith.constant dense<0.000000e+00> : vector<16x256xf32>
    %83 = tpu.matmul %80, %82, %cst_40 {dimension_numbers = #tpu.dot_dimension_numbers<[1], [0], [0], [1], [0, 0, 1, 1], [], []>} : vector<16x256xbf16>, vector<256x256xbf16>, vector<16x256xf32> -> vector<16x256xf32>
    %c1_41 = arith.constant 1 : index
    %c0_42 = arith.constant 0 : index
    %c0_43 = arith.constant 0 : index
    %84 = vector.load %arg6[%c1_41, %c0_42, %c0_43] : memref<4x1x256xf32, #tpu.memory_space<vmem>>, vector<1x1x256xf32>
    %85 = vector.shape_cast %84 : vector<1x1x256xf32> to vector<1x256xf32>
    %86 = vector.broadcast %85 : vector<1x256xf32> to vector<16x256xf32>
    %87 = arith.addf %83, %86 : vector<16x256xf32>
    %cst_44 = arith.constant 0.000000e+00 : f32
    %88 = vector.broadcast %cst_44 : f32 to vector<16x256xf32>
    %89 = arith.maximumf %87, %88 : vector<16x256xf32>
    %90 = arith.addf %45, %89 : vector<16x256xf32>
    %91 = arith.truncf %90 : vector<16x256xf32> to vector<16x256xbf16>
    %c0_45 = arith.constant 0 : index
    %c256 = arith.constant 256 : index
    %92 = vector.load %arg16[%c0_45, %c256] : memref<16x1280xbf16, #tpu.memory_space<vmem>>, vector<16x256xbf16>
    tpu.vector_store %arg16[%c0_45, %c256], %91 {strides = array<i32>} : memref<16x1280xbf16, #tpu.memory_space<vmem>>, vector<16x256xbf16>,
    %93 = arith.truncf %90 : vector<16x256xf32> to vector<16x256xbf16>
    %c2 = arith.constant 2 : index
    %c0_46 = arith.constant 0 : index
    %c0_47 = arith.constant 0 : index
    %94 = vector.load %arg3[%c2, %c0_46, %c0_47] : memref<4x256x384xbf16, #tpu.memory_space<vmem>>, vector<1x256x384xbf16>
    %95 = vector.shape_cast %94 : vector<1x256x384xbf16> to vector<256x384xbf16>
    %cst_48 = arith.constant dense<0.000000e+00> : vector<16x384xf32>
    %96 = tpu.matmul %93, %95, %cst_48 {dimension_numbers = #tpu.dot_dimension_numbers<[1], [0], [0], [1], [0, 0, 1, 1], [], []>} : vector<16x256xbf16>, vector<256x384xbf16>, vector<16x384xf32> -> vector<16x384xf32>
    %c2_49 = arith.constant 2 : index
    %c0_50 = arith.constant 0 : index
    %c0_51 = arith.constant 0 : index
    %97 = vector.load %arg4[%c2_49, %c0_50, %c0_51] : memref<4x1x384xf32, #tpu.memory_space<vmem>>, vector<1x1x384xf32>
    %98 = vector.shape_cast %97 : vector<1x1x384xf32> to vector<1x384xf32>
    %99 = vector.broadcast %98 : vector<1x384xf32> to vector<16x384xf32>
    %100 = arith.addf %96, %99 : vector<16x384xf32>
    %101 = vector.extract_strided_slice %100 {offsets = [0, 0], sizes = [16, 256], strides = [1, 1]} : vector<16x384xf32> to vector<16x256xf32>
    %102 = vector.extract_strided_slice %100 {offsets = [0, 256], sizes = [16, 128], strides = [1, 1]} : vector<16x384xf32> to vector<16x128xf32>
    %103 = arith.truncf %102 : vector<16x128xf32> to vector<16x128xbf16>
    %cst_52 = arith.constant dense<0.000000e+00> : vector<16x16xf32>
    %104 = tpu.matmul %103, %103, %cst_52 {dimension_numbers = #tpu.dot_dimension_numbers<[1], [1], [0], [0], [0, 0, 1, 0], [], []>} : vector<16x128xbf16>, vector<16x128xbf16>, vector<16x16xf32> -> vector<16x16xf32>
    %cst_53 = arith.constant dense<0xFF800000> : vector<16xf32>
    %105 = vector.multi_reduction <maximumf>, %104, %cst_53 [1] : vector<16x16xf32> to vector<16xf32>
    %106 = vector.shape_cast %105 : vector<16xf32> to vector<16x1xf32>
    %107 = vector.broadcast %106 : vector<16x1xf32> to vector<16x16xf32>
    %108 = arith.subf %104, %107 : vector<16x16xf32>
    %109 = math.exp %108 : vector<16x16xf32>
    %cst_54 = arith.constant dense<0.000000e+00> : vector<16xf32>
    %110 = vector.multi_reduction <add>, %109, %cst_54 [1] : vector<16x16xf32> to vector<16xf32>
    %111 = vector.shape_cast %110 : vector<16xf32> to vector<16x1xf32>
    %112 = tpu.reciprocal %111 {approx = true} : vector<16x1xf32> -> vector<16x1xf32>
    %113 = vector.broadcast %112 : vector<16x1xf32> to vector<16x16xf32>
    %114 = arith.mulf %109, %113 : vector<16x16xf32>
    %115 = arith.truncf %114 : vector<16x16xf32> to vector<16x16xbf16>
    %116 = arith.truncf %101 : vector<16x256xf32> to vector<16x256xbf16>
    %cst_55 = arith.constant dense<0.000000e+00> : vector<16x256xf32>
    %117 = tpu.matmul %115, %116, %cst_55 {dimension_numbers = #tpu.dot_dimension_numbers<[0], [0], [1], [1], [0, 1, 1, 1], [], []>} : vector<16x16xbf16>, vector<16x256xbf16>, vector<16x256xf32> -> vector<16x256xf32>
    %cst_56 = arith.constant dense<0.000000e+00> : vector<16x1xf32>
    %118 = tpu.matmul %115, %2, %cst_56 {dimension_numbers = #tpu.dot_dimension_numbers<[0], [0], [1], [1], [0, 1, 1, 1], [], []>} : vector<16x16xbf16>, vector<16x1xbf16>, vector<16x1xf32> -> vector<16x1xf32>
    %cst_57 = arith.constant 9.99999971E-10 : f32
    %119 = vector.broadcast %cst_57 : f32 to vector<16x1xf32>
    %120 = arith.addf %119, %118 : vector<16x1xf32>
    %121 = tpu.reciprocal %120 : vector<16x1xf32> -> vector<16x1xf32>
    %122 = vector.broadcast %121 : vector<16x1xf32> to vector<16x256xf32>
    %123 = arith.mulf %117, %122 : vector<16x256xf32>
    %124 = arith.subf %90, %123 : vector<16x256xf32>
    %125 = arith.truncf %124 : vector<16x256xf32> to vector<16x256xbf16>
    %c2_58 = arith.constant 2 : index
    %c0_59 = arith.constant 0 : index
    %c0_60 = arith.constant 0 : index
    %126 = vector.load %arg5[%c2_58, %c0_59, %c0_60] : memref<4x256x256xbf16, #tpu.memory_space<vmem>>, vector<1x256x256xbf16>
    %127 = vector.shape_cast %126 : vector<1x256x256xbf16> to vector<256x256xbf16>
    %cst_61 = arith.constant dense<0.000000e+00> : vector<16x256xf32>
    %128 = tpu.matmul %125, %127, %cst_61 {dimension_numbers = #tpu.dot_dimension_numbers<[1], [0], [0], [1], [0, 0, 1, 1], [], []>} : vector<16x256xbf16>, vector<256x256xbf16>, vector<16x256xf32> -> vector<16x256xf32>
    %c2_62 = arith.constant 2 : index
    %c0_63 = arith.constant 0 : index
    %c0_64 = arith.constant 0 : index
    %129 = vector.load %arg6[%c2_62, %c0_63, %c0_64] : memref<4x1x256xf32, #tpu.memory_space<vmem>>, vector<1x1x256xf32>
    %130 = vector.shape_cast %129 : vector<1x1x256xf32> to vector<1x256xf32>
    %131 = vector.broadcast %130 : vector<1x256xf32> to vector<16x256xf32>
    %132 = arith.addf %128, %131 : vector<16x256xf32>
    %cst_65 = arith.constant 0.000000e+00 : f32
    %133 = vector.broadcast %cst_65 : f32 to vector<16x256xf32>
    %134 = arith.maximumf %132, %133 : vector<16x256xf32>
    %135 = arith.addf %90, %134 : vector<16x256xf32>
    %136 = arith.truncf %135 : vector<16x256xf32> to vector<16x256xbf16>
    %c0_66 = arith.constant 0 : index
    %c512 = arith.constant 512 : index
    %137 = vector.load %arg16[%c0_66, %c512] : memref<16x1280xbf16, #tpu.memory_space<vmem>>, vector<16x256xbf16>
    tpu.vector_store %arg16[%c0_66, %c512], %136 {strides = array<i32>} : memref<16x1280xbf16, #tpu.memory_space<vmem>>, vector<16x256xbf16>,
    %138 = arith.truncf %135 : vector<16x256xf32> to vector<16x256xbf16>
    %c3 = arith.constant 3 : index
    %c0_67 = arith.constant 0 : index
    %c0_68 = arith.constant 0 : index
    %139 = vector.load %arg3[%c3, %c0_67, %c0_68] : memref<4x256x384xbf16, #tpu.memory_space<vmem>>, vector<1x256x384xbf16>
    %140 = vector.shape_cast %139 : vector<1x256x384xbf16> to vector<256x384xbf16>
    %cst_69 = arith.constant dense<0.000000e+00> : vector<16x384xf32>
    %141 = tpu.matmul %138, %140, %cst_69 {dimension_numbers = #tpu.dot_dimension_numbers<[1], [0], [0], [1], [0, 0, 1, 1], [], []>} : vector<16x256xbf16>, vector<256x384xbf16>, vector<16x384xf32> -> vector<16x384xf32>
    %c3_70 = arith.constant 3 : index
    %c0_71 = arith.constant 0 : index
    %c0_72 = arith.constant 0 : index
    %142 = vector.load %arg4[%c3_70, %c0_71, %c0_72] : memref<4x1x384xf32, #tpu.memory_space<vmem>>, vector<1x1x384xf32>
    %143 = vector.shape_cast %142 : vector<1x1x384xf32> to vector<1x384xf32>
    %144 = vector.broadcast %143 : vector<1x384xf32> to vector<16x384xf32>
    %145 = arith.addf %141, %144 : vector<16x384xf32>
    %146 = vector.extract_strided_slice %145 {offsets = [0, 0], sizes = [16, 256], strides = [1, 1]} : vector<16x384xf32> to vector<16x256xf32>
    %147 = vector.extract_strided_slice %145 {offsets = [0, 256], sizes = [16, 128], strides = [1, 1]} : vector<16x384xf32> to vector<16x128xf32>
    %148 = arith.truncf %147 : vector<16x128xf32> to vector<16x128xbf16>
    %cst_73 = arith.constant dense<0.000000e+00> : vector<16x16xf32>
    %149 = tpu.matmul %148, %148, %cst_73 {dimension_numbers = #tpu.dot_dimension_numbers<[1], [1], [0], [0], [0, 0, 1, 0], [], []>} : vector<16x128xbf16>, vector<16x128xbf16>, vector<16x16xf32> -> vector<16x16xf32>
    %cst_74 = arith.constant dense<0xFF800000> : vector<16xf32>
    %150 = vector.multi_reduction <maximumf>, %149, %cst_74 [1] : vector<16x16xf32> to vector<16xf32>
    %151 = vector.shape_cast %150 : vector<16xf32> to vector<16x1xf32>
    %152 = vector.broadcast %151 : vector<16x1xf32> to vector<16x16xf32>
    %153 = arith.subf %149, %152 : vector<16x16xf32>
    %154 = math.exp %153 : vector<16x16xf32>
    %cst_75 = arith.constant dense<0.000000e+00> : vector<16xf32>
    %155 = vector.multi_reduction <add>, %154, %cst_75 [1] : vector<16x16xf32> to vector<16xf32>
    %156 = vector.shape_cast %155 : vector<16xf32> to vector<16x1xf32>
    %157 = tpu.reciprocal %156 {approx = true} : vector<16x1xf32> -> vector<16x1xf32>
    %158 = vector.broadcast %157 : vector<16x1xf32> to vector<16x16xf32>
    %159 = arith.mulf %154, %158 : vector<16x16xf32>
    %160 = arith.truncf %159 : vector<16x16xf32> to vector<16x16xbf16>
    %161 = arith.truncf %146 : vector<16x256xf32> to vector<16x256xbf16>
    %cst_76 = arith.constant dense<0.000000e+00> : vector<16x256xf32>
    %162 = tpu.matmul %160, %161, %cst_76 {dimension_numbers = #tpu.dot_dimension_numbers<[0], [0], [1], [1], [0, 1, 1, 1], [], []>} : vector<16x16xbf16>, vector<16x256xbf16>, vector<16x256xf32> -> vector<16x256xf32>
    %cst_77 = arith.constant dense<0.000000e+00> : vector<16x1xf32>
    %163 = tpu.matmul %160, %2, %cst_77 {dimension_numbers = #tpu.dot_dimension_numbers<[0], [0], [1], [1], [0, 1, 1, 1], [], []>} : vector<16x16xbf16>, vector<16x1xbf16>, vector<16x1xf32> -> vector<16x1xf32>
    %cst_78 = arith.constant 9.99999971E-10 : f32
    %164 = vector.broadcast %cst_78 : f32 to vector<16x1xf32>
    %165 = arith.addf %164, %163 : vector<16x1xf32>
    %166 = tpu.reciprocal %165 : vector<16x1xf32> -> vector<16x1xf32>
    %167 = vector.broadcast %166 : vector<16x1xf32> to vector<16x256xf32>
    %168 = arith.mulf %162, %167 : vector<16x256xf32>
    %169 = arith.subf %135, %168 : vector<16x256xf32>
    %170 = arith.truncf %169 : vector<16x256xf32> to vector<16x256xbf16>
    %c3_79 = arith.constant 3 : index
    %c0_80 = arith.constant 0 : index
    %c0_81 = arith.constant 0 : index
    %171 = vector.load %arg5[%c3_79, %c0_80, %c0_81] : memref<4x256x256xbf16, #tpu.memory_space<vmem>>, vector<1x256x256xbf16>
    %172 = vector.shape_cast %171 : vector<1x256x256xbf16> to vector<256x256xbf16>
    %cst_82 = arith.constant dense<0.000000e+00> : vector<16x256xf32>
    %173 = tpu.matmul %170, %172, %cst_82 {dimension_numbers = #tpu.dot_dimension_numbers<[1], [0], [0], [1], [0, 0, 1, 1], [], []>} : vector<16x256xbf16>, vector<256x256xbf16>, vector<16x256xf32> -> vector<16x256xf32>
    %c3_83 = arith.constant 3 : index
    %c0_84 = arith.constant 0 : index
    %c0_85 = arith.constant 0 : index
    %174 = vector.load %arg6[%c3_83, %c0_84, %c0_85] : memref<4x1x256xf32, #tpu.memory_space<vmem>>, vector<1x1x256xf32>
    %175 = vector.shape_cast %174 : vector<1x1x256xf32> to vector<1x256xf32>
    %176 = vector.broadcast %175 : vector<1x256xf32> to vector<16x256xf32>
    %177 = arith.addf %173, %176 : vector<16x256xf32>
    %cst_86 = arith.constant 0.000000e+00 : f32
    %178 = vector.broadcast %cst_86 : f32 to vector<16x256xf32>
    %179 = arith.maximumf %177, %178 : vector<16x256xf32>
    %180 = arith.addf %135, %179 : vector<16x256xf32>
    %181 = arith.truncf %180 : vector<16x256xf32> to vector<16x256xbf16>
    %c0_87 = arith.constant 0 : index
    %c768 = arith.constant 768 : index
    %182 = vector.load %arg16[%c0_87, %c768] : memref<16x1280xbf16, #tpu.memory_space<vmem>>, vector<16x256xbf16>
    tpu.vector_store %arg16[%c0_87, %c768], %181 {strides = array<i32>} : memref<16x1280xbf16, #tpu.memory_space<vmem>>, vector<16x256xbf16>,
    %c0_88 = arith.constant 0 : index
    %c0_89 = arith.constant 0 : index
    %c0_90 = arith.constant 0 : index
    %183 = vector.load %arg2[%c0_88, %c0_89, %c0_90] : memref<1x16x256xf32, #tpu.memory_space<vmem>>, vector<1x16x256xf32>
    %184 = vector.shape_cast %183 : vector<1x16x256xf32> to vector<16x256xf32>
    %185 = arith.truncf %184 : vector<16x256xf32> to vector<16x256xbf16>
    %c0_91 = arith.constant 0 : index
    %c1024 = arith.constant 1024 : index
    %186 = vector.load %arg16[%c0_91, %c1024] : memref<16x1280xbf16, #tpu.memory_space<vmem>>, vector<16x256xbf16>
    tpu.vector_store %arg16[%c0_91, %c1024], %185 {strides = array<i32>} : memref<16x1280xbf16, #tpu.memory_space<vmem>>, vector<16x256xbf16>,
    %c0_92 = arith.constant 0 : index
    %c0_93 = arith.constant 0 : index
    %187 = vector.load %arg16[%c0_92, %c0_93] : memref<16x1280xbf16, #tpu.memory_space<vmem>>, vector<16x1280xbf16>
    %c0_94 = arith.constant 0 : index
    %c0_95 = arith.constant 0 : index
    %188 = vector.load %arg7[%c0_94, %c0_95] : memref<1280x1024xbf16, #tpu.memory_space<vmem>>, vector<1280x1024xbf16>
    %cst_96 = arith.constant dense<0.000000e+00> : vector<16x1024xf32>
    %189 = tpu.matmul %187, %188, %cst_96 {dimension_numbers = #tpu.dot_dimension_numbers<[1], [0], [0], [1], [0, 0, 1, 1], [], []>} : vector<16x1280xbf16>, vector<1280x1024xbf16>, vector<16x1024xf32> -> vector<16x1024xf32>
    %c0_97 = arith.constant 0 : index
    %c0_98 = arith.constant 0 : index
    %190 = vector.load %arg8[%c0_97, %c0_98] : memref<1x1024xf32, #tpu.memory_space<vmem>>, vector<1x1024xf32>
    %191 = vector.broadcast %190 : vector<1x1024xf32> to vector<16x1024xf32>
    %192 = arith.addf %189, %191 : vector<16x1024xf32>
    %cst_99 = arith.constant 0.000000e+00 : f32
    %193 = vector.broadcast %cst_99 : f32 to vector<16x1024xf32>
    %194 = arith.cmpf oge, %192, %193 : vector<16x1024xf32>
    %cst_100 = arith.constant 2.000000e-01 : f32
    %195 = vector.broadcast %cst_100 : f32 to vector<16x1024xf32>
    %196 = arith.mulf %195, %192 : vector<16x1024xf32>
    %197 = arith.select %194, %192, %196 : vector<16x1024xi1>, vector<16x1024xf32>
    %cst_101 = arith.constant dense<0xFF800000> : vector<1024xf32>
    %198 = vector.multi_reduction <maximumf>, %197, %cst_101 [0] : vector<16x1024xf32> to vector<1024xf32>
    %199 = vector.shape_cast %198 : vector<1024xf32> to vector<1x1024xf32>
    %200 = arith.truncf %199 : vector<1x1024xf32> to vector<1x1024xbf16>
    %c0_102 = arith.constant 0 : index
    %c0_103 = arith.constant 0 : index
    %201 = vector.load %arg9[%c0_102, %c0_103] : memref<1024x512xbf16, #tpu.memory_space<vmem>>, vector<1024x512xbf16>
    %cst_104 = arith.constant dense<0.000000e+00> : vector<1x512xf32>
    %202 = tpu.matmul %200, %201, %cst_104 {dimension_numbers = #tpu.dot_dimension_numbers<[1], [0], [0], [1], [0, 0, 1, 1], [], []>} : vector<1x1024xbf16>, vector<1024x512xbf16>, vector<1x512xf32> -> vector<1x512xf32>
    %c0_105 = arith.constant 0 : index
    %c0_106 = arith.constant 0 : index
    %203 = vector.load %arg10[%c0_105, %c0_106] : memref<1x512xf32, #tpu.memory_space<vmem>>, vector<1x512xf32>
    %204 = arith.addf %202, %203 : vector<1x512xf32>
    %cst_107 = arith.constant 0.000000e+00 : f32
    %205 = vector.broadcast %cst_107 : f32 to vector<1x512xf32>
    %206 = arith.cmpf oge, %204, %205 : vector<1x512xf32>
    %cst_108 = arith.constant 2.000000e-01 : f32
    %207 = vector.broadcast %cst_108 : f32 to vector<1x512xf32>
    %208 = arith.mulf %207, %204 : vector<1x512xf32>
    %209 = arith.select %206, %204, %208 : vector<1x512xi1>, vector<1x512xf32>
    %210 = arith.truncf %209 : vector<1x512xf32> to vector<1x512xbf16>
    %c0_109 = arith.constant 0 : index
    %c0_110 = arith.constant 0 : index
    %211 = vector.load %arg11[%c0_109, %c0_110] : memref<512x256xbf16, #tpu.memory_space<vmem>>, vector<512x256xbf16>
    %cst_111 = arith.constant dense<0.000000e+00> : vector<1x256xf32>
    %212 = tpu.matmul %210, %211, %cst_111 {dimension_numbers = #tpu.dot_dimension_numbers<[1], [0], [0], [1], [0, 0, 1, 1], [], []>} : vector<1x512xbf16>, vector<512x256xbf16>, vector<1x256xf32> -> vector<1x256xf32>
    %c0_112 = arith.constant 0 : index
    %c0_113 = arith.constant 0 : index
    %213 = vector.load %arg12[%c0_112, %c0_113] : memref<1x256xf32, #tpu.memory_space<vmem>>, vector<1x256xf32>
    %214 = arith.addf %212, %213 : vector<1x256xf32>
    %cst_114 = arith.constant 0.000000e+00 : f32
    %215 = vector.broadcast %cst_114 : f32 to vector<1x256xf32>
    %216 = arith.cmpf oge, %214, %215 : vector<1x256xf32>
    %cst_115 = arith.constant 2.000000e-01 : f32
    %217 = vector.broadcast %cst_115 : f32 to vector<1x256xf32>
    %218 = arith.mulf %217, %214 : vector<1x256xf32>
    %219 = arith.select %216, %214, %218 : vector<1x256xi1>, vector<1x256xf32>
    %220 = arith.truncf %219 : vector<1x256xf32> to vector<1x256xbf16>
    %c0_116 = arith.constant 0 : index
    %c0_117 = arith.constant 0 : index
    %221 = vector.load %arg13[%c0_116, %c0_117] : memref<256x128xbf16, #tpu.memory_space<vmem>>, vector<256x128xbf16>
    %cst_118 = arith.constant dense<0.000000e+00> : vector<1x128xf32>
    %222 = tpu.matmul %220, %221, %cst_118 {dimension_numbers = #tpu.dot_dimension_numbers<[1], [0], [0], [1], [0, 0, 1, 1], [], []>} : vector<1x256xbf16>, vector<256x128xbf16>, vector<1x128xf32> -> vector<1x128xf32>
    %c0_119 = arith.constant 0 : index
    %c0_120 = arith.constant 0 : index
    %223 = vector.load %arg14[%c0_119, %c0_120] : memref<1x128xf32, #tpu.memory_space<vmem>>, vector<1x128xf32>
    %224 = arith.addf %222, %223 : vector<1x128xf32>
    %c0_121 = arith.constant 0 : index
    %c0_122 = arith.constant 0 : index
    %c0_123 = arith.constant 0 : index
    %225 = vector.load %arg15[%c0_121, %c0_122, %c0_123] : memref<1x1x128xf32, #tpu.memory_space<vmem>>, vector<1x1x128xf32>
    %226 = vector.shape_cast %225 : vector<1x1x128xf32> to vector<1x128xf32>
    %227 = vector.shape_cast %224 : vector<1x128xf32> to vector<1x1x128xf32>
    tpu.vector_store %arg15[%c0_121, %c0_122, %c0_123], %227 {strides = array<i32>} : memref<1x1x128xf32, #tpu.memory_space<vmem>>, vector<1x1x128xf32>,
    return
  }
  func.func @transform_0(%arg0: i32) -> (i32, i32, i32) {
    %c0_i32 = arith.constant 0 : i32
    %c0_i32_0 = arith.constant 0 : i32
    %c0_i32_1 = arith.constant 0 : i32
    return %arg0, %c0_i32, %c0_i32_0 : i32, i32, i32
  }
  func.func @transform_1(%arg0: i32) -> (i32, i32, i32) {
    %c0_i32 = arith.constant 0 : i32
    %c0_i32_0 = arith.constant 0 : i32
    %c0_i32_1 = arith.constant 0 : i32
    return %arg0, %c0_i32, %c0_i32_0 : i32, i32, i32
  }
  func.func @transform_2(%arg0: i32) -> (i32, i32, i32) {
    %c0_i32 = arith.constant 0 : i32
    %c0_i32_0 = arith.constant 0 : i32
    %c0_i32_1 = arith.constant 0 : i32
    %c0_i32_2 = arith.constant 0 : i32
    return %c0_i32, %c0_i32_0, %c0_i32_1 : i32, i32, i32
  }
  func.func @transform_3(%arg0: i32) -> (i32, i32, i32) {
    %c0_i32 = arith.constant 0 : i32
    %c0_i32_0 = arith.constant 0 : i32
    %c0_i32_1 = arith.constant 0 : i32
    %c0_i32_2 = arith.constant 0 : i32
    return %c0_i32, %c0_i32_0, %c0_i32_1 : i32, i32, i32
  }
  func.func @transform_4(%arg0: i32) -> (i32, i32, i32) {
    %c0_i32 = arith.constant 0 : i32
    %c0_i32_0 = arith.constant 0 : i32
    %c0_i32_1 = arith.constant 0 : i32
    %c0_i32_2 = arith.constant 0 : i32
    return %c0_i32, %c0_i32_0, %c0_i32_1 : i32, i32, i32
  }
  func.func @transform_5(%arg0: i32) -> (i32, i32, i32) {
    %c0_i32 = arith.constant 0 : i32
    %c0_i32_0 = arith.constant 0 : i32
    %c0_i32_1 = arith.constant 0 : i32
    %c0_i32_2 = arith.constant 0 : i32
    return %c0_i32, %c0_i32_0, %c0_i32_1 : i32, i32, i32
  }
  func.func @transform_6(%arg0: i32) -> (i32, i32) {
    %c0_i32 = arith.constant 0 : i32
    %c0_i32_0 = arith.constant 0 : i32
    %c0_i32_1 = arith.constant 0 : i32
    return %c0_i32, %c0_i32_0 : i32, i32
  }
  func.func @transform_7(%arg0: i32) -> (i32, i32) {
    %c0_i32 = arith.constant 0 : i32
    %c0_i32_0 = arith.constant 0 : i32
    %c0_i32_1 = arith.constant 0 : i32
    return %c0_i32, %c0_i32_0 : i32, i32
  }
  func.func @transform_8(%arg0: i32) -> (i32, i32) {
    %c0_i32 = arith.constant 0 : i32
    %c0_i32_0 = arith.constant 0 : i32
    %c0_i32_1 = arith.constant 0 : i32
    return %c0_i32, %c0_i32_0 : i32, i32
  }
  func.func @transform_9(%arg0: i32) -> (i32, i32) {
    %c0_i32 = arith.constant 0 : i32
    %c0_i32_0 = arith.constant 0 : i32
    %c0_i32_1 = arith.constant 0 : i32
    return %c0_i32, %c0_i32_0 : i32, i32
  }
  func.func @transform_10(%arg0: i32) -> (i32, i32) {
    %c0_i32 = arith.constant 0 : i32
    %c0_i32_0 = arith.constant 0 : i32
    %c0_i32_1 = arith.constant 0 : i32
    return %c0_i32, %c0_i32_0 : i32, i32
  }
  func.func @transform_11(%arg0: i32) -> (i32, i32) {
    %c0_i32 = arith.constant 0 : i32
    %c0_i32_0 = arith.constant 0 : i32
    %c0_i32_1 = arith.constant 0 : i32
    return %c0_i32, %c0_i32_0 : i32, i32
  }
  func.func @transform_12(%arg0: i32) -> (i32, i32) {
    %c0_i32 = arith.constant 0 : i32
    %c0_i32_0 = arith.constant 0 : i32
    %c0_i32_1 = arith.constant 0 : i32
    return %c0_i32, %c0_i32_0 : i32, i32
  }
  func.func @transform_13(%arg0: i32) -> (i32, i32) {
    %c0_i32 = arith.constant 0 : i32
    %c0_i32_0 = arith.constant 0 : i32
    %c0_i32_1 = arith.constant 0 : i32
    return %c0_i32, %c0_i32_0 : i32, i32
  }
  func.func @transform_14(%arg0: i32) -> (i32, i32, i32) {
    %c0_i32 = arith.constant 0 : i32
    %c0_i32_0 = arith.constant 0 : i32
    %c0_i32_1 = arith.constant 0 : i32
    return %arg0, %c0_i32, %c0_i32_0 : i32, i32, i32
  }
}

</mosaic_0001>

<bundles_post_ra>
// kernel: custom-call.16
= control target key start
LH: loop header
LB: loop body
LE: loop exit
PB: predicated region body
PF: predicated region fallthrough
CT: control target
= control target key end

     0   :  { %s6_s0 = inlined_call_operand.vmem [shape: f32[2,64], index: 0, kind: output, shape index: {}]  }

// kernel: custom-call.17
= control target key start
LH: loop header
LB: loop body
LE: loop exit
PB: predicated region body
PF: predicated region fallthrough
CT: control target
= control target key end

     0   :  { %s6_s0 = inlined_call_operand.vmem [shape: f32[2,32], index: 0, kind: output, shape index: {}]  }

// kernel: pct_forward.5
= control target key start
LH: loop header
LB: loop body
LE: loop exit
PB: predicated region body
PF: predicated region fallthrough
CT: control target
= control target key end

     0   :  { %s715_s18 = smov 0   ;;  %s780_s0 = inlined_call_operand.vmem [shape: f32[128,3], index: 0, kind: input, shape index: {}]   ;;  %s781_s1 = inlined_call_operand.vmem [shape: f32[3,64], index: 1, kind: input, shape index: {}]   ;;  %s782_s2 = inlined_call_operand.vmem [shape: f32[1,64], index: 2, kind: input, shape index: {}]   ;;  %s783_s3 = inlined_call_operand.vmem [shape: bf16[64,64], index: 3, kind: input, shape index: {}]   ;;  %s784_s4 = inlined_call_operand.vmem [shape: f32[1,64], index: 4, kind: input, shape index: {}]   ;;  %s785_s5 = inlined_call_operand.vmem [shape: f32[128,64], index: 5, kind: output, shape index: {}]  }
   0x1 LB: > { %s580_s19 = sadd.s32 4294967295, %s683_s18   ;;  %p584_p0 = scmp.ge.s32.totalorder %s683_s18, 1  ;;  %s683_s18 = sphi %s715_s18, %s15_s18  }
   0x2   : > { %p188_p1 = scmp.lt.s32.totalorder %s683_s18, 3 }
   0x4   : > { %p189_p2 = pnand %p584_p0, %p188_p1 }
   0x5   : > { %v237_v0 = vld [vmem:[%s781_s1] sm:$0x7] (!%p189_p2)  ;;  %vm270_vm0 = vcmask (!%p189_p2), 1042432   ;;  %s585_s22 = sshll.u32 (!%p189_p2), %s580_s19, 3  ;;  %vm245_vm1 = vcmask (!%p189_p2), 23552   ;;  %v674_v10 = vld [vmem:[%s783_s3 + $0x8] sm:$0xff] (!%p189_p2)  }
   0x6   : > { %192 = sbr.rel (%p189_p2) target bundleno = 469 (0x1d5), region = 40  ;;  %v673_v1 = vld [vmem:[%s783_s3] sm:$0xff] (!%p189_p2)   ;;  %627 = vmatprep.subr.msk.mxu0 (!%p189_p2), %vm270_vm0, %v237_v0  ;;  %p217_p3 = scmp.lt.s32.totalorder (!%p189_p2), %s585_s22, 15  ;;  %v675_v11 = vld [vmem:[%s783_s3 + $0x10] sm:$0xff] (!%p189_p2)   ;;  %v676_v12 = vld [vmem:[%s783_s3 + $0x18] sm:$0xff] (!%p189_p2)   ;;  %vm430_vm2 = vcmask (!%p189_p2), 523264  }
   0x7   : > { %628 = vmatpush3.msk.msra.mxu0 (!%p189_p2), %vm270_vm0, %v237_v0  ;;  %657 = vmatprep.subr.bf16.mxu1 (!%p189_p2), %v673_v1  ;;  %v589_v13 = vld [vmem:[%s782_s2] ss:$0 sm:$0xff] (!%p189_p2) }
   0x8   : > { %641 = vmatprep.subr.bf16.mxu0 (!%p189_p2), %v673_v1  ;;  %661 = vmatpush3.bf16.msra.mxu1 (!%p189_p2), %v673_v1  ;;  %v599_v42 = vld [vmem:[%s784_s4] ss:$0 sm:$0xff] (!%p189_p2) }
   0x9   : > { %658 = vmatprep.subr.bf16.mxu1 (!%p189_p2), %v674_v10 }
   0xc   : > { %662 = vmatpush3.bf16.msra.mxu1 (!%p189_p2), %v674_v10 }
   0xd   : > { %s787_s22 = smov (!%p217_p3, %s585_s22), 15  ;;  %659 = vmatprep.subr.bf16.mxu1 %v675_v11 }
   0xe   : > { %s586_s25 = sshll.u32 %s787_s22, 3 }
   0xf   : > { %s220_s28 = scalar_lea.vmem %s780_s0, %s586_s25  ;;  %s226_s16 = scalar_lea.vmem %s785_s5, %s586_s25 }
  0x10   : > { %v229_v2 = vld [vmem:[%s220_s28] sm:$0xff]  ;;  %v230_v3 = vld [vmem:[%s220_s28 + $0x8] sm:$0xff]  ;;  %v231_v4 = vld [vmem:[%s220_s28 + $0x10] sm:$0xff]  ;;  %663 = vmatpush3.bf16.msra.mxu1 %v675_v11 }
  0x11   : > { %629 = vmatprep.mubr.msk.f32.mxu0 %vm245_vm1, %v229_v2  ;;  %v232_v5 = vld [vmem:[%s220_s28 + $0x18] sm:$0xff]  ;;  %v233_v6 = vld [vmem:[%s220_s28 + $0x20] sm:$0xff]  ;;  %v234_v7 = vld [vmem:[%s220_s28 + $0x28] sm:$0xff]  ;;  %660 = vmatprep.subr.bf16.mxu1 %v676_v12 }
  0x12   : > { %630 = vmatmul.mubr.msk.f32.vlgmr.msra.gmra.mrb[0].mxu0 %vm245_vm1, %v230_v3  ;;  %v235_v8 = vld [vmem:[%s220_s28 + $0x30] sm:$0xff]  ;;  %v236_v9 = vld [vmem:[%s220_s28 + $0x38] sm:$0xff] }
  0x13   : > { %632 = vmatprep.mubr.msk.f32.mxu0 %vm245_vm1, %v231_v4  ;;  %642 = vmatpush3.bf16.msra.mxu0 %v673_v1 }
  0x14   : > { %643 = vmatprep.subr.bf16.mxu0 %v674_v10  ;;  %664 = vmatpush3.bf16.msra.mxu1 %v676_v12 }
  0x16   : > { %633 = vmatmul.mubr.msk.f32.gmra.mrb[2].mxu0 %vm245_vm1, %v232_v5 }
  0x17   : > { %635 = vmatprep.mubr.msk.f32.mxu0 %vm245_vm1, %v233_v6  ;;  %644 = vmatpush3.bf16.msra.mxu0 %v674_v10 }
  0x18   : > { %645 = vmatprep.subr.bf16.mxu0 %v675_v11 }
  0x1a   : > { %636 = vmatmul.mubr.msk.f32.gmra.mrb[4].mxu0 %vm245_vm1, %v234_v7 }
  0x1b   : > { %638 = vmatprep.mubr.msk.f32.mxu0 %vm245_vm1, %v235_v8  ;;  %646 = vmatpush3.bf16.msra.mxu0 %v675_v11 }
  0x1c   : > { %647 = vmatprep.subr.bf16.mxu0 %v676_v12 }
  0x1e   : > { %639 = vmatmul.mubr.msk.f32.gmra.mrb[6].mxu0 %vm245_vm1, %v236_v9 }
  0x1f   : > { %648 = vmatpush3.bf16.msra.mxu0 %v676_v12 }
  0xe5   : > { %v631_v14 = vpop.f32.mrb[0].mxu0 }
  0xe6   : > { %v346_v15 = vadd.f32 %v631_v14, %v589_v13  ;;  %v340_v16 = vpop.f32.mrb[1].mxu0 }
  0xe7   : > { %v341_v17 = vadd.f32 %v589_v13, %v340_v16 }
  0xe8   : > { %v380_v18 = vmax.f32 %v346_v15, 0.0 }
  0xe9   : > { %v379_v19 = vmax.f32 %v341_v17, 0.0  ;;  %v634_v20 = vpop.f32.mrb[2].mxu0 }
  0xea   : > { %v356_v21 = vadd.f32 %v634_v20, %v589_v13  ;;  %v350_v22 = vpop.f32.mrb[3].mxu0 }
  0xeb   : > { %v387_v23 = vpack.c.bf16 %v380_v18, %v379_v19  ;;  %v351_v24 = vadd.f32 %v589_v13, %v350_v22 }
  0xec   : > { %v382_v25 = vmax.f32 %v356_v21, 0.0 }
  0xed   : > { %v381_v26 = vmax.f32 %v351_v24, 0.0  ;;  %v637_v27 = vpop.f32.mrb[4].mxu0  ;;  %649 = vmatprep.mubr.msk.bf16.mxu0 %vm430_vm2, %v387_v23 }
  0xee   : > { %v366_v28 = vadd.f32 %v637_v27, %v589_v13  ;;  %v360_v29 = vpop.f32.mrb[5].mxu0 }
  0xef   : > { %v388_v30 = vpack.c.bf16 %v382_v25, %v381_v26  ;;  %v361_v31 = vadd.f32 %v589_v13, %v360_v29 }
  0xf0   : > { %v384_v32 = vmax.f32 %v366_v28, 0.0 }
  0xf1   : > { %v383_v33 = vmax.f32 %v361_v31, 0.0  ;;  %v640_v34 = vpop.f32.mrb[6].mxu0  ;;  %650 = vmatmul.mubr.msk.bf16.vlgmr.msra.gmra.mrb[8].mxu0 %vm430_vm2, %v388_v30 }
  0xf2   : > { %v376_v35 = vadd.f32 %v640_v34, %v589_v13  ;;  %v370_v36 = vpop.f32.mrb[7].mxu0 }
  0xf3   : > { %v371_v37 = vadd.f32 %v589_v13, %v370_v36  ;;  %v389_v38 = vpack.c.bf16 %v384_v32, %v383_v33 }
  0xf4   : > { %v386_v39 = vmax.f32 %v376_v35, 0.0 }
  0xf5   : > { %v385_v40 = vmax.f32 %v371_v37, 0.0  ;;  %653 = vmatprep.mubr.msk.bf16.mxu1 %vm430_vm2, %v389_v38 }
  0xf7   : > { %v390_v41 = vpack.c.bf16 %v386_v39, %v385_v40 }
  0xf9   : > { %654 = vmatmul.mubr.msk.bf16.vlgmr.msra.gmra.mrb[0].mxu1 %vm430_vm2, %v390_v41 }
 0x1c4   : > { %v651_v43 = vpop.f32.mrb[8].mxu0 }
 0x1c5   : > { %v486_v44 = vadd.f32 %v651_v43, %v599_v42  ;;  %v477_v45 = vpop.f32.mrb[9].mxu0 }
 0x1c6   : > { %v478_v46 = vadd.f32 %v599_v42, %v477_v45  ;;  %v652_v47 = vpop.f32.mrb[10].mxu0 }
 0x1c7   : > { %v510_v48 = vmax.f32 %v486_v44, 0.0  ;;  %v489_v49 = vadd.f32 %v652_v47, %v599_v42  ;;  %v480_v50 = vpop.f32.mrb[11].mxu0 }
 0x1c8   : > { %v508_v51 = vmax.f32 %v478_v46, 0.0  ;;  %v481_v52 = vadd.f32 %v599_v42, %v480_v50 }
 0x1c9   : > { %518 = vst.msk [vmem:[%s226_s16 + $0x10] sm:$0xff] %vm430_vm2, %v510_v48  ;;  %v511_v53 = vmax.f32 %v489_v49, 0.0 }
 0x1ca   : > { %516 = vst.msk [vmem:[%s226_s16] sm:$0xff] %vm430_vm2, %v508_v51  ;;  %v509_v54 = vmax.f32 %v481_v52, 0.0 }
 0x1cb   : > { %519 = vst.msk [vmem:[%s226_s16 + $0x18] sm:$0xff] %vm430_vm2, %v511_v53 }
 0x1cc   : > { %517 = vst.msk [vmem:[%s226_s16 + $0x8] sm:$0xff] %vm430_vm2, %v509_v54  ;;  %v655_v55 = vpop.f32.mrb[0].mxu1 }
 0x1cd   : > { %v502_v56 = vadd.f32 %v655_v55, %v599_v42  ;;  %v493_v57 = vpop.f32.mrb[1].mxu1 }
 0x1ce   : > { %v494_v58 = vadd.f32 %v599_v42, %v493_v57  ;;  %v656_v59 = vpop.f32.mrb[2].mxu1 }
 0x1cf   : > { %v514_v60 = vmax.f32 %v502_v56, 0.0  ;;  %v505_v61 = vadd.f32 %v656_v59, %v599_v42  ;;  %v496_v62 = vpop.f32.mrb[3].mxu1 }
 0x1d0   : > { %v512_v63 = vmax.f32 %v494_v58, 0.0  ;;  %v497_v0 = vadd.f32 %v599_v42, %v496_v62 }
 0x1d1   : > { %522 = vst.msk [vmem:[%s226_s16 + $0x30] sm:$0xff] %vm430_vm2, %v514_v60  ;;  %v515_v1 = vmax.f32 %v505_v61, 0.0 }
 0x1d2   : > { %520 = vst.msk [vmem:[%s226_s16 + $0x20] sm:$0xff] %vm430_vm2, %v512_v63  ;;  %v513_v2 = vmax.f32 %v497_v0, 0.0 }
 0x1d3   : > { %523 = vst.msk [vmem:[%s226_s16 + $0x38] sm:$0xff] %vm430_vm2, %v515_v1 }
 0x1d4   : > { %521 = vst.msk [vmem:[%s226_s16 + $0x28] sm:$0xff] %vm430_vm2, %v513_v2 }
 0x1d5 PF: > { %s15_s18 = sadd.s32 1, %s683_s18  }
 0x1d6   : > { %p12_p4 = scmp.ge.s32.totalorder %s15_s18, 4  }
 0x1d8   :  { %14 = sbr.rel (!%p12_p4) target bundleno = 1 (0x1), region = 70 }

// kernel: pct_forward.6
= control target key start
LH: loop header
LB: loop body
LE: loop exit
PB: predicated region body
PF: predicated region fallthrough
CT: control target
= control target key end

     0   :  { %s1491_s18 = smov 0   ;;  %s1695_s0 = inlined_call_operand.vmem [shape: bf16[512,128], index: 0, kind: input, shape index: {}]   ;;  %s1696_s1 = inlined_call_operand.vmem [shape: bf16[128,128], index: 1, kind: input, shape index: {}]   ;;  %s1697_s2 = inlined_call_operand.vmem [shape: f32[1,128], index: 2, kind: input, shape index: {}]   ;;  %s1698_s3 = inlined_call_operand.vmem [shape: bf16[128,128], index: 3, kind: input, shape index: {}]   ;;  %s1699_s4 = inlined_call_operand.vmem [shape: f32[1,128], index: 4, kind: input, shape index: {}]   ;;  %s1700_s5 = inlined_call_operand.vmem [shape: f32[64,128], index: 5, kind: output, shape index: {}]  }
   0x1 LB: > { %s1224_s19 = sadd.s32 4294967295, %s1459_s18   ;;  %p1228_p0 = scmp.ge.s32.totalorder %s1459_s18, 1  ;;  %s1459_s18 = sphi %s1491_s18, %s15_s18  }
   0x2   : > { %p188_p1 = scmp.lt.s32.totalorder %s1459_s18, 3 }
   0x4   : > { %p189_p2 = pnand %p1228_p0, %p188_p1 }
   0x5   : > { %v1421_v0 = vld [vmem:[%s1696_s1] sm:$0xff] (!%p189_p2)   ;;  %s1229_s22 = sshll.u32 (!%p189_p2), %s1224_s19, 5  ;;  %v1422_v1 = vld [vmem:[%s1696_s1 + $0x8] sm:$0xff] (!%p189_p2)   ;;  %v1423_v2 = vld [vmem:[%s1696_s1 + $0x10] sm:$0xff] (!%p189_p2)   ;;  %vm1125_vm0 = vcmask (!%p189_p2), 1041409   ;;  %vm1127_vm1 = vcmask (!%p189_p2), 1042434  }
   0x6   : > { %192 = sbr.rel (%p189_p2) target bundleno = 556 (0x22c), region = 40  ;;  %p217_p3 = scmp.lt.s32.totalorder (!%p189_p2), %s1229_s22, 63  ;;  %1317 = vmatprep.subr.bf16.mxu0 (!%p189_p2), %v1421_v0  ;;  %v1424_v3 = vld [vmem:[%s1696_s1 + $0x18] sm:$0xff] (!%p189_p2)   ;;  %v1425_v5 = vld [vmem:[%s1696_s1 + $0x20] sm:$0xff] (!%p189_p2)   ;;  %v1426_v6 = vld [vmem:[%s1696_s1 + $0x28] sm:$0xff] (!%p189_p2)   ;;  %vm1129_vm2 = vcmask (!%p189_p2), 1043459  }
   0x7   : > { %1318 = vmatpush3.bf16.msra.mxu0 (!%p189_p2), %v1421_v0  ;;  %v1427_v7 = vld [vmem:[%s1696_s1 + $0x30] sm:$0xff] (!%p189_p2)   ;;  %v1428_v8 = vld [vmem:[%s1696_s1 + $0x38] sm:$0xff] (!%p189_p2)   ;;  %v1445_v9 = vld [vmem:[%s1698_s3] sm:$0xff] (!%p189_p2)   ;;  %s1622_s13 = sshll.u32 (!%p189_p2), %s1224_s19, 2  ;;  %vm1131_vm3 = vcmask (!%p189_p2), 1044484   ;;  %vm1133_vm4 = vcmask (!%p189_p2), 1045509  }
   0x8   : > { %1319 = vmatprep.subr.bf16.mxu0 (!%p189_p2), %v1422_v1  ;;  %v1446_v10 = vld [vmem:[%s1698_s3 + $0x8] sm:$0xff] (!%p189_p2)   ;;  %1365 = vmatprep.subr.bf16.mxu1 (!%p189_p2), %v1445_v9  ;;  %v1447_v11 = vld [vmem:[%s1698_s3 + $0x10] sm:$0xff] (!%p189_p2)   ;;  %v1448_v14 = vld [vmem:[%s1698_s3 + $0x18] sm:$0xff] (!%p189_p2)   ;;  %p223_p4 = scmp.lt.s32.totalorder (!%p189_p2), %s1622_s13, 7  ;;  %vm1135_vm5 = vcmask (!%p189_p2), 1046534   ;;  %vm1137_vm6 = vcmask (!%p189_p2), 1047559  }
   0x9   : > { %1366 = vmatpush3.bf16.msra.mxu1 (!%p189_p2), %v1445_v9  ;;  %v1449_v15 = vld [vmem:[%s1698_s3 + $0x20] sm:$0xff] (!%p189_p2)   ;;  %v1450_v18 = vld [vmem:[%s1698_s3 + $0x28] sm:$0xff] (!%p189_p2)   ;;  %v1451_v30 = vld [vmem:[%s1698_s3 + $0x30] sm:$0xff] (!%p189_p2)  }
   0xa   : > { %1367 = vmatprep.subr.bf16.mxu1 (!%p189_p2), %v1446_v10  ;;  %v1452_v31 = vld [vmem:[%s1698_s3 + $0x38] sm:$0xff] (!%p189_p2)   ;;  %v1573_v32 = vld [vmem:[%s1697_s2] ss:$0 sm:$0xff] (!%p189_p2) }
   0xb   : > { %1320 = vmatpush3.bf16.msra.mxu0 (!%p189_p2), %v1422_v1 }
   0xc   : > { %1321 = vmatprep.subr.bf16.mxu0 (!%p189_p2), %v1423_v2 }
   0xd   : > { %s1702_s22 = smov (!%p217_p3, %s1229_s22), 63  ;;  %1368 = vmatpush3.bf16.msra.mxu1 %v1446_v10  ;;  %s1704_s13 = smov (!%p223_p4, %s1622_s13), 7 }
   0xe   : > { %s1230_s27 = sshll.u32 %s1702_s22, 2  ;;  %1369 = vmatprep.subr.bf16.mxu1 %v1447_v11  ;;  %s1232_s19 = sshll.u32 %s1704_s13, 3 }
   0xf   : > { %s1513_s30 = scalar_lea.vmem %s1695_s0, %s1230_s27  ;;  %1322 = vmatpush3.bf16.msra.mxu0 %v1423_v2  ;;  %s1644_s16 = scalar_lea.vmem %s1700_s5, %s1232_s19 }
  0x10   : > { %v1429_v4 = vld [vmem:[%s1513_s30] sm:$0xff]   ;;  %1323 = vmatprep.subr.bf16.mxu0 %v1424_v3  ;;  %v1430_v12 = vld [vmem:[%s1513_s30 + $0x8] sm:$0xff]   ;;  %v1431_v13 = vld [vmem:[%s1513_s30 + $0x10] sm:$0xff]  }
  0x11   : > { %1333 = vmatprep.mubr.bf16.mxu0 %v1429_v4  ;;  %1370 = vmatpush3.bf16.msra.mxu1 %v1447_v11  ;;  %v1432_v16 = vld [vmem:[%s1513_s30 + $0x18] sm:$0xff]   ;;  %v1433_v17 = vld [vmem:[%s1513_s30 + $0x20] sm:$0xff]   ;;  %v1434_v19 = vld [vmem:[%s1513_s30 + $0x28] sm:$0xff]  }
  0x12   : > { %1371 = vmatprep.subr.bf16.mxu1 %v1448_v14  ;;  %v1435_v20 = vld [vmem:[%s1513_s30 + $0x30] sm:$0xff]   ;;  %v1436_v21 = vld [vmem:[%s1513_s30 + $0x38] sm:$0xff]   ;;  %v1437_v22 = vld [vmem:[%s1513_s30 + $0x40] sm:$0xff]  }
  0x13   : > { %1324 = vmatpush3.bf16.msra.mxu0 %v1424_v3  ;;  %v1438_v23 = vld [vmem:[%s1513_s30 + $0x48] sm:$0xff]   ;;  %v1439_v24 = vld [vmem:[%s1513_s30 + $0x50] sm:$0xff]   ;;  %v1440_v25 = vld [vmem:[%s1513_s30 + $0x58] sm:$0xff]  }
  0x14   : > { %1325 = vmatprep.subr.bf16.mxu0 %v1425_v5  ;;  %v1441_v26 = vld [vmem:[%s1513_s30 + $0x60] sm:$0xff]   ;;  %v1442_v27 = vld [vmem:[%s1513_s30 + $0x68] sm:$0xff]   ;;  %v1443_v28 = vld [vmem:[%s1513_s30 + $0x70] sm:$0xff]  }
  0x15   : > { %1372 = vmatpush3.bf16.msra.mxu1 %v1448_v14  ;;  %v1444_v29 = vld [vmem:[%s1513_s30 + $0x78] sm:$0xff]  }
  0x16   : > { %1373 = vmatprep.subr.bf16.mxu1 %v1449_v15 }
  0x17   : > { %1326 = vmatpush3.bf16.msra.mxu0 %v1425_v5 }
  0x18   : > { %1327 = vmatprep.subr.bf16.mxu0 %v1426_v6 }
  0x19   : > { %1374 = vmatpush3.bf16.msra.mxu1 %v1449_v15 }
  0x1a   : > { %1375 = vmatprep.subr.bf16.mxu1 %v1450_v18 }
  0x1b   : > { %1328 = vmatpush3.bf16.msra.mxu0 %v1426_v6 }
  0x1c   : > { %1329 = vmatprep.subr.bf16.mxu0 %v1427_v7 }
  0x1d   : > { %1376 = vmatpush3.bf16.msra.mxu1 %v1450_v18 }
  0x1e   : > { %1377 = vmatprep.subr.bf16.mxu1 %v1451_v30 }
  0x1f   : > { %1330 = vmatpush3.bf16.msra.mxu0 %v1427_v7 }
  0x20   : > { %1331 = vmatprep.subr.bf16.mxu0 %v1428_v8 }
  0x21   : > { %1378 = vmatpush3.bf16.msra.mxu1 %v1451_v30 }
  0x22   : > { %1379 = vmatprep.subr.bf16.mxu1 %v1452_v31 }
  0x23   : > { %1332 = vmatpush3.bf16.msra.mxu0 %v1428_v8 }
  0x25   : > { %1380 = vmatpush3.bf16.msra.mxu1 %v1452_v31 }
  0x26   : > { %1334 = vmatmul.mubr.bf16.vlgmr.msra.gmra.mrb[0].mxu0 %v1430_v12 }
  0x27   : > { %1337 = vmatprep.mubr.bf16.mxu0 %v1431_v13 }
  0x2e   : > { %1338 = vmatmul.mubr.bf16.gmra.mrb[4].mxu0 %v1432_v16 }
  0x2f   : > { %1341 = vmatprep.mubr.bf16.mxu0 %v1433_v17 }
  0x36   : > { %1342 = vmatmul.mubr.bf16.gmra.mrb[8].mxu0 %v1434_v19 }
  0x37   : > { %1345 = vmatprep.mubr.bf16.mxu0 %v1435_v20 }
  0x3e   : > { %1346 = vmatmul.mubr.bf16.gmra.mrb[12].mxu0 %v1436_v21 }
  0x3f   : > { %1349 = vmatprep.mubr.bf16.mxu0 %v1437_v22 }
  0x46   : > { %1350 = vmatmul.mubr.bf16.gmra.mrb[16].mxu0 %v1438_v23 }
  0x47   : > { %1353 = vmatprep.mubr.bf16.mxu0 %v1439_v24 }
  0x4e   : > { %1354 = vmatmul.mubr.bf16.gmra.mrb[20].mxu0 %v1440_v25 }
  0x4f   : > { %1357 = vmatprep.mubr.bf16.mxu0 %v1441_v26 }
  0x56   : > { %1358 = vmatmul.mubr.bf16.gmra.mrb[24].mxu0 %v1442_v27 }
  0x57   : > { %1361 = vmatprep.mubr.bf16.mxu0 %v1443_v28 }
  0x5e   : > { %1362 = vmatmul.mubr.bf16.gmra.mrb[28].mxu0 %v1444_v29 }
  0xf9   : > { %v1335_v33 = vpop.f32.mrb[0].mxu0 }
  0xfa   : > { %v471_v34 = vadd.f32 %v1335_v33, %v1573_v32  ;;  %v462_v35 = vpop.f32.mrb[1].mxu0 }
  0xfb   : > { %v463_v36 = vadd.f32 %v1573_v32, %v462_v35  ;;  %v1336_v37 = vpop.f32.mrb[2].mxu0 }
  0xfc   : > { %v474_v38 = vadd.f32 %v1336_v37, %v1573_v32  ;;  %v465_v39 = vpop.f32.mrb[3].mxu0  ;;  %v591_v41 = vmax.f32 %v471_v34, 0.0 }
  0xfd   : > { %v466_v40 = vadd.f32 %v1573_v32, %v465_v39  ;;  %v589_v43 = vmax.f32 %v463_v36, 0.0 }
  0xfe   : > { %v592_v42 = vmax.f32 %v474_v38, 0.0 }
  0xff   : > { %v590_v44 = vmax.f32 %v466_v40, 0.0 }
 0x100   : > { %v622_v45 = vpack.c.bf16 %v592_v42, %v591_v41 }
 0x101   : > { %v1339_v46 = vpop.f32.mrb[4].mxu0  ;;  %v621_v47 = vpack.c.bf16 %v590_v44, %v589_v43 }
 0x102   : > { %v487_v48 = vadd.f32 %v1339_v46, %v1573_v32  ;;  %v478_v49 = vpop.f32.mrb[5].mxu0 }
 0x103   : > { %v479_v50 = vadd.f32 %v1573_v32, %v478_v49  ;;  %v1340_v51 = vpop.f32.mrb[6].mxu0  ;;  %1381 = vmatprep.mubr.bf16.mxu1 %v621_v47 }
 0x104   : > { %v490_v52 = vadd.f32 %v1340_v51, %v1573_v32  ;;  %v481_v53 = vpop.f32.mrb[7].mxu0  ;;  %1382 = vmatmul.mubr.bf16.vlgmr.msra.gmra.mrb[0].mxu1 %v622_v45  ;;  %v595_v55 = vmax.f32 %v487_v48, 0.0 }
 0x105   : > { %v482_v54 = vadd.f32 %v1573_v32, %v481_v53  ;;  %v593_v57 = vmax.f32 %v479_v50, 0.0 }
 0x106   : > { %v596_v56 = vmax.f32 %v490_v52, 0.0 }
 0x107   : > { %v594_v58 = vmax.f32 %v482_v54, 0.0 }
 0x108   : > { %v624_v59 = vpack.c.bf16 %v596_v56, %v595_v55 }
 0x109   : > { %v623_v60 = vpack.c.bf16 %v594_v58, %v593_v57  ;;  %v1343_v61 = vpop.f32.mrb[8].mxu0 }
 0x10a   : > { %v503_v62 = vadd.f32 %v1343_v61, %v1573_v32  ;;  %v494_v63 = vpop.f32.mrb[9].mxu0 }
 0x10b   : > { %v495_v0 = vadd.f32 %v1573_v32, %v494_v63  ;;  %v1344_v1 = vpop.f32.mrb[10].mxu0  ;;  %1385 = vmatprep.mubr.bf16.mxu1 %v623_v60 }
 0x10c   : > { %v506_v2 = vadd.f32 %v1344_v1, %v1573_v32  ;;  %v497_v3 = vpop.f32.mrb[11].mxu0  ;;  %1386 = vmatmul.mubr.bf16.gmra.mrb[4].mxu1 %v624_v59  ;;  %v599_v5 = vmax.f32 %v503_v62, 0.0 }
 0x10d   : > { %v498_v4 = vadd.f32 %v1573_v32, %v497_v3  ;;  %v597_v7 = vmax.f32 %v495_v0, 0.0 }
 0x10e   : > { %v600_v6 = vmax.f32 %v506_v2, 0.0 }
 0x10f   : > { %v598_v8 = vmax.f32 %v498_v4, 0.0 }
 0x110   : > { %v626_v9 = vpack.c.bf16 %v600_v6, %v599_v5 }
 0x111   : > { %v625_v10 = vpack.c.bf16 %v598_v8, %v597_v7  ;;  %v1347_v11 = vpop.f32.mrb[12].mxu0 }
 0x112   : > { %v519_v12 = vadd.f32 %v1347_v11, %v1573_v32  ;;  %v510_v13 = vpop.f32.mrb[13].mxu0 }
 0x113   : > { %v511_v14 = vadd.f32 %v1573_v32, %v510_v13  ;;  %v1348_v15 = vpop.f32.mrb[14].mxu0  ;;  %1389 = vmatprep.mubr.bf16.mxu1 %v625_v10 }
 0x114   : > { %v522_v16 = vadd.f32 %v1348_v15, %v1573_v32  ;;  %v513_v17 = vpop.f32.mrb[15].mxu0  ;;  %1390 = vmatmul.mubr.bf16.gmra.mrb[8].mxu1 %v626_v9  ;;  %v603_v19 = vmax.f32 %v519_v12, 0.0 }
 0x115   : > { %v514_v18 = vadd.f32 %v1573_v32, %v513_v17  ;;  %v601_v21 = vmax.f32 %v511_v14, 0.0 }
 0x116   : > { %v604_v20 = vmax.f32 %v522_v16, 0.0 }
 0x117   : > { %v602_v22 = vmax.f32 %v514_v18, 0.0  ;;  %v1610_v18 = vld [vmem:[%s1699_s4] ss:$0 sm:$0xff] }
 0x118   : > { %v628_v23 = vpack.c.bf16 %v604_v20, %v603_v19 }
 0x119   : > { %v627_v24 = vpack.c.bf16 %v602_v22, %v601_v21  ;;  %v1351_v25 = vpop.f32.mrb[16].mxu0 }
 0x11a   : > { %v535_v26 = vadd.f32 %v1351_v25, %v1573_v32  ;;  %v526_v27 = vpop.f32.mrb[17].mxu0 }
 0x11b   : > { %v527_v28 = vadd.f32 %v1573_v32, %v526_v27  ;;  %v1352_v29 = vpop.f32.mrb[18].mxu0  ;;  %1393 = vmatprep.mubr.bf16.mxu1 %v627_v24 }
 0x11c   : > { %v538_v30 = vadd.f32 %v1352_v29, %v1573_v32  ;;  %v529_v31 = vpop.f32.mrb[19].mxu0  ;;  %1394 = vmatmul.mubr.bf16.gmra.mrb[12].mxu1 %v628_v23  ;;  %v607_v34 = vmax.f32 %v535_v26, 0.0 }
 0x11d   : > { %v530_v33 = vadd.f32 %v1573_v32, %v529_v31  ;;  %v605_v36 = vmax.f32 %v527_v28, 0.0 }
 0x11e   : > { %v608_v35 = vmax.f32 %v538_v30, 0.0 }
 0x11f   : > { %v606_v37 = vmax.f32 %v530_v33, 0.0 }
 0x120   : > { %v630_v38 = vpack.c.bf16 %v608_v35, %v607_v34 }
 0x121   : > { %v629_v39 = vpack.c.bf16 %v606_v37, %v605_v36  ;;  %v1355_v40 = vpop.f32.mrb[20].mxu0 }
 0x122   : > { %v551_v41 = vadd.f32 %v1355_v40, %v1573_v32  ;;  %v542_v42 = vpop.f32.mrb[21].mxu0 }
 0x123   : > { %v543_v43 = vadd.f32 %v1573_v32, %v542_v42  ;;  %v1356_v44 = vpop.f32.mrb[22].mxu0  ;;  %1397 = vmatprep.mubr.bf16.mxu1 %v629_v39 }
 0x124   : > { %v554_v45 = vadd.f32 %v1356_v44, %v1573_v32  ;;  %v545_v46 = vpop.f32.mrb[23].mxu0  ;;  %1398 = vmatmul.mubr.bf16.gmra.mrb[16].mxu1 %v630_v38  ;;  %v611_v48 = vmax.f32 %v551_v41, 0.0 }
 0x125   : > { %v546_v47 = vadd.f32 %v1573_v32, %v545_v46  ;;  %v609_v50 = vmax.f32 %v543_v43, 0.0 }
 0x126   : > { %v612_v49 = vmax.f32 %v554_v45, 0.0 }
 0x127   : > { %v610_v51 = vmax.f32 %v546_v47, 0.0 }
 0x128   : > { %v632_v52 = vpack.c.bf16 %v612_v49, %v611_v48 }
 0x129   : > { %v631_v53 = vpack.c.bf16 %v610_v51, %v609_v50  ;;  %v1359_v54 = vpop.f32.mrb[24].mxu0 }
 0x12a   : > { %v567_v55 = vadd.f32 %v1359_v54, %v1573_v32  ;;  %v558_v56 = vpop.f32.mrb[25].mxu0 }
 0x12b   : > { %v559_v57 = vadd.f32 %v1573_v32, %v558_v56  ;;  %v1360_v58 = vpop.f32.mrb[26].mxu0  ;;  %1401 = vmatprep.mubr.bf16.mxu1 %v631_v53 }
 0x12c   : > { %v570_v59 = vadd.f32 %v1360_v58, %v1573_v32  ;;  %v561_v60 = vpop.f32.mrb[27].mxu0  ;;  %1402 = vmatmul.mubr.bf16.gmra.mrb[20].mxu1 %v632_v52  ;;  %v615_v62 = vmax.f32 %v567_v55, 0.0 }
 0x12d   : > { %v562_v61 = vadd.f32 %v1573_v32, %v561_v60  ;;  %v613_v0 = vmax.f32 %v559_v57, 0.0 }
 0x12e   : > { %v616_v63 = vmax.f32 %v570_v59, 0.0 }
 0x12f   : > { %v614_v1 = vmax.f32 %v562_v61, 0.0 }
 0x130   : > { %v634_v2 = vpack.c.bf16 %v616_v63, %v615_v62 }
 0x131   : > { %v633_v3 = vpack.c.bf16 %v614_v1, %v613_v0  ;;  %v1363_v4 = vpop.f32.mrb[28].mxu0 }
 0x132   : > { %v583_v5 = vadd.f32 %v1363_v4, %v1573_v32  ;;  %v574_v6 = vpop.f32.mrb[29].mxu0 }
 0x133   : > { %v575_v7 = vadd.f32 %v1573_v32, %v574_v6  ;;  %v1364_v8 = vpop.f32.mrb[30].mxu0  ;;  %1405 = vmatprep.mubr.bf16.mxu1 %v633_v3 }
 0x134   : > { %v586_v9 = vadd.f32 %v1364_v8, %v1573_v32  ;;  %v577_v10 = vpop.f32.mrb[31].mxu0  ;;  %1406 = vmatmul.mubr.bf16.gmra.mrb[24].mxu1 %v634_v2  ;;  %v619_v12 = vmax.f32 %v583_v5, 0.0 }
 0x135   : > { %v578_v11 = vadd.f32 %v1573_v32, %v577_v10  ;;  %v617_v14 = vmax.f32 %v575_v7, 0.0 }
 0x136   : > { %v620_v13 = vmax.f32 %v586_v9, 0.0 }
 0x137   : > { %v618_v15 = vmax.f32 %v578_v11, 0.0 }
 0x138   : > { %v636_v16 = vpack.c.bf16 %v620_v13, %v619_v12 }
 0x139   : > { %v635_v17 = vpack.c.bf16 %v618_v15, %v617_v14 }
 0x13b   : > { %1409 = vmatprep.mubr.bf16.mxu1 %v635_v17 }
 0x13c   : > { %1410 = vmatmul.mubr.bf16.gmra.mrb[28].mxu1 %v636_v16 }
 0x1d7   : > { %v1383_v19 = vpop.f32.mrb[0].mxu1 }
 0x1d8   : > { %v751_v20 = vadd.f32 %v1383_v19, %v1610_v18  ;;  %v742_v21 = vpop.f32.mrb[1].mxu1 }
 0x1d9   : > { %v743_v22 = vadd.f32 %v1610_v18, %v742_v21  ;;  %v1384_v32 = vpop.f32.mrb[2].mxu1 }
 0x1da   : > { %v871_v23 = vmax.f32 %v751_v20, 0.0  ;;  %v754_v24 = vadd.f32 %v1384_v32, %v1610_v18  ;;  %v745_v25 = vpop.f32.mrb[3].mxu1 }
 0x1db   : > { %v869_v26 = vmax.f32 %v743_v22, 0.0  ;;  %v746_v27 = vadd.f32 %v1610_v18, %v745_v25 }
 0x1dc   : > { %v913_v28 = vrot.slane %v871_v23, 4  ;;  %v872_v29 = vmax.f32 %v754_v24, 0.0 }
 0x1dd   : > { %v901_v30 = vrot.slane %v869_v26, 4  ;;  %v870_v31 = vmax.f32 %v746_v27, 0.0 }
 0x1de   : > { %v914_v33 = vmax.f32 %v871_v23, %v913_v28  ;;  %v919_v34 = vrot.slane %v872_v29, 4 }
 0x1df   : > { %v902_v35 = vmax.f32 %v869_v26, %v901_v30  ;;  %v907_v36 = vrot.slane %v870_v31, 4  ;;  %v1387_v37 = vpop.f32.mrb[4].mxu1 }
 0x1e0   : > { %v915_v38 = vrot.slane %v914_v33, 2  ;;  %v920_v39 = vmax.f32 %v872_v29, %v919_v34  ;;  %v767_v40 = vadd.f32 %v1387_v37, %v1610_v18  ;;  %v758_v41 = vpop.f32.mrb[5].mxu1 }
 0x1e1   : > { %v903_v42 = vrot.slane %v902_v35, 2  ;;  %v908_v43 = vmax.f32 %v870_v31, %v907_v36  ;;  %v759_v44 = vadd.f32 %v1610_v18, %v758_v41  ;;  %v1388_v45 = vpop.f32.mrb[6].mxu1 }
 0x1e2   : > { %v916_v46 = vmax.f32 %v914_v33, %v915_v38  ;;  %v921_v47 = vrot.slane %v920_v39, 2  ;;  %v875_v48 = vmax.f32 %v767_v40, 0.0  ;;  %v770_v49 = vadd.f32 %v1388_v45, %v1610_v18  ;;  %v761_v50 = vpop.f32.mrb[7].mxu1 }
 0x1e3   : > { %v904_v51 = vmax.f32 %v902_v35, %v903_v42  ;;  %v909_v52 = vrot.slane %v908_v43, 2  ;;  %v873_v53 = vmax.f32 %v759_v44, 0.0  ;;  %v762_v54 = vadd.f32 %v1610_v18, %v761_v50 }
 0x1e4   : > { %v917_v55 = vrot.slane %v916_v46, 1  ;;  %v922_v56 = vmax.f32 %v920_v39, %v921_v47  ;;  %v937_v57 = vrot.slane %v875_v48, 4  ;;  %v876_v58 = vmax.f32 %v770_v49, 0.0 }
 0x1e5   : > { %v905_v59 = vrot.slane %v904_v51, 1  ;;  %v910_v60 = vmax.f32 %v908_v43, %v909_v52  ;;  %v925_v61 = vrot.slane %v873_v53, 4  ;;  %v874_v62 = vmax.f32 %v762_v54, 0.0 }
 0x1e6   : > { %v918_v63 = vmax.f32 %v916_v46, %v917_v55  ;;  %v923_v0 = vrot.slane %v922_v56, 1  ;;  %v938_v1 = vmax.f32 %v875_v48, %v937_v57  ;;  %v943_v2 = vrot.slane %v876_v58, 4 }
 0x1e7   : > { %v906_v3 = vmax.f32 %v904_v51, %v905_v59  ;;  %v911_v4 = vrot.slane %v910_v60, 1  ;;  %v926_v5 = vmax.f32 %v873_v53, %v925_v61  ;;  %v931_v6 = vrot.slane %v874_v62, 4  ;;  %v1391_v7 = vpop.f32.mrb[8].mxu1 }
 0x1e8   : > { %v924_v8 = vmax.f32 %v922_v56, %v923_v0  ;;  %v939_v9 = vrot.slane %v938_v1, 2  ;;  %v944_v10 = vmax.f32 %v876_v58, %v943_v2  ;;  %v783_v11 = vadd.f32 %v1391_v7, %v1610_v18  ;;  %v774_v12 = vpop.f32.mrb[9].mxu1 }
 0x1e9   : > { %v912_v13 = vmax.f32 %v910_v60, %v911_v4  ;;  %v927_v14 = vrot.slane %v926_v5, 2  ;;  %v932_v15 = vmax.f32 %v874_v62, %v931_v6  ;;  %v775_v16 = vadd.f32 %v1610_v18, %v774_v12  ;;  %v1392_v17 = vpop.f32.mrb[10].mxu1 }
 0x1ea   : > { %v940_v19 = vmax.f32 %v938_v1, %v939_v9  ;;  %v945_v20 = vrot.slane %v944_v10, 2  ;;  %v879_v21 = vmax.f32 %v783_v11, 0.0  ;;  %v786_v22 = vadd.f32 %v1392_v17, %v1610_v18  ;;  %v777_v32 = vpop.f32.mrb[11].mxu1 }
 0x1eb   : > { %v1126_v23 = vsel %vm1125_vm0, %v912_v13, %v906_v3  ;;  %v928_v24 = vmax.f32 %v926_v5, %v927_v14  ;;  %v933_v25 = vrot.slane %v932_v15, 2  ;;  %v877_v26 = vmax.f32 %v775_v16, 0.0 }
 0x1ec   : > { %v1128_v27 = vsel %vm1127_vm1, %v918_v63, %v1126_v23  ;;  %v941_v28 = vrot.slane %v940_v19, 1  ;;  %v946_v29 = vmax.f32 %v944_v10, %v945_v20  ;;  %v961_v30 = vrot.slane %v879_v21, 4 }
 0x1ed   : > { %v929_v31 = vrot.slane %v928_v24, 1  ;;  %v1130_v33 = vsel %vm1129_vm2, %v924_v8, %v1128_v27  ;;  %v934_v34 = vmax.f32 %v932_v15, %v933_v25  ;;  %v949_v35 = vrot.slane %v877_v26, 4 }
 0x1ee   : > { %v942_v36 = vmax.f32 %v940_v19, %v941_v28  ;;  %v947_v37 = vrot.slane %v946_v29, 1  ;;  %v962_v38 = vmax.f32 %v879_v21, %v961_v30  ;;  %v880_v39 = vmax.f32 %v786_v22, 0.0 }
 0x1ef   : > { %v930_v40 = vmax.f32 %v928_v24, %v929_v31  ;;  %v935_v41 = vrot.slane %v934_v34, 1  ;;  %v950_v42 = vmax.f32 %v877_v26, %v949_v35  ;;  %v778_v43 = vadd.f32 %v1610_v18, %v777_v32  ;;  %v1395_v44 = vpop.f32.mrb[12].mxu1 }
 0x1f0   : > { %v948_v45 = vmax.f32 %v946_v29, %v947_v37  ;;  %v963_v46 = vrot.slane %v962_v38, 2  ;;  %v967_v47 = vrot.slane %v880_v39, 4  ;;  %v799_v48 = vadd.f32 %v1395_v44, %v1610_v18  ;;  %v790_v49 = vpop.f32.mrb[13].mxu1 }
 0x1f1   : > { %v1132_v50 = vsel %vm1131_vm3, %v930_v40, %v1130_v33  ;;  %v936_v51 = vmax.f32 %v934_v34, %v935_v41  ;;  %v951_v52 = vrot.slane %v950_v42, 2  ;;  %v878_v53 = vmax.f32 %v778_v43, 0.0  ;;  %v1396_v54 = vpop.f32.mrb[14].mxu1 }
 0x1f2   : > { %v964_v55 = vmax.f32 %v962_v38, %v963_v46  ;;  %v968_v56 = vmax.f32 %v880_v39, %v967_v47  ;;  %v883_v57 = vmax.f32 %v799_v48, 0.0  ;;  %v791_v58 = vadd.f32 %v1610_v18, %v790_v49  ;;  %v793_v59 = vpop.f32.mrb[15].mxu1 }
 0x1f3   : > { %v1134_v60 = vsel %vm1133_vm4, %v936_v51, %v1132_v50  ;;  %v952_v61 = vmax.f32 %v950_v42, %v951_v52  ;;  %v955_v62 = vrot.slane %v878_v53, 4  ;;  %v802_v63 = vadd.f32 %v1396_v54, %v1610_v18 }
 0x1f4   : > { %v1136_v0 = vsel %vm1135_vm5, %v942_v36, %v1134_v60  ;;  %v965_v1 = vrot.slane %v964_v55, 1  ;;  %v969_v2 = vrot.slane %v968_v56, 2  ;;  %v985_v3 = vrot.slane %v883_v57, 4 }
 0x1f5   : > { %v1138_v4 = vsel %vm1137_vm6, %v948_v45, %v1136_v0  ;;  %v956_v5 = vmax.f32 %v878_v53, %v955_v62  ;;  %v881_v6 = vmax.f32 %v791_v58, 0.0  ;;  %v953_v7 = vrot.slane %v952_v61, 1 }
 0x1f6   : > { %1164 = vst [vmem:[%s1644_s16] sm:$0xff] %v1138_v4  ;;  %v970_v8 = vmax.f32 %v968_v56, %v969_v2  ;;  %v986_v9 = vmax.f32 %v883_v57, %v985_v3  ;;  %v884_v10 = vmax.f32 %v802_v63, 0.0  ;;  %v794_v13 = vadd.f32 %v1610_v18, %v793_v59 }
 0x1f7   : > { %v957_v11 = vrot.slane %v956_v5, 2  ;;  %v973_v12 = vrot.slane %v881_v6, 4  ;;  %v1399_v14 = vpop.f32.mrb[16].mxu1  ;;  %v966_v15 = vmax.f32 %v964_v55, %v965_v1  ;;  %v954_v25 = vmax.f32 %v952_v61, %v953_v7 }
 0x1f8   : > { %v987_v16 = vrot.slane %v986_v9, 2  ;;  %v991_v17 = vrot.slane %v884_v10, 4  ;;  %v815_v19 = vadd.f32 %v1399_v14, %v1610_v18  ;;  %v806_v20 = vpop.f32.mrb[17].mxu1  ;;  %v882_v32 = vmax.f32 %v794_v13, 0.0 }
 0x1f9   : > { %v958_v21 = vmax.f32 %v956_v5, %v957_v11  ;;  %v974_v22 = vmax.f32 %v881_v6, %v973_v12  ;;  %v807_v23 = vadd.f32 %v1610_v18, %v806_v20  ;;  %v1400_v24 = vpop.f32.mrb[18].mxu1  ;;  %v971_v26 = vrot.slane %v970_v8, 1 }
 0x1fa   : > { %v992_v27 = vmax.f32 %v884_v10, %v991_v17  ;;  %v887_v28 = vmax.f32 %v815_v19, 0.0  ;;  %v809_v29 = vpop.f32.mrb[19].mxu1  ;;  %v979_v33 = vrot.slane %v882_v32, 4  ;;  %v988_v35 = vmax.f32 %v986_v9, %v987_v16 }
 0x1fb   : > { %v959_v30 = vrot.slane %v958_v21, 1  ;;  %v975_v31 = vrot.slane %v974_v22, 2  ;;  %v885_v34 = vmax.f32 %v807_v23, 0.0  ;;  %v818_v38 = vadd.f32 %v1400_v24, %v1610_v18 }
 0x1fc   : > { %v993_v36 = vrot.slane %v992_v27, 2  ;;  %v1009_v37 = vrot.slane %v887_v28, 4  ;;  %v980_v41 = vmax.f32 %v882_v32, %v979_v33  ;;  %v972_v43 = vmax.f32 %v970_v8, %v971_v26 }
 0x1fd   : > { %v960_v39 = vmax.f32 %v958_v21, %v959_v30  ;;  %v976_v40 = vmax.f32 %v974_v22, %v975_v31  ;;  %v997_v42 = vrot.slane %v885_v34, 4  ;;  %v888_v46 = vmax.f32 %v818_v38, 0.0 }
 0x1fe   : > { %v994_v44 = vmax.f32 %v992_v27, %v993_v36  ;;  %v1010_v45 = vmax.f32 %v887_v28, %v1009_v37  ;;  %v981_v49 = vrot.slane %v980_v41, 2  ;;  %v989_v56 = vrot.slane %v988_v35, 1 }
 0x1ff   : > { %v1139_v47 = vsel %vm1125_vm0, %v960_v39, %v954_v25  ;;  %v977_v48 = vrot.slane %v976_v40, 1  ;;  %v998_v50 = vmax.f32 %v885_v34, %v997_v42  ;;  %v1403_v51 = vpop.f32.mrb[20].mxu1  ;;  %v1015_v54 = vrot.slane %v888_v46, 4 }
 0x200   : > { %v1140_v52 = vsel %vm1127_vm1, %v966_v15, %v1139_v47  ;;  %v1011_v53 = vrot.slane %v1010_v45, 2  ;;  %v822_v55 = vpop.f32.mrb[21].mxu1  ;;  %v982_v59 = vmax.f32 %v980_v41, %v981_v49  ;;  %v995_v61 = vrot.slane %v994_v44, 1 }
 0x201   : > { %v978_v57 = vmax.f32 %v976_v40, %v977_v48  ;;  %v1141_v58 = vsel %vm1129_vm2, %v972_v43, %v1140_v52  ;;  %v1404_v60 = vpop.f32.mrb[22].mxu1  ;;  %v999_v62 = vrot.slane %v998_v50, 2  ;;  %v1016_v63 = vmax.f32 %v888_v46, %v1015_v54 }
 0x202   : > { %v810_v0 = vadd.f32 %v1610_v18, %v809_v29  ;;  %v825_v1 = vpop.f32.mrb[23].mxu1  ;;  %v983_v3 = vrot.slane %v982_v59, 1  ;;  %v1012_v4 = vmax.f32 %v1010_v45, %v1011_v53  ;;  %v831_v5 = vadd.f32 %v1403_v51, %v1610_v18 }
 0x203   : > { %v1142_v2 = vsel %vm1131_vm3, %v978_v57, %v1141_v58  ;;  %v1017_v6 = vrot.slane %v1016_v63, 2  ;;  %v823_v8 = vadd.f32 %v1610_v18, %v822_v55  ;;  %v990_v9 = vmax.f32 %v988_v35, %v989_v56 }
 0x204   : > { %v886_v7 = vmax.f32 %v810_v0, 0.0  ;;  %v984_v10 = vmax.f32 %v982_v59, %v983_v3  ;;  %v891_v11 = vmax.f32 %v831_v5, 0.0  ;;  %v834_v12 = vadd.f32 %v1404_v60, %v1610_v18 }
 0x205   : > { %v996_v13 = vmax.f32 %v994_v44, %v995_v61  ;;  %v1000_v14 = vmax.f32 %v998_v50, %v999_v62  ;;  %v889_v16 = vmax.f32 %v823_v8, 0.0  ;;  %v1013_v19 = vrot.slane %v1012_v4, 1 }
 0x206   : > { %v1003_v15 = vrot.slane %v886_v7, 4  ;;  %v1143_v17 = vsel %vm1133_vm4, %v984_v10, %v1142_v2  ;;  %v1033_v20 = vrot.slane %v891_v11, 4  ;;  %v892_v21 = vmax.f32 %v834_v12, 0.0 }
 0x207   : > { %v1407_v22 = vpop.f32.mrb[24].mxu1  ;;  %v1144_v32 = vsel %vm1135_vm5, %v990_v9, %v1143_v17  ;;  %v1018_v23 = vmax.f32 %v1016_v63, %v1017_v6  ;;  %v1021_v25 = vrot.slane %v889_v16, 4  ;;  %v826_v30 = vadd.f32 %v1610_v18, %v825_v1 }
 0x208   : > { %v1004_v24 = vmax.f32 %v886_v7, %v1003_v15  ;;  %v838_v26 = vpop.f32.mrb[25].mxu1  ;;  %v1145_v27 = vsel %vm1137_vm6, %v996_v13, %v1144_v32  ;;  %v1034_v28 = vmax.f32 %v891_v11, %v1033_v20  ;;  %v1039_v29 = vrot.slane %v892_v21, 4 }
 0x209   : > { %v1408_v31 = vpop.f32.mrb[26].mxu1  ;;  %1165 = vst [vmem:[%s1644_s16 + $0x8] sm:$0xff] %v1145_v27  ;;  %v1001_v33 = vrot.slane %v1000_v14, 1  ;;  %v1022_v35 = vmax.f32 %v889_v16, %v1021_v25  ;;  %v847_v36 = vadd.f32 %v1407_v22, %v1610_v18  ;;  %v890_v40 = vmax.f32 %v826_v30, 0.0 }
 0x20a   : > { %v1005_v34 = vrot.slane %v1004_v24, 2  ;;  %v841_v37 = vpop.f32.mrb[27].mxu1  ;;  %v1035_v38 = vrot.slane %v1034_v28, 2  ;;  %v1040_v39 = vmax.f32 %v892_v21, %v1039_v29  ;;  %v839_v41 = vadd.f32 %v1610_v18, %v838_v26 }
 0x20b   : > { %v1023_v43 = vrot.slane %v1022_v35, 2  ;;  %v895_v44 = vmax.f32 %v847_v36, 0.0  ;;  %v850_v45 = vadd.f32 %v1408_v31, %v1610_v18  ;;  %v1019_v46 = vrot.slane %v1018_v23, 1 }
 0x20c   : > { %v1006_v42 = vmax.f32 %v1004_v24, %v1005_v34  ;;  %v1041_v47 = vrot.slane %v1040_v39, 2  ;;  %v1027_v48 = vrot.slane %v890_v40, 4  ;;  %v893_v49 = vmax.f32 %v839_v41, 0.0 }
 0x20d   : > { %v1024_v51 = vmax.f32 %v1022_v35, %v1023_v43  ;;  %v1057_v52 = vrot.slane %v895_v44, 4  ;;  %v896_v53 = vmax.f32 %v850_v45, 0.0  ;;  %v1002_v54 = vmax.f32 %v1000_v14, %v1001_v33 }
 0x20e   : > { %v1007_v50 = vrot.slane %v1006_v42, 1  ;;  %v1036_v55 = vmax.f32 %v1034_v28, %v1035_v38  ;;  %v1028_v56 = vmax.f32 %v890_v40, %v1027_v48  ;;  %v1045_v57 = vrot.slane %v893_v49, 4 }
 0x20f   : > { %v1411_v58 = vpop.f32.mrb[28].mxu1  ;;  %v1025_v60 = vrot.slane %v1024_v51, 1  ;;  %v1042_v61 = vmax.f32 %v1040_v39, %v1041_v47  ;;  %v1063_v62 = vrot.slane %v896_v53, 4  ;;  %v1014_v0 = vmax.f32 %v1012_v4, %v1013_v19 }
 0x210   : > { %v1008_v59 = vmax.f32 %v1006_v42, %v1007_v50  ;;  %v854_v63 = vpop.f32.mrb[29].mxu1  ;;  %v1029_v1 = vrot.slane %v1028_v56, 2  ;;  %v1058_v2 = vmax.f32 %v895_v44, %v1057_v52  ;;  %v1020_v5 = vmax.f32 %v1018_v23, %v1019_v46 }
 0x211   : > { %v1412_v3 = vpop.f32.mrb[30].mxu1  ;;  %v1026_v7 = vmax.f32 %v1024_v51, %v1025_v60  ;;  %v1046_v8 = vmax.f32 %v893_v49, %v1045_v57  ;;  %v1037_v11 = vrot.slane %v1036_v55, 1  ;;  %v1043_v14 = vrot.slane %v1042_v61, 1 }
 0x212   : > { %v1146_v6 = vsel %vm1125_vm0, %v1008_v59, %v1002_v54  ;;  %v857_v9 = vpop.f32.mrb[31].mxu1  ;;  %v1030_v12 = vmax.f32 %v1028_v56, %v1029_v1  ;;  %v1064_v15 = vmax.f32 %v896_v53, %v1063_v62  ;;  %v842_v16 = vadd.f32 %v1610_v18, %v841_v37 }
 0x213   : > { %v1147_v10 = vsel %vm1127_vm1, %v1014_v0, %v1146_v6  ;;  %v1059_v19 = vrot.slane %v1058_v2, 2  ;;  %v863_v20 = vadd.f32 %v1411_v58, %v1610_v18  ;;  %v1047_v21 = vrot.slane %v1046_v8, 2 }
 0x214   : > { %v1148_v13 = vsel %vm1129_vm2, %v1020_v5, %v1147_v10  ;;  %v1031_v17 = vrot.slane %v1030_v12, 1  ;;  %v894_v22 = vmax.f32 %v842_v16, 0.0  ;;  %v855_v32 = vadd.f32 %v1610_v18, %v854_v63 }
 0x215   : > { %v1149_v4 = vsel %vm1131_vm3, %v1026_v7, %v1148_v13  ;;  %v1038_v23 = vmax.f32 %v1036_v55, %v1037_v11  ;;  %v899_v25 = vmax.f32 %v863_v20, 0.0  ;;  %v866_v26 = vadd.f32 %v1412_v3, %v1610_v18 }
 0x216   : > { %v1032_v24 = vmax.f32 %v1030_v12, %v1031_v17  ;;  %v1044_v27 = vmax.f32 %v1042_v61, %v1043_v14  ;;  %v1065_v28 = vrot.slane %v1064_v15, 2  ;;  %v1051_v29 = vrot.slane %v894_v22, 4 }
 0x217   : > { %v897_v30 = vmax.f32 %v855_v32, 0.0  ;;  %v1060_v33 = vmax.f32 %v1058_v2, %v1059_v19  ;;  %v1081_v34 = vrot.slane %v899_v25, 4  ;;  %v900_v35 = vmax.f32 %v866_v26, 0.0 }
 0x218   : > { %v1150_v31 = vsel %vm1133_vm4, %v1032_v24, %v1149_v4  ;;  %v1048_v37 = vmax.f32 %v1046_v8, %v1047_v21  ;;  %v1052_v38 = vmax.f32 %v894_v22, %v1051_v29  ;;  %v858_v43 = vadd.f32 %v1610_v18, %v857_v9 }
 0x219   : > { %v1151_v36 = vsel %vm1135_vm5, %v1038_v23, %v1150_v31  ;;  %v1069_v39 = vrot.slane %v897_v30, 4  ;;  %v1082_v41 = vmax.f32 %v899_v25, %v1081_v34  ;;  %v1087_v42 = vrot.slane %v900_v35, 4 }
 0x21a   : > { %v1152_v40 = vsel %vm1137_vm6, %v1044_v27, %v1151_v36  ;;  %v1066_v44 = vmax.f32 %v1064_v15, %v1065_v28  ;;  %v1053_v45 = vrot.slane %v1052_v38, 2  ;;  %v898_v48 = vmax.f32 %v858_v43, 0.0 }
 0x21b   : > { %1166 = vst [vmem:[%s1644_s16 + $0x10] sm:$0xff] %v1152_v40  ;;  %v1070_v46 = vmax.f32 %v897_v30, %v1069_v39  ;;  %v1088_v47 = vmax.f32 %v900_v35, %v1087_v42  ;;  %v1049_v49 = vrot.slane %v1048_v37, 1  ;;  %v1083_v51 = vrot.slane %v1082_v41, 2 }
 0x21c   : > { %v1054_v50 = vmax.f32 %v1052_v38, %v1053_v45  ;;  %v1061_v53 = vrot.slane %v1060_v33, 1  ;;  %v1075_v55 = vrot.slane %v898_v48, 4  ;;  %v1067_v56 = vrot.slane %v1066_v44, 1 }
 0x21d   : > { %v1071_v52 = vrot.slane %v1070_v46, 2  ;;  %v1089_v54 = vrot.slane %v1088_v47, 2  ;;  %v1050_v60 = vmax.f32 %v1048_v37, %v1049_v49  ;;  %v1084_v18 = vmax.f32 %v1082_v41, %v1083_v51 }
 0x21e   : > { %v1055_v57 = vrot.slane %v1054_v50, 1  ;;  %v1076_v59 = vmax.f32 %v898_v48, %v1075_v55  ;;  %v1062_v63 = vmax.f32 %v1060_v33, %v1061_v53  ;;  %v1068_v2 = vmax.f32 %v1066_v44, %v1067_v56 }
 0x21f   : > { %v1072_v58 = vmax.f32 %v1070_v46, %v1071_v52  ;;  %v1090_v0 = vmax.f32 %v1088_v47, %v1089_v54  ;;  %v1085_v8 = vrot.slane %v1084_v18, 1 }
 0x220   : > { %v1056_v61 = vmax.f32 %v1054_v50, %v1055_v57  ;;  %v1077_v1 = vrot.slane %v1076_v59, 2 }
 0x221   : > { %v1073_v62 = vrot.slane %v1072_v58, 1  ;;  %v1091_v11 = vrot.slane %v1090_v0, 1  ;;  %v1086_v14 = vmax.f32 %v1084_v18, %v1085_v8 }
 0x222   : > { %v1153_v3 = vsel %vm1125_vm0, %v1056_v61, %v1050_v60  ;;  %v1078_v7 = vmax.f32 %v1076_v59, %v1077_v1 }
 0x223   : > { %v1074_v5 = vmax.f32 %v1072_v58, %v1073_v62  ;;  %v1154_v6 = vsel %vm1127_vm1, %v1062_v63, %v1153_v3  ;;  %v1092_v15 = vmax.f32 %v1090_v0, %v1091_v11 }
 0x224   : > { %v1155_v9 = vsel %vm1129_vm2, %v1068_v2, %v1154_v6  ;;  %v1079_v12 = vrot.slane %v1078_v7, 1 }
 0x225   : > { %v1156_v10 = vsel %vm1131_vm3, %v1074_v5, %v1155_v9 }
 0x226   : > { %v1080_v13 = vmax.f32 %v1078_v7, %v1079_v12 }
 0x228   : > { %v1157_v16 = vsel %vm1133_vm4, %v1080_v13, %v1156_v10 }
 0x229   : > { %v1158_v4 = vsel %vm1135_vm5, %v1086_v14, %v1157_v16 }
 0x22a   : > { %v1159_v17 = vsel %vm1137_vm6, %v1092_v15, %v1158_v4 }
 0x22b   : > { %1167 = vst [vmem:[%s1644_s16 + $0x18] sm:$0xff] %v1159_v17 }
 0x22c PF: > { %s15_s18 = sadd.s32 1, %s1459_s18  }
 0x22d   : > { %p12_p5 = scmp.ge.s32.totalorder %s15_s18, 4  }
 0x22f   :  { %14 = sbr.rel (!%p12_p5) target bundleno = 1 (0x1), region = 70 }

// kernel: pct_forward.7
= control target key start
LH: loop header
LB: loop body
LE: loop exit
PB: predicated region body
PF: predicated region fallthrough
CT: control target
= control target key end

     0   :  { %s1629_s18 = smov 0   ;;  %s1993_s0 = inlined_call_operand.vmem [shape: bf16[256,256], index: 0, kind: input, shape index: {}]   ;;  %s1994_s1 = inlined_call_operand.vmem [shape: bf16[256,256], index: 1, kind: input, shape index: {}]   ;;  %s1995_s2 = inlined_call_operand.vmem [shape: f32[1,256], index: 2, kind: input, shape index: {}]   ;;  %s1996_s3 = inlined_call_operand.vmem [shape: bf16[256,256], index: 3, kind: input, shape index: {}]   ;;  %s1997_s4 = inlined_call_operand.vmem [shape: f32[1,256], index: 4, kind: input, shape index: {}]   ;;  %s1998_s5 = inlined_call_operand.vmem [shape: f32[32,256], index: 5, kind: output, shape index: {}]  }
   0x1 LB: > { %s1368_s19 = sadd.s32 4294967295, %s1597_s18   ;;  %p1372_p0 = scmp.ge.s32.totalorder %s1597_s18, 1  ;;  %s1597_s18 = sphi %s1629_s18, %s15_s18  }
   0x2   : > { %p189_p1 = scmp.lt.s32.totalorder %s1597_s18, 3 }
   0x4   : > { %p190_p2 = pnand %p1372_p0, %p189_p1 }
   0x5   : > { %v1471_v0 = vld [vmem:[%s1994_s1 + $0x4] ss:$8 sps:$4 sm:$0xff] (!%p190_p2)   ;;  %v1473_v1 = vld [vmem:[%s1994_s1] ss:$8 sps:$4 sm:$0xff] (!%p190_p2)   ;;  %v1474_v2 = vld [vmem:[%s1994_s1 + $0x14] ss:$8 sps:$4 sm:$0xff] (!%p190_p2)  }
   0x6   : > { %193 = sbr.rel (%p190_p2) target bundleno = 587 (0x24b), region = 40  ;;  %533 = vmatprep.subr.bf16.mxu0 (!%p190_p2), %v1471_v0  ;;  %v1476_v3 = vld [vmem:[%s1994_s1 + $0x10] ss:$8 sps:$4 sm:$0xff] (!%p190_p2)   ;;  %v1477_v4 = vld [vmem:[%s1994_s1 + $0x24] ss:$8 sps:$4 sm:$0xff] (!%p190_p2)   ;;  %s1373_s30 = sshll.u32 (!%p190_p2), %s1368_s19, 4 }
   0x7   : > { %534 = vmatpush1.bf16.msra.mxu0 (!%p190_p2), %v1473_v1  ;;  %v1479_v5 = vld [vmem:[%s1994_s1 + $0x20] ss:$8 sps:$4 sm:$0xff] (!%p190_p2)   ;;  %v1480_v6 = vld [vmem:[%s1994_s1 + $0x34] ss:$8 sps:$4 sm:$0xff] (!%p190_p2)   ;;  %p220_p3 = scmp.lt.s32.totalorder (!%p190_p2), %s1373_s30, 31  ;;  %vm1267_vm0 = vcmask (!%p190_p2), 1041409  }
   0x8   : > { %535 = vmatprep.subr.bf16.mxu0 (!%p190_p2), %v1474_v2  ;;  %v1482_v7 = vld [vmem:[%s1994_s1 + $0x30] ss:$8 sps:$4 sm:$0xff] (!%p190_p2)   ;;  %v1483_v8 = vld [vmem:[%s1994_s1 + $0x44] ss:$8 sps:$4 sm:$0xff] (!%p190_p2)   ;;  %v1485_v9 = vld [vmem:[%s1994_s1 + $0x40] ss:$8 sps:$4 sm:$0xff] (!%p190_p2)  }
   0x9   : > { %v1486_v10 = vld [vmem:[%s1994_s1 + $0x54] ss:$8 sps:$4 sm:$0xff] (!%p190_p2)   ;;  %v1488_v11 = vld [vmem:[%s1994_s1 + $0x50] ss:$8 sps:$4 sm:$0xff] (!%p190_p2)   ;;  %v1489_v12 = vld [vmem:[%s1994_s1 + $0x64] ss:$8 sps:$4 sm:$0xff] (!%p190_p2)  }
   0xa   : > { %v1491_v14 = vld [vmem:[%s1994_s1 + $0x60] ss:$8 sps:$4 sm:$0xff] (!%p190_p2)   ;;  %v1492_v15 = vld [vmem:[%s1994_s1 + $0x74] ss:$8 sps:$4 sm:$0xff] (!%p190_p2)   ;;  %v1494_v16 = vld [vmem:[%s1994_s1 + $0x70] ss:$8 sps:$4 sm:$0xff] (!%p190_p2)  }
   0xb   : > { %536 = vmatpush1.bf16.msra.mxu0 (!%p190_p2), %v1476_v3  ;;  %v1495_v17 = vld [vmem:[%s1994_s1 + $0x84] ss:$8 sps:$4 sm:$0xff] (!%p190_p2)   ;;  %v1497_v18 = vld [vmem:[%s1994_s1 + $0x80] ss:$8 sps:$4 sm:$0xff] (!%p190_p2)   ;;  %v1498_v19 = vld [vmem:[%s1994_s1 + $0x94] ss:$8 sps:$4 sm:$0xff] (!%p190_p2)  }
   0xc   : > { %537 = vmatprep.subr.bf16.mxu0 (!%p190_p2), %v1477_v4  ;;  %v1543_v20 = vld [vmem:[%s1996_s3 + $0x4] ss:$8 sps:$4 sm:$0xff] (!%p190_p2)   ;;  %v1545_v21 = vld [vmem:[%s1996_s3] ss:$8 sps:$4 sm:$0xff] (!%p190_p2)   ;;  %v1500_v22 = vld [vmem:[%s1994_s1 + $0x90] ss:$8 sps:$4 sm:$0xff] (!%p190_p2)  }
   0xd   : > { %s2000_s30 = smov (!%p220_p3, %s1373_s30), 31  ;;  %898 = vmatprep.subr.bf16.mxu1 %v1543_v20  ;;  %v1546_v23 = vld [vmem:[%s1996_s3 + $0x14] ss:$8 sps:$4 sm:$0xff]   ;;  %v1501_v24 = vld [vmem:[%s1994_s1 + $0xa4] ss:$8 sps:$4 sm:$0xff]   ;;  %vm1269_vm1 = vcmask 1042434  }
   0xe   : > { %s1461_s20 = sshll.u32 %s2000_s30, 3  ;;  %899 = vmatpush1.bf16.msra.mxu1 %v1545_v21  ;;  %v1548_v25 = vld [vmem:[%s1996_s3 + $0x10] ss:$8 sps:$4 sm:$0xff]   ;;  %v1549_v26 = vld [vmem:[%s1996_s3 + $0x24] ss:$8 sps:$4 sm:$0xff]   ;;  %vm1271_vm2 = vcmask 1043459  }
   0xf   : > { %538 = vmatpush1.bf16.msra.mxu0 %v1479_v5  ;;  %s1678_s25 = scalar_lea.vmem %s1993_s0, %s1461_s20  ;;  %900 = vmatprep.subr.bf16.mxu1 %v1546_v23  ;;  %v1503_v27 = vld [vmem:[%s1994_s1 + $0xa0] ss:$8 sps:$4 sm:$0xff]   ;;  %v1504_v28 = vld [vmem:[%s1994_s1 + $0xb4] ss:$8 sps:$4 sm:$0xff]   ;;  %v1506_v31 = vld [vmem:[%s1994_s1 + $0xb0] ss:$8 sps:$4 sm:$0xff]  }
  0x10   : > { %539 = vmatprep.subr.bf16.mxu0 %v1480_v6  ;;  %v1521_v13 = vld [vmem:[%s1678_s25 + $0x4] ss:$8 sps:$4 sm:$0xff]   ;;  %v1551_v29 = vld [vmem:[%s1996_s3 + $0x20] ss:$8 sps:$4 sm:$0xff]   ;;  %v1552_v30 = vld [vmem:[%s1996_s3 + $0x34] ss:$8 sps:$4 sm:$0xff]  }
  0x11   : > { %565 = vmatprep.mubr.bf16.mxu0 %v1521_v13  ;;  %v1507_v32 = vld [vmem:[%s1994_s1 + $0xc4] ss:$8 sps:$4 sm:$0xff]   ;;  %v1554_v33 = vld [vmem:[%s1996_s3 + $0x30] ss:$8 sps:$4 sm:$0xff]   ;;  %v1509_v35 = vld [vmem:[%s1994_s1 + $0xc0] ss:$8 sps:$4 sm:$0xff]  }
  0x12   : > { %901 = vmatpush1.bf16.msra.mxu1 %v1548_v25  ;;  %v1555_v34 = vld [vmem:[%s1996_s3 + $0x44] ss:$8 sps:$4 sm:$0xff]   ;;  %v1510_v36 = vld [vmem:[%s1994_s1 + $0xd4] ss:$8 sps:$4 sm:$0xff]   ;;  %v1557_v37 = vld [vmem:[%s1996_s3 + $0x40] ss:$8 sps:$4 sm:$0xff]  }
  0x13   : > { %540 = vmatpush1.bf16.msra.mxu0 %v1482_v7  ;;  %902 = vmatprep.subr.bf16.mxu1 %v1549_v26  ;;  %v1558_v38 = vld [vmem:[%s1996_s3 + $0x54] ss:$8 sps:$4 sm:$0xff]   ;;  %v1512_v39 = vld [vmem:[%s1994_s1 + $0xd0] ss:$8 sps:$4 sm:$0xff]   ;;  %v1513_v41 = vld [vmem:[%s1994_s1 + $0xe4] ss:$8 sps:$4 sm:$0xff]  }
  0x14   : > { %541 = vmatprep.subr.bf16.mxu0 %v1483_v8  ;;  %v1560_v40 = vld [vmem:[%s1996_s3 + $0x50] ss:$8 sps:$4 sm:$0xff]   ;;  %v1561_v42 = vld [vmem:[%s1996_s3 + $0x64] ss:$8 sps:$4 sm:$0xff]   ;;  %v1515_v43 = vld [vmem:[%s1994_s1 + $0xe0] ss:$8 sps:$4 sm:$0xff]  }
  0x15   : > { %v1563_v44 = vld [vmem:[%s1996_s3 + $0x60] ss:$8 sps:$4 sm:$0xff]   ;;  %v1516_v45 = vld [vmem:[%s1994_s1 + $0xf4] ss:$8 sps:$4 sm:$0xff]   ;;  %v1518_v47 = vld [vmem:[%s1994_s1 + $0xf0] ss:$8 sps:$4 sm:$0xff]  }
  0x16   : > { %903 = vmatpush1.bf16.msra.mxu1 %v1551_v29  ;;  %v1564_v46 = vld [vmem:[%s1996_s3 + $0x74] ss:$8 sps:$4 sm:$0xff]   ;;  %v1566_v48 = vld [vmem:[%s1996_s3 + $0x70] ss:$8 sps:$4 sm:$0xff]   ;;  %v1567_v49 = vld [vmem:[%s1996_s3 + $0x84] ss:$8 sps:$4 sm:$0xff]  }
  0x17   : > { %542 = vmatpush1.bf16.msra.mxu0 %v1485_v9  ;;  %904 = vmatprep.subr.bf16.mxu1 %v1552_v30  ;;  %v1519_v50 = vld [vmem:[%s1678_s25] ss:$8 sps:$4 sm:$0xff]   ;;  %v1522_v51 = vld [vmem:[%s1678_s25 + $0x14] ss:$8 sps:$4 sm:$0xff]   ;;  %v1572_v54 = vld [vmem:[%s1996_s3 + $0x90] ss:$8 sps:$4 sm:$0xff]  }
  0x18   : > { %543 = vmatprep.subr.bf16.mxu0 %v1486_v10  ;;  %v1569_v52 = vld [vmem:[%s1996_s3 + $0x80] ss:$8 sps:$4 sm:$0xff]   ;;  %v1570_v53 = vld [vmem:[%s1996_s3 + $0x94] ss:$8 sps:$4 sm:$0xff]   ;;  %v1573_v55 = vld [vmem:[%s1996_s3 + $0xa4] ss:$8 sps:$4 sm:$0xff]  }
  0x19   : > { %v1524_v56 = vld [vmem:[%s1678_s25 + $0x10] ss:$8 sps:$4 sm:$0xff]   ;;  %v1525_v57 = vld [vmem:[%s1678_s25 + $0x24] ss:$8 sps:$4 sm:$0xff]   ;;  %v1575_v58 = vld [vmem:[%s1996_s3 + $0xa0] ss:$8 sps:$4 sm:$0xff]  }
  0x1a   : > { %905 = vmatpush1.bf16.msra.mxu1 %v1554_v33  ;;  %v1576_v59 = vld [vmem:[%s1996_s3 + $0xb4] ss:$8 sps:$4 sm:$0xff]   ;;  %v1578_v60 = vld [vmem:[%s1996_s3 + $0xb0] ss:$8 sps:$4 sm:$0xff]   ;;  %v1579_v61 = vld [vmem:[%s1996_s3 + $0xc4] ss:$8 sps:$4 sm:$0xff]  }
  0x1b   : > { %544 = vmatpush1.bf16.msra.mxu0 %v1488_v11  ;;  %906 = vmatprep.subr.bf16.mxu1 %v1555_v34  ;;  %v1527_v62 = vld [vmem:[%s1678_s25 + $0x20] ss:$8 sps:$4 sm:$0xff]   ;;  %v1528_v63 = vld [vmem:[%s1678_s25 + $0x34] ss:$8 sps:$4 sm:$0xff]   ;;  %v1530_v2 = vld [vmem:[%s1678_s25 + $0x30] ss:$8 sps:$4 sm:$0xff]  }
  0x1c   : > { %545 = vmatprep.subr.bf16.mxu0 %v1489_v12  ;;  %v1581_v0 = vld [vmem:[%s1996_s3 + $0xc0] ss:$8 sps:$4 sm:$0xff]   ;;  %v1582_v1 = vld [vmem:[%s1996_s3 + $0xd4] ss:$8 sps:$4 sm:$0xff]   ;;  %v1531_v3 = vld [vmem:[%s1678_s25 + $0x44] ss:$8 sps:$4 sm:$0xff]  }
  0x1d   : > { %v1533_v4 = vld [vmem:[%s1678_s25 + $0x40] ss:$8 sps:$4 sm:$0xff]   ;;  %v1534_v5 = vld [vmem:[%s1678_s25 + $0x54] ss:$8 sps:$4 sm:$0xff]   ;;  %v1536_v6 = vld [vmem:[%s1678_s25 + $0x50] ss:$8 sps:$4 sm:$0xff]  }
  0x1e   : > { %907 = vmatpush1.bf16.msra.mxu1 %v1557_v37  ;;  %v1537_v7 = vld [vmem:[%s1678_s25 + $0x64] ss:$8 sps:$4 sm:$0xff]   ;;  %v1539_v8 = vld [vmem:[%s1678_s25 + $0x60] ss:$8 sps:$4 sm:$0xff]   ;;  %v1540_v9 = vld [vmem:[%s1678_s25 + $0x74] ss:$8 sps:$4 sm:$0xff]  }
  0x1f   : > { %546 = vmatpush1.bf16.msra.mxu0 %v1491_v14  ;;  %908 = vmatprep.subr.bf16.mxu1 %v1558_v38  ;;  %v1542_v10 = vld [vmem:[%s1678_s25 + $0x70] ss:$8 sps:$4 sm:$0xff]   ;;  %v1585_v12 = vld [vmem:[%s1996_s3 + $0xe4] ss:$8 sps:$4 sm:$0xff]   ;;  %v1587_v13 = vld [vmem:[%s1996_s3 + $0xe0] ss:$8 sps:$4 sm:$0xff]  }
  0x20   : > { %547 = vmatprep.subr.bf16.mxu0 %v1492_v15  ;;  %v1584_v11 = vld [vmem:[%s1996_s3 + $0xd0] ss:$8 sps:$4 sm:$0xff]   ;;  %v1588_v14 = vld [vmem:[%s1996_s3 + $0xf4] ss:$8 sps:$4 sm:$0xff]   ;;  %vm1273_vm3 = vcmask 1044484   ;;  %vm1275_vm4 = vcmask 1045509  }
  0x21   : > { %v1590_v15 = vld [vmem:[%s1996_s3 + $0xf0] ss:$8 sps:$4 sm:$0xff]   ;;  %s1932_s22 = sshll.u32 %s1368_s19, 1  ;;  %vm1277_vm5 = vcmask 1046534   ;;  %vm1279_vm6 = vcmask 1047559  }
  0x22   : > { %909 = vmatpush1.bf16.msra.mxu1 %v1560_v40  ;;  %p227_p4 = scmp.lt.s32.totalorder %s1932_s22, 3 }
  0x23   : > { %548 = vmatpush1.bf16.msra.mxu0 %v1494_v16  ;;  %910 = vmatprep.subr.bf16.mxu1 %v1561_v42  ;;  %v283_v16 = vlaneseq }
  0x24   : > { %549 = vmatprep.subr.bf16.mxu0 %v1495_v17  ;;  %s2002_s22 = smov (!%p227_p4, %s1932_s22), 3 }
  0x25   : > { %v1852_v17 = vshrl.u32 %v283_v16, 7  ;;  %s1462_s19 = sshll.u32 %s2002_s22, 4 }
  0x26   : > { %911 = vmatpush1.bf16.msra.mxu1 %v1563_v44  ;;  %s1955_s26 = scalar_lea.vmem %s1998_s5, %s1462_s19 }
  0x27   : > { %550 = vmatpush1.bf16.msra.mxu0 %v1497_v18  ;;  %912 = vmatprep.subr.bf16.mxu1 %v1564_v46  ;;  %v285_v18 = vsub.s32 0, %v1852_v17  ;;  %v289_v20 = vsub.s32 1, %v1852_v17 }
  0x28   : > { %551 = vmatprep.subr.bf16.mxu0 %v1498_v19  ;;  %v281_v19 = vld [vmem:[%s1995_s2] sm:$0x3] }
  0x29   : > { %v1861_v21 = vrot.slane %v281_v19, %v285_v18 }
  0x2a   : > { %913 = vmatpush1.bf16.msra.mxu1 %v1566_v48 }
  0x2b   : > { %552 = vmatpush1.bf16.msra.mxu0 %v1500_v22  ;;  %914 = vmatprep.subr.bf16.mxu1 %v1567_v49  ;;  %v1865_v22 = vrot.slane %v281_v19, %v289_v20 }
  0x2c   : > { %553 = vmatprep.subr.bf16.mxu0 %v1501_v24 }
  0x2e   : > { %915 = vmatpush1.bf16.msra.mxu1 %v1569_v52 }
  0x2f   : > { %554 = vmatpush1.bf16.msra.mxu0 %v1503_v27  ;;  %916 = vmatprep.subr.bf16.mxu1 %v1570_v53 }
  0x30   : > { %555 = vmatprep.subr.bf16.mxu0 %v1504_v28 }
  0x32   : > { %917 = vmatpush1.bf16.msra.mxu1 %v1572_v54 }
  0x33   : > { %556 = vmatpush1.bf16.msra.mxu0 %v1506_v31  ;;  %918 = vmatprep.subr.bf16.mxu1 %v1573_v55 }
  0x34   : > { %557 = vmatprep.subr.bf16.mxu0 %v1507_v32 }
  0x36   : > { %919 = vmatpush1.bf16.msra.mxu1 %v1575_v58 }
  0x37   : > { %558 = vmatpush1.bf16.msra.mxu0 %v1509_v35  ;;  %920 = vmatprep.subr.bf16.mxu1 %v1576_v59 }
  0x38   : > { %559 = vmatprep.subr.bf16.mxu0 %v1510_v36 }
  0x3a   : > { %921 = vmatpush1.bf16.msra.mxu1 %v1578_v60 }
  0x3b   : > { %560 = vmatpush1.bf16.msra.mxu0 %v1512_v39  ;;  %922 = vmatprep.subr.bf16.mxu1 %v1579_v61 }
  0x3c   : > { %561 = vmatprep.subr.bf16.mxu0 %v1513_v41 }
  0x3e   : > { %923 = vmatpush1.bf16.msra.mxu1 %v1581_v0 }
  0x3f   : > { %562 = vmatpush1.bf16.msra.mxu0 %v1515_v43  ;;  %924 = vmatprep.subr.bf16.mxu1 %v1582_v1 }
  0x40   : > { %563 = vmatprep.subr.bf16.mxu0 %v1516_v45 }
  0x42   : > { %925 = vmatpush1.bf16.msra.mxu1 %v1584_v11 }
  0x43   : > { %564 = vmatpush1.bf16.msra.mxu0 %v1518_v47  ;;  %926 = vmatprep.subr.bf16.mxu1 %v1585_v12 }
  0x46   : > { %566 = vmatmul.mubr.bf16.vlgmr.msra.gmra.mrb[0].mxu0 %v1519_v50  ;;  %927 = vmatpush1.bf16.msra.mxu1 %v1587_v13 }
  0x47   : > { %575 = vmatprep.mubr.bf16.mxu0 %v1522_v51  ;;  %928 = vmatprep.subr.bf16.mxu1 %v1588_v14 }
  0x4a   : > { %929 = vmatpush1.bf16.msra.mxu1 %v1590_v15 }
  0x4e   : > { %576 = vmatmul.mubr.bf16.gmra.mrb[4].mxu0 %v1524_v56 }
  0x4f   : > { %585 = vmatprep.mubr.bf16.mxu0 %v1525_v57 }
  0x56   : > { %586 = vmatmul.mubr.bf16.gmra.mrb[8].mxu0 %v1527_v62 }
  0x57   : > { %595 = vmatprep.mubr.bf16.mxu0 %v1528_v63 }
  0x5e   : > { %596 = vmatmul.mubr.bf16.gmra.mrb[12].mxu0 %v1530_v2 }
  0x5f   : > { %605 = vmatprep.mubr.bf16.mxu0 %v1531_v3 }
  0x66   : > { %606 = vmatmul.mubr.bf16.gmra.mrb[16].mxu0 %v1533_v4 }
  0x67   : > { %615 = vmatprep.mubr.bf16.mxu0 %v1534_v5 }
  0x6e   : > { %616 = vmatmul.mubr.bf16.gmra.mrb[20].mxu0 %v1536_v6 }
  0x6f   : > { %625 = vmatprep.mubr.bf16.mxu0 %v1537_v7 }
  0x76   : > { %626 = vmatmul.mubr.bf16.gmra.mrb[24].mxu0 %v1539_v8 }
  0x77   : > { %635 = vmatprep.mubr.bf16.mxu0 %v1540_v9 }
  0x7e   : > { %636 = vmatmul.mubr.bf16.gmra.mrb[28].mxu0 %v1542_v10 }
 0x119   : > { %v567_v23 = vpop.f32.mrb[0].mxu0 }
 0x11a   : > { %v568_v24 = vadd.f32 %v567_v23, %v1861_v21  ;;  %v569_v25 = vpop.f32.mrb[1].mxu0 }
 0x11b   : > { %v570_v26 = vadd.f32 %v569_v25, %v1865_v22  ;;  %v571_v27 = vpop.f32.mrb[2].mxu0 }
 0x11c   : > { %v572_v28 = vadd.f32 %v571_v27, %v1861_v21  ;;  %v573_v29 = vpop.f32.mrb[3].mxu0  ;;  %v646_v31 = vmax.f32 %v568_v24, 0.0 }
 0x11d   : > { %v574_v30 = vadd.f32 %v573_v29, %v1865_v22  ;;  %v647_v33 = vmax.f32 %v570_v26, 0.0 }
 0x11e   : > { %v648_v32 = vmax.f32 %v572_v28, 0.0 }
 0x11f   : > { %v649_v34 = vmax.f32 %v574_v30, 0.0 }
 0x120   : > { %v678_v35 = vpack.c.bf16 %v648_v32, %v646_v31 }
 0x121   : > { %v577_v36 = vpop.f32.mrb[4].mxu0  ;;  %v679_v37 = vpack.c.bf16 %v649_v34, %v647_v33 }
 0x122   : > { %v578_v38 = vadd.f32 %v577_v36, %v1861_v21  ;;  %v579_v39 = vpop.f32.mrb[5].mxu0 }
 0x123   : > { %v580_v40 = vadd.f32 %v579_v39, %v1865_v22  ;;  %v581_v41 = vpop.f32.mrb[6].mxu0  ;;  %930 = vmatprep.mubr.bf16.mxu1 %v679_v37 }
 0x124   : > { %v582_v42 = vadd.f32 %v581_v41, %v1861_v21  ;;  %v583_v43 = vpop.f32.mrb[7].mxu0  ;;  %931 = vmatmul.mubr.bf16.vlgmr.msra.gmra.mrb[0].mxu1 %v678_v35  ;;  %v650_v45 = vmax.f32 %v578_v38, 0.0 }
 0x125   : > { %v584_v44 = vadd.f32 %v583_v43, %v1865_v22  ;;  %v651_v47 = vmax.f32 %v580_v40, 0.0 }
 0x126   : > { %v652_v46 = vmax.f32 %v582_v42, 0.0 }
 0x127   : > { %v653_v48 = vmax.f32 %v584_v44, 0.0 }
 0x128   : > { %v680_v49 = vpack.c.bf16 %v652_v46, %v650_v45 }
 0x129   : > { %v681_v50 = vpack.c.bf16 %v653_v48, %v651_v47  ;;  %v587_v51 = vpop.f32.mrb[8].mxu0 }
 0x12a   : > { %v588_v52 = vadd.f32 %v587_v51, %v1861_v21  ;;  %v589_v53 = vpop.f32.mrb[9].mxu0 }
 0x12b   : > { %v590_v54 = vadd.f32 %v589_v53, %v1865_v22  ;;  %v591_v55 = vpop.f32.mrb[10].mxu0  ;;  %940 = vmatprep.mubr.bf16.mxu1 %v681_v50 }
 0x12c   : > { %v592_v56 = vadd.f32 %v591_v55, %v1861_v21  ;;  %v593_v57 = vpop.f32.mrb[11].mxu0  ;;  %941 = vmatmul.mubr.bf16.gmra.mrb[4].mxu1 %v680_v49  ;;  %v654_v59 = vmax.f32 %v588_v52, 0.0 }
 0x12d   : > { %v594_v58 = vadd.f32 %v593_v57, %v1865_v22  ;;  %v655_v61 = vmax.f32 %v590_v54, 0.0 }
 0x12e   : > { %v656_v60 = vmax.f32 %v592_v56, 0.0 }
 0x12f   : > { %v657_v62 = vmax.f32 %v594_v58, 0.0 }
 0x130   : > { %v682_v63 = vpack.c.bf16 %v656_v60, %v654_v59 }
 0x131   : > { %v683_v0 = vpack.c.bf16 %v657_v62, %v655_v61  ;;  %v597_v1 = vpop.f32.mrb[12].mxu0 }
 0x132   : > { %v598_v2 = vadd.f32 %v597_v1, %v1861_v21  ;;  %v599_v3 = vpop.f32.mrb[13].mxu0 }
 0x133   : > { %v600_v4 = vadd.f32 %v599_v3, %v1865_v22  ;;  %v601_v5 = vpop.f32.mrb[14].mxu0  ;;  %950 = vmatprep.mubr.bf16.mxu1 %v683_v0 }
 0x134   : > { %v602_v6 = vadd.f32 %v601_v5, %v1861_v21  ;;  %v603_v7 = vpop.f32.mrb[15].mxu0  ;;  %951 = vmatmul.mubr.bf16.gmra.mrb[8].mxu1 %v682_v63  ;;  %v658_v9 = vmax.f32 %v598_v2, 0.0 }
 0x135   : > { %v604_v8 = vadd.f32 %v603_v7, %v1865_v22  ;;  %v659_v11 = vmax.f32 %v600_v4, 0.0 }
 0x136   : > { %v660_v10 = vmax.f32 %v602_v6, 0.0 }
 0x137   : > { %v661_v12 = vmax.f32 %v604_v8, 0.0 }
 0x138   : > { %v684_v13 = vpack.c.bf16 %v660_v10, %v658_v9 }
 0x139   : > { %v685_v14 = vpack.c.bf16 %v661_v12, %v659_v11  ;;  %v607_v15 = vpop.f32.mrb[16].mxu0  ;;  %v726_v12 = vld [vmem:[%s1997_s4] sm:$0x3] }
 0x13a   : > { %v608_v16 = vadd.f32 %v607_v15, %v1861_v21  ;;  %v609_v19 = vpop.f32.mrb[17].mxu0 }
 0x13b   : > { %v610_v23 = vadd.f32 %v609_v19, %v1865_v22  ;;  %v611_v24 = vpop.f32.mrb[18].mxu0  ;;  %960 = vmatprep.mubr.bf16.mxu1 %v685_v14 }
 0x13c   : > { %v612_v25 = vadd.f32 %v611_v24, %v1861_v21  ;;  %v613_v26 = vpop.f32.mrb[19].mxu0  ;;  %961 = vmatmul.mubr.bf16.gmra.mrb[12].mxu1 %v684_v13  ;;  %v662_v28 = vmax.f32 %v608_v16, 0.0  ;;  %v1904_v13 = vrot.slane %v726_v12, %v285_v18 }
 0x13d   : > { %v614_v27 = vadd.f32 %v613_v26, %v1865_v22  ;;  %v663_v30 = vmax.f32 %v610_v23, 0.0 }
 0x13e   : > { %v664_v29 = vmax.f32 %v612_v25, 0.0 }
 0x13f   : > { %v665_v31 = vmax.f32 %v614_v27, 0.0 }
 0x140   : > { %v686_v32 = vpack.c.bf16 %v664_v29, %v662_v28 }
 0x141   : > { %v687_v33 = vpack.c.bf16 %v665_v31, %v663_v30  ;;  %v617_v34 = vpop.f32.mrb[20].mxu0 }
 0x142   : > { %v618_v35 = vadd.f32 %v617_v34, %v1861_v21  ;;  %v619_v36 = vpop.f32.mrb[21].mxu0 }
 0x143   : > { %v620_v37 = vadd.f32 %v619_v36, %v1865_v22  ;;  %v621_v38 = vpop.f32.mrb[22].mxu0  ;;  %970 = vmatprep.mubr.bf16.mxu1 %v687_v33 }
 0x144   : > { %v622_v39 = vadd.f32 %v621_v38, %v1861_v21  ;;  %v623_v40 = vpop.f32.mrb[23].mxu0  ;;  %971 = vmatmul.mubr.bf16.gmra.mrb[16].mxu1 %v686_v32  ;;  %v666_v42 = vmax.f32 %v618_v35, 0.0 }
 0x145   : > { %v624_v41 = vadd.f32 %v623_v40, %v1865_v22  ;;  %v667_v44 = vmax.f32 %v620_v37, 0.0 }
 0x146   : > { %v668_v43 = vmax.f32 %v622_v39, 0.0 }
 0x147   : > { %v669_v45 = vmax.f32 %v624_v41, 0.0 }
 0x148   : > { %v688_v46 = vpack.c.bf16 %v668_v43, %v666_v42 }
 0x149   : > { %v689_v47 = vpack.c.bf16 %v669_v45, %v667_v44  ;;  %v627_v48 = vpop.f32.mrb[24].mxu0 }
 0x14a   : > { %v628_v49 = vadd.f32 %v627_v48, %v1861_v21  ;;  %v629_v50 = vpop.f32.mrb[25].mxu0 }
 0x14b   : > { %v630_v51 = vadd.f32 %v629_v50, %v1865_v22  ;;  %v631_v52 = vpop.f32.mrb[26].mxu0  ;;  %980 = vmatprep.mubr.bf16.mxu1 %v689_v47 }
 0x14c   : > { %v632_v53 = vadd.f32 %v631_v52, %v1861_v21  ;;  %v633_v54 = vpop.f32.mrb[27].mxu0  ;;  %981 = vmatmul.mubr.bf16.gmra.mrb[20].mxu1 %v688_v46  ;;  %v670_v56 = vmax.f32 %v628_v49, 0.0 }
 0x14d   : > { %v634_v55 = vadd.f32 %v633_v54, %v1865_v22  ;;  %v671_v58 = vmax.f32 %v630_v51, 0.0 }
 0x14e   : > { %v672_v57 = vmax.f32 %v632_v53, 0.0 }
 0x14f   : > { %v673_v59 = vmax.f32 %v634_v55, 0.0 }
 0x150   : > { %v690_v60 = vpack.c.bf16 %v672_v57, %v670_v56 }
 0x151   : > { %v691_v61 = vpack.c.bf16 %v673_v59, %v671_v58  ;;  %v637_v62 = vpop.f32.mrb[28].mxu0 }
 0x152   : > { %v638_v63 = vadd.f32 %v637_v62, %v1861_v21  ;;  %v639_v0 = vpop.f32.mrb[29].mxu0 }
 0x153   : > { %v640_v1 = vadd.f32 %v639_v0, %v1865_v22  ;;  %v641_v2 = vpop.f32.mrb[30].mxu0  ;;  %990 = vmatprep.mubr.bf16.mxu1 %v691_v61 }
 0x154   : > { %v642_v3 = vadd.f32 %v641_v2, %v1861_v21  ;;  %v643_v4 = vpop.f32.mrb[31].mxu0  ;;  %991 = vmatmul.mubr.bf16.gmra.mrb[24].mxu1 %v690_v60  ;;  %v674_v6 = vmax.f32 %v638_v63, 0.0  ;;  %v1908_v21 = vrot.slane %v726_v12, %v289_v20 }
 0x155   : > { %v644_v5 = vadd.f32 %v643_v4, %v1865_v22  ;;  %v675_v8 = vmax.f32 %v640_v1, 0.0 }
 0x156   : > { %v676_v7 = vmax.f32 %v642_v3, 0.0 }
 0x157   : > { %v677_v9 = vmax.f32 %v644_v5, 0.0 }
 0x158   : > { %v692_v10 = vpack.c.bf16 %v676_v7, %v674_v6 }
 0x159   : > { %v693_v11 = vpack.c.bf16 %v677_v9, %v675_v8 }
 0x15b   : > { %1000 = vmatprep.mubr.bf16.mxu1 %v693_v11 }
 0x15c   : > { %1001 = vmatmul.mubr.bf16.gmra.mrb[28].mxu1 %v692_v10 }
 0x1f7   : > { %v932_v22 = vpop.f32.mrb[0].mxu1 }
 0x1f8   : > { %v933_v14 = vadd.f32 %v932_v22, %v1904_v13  ;;  %v934_v15 = vpop.f32.mrb[1].mxu1 }
 0x1f9   : > { %v935_v16 = vadd.f32 %v934_v15, %v1908_v21  ;;  %v936_v19 = vpop.f32.mrb[2].mxu1 }
 0x1fa   : > { %v1011_v23 = vmax.f32 %v933_v14, 0.0  ;;  %v937_v24 = vadd.f32 %v936_v19, %v1904_v13  ;;  %v938_v25 = vpop.f32.mrb[3].mxu1 }
 0x1fb   : > { %v1012_v26 = vmax.f32 %v935_v16, 0.0  ;;  %v939_v27 = vadd.f32 %v938_v25, %v1908_v21 }
 0x1fc   : > { %v1043_v18 = vrot.slane %v1011_v23, 4  ;;  %v1013_v28 = vmax.f32 %v937_v24, 0.0 }
 0x1fd   : > { %v1049_v29 = vrot.slane %v1012_v26, 4  ;;  %v1014_v17 = vmax.f32 %v939_v27, 0.0 }
 0x1fe   : > { %v1044_v20 = vmax.f32 %v1011_v23, %v1043_v18  ;;  %v1055_v30 = vrot.slane %v1013_v28, 4 }
 0x1ff   : > { %v1050_v31 = vmax.f32 %v1012_v26, %v1049_v29  ;;  %v1061_v32 = vrot.slane %v1014_v17, 4  ;;  %v942_v33 = vpop.f32.mrb[4].mxu1 }
 0x200   : > { %v1045_v34 = vrot.slane %v1044_v20, 2  ;;  %v1056_v35 = vmax.f32 %v1013_v28, %v1055_v30  ;;  %v943_v36 = vadd.f32 %v942_v33, %v1904_v13  ;;  %v944_v37 = vpop.f32.mrb[5].mxu1 }
 0x201   : > { %v1051_v38 = vrot.slane %v1050_v31, 2  ;;  %v1062_v39 = vmax.f32 %v1014_v17, %v1061_v32  ;;  %v945_v40 = vadd.f32 %v944_v37, %v1908_v21  ;;  %v946_v41 = vpop.f32.mrb[6].mxu1 }
 0x202   : > { %v1046_v42 = vmax.f32 %v1044_v20, %v1045_v34  ;;  %v1057_v43 = vrot.slane %v1056_v35, 2  ;;  %v1015_v44 = vmax.f32 %v943_v36, 0.0  ;;  %v947_v45 = vadd.f32 %v946_v41, %v1904_v13  ;;  %v948_v46 = vpop.f32.mrb[7].mxu1 }
 0x203   : > { %v1052_v47 = vmax.f32 %v1050_v31, %v1051_v38  ;;  %v1063_v48 = vrot.slane %v1062_v39, 2  ;;  %v1016_v49 = vmax.f32 %v945_v40, 0.0  ;;  %v949_v50 = vadd.f32 %v948_v46, %v1908_v21 }
 0x204   : > { %v1047_v51 = vrot.slane %v1046_v42, 1  ;;  %v1058_v52 = vmax.f32 %v1056_v35, %v1057_v43  ;;  %v1067_v53 = vrot.slane %v1015_v44, 4  ;;  %v1017_v54 = vmax.f32 %v947_v45, 0.0 }
 0x205   : > { %v1053_v55 = vrot.slane %v1052_v47, 1  ;;  %v1064_v56 = vmax.f32 %v1062_v39, %v1063_v48  ;;  %v1073_v57 = vrot.slane %v1016_v49, 4  ;;  %v1018_v58 = vmax.f32 %v949_v50, 0.0 }
 0x206   : > { %v1048_v59 = vmax.f32 %v1046_v42, %v1047_v51  ;;  %v1059_v60 = vrot.slane %v1058_v52, 1  ;;  %v1068_v61 = vmax.f32 %v1015_v44, %v1067_v53  ;;  %v1079_v62 = vrot.slane %v1017_v54, 4 }
 0x207   : > { %v1054_v63 = vmax.f32 %v1052_v47, %v1053_v55  ;;  %v1065_v0 = vrot.slane %v1064_v56, 1  ;;  %v1074_v1 = vmax.f32 %v1016_v49, %v1073_v57  ;;  %v1085_v2 = vrot.slane %v1018_v58, 4  ;;  %v952_v3 = vpop.f32.mrb[8].mxu1 }
 0x208   : > { %v1060_v4 = vmax.f32 %v1058_v52, %v1059_v60  ;;  %v1069_v5 = vrot.slane %v1068_v61, 2  ;;  %v1080_v6 = vmax.f32 %v1017_v54, %v1079_v62  ;;  %v953_v7 = vadd.f32 %v952_v3, %v1904_v13  ;;  %v954_v8 = vpop.f32.mrb[9].mxu1 }
 0x209   : > { %v1066_v9 = vmax.f32 %v1064_v56, %v1065_v0  ;;  %v1075_v10 = vrot.slane %v1074_v1, 2  ;;  %v1086_v11 = vmax.f32 %v1018_v58, %v1085_v2  ;;  %v955_v12 = vadd.f32 %v954_v8, %v1908_v21  ;;  %v956_v22 = vpop.f32.mrb[10].mxu1 }
 0x20a   : > { %v1268_v14 = vsel %vm1267_vm0, %v1060_v4, %v1048_v59  ;;  %v1070_v15 = vmax.f32 %v1068_v61, %v1069_v5  ;;  %v1081_v16 = vrot.slane %v1080_v6, 2  ;;  %v1019_v19 = vmax.f32 %v953_v7, 0.0  ;;  %v958_v23 = vpop.f32.mrb[11].mxu1 }
 0x20b   : > { %v1281_v24 = vsel %vm1267_vm0, %v1066_v9, %v1054_v63  ;;  %v1076_v25 = vmax.f32 %v1074_v1, %v1075_v10  ;;  %v1087_v26 = vrot.slane %v1086_v11, 2  ;;  %v1020_v27 = vmax.f32 %v955_v12, 0.0 }
 0x20c   : > { %v1071_v18 = vrot.slane %v1070_v15, 1  ;;  %v1082_v28 = vmax.f32 %v1080_v6, %v1081_v16  ;;  %v1091_v29 = vrot.slane %v1019_v19, 4  ;;  %v957_v17 = vadd.f32 %v956_v22, %v1904_v13 }
 0x20d   : > { %v1077_v20 = vrot.slane %v1076_v25, 1  ;;  %v1088_v30 = vmax.f32 %v1086_v11, %v1087_v26  ;;  %v1097_v31 = vrot.slane %v1020_v27, 4  ;;  %v959_v32 = vadd.f32 %v958_v23, %v1908_v21 }
 0x20e   : > { %v1072_v33 = vmax.f32 %v1070_v15, %v1071_v18  ;;  %v1083_v34 = vrot.slane %v1082_v28, 1  ;;  %v1092_v35 = vmax.f32 %v1019_v19, %v1091_v29  ;;  %v1021_v36 = vmax.f32 %v957_v17, 0.0 }
 0x20f   : > { %v1078_v37 = vmax.f32 %v1076_v25, %v1077_v20  ;;  %v1089_v38 = vrot.slane %v1088_v30, 1  ;;  %v1098_v39 = vmax.f32 %v1020_v27, %v1097_v31  ;;  %v1022_v40 = vmax.f32 %v959_v32, 0.0  ;;  %v962_v41 = vpop.f32.mrb[12].mxu1 }
 0x210   : > { %v1270_v42 = vsel %vm1269_vm1, %v1072_v33, %v1268_v14  ;;  %v1084_v43 = vmax.f32 %v1082_v28, %v1083_v34  ;;  %v1093_v44 = vrot.slane %v1092_v35, 2  ;;  %v1103_v45 = vrot.slane %v1021_v36, 4  ;;  %v964_v46 = vpop.f32.mrb[13].mxu1 }
 0x211   : > { %v1282_v47 = vsel %vm1269_vm1, %v1078_v37, %v1281_v24  ;;  %v1090_v48 = vmax.f32 %v1088_v30, %v1089_v38  ;;  %v1099_v49 = vrot.slane %v1098_v39, 2  ;;  %v1109_v50 = vrot.slane %v1022_v40, 4  ;;  %v966_v51 = vpop.f32.mrb[14].mxu1 }
 0x212   : > { %v1272_v52 = vsel %vm1271_vm2, %v1084_v43, %v1270_v42  ;;  %v1094_v53 = vmax.f32 %v1092_v35, %v1093_v44  ;;  %v1104_v54 = vmax.f32 %v1021_v36, %v1103_v45  ;;  %v963_v55 = vadd.f32 %v962_v41, %v1904_v13  ;;  %v968_v56 = vpop.f32.mrb[15].mxu1 }
 0x213   : > { %v1283_v57 = vsel %vm1271_vm2, %v1090_v48, %v1282_v47  ;;  %v1100_v58 = vmax.f32 %v1098_v39, %v1099_v49  ;;  %v1110_v59 = vmax.f32 %v1022_v40, %v1109_v50  ;;  %v965_v60 = vadd.f32 %v964_v46, %v1908_v21 }
 0x214   : > { %v1095_v61 = vrot.slane %v1094_v53, 1  ;;  %v1105_v62 = vrot.slane %v1104_v54, 2  ;;  %v1023_v63 = vmax.f32 %v963_v55, 0.0  ;;  %v967_v0 = vadd.f32 %v966_v51, %v1904_v13 }
 0x215   : > { %v1101_v1 = vrot.slane %v1100_v58, 1  ;;  %v1111_v2 = vrot.slane %v1110_v59, 2  ;;  %v1024_v3 = vmax.f32 %v965_v60, 0.0  ;;  %v969_v4 = vadd.f32 %v968_v56, %v1908_v21 }
 0x216   : > { %v1096_v5 = vmax.f32 %v1094_v53, %v1095_v61  ;;  %v1106_v6 = vmax.f32 %v1104_v54, %v1105_v62  ;;  %v1115_v7 = vrot.slane %v1023_v63, 4  ;;  %v1025_v8 = vmax.f32 %v967_v0, 0.0 }
 0x217   : > { %v1102_v9 = vmax.f32 %v1100_v58, %v1101_v1  ;;  %v1112_v10 = vmax.f32 %v1110_v59, %v1111_v2  ;;  %v1121_v11 = vrot.slane %v1024_v3, 4  ;;  %v1026_v12 = vmax.f32 %v969_v4, 0.0  ;;  %v972_v22 = vpop.f32.mrb[16].mxu1 }
 0x218   : > { %v1274_v14 = vsel %vm1273_vm3, %v1096_v5, %v1272_v52  ;;  %v1107_v15 = vrot.slane %v1106_v6, 1  ;;  %v1116_v16 = vmax.f32 %v1023_v63, %v1115_v7  ;;  %v1127_v19 = vrot.slane %v1025_v8, 4  ;;  %v974_v23 = vpop.f32.mrb[17].mxu1 }
 0x219   : > { %v1284_v24 = vsel %vm1273_vm3, %v1102_v9, %v1283_v57  ;;  %v1113_v25 = vrot.slane %v1112_v10, 1  ;;  %v1122_v26 = vmax.f32 %v1024_v3, %v1121_v11  ;;  %v1133_v27 = vrot.slane %v1026_v12, 4  ;;  %v976_v18 = vpop.f32.mrb[18].mxu1 }
 0x21a   : > { %v1108_v28 = vmax.f32 %v1106_v6, %v1107_v15  ;;  %v1117_v29 = vrot.slane %v1116_v16, 2  ;;  %v1128_v17 = vmax.f32 %v1025_v8, %v1127_v19  ;;  %v973_v20 = vadd.f32 %v972_v22, %v1904_v13  ;;  %v978_v30 = vpop.f32.mrb[19].mxu1 }
 0x21b   : > { %v1114_v31 = vmax.f32 %v1112_v10, %v1113_v25  ;;  %v1123_v32 = vrot.slane %v1122_v26, 2  ;;  %v1134_v33 = vmax.f32 %v1026_v12, %v1133_v27  ;;  %v975_v34 = vadd.f32 %v974_v23, %v1908_v21 }
 0x21c   : > { %v1276_v35 = vsel %vm1275_vm4, %v1108_v28, %v1274_v14  ;;  %v1118_v36 = vmax.f32 %v1116_v16, %v1117_v29  ;;  %v1129_v37 = vrot.slane %v1128_v17, 2  ;;  %v1027_v38 = vmax.f32 %v973_v20, 0.0 }
 0x21d   : > { %v1285_v39 = vsel %vm1275_vm4, %v1114_v31, %v1284_v24  ;;  %v1124_v40 = vmax.f32 %v1122_v26, %v1123_v32  ;;  %v1135_v41 = vrot.slane %v1134_v33, 2  ;;  %v1028_v42 = vmax.f32 %v975_v34, 0.0 }
 0x21e   : > { %v1119_v43 = vrot.slane %v1118_v36, 1  ;;  %v1130_v44 = vmax.f32 %v1128_v17, %v1129_v37  ;;  %v1139_v45 = vrot.slane %v1027_v38, 4  ;;  %v977_v46 = vadd.f32 %v976_v18, %v1904_v13 }
 0x21f   : > { %v1125_v47 = vrot.slane %v1124_v40, 1  ;;  %v1136_v48 = vmax.f32 %v1134_v33, %v1135_v41  ;;  %v1145_v49 = vrot.slane %v1028_v42, 4  ;;  %v979_v50 = vadd.f32 %v978_v30, %v1908_v21  ;;  %v982_v51 = vpop.f32.mrb[20].mxu1 }
 0x220   : > { %v1120_v52 = vmax.f32 %v1118_v36, %v1119_v43  ;;  %v1131_v53 = vrot.slane %v1130_v44, 1  ;;  %v1140_v54 = vmax.f32 %v1027_v38, %v1139_v45  ;;  %v1029_v55 = vmax.f32 %v977_v46, 0.0  ;;  %v984_v56 = vpop.f32.mrb[21].mxu1 }
 0x221   : > { %v1126_v57 = vmax.f32 %v1124_v40, %v1125_v47  ;;  %v1137_v58 = vrot.slane %v1136_v48, 1  ;;  %v1146_v59 = vmax.f32 %v1028_v42, %v1145_v49  ;;  %v1030_v60 = vmax.f32 %v979_v50, 0.0  ;;  %v986_v61 = vpop.f32.mrb[22].mxu1 }
 0x222   : > { %v1278_v62 = vsel %vm1277_vm5, %v1120_v52, %v1276_v35  ;;  %v1132_v63 = vmax.f32 %v1130_v44, %v1131_v53  ;;  %v1141_v0 = vrot.slane %v1140_v54, 2  ;;  %v1151_v1 = vrot.slane %v1029_v55, 4  ;;  %v988_v2 = vpop.f32.mrb[23].mxu1 }
 0x223   : > { %v1286_v3 = vsel %vm1277_vm5, %v1126_v57, %v1285_v39  ;;  %v1138_v4 = vmax.f32 %v1136_v48, %v1137_v58  ;;  %v1147_v5 = vrot.slane %v1146_v59, 2  ;;  %v1157_v6 = vrot.slane %v1030_v60, 4 }
 0x224   : > { %v1280_v7 = vsel %vm1279_vm6, %v1132_v63, %v1278_v62  ;;  %v1142_v8 = vmax.f32 %v1140_v54, %v1141_v0  ;;  %v1152_v9 = vmax.f32 %v1029_v55, %v1151_v1  ;;  %v983_v10 = vadd.f32 %v982_v51, %v1904_v13 }
 0x225   : > { %1306 = vst [vmem:[%s1955_s26] sm:$0xff] %v1280_v7  ;;  %v1287_v11 = vsel %vm1279_vm6, %v1138_v4, %v1286_v3  ;;  %v1148_v12 = vmax.f32 %v1146_v59, %v1147_v5  ;;  %v1158_v22 = vmax.f32 %v1030_v60, %v1157_v6  ;;  %v985_v14 = vadd.f32 %v984_v56, %v1908_v21 }
 0x226   : > { %1307 = vst [vmem:[%s1955_s26 + $0x8] sm:$0xff] %v1287_v11  ;;  %v1143_v15 = vrot.slane %v1142_v8, 1  ;;  %v1153_v16 = vrot.slane %v1152_v9, 2  ;;  %v1031_v19 = vmax.f32 %v983_v10, 0.0  ;;  %v987_v23 = vadd.f32 %v986_v61, %v1904_v13 }
 0x227   : > { %v1149_v24 = vrot.slane %v1148_v12, 1  ;;  %v1159_v25 = vrot.slane %v1158_v22, 2  ;;  %v1032_v26 = vmax.f32 %v985_v14, 0.0  ;;  %v989_v27 = vadd.f32 %v988_v2, %v1908_v21  ;;  %v992_v18 = vpop.f32.mrb[24].mxu1 }
 0x228   : > { %v1144_v28 = vmax.f32 %v1142_v8, %v1143_v15  ;;  %v1154_v29 = vmax.f32 %v1152_v9, %v1153_v16  ;;  %v1163_v17 = vrot.slane %v1031_v19, 4  ;;  %v1033_v20 = vmax.f32 %v987_v23, 0.0  ;;  %v994_v30 = vpop.f32.mrb[25].mxu1 }
 0x229   : > { %v1150_v31 = vmax.f32 %v1148_v12, %v1149_v24  ;;  %v1160_v32 = vmax.f32 %v1158_v22, %v1159_v25  ;;  %v1169_v33 = vrot.slane %v1032_v26, 4  ;;  %v1034_v34 = vmax.f32 %v989_v27, 0.0  ;;  %v996_v35 = vpop.f32.mrb[26].mxu1 }
 0x22a   : > { %v1155_v36 = vrot.slane %v1154_v29, 1  ;;  %v1164_v37 = vmax.f32 %v1031_v19, %v1163_v17  ;;  %v1175_v38 = vrot.slane %v1033_v20, 4  ;;  %v993_v39 = vadd.f32 %v992_v18, %v1904_v13  ;;  %v998_v40 = vpop.f32.mrb[27].mxu1 }
 0x22b   : > { %v1161_v41 = vrot.slane %v1160_v32, 1  ;;  %v1170_v42 = vmax.f32 %v1032_v26, %v1169_v33  ;;  %v1181_v43 = vrot.slane %v1034_v34, 4  ;;  %v995_v44 = vadd.f32 %v994_v30, %v1908_v21 }
 0x22c   : > { %v1156_v45 = vmax.f32 %v1154_v29, %v1155_v36  ;;  %v1165_v46 = vrot.slane %v1164_v37, 2  ;;  %v1176_v47 = vmax.f32 %v1033_v20, %v1175_v38  ;;  %v1035_v48 = vmax.f32 %v993_v39, 0.0 }
 0x22d   : > { %v1162_v49 = vmax.f32 %v1160_v32, %v1161_v41  ;;  %v1171_v50 = vrot.slane %v1170_v42, 2  ;;  %v1182_v51 = vmax.f32 %v1034_v34, %v1181_v43  ;;  %v1036_v52 = vmax.f32 %v995_v44, 0.0 }
 0x22e   : > { %v1288_v53 = vsel %vm1267_vm0, %v1156_v45, %v1144_v28  ;;  %v1166_v54 = vmax.f32 %v1164_v37, %v1165_v46  ;;  %v1177_v55 = vrot.slane %v1176_v47, 2  ;;  %v1187_v56 = vrot.slane %v1035_v48, 4 }
 0x22f   : > { %v1295_v57 = vsel %vm1267_vm0, %v1162_v49, %v1150_v31  ;;  %v1172_v58 = vmax.f32 %v1170_v42, %v1171_v50  ;;  %v1183_v59 = vrot.slane %v1182_v51, 2  ;;  %v1193_v60 = vrot.slane %v1036_v52, 4  ;;  %v1002_v61 = vpop.f32.mrb[28].mxu1 }
 0x230   : > { %v1167_v62 = vrot.slane %v1166_v54, 1  ;;  %v1178_v63 = vmax.f32 %v1176_v47, %v1177_v55  ;;  %v1188_v0 = vmax.f32 %v1035_v48, %v1187_v56  ;;  %v997_v1 = vadd.f32 %v996_v35, %v1904_v13  ;;  %v1004_v2 = vpop.f32.mrb[29].mxu1 }
 0x231   : > { %v1173_v3 = vrot.slane %v1172_v58, 1  ;;  %v1184_v4 = vmax.f32 %v1182_v51, %v1183_v59  ;;  %v1194_v5 = vmax.f32 %v1036_v52, %v1193_v60  ;;  %v999_v6 = vadd.f32 %v998_v40, %v1908_v21  ;;  %v1006_v7 = vpop.f32.mrb[30].mxu1 }
 0x232   : > { %v1168_v8 = vmax.f32 %v1166_v54, %v1167_v62  ;;  %v1179_v9 = vrot.slane %v1178_v63, 1  ;;  %v1189_v10 = vrot.slane %v1188_v0, 2  ;;  %v1037_v11 = vmax.f32 %v997_v1, 0.0  ;;  %v1008_v12 = vpop.f32.mrb[31].mxu1 }
 0x233   : > { %v1174_v22 = vmax.f32 %v1172_v58, %v1173_v3  ;;  %v1185_v14 = vrot.slane %v1184_v4, 1  ;;  %v1195_v15 = vrot.slane %v1194_v5, 2  ;;  %v1038_v16 = vmax.f32 %v999_v6, 0.0 }
 0x234   : > { %v1289_v19 = vsel %vm1269_vm1, %v1168_v8, %v1288_v53  ;;  %v1180_v23 = vmax.f32 %v1178_v63, %v1179_v9  ;;  %v1190_v24 = vmax.f32 %v1188_v0, %v1189_v10  ;;  %v1199_v25 = vrot.slane %v1037_v11, 4 }
 0x235   : > { %v1296_v26 = vsel %vm1269_vm1, %v1174_v22, %v1295_v57  ;;  %v1186_v27 = vmax.f32 %v1184_v4, %v1185_v14  ;;  %v1196_v18 = vmax.f32 %v1194_v5, %v1195_v15  ;;  %v1205_v28 = vrot.slane %v1038_v16, 4 }
 0x236   : > { %v1290_v29 = vsel %vm1271_vm2, %v1180_v23, %v1289_v19  ;;  %v1191_v17 = vrot.slane %v1190_v24, 1  ;;  %v1200_v20 = vmax.f32 %v1037_v11, %v1199_v25  ;;  %v1003_v30 = vadd.f32 %v1002_v61, %v1904_v13 }
 0x237   : > { %v1297_v31 = vsel %vm1271_vm2, %v1186_v27, %v1296_v26  ;;  %v1197_v32 = vrot.slane %v1196_v18, 1  ;;  %v1206_v33 = vmax.f32 %v1038_v16, %v1205_v28  ;;  %v1005_v34 = vadd.f32 %v1004_v2, %v1908_v21 }
 0x238   : > { %v1192_v35 = vmax.f32 %v1190_v24, %v1191_v17  ;;  %v1201_v36 = vrot.slane %v1200_v20, 2  ;;  %v1039_v37 = vmax.f32 %v1003_v30, 0.0  ;;  %v1007_v38 = vadd.f32 %v1006_v7, %v1904_v13 }
 0x239   : > { %v1198_v39 = vmax.f32 %v1196_v18, %v1197_v32  ;;  %v1207_v40 = vrot.slane %v1206_v33, 2  ;;  %v1040_v41 = vmax.f32 %v1005_v34, 0.0  ;;  %v1009_v42 = vadd.f32 %v1008_v12, %v1908_v21 }
 0x23a   : > { %v1291_v43 = vsel %vm1273_vm3, %v1192_v35, %v1290_v29  ;;  %v1202_v44 = vmax.f32 %v1200_v20, %v1201_v36  ;;  %v1211_v45 = vrot.slane %v1039_v37, 4  ;;  %v1041_v46 = vmax.f32 %v1007_v38, 0.0 }
 0x23b   : > { %v1298_v47 = vsel %vm1273_vm3, %v1198_v39, %v1297_v31  ;;  %v1208_v48 = vmax.f32 %v1206_v33, %v1207_v40  ;;  %v1217_v49 = vrot.slane %v1040_v41, 4  ;;  %v1042_v50 = vmax.f32 %v1009_v42, 0.0 }
 0x23c   : > { %v1203_v51 = vrot.slane %v1202_v44, 1  ;;  %v1212_v52 = vmax.f32 %v1039_v37, %v1211_v45  ;;  %v1223_v53 = vrot.slane %v1041_v46, 4 }
 0x23d   : > { %v1209_v54 = vrot.slane %v1208_v48, 1  ;;  %v1218_v13 = vmax.f32 %v1040_v41, %v1217_v49  ;;  %v1229_v55 = vrot.slane %v1042_v50, 4 }
 0x23e   : > { %v1204_v56 = vmax.f32 %v1202_v44, %v1203_v51  ;;  %v1213_v57 = vrot.slane %v1212_v52, 2  ;;  %v1224_v58 = vmax.f32 %v1041_v46, %v1223_v53 }
 0x23f   : > { %v1210_v21 = vmax.f32 %v1208_v48, %v1209_v54  ;;  %v1219_v59 = vrot.slane %v1218_v13, 2  ;;  %v1230_v60 = vmax.f32 %v1042_v50, %v1229_v55 }
 0x240   : > { %v1292_v61 = vsel %vm1275_vm4, %v1204_v56, %v1291_v43  ;;  %v1214_v62 = vmax.f32 %v1212_v52, %v1213_v57  ;;  %v1225_v63 = vrot.slane %v1224_v58, 2 }
 0x241   : > { %v1299_v0 = vsel %vm1275_vm4, %v1210_v21, %v1298_v47  ;;  %v1220_v1 = vmax.f32 %v1218_v13, %v1219_v59  ;;  %v1231_v2 = vrot.slane %v1230_v60, 2 }
 0x242   : > { %v1215_v3 = vrot.slane %v1214_v62, 1  ;;  %v1226_v4 = vmax.f32 %v1224_v58, %v1225_v63 }
 0x243   : > { %v1221_v5 = vrot.slane %v1220_v1, 1  ;;  %v1232_v6 = vmax.f32 %v1230_v60, %v1231_v2 }
 0x244   : > { %v1216_v7 = vmax.f32 %v1214_v62, %v1215_v3  ;;  %v1227_v8 = vrot.slane %v1226_v4, 1 }
 0x245   : > { %v1222_v9 = vmax.f32 %v1220_v1, %v1221_v5  ;;  %v1233_v10 = vrot.slane %v1232_v6, 1 }
 0x246   : > { %v1293_v11 = vsel %vm1277_vm5, %v1216_v7, %v1292_v61  ;;  %v1228_v12 = vmax.f32 %v1226_v4, %v1227_v8 }
 0x247   : > { %v1300_v22 = vsel %vm1277_vm5, %v1222_v9, %v1299_v0  ;;  %v1234_v14 = vmax.f32 %v1232_v6, %v1233_v10 }
 0x248   : > { %v1294_v15 = vsel %vm1279_vm6, %v1228_v12, %v1293_v11 }
 0x249   : > { %1308 = vst [vmem:[%s1955_s26 + $0x10] sm:$0xff] %v1294_v15  ;;  %v1301_v16 = vsel %vm1279_vm6, %v1234_v14, %v1300_v22 }
 0x24a   : > { %1309 = vst [vmem:[%s1955_s26 + $0x18] sm:$0xff] %v1301_v16 }
 0x24b PF: > { %s15_s18 = sadd.s32 1, %s1597_s18  }
 0x24c   : > { %p12_p5 = scmp.ge.s32.totalorder %s15_s18, 4  }
 0x24e   :  { %14 = sbr.rel (!%p12_p5) target bundleno = 1 (0x1), region = 70 }

// kernel: pct_forward.8
= control target key start
LH: loop header
LB: loop body
LE: loop exit
PB: predicated region body
PF: predicated region fallthrough
CT: control target
= control target key end

     0   :  { %s1026_s18 = smov 0   ;;  %s1254_s0 = inlined_call_operand.vmem [shape: f32[32,256], index: 0, kind: input, shape index: {}]   ;;  %s1255_s1 = inlined_call_operand.vmem [shape: bf16[256,256], index: 1, kind: input, shape index: {}]   ;;  %s1256_s2 = inlined_call_operand.vmem [shape: f32[1,256], index: 2, kind: input, shape index: {}]   ;;  %s1257_s3 = inlined_call_operand.vmem [shape: bf16[256,256], index: 3, kind: input, shape index: {}]   ;;  %s1258_s4 = inlined_call_operand.vmem [shape: f32[1,256], index: 4, kind: input, shape index: {}]   ;;  %s1259_s5 = inlined_call_operand.vmem [shape: f32[32,256], index: 5, kind: output, shape index: {}]  }
   0x1 LB: > { %s805_s19 = sadd.s32 4294967295, %s994_s18   ;;  %p809_p0 = scmp.ge.s32.totalorder %s994_s18, 1  ;;  %s994_s18 = sphi %s1026_s18, %s15_s18  }
   0x2   : > { %p189_p1 = scmp.lt.s32.totalorder %s994_s18, 3 }
   0x4   : > { %p190_p2 = pnand %p809_p0, %p189_p1 }
   0x5   : > { %v892_v0 = vld [vmem:[%s1255_s1 + $0x4] ss:$8 sps:$4 sm:$0xff] (!%p190_p2)   ;;  %v894_v1 = vld [vmem:[%s1255_s1] ss:$8 sps:$4 sm:$0xff] (!%p190_p2)   ;;  %v895_v2 = vld [vmem:[%s1255_s1 + $0x14] ss:$8 sps:$4 sm:$0xff] (!%p190_p2)  }
   0x6   : > { %193 = sbr.rel (%p190_p2) target bundleno = 512 (0x200), region = 40  ;;  %443 = vmatprep.subr.bf16.mxu0 (!%p190_p2), %v892_v0  ;;  %v897_v3 = vld [vmem:[%s1255_s1 + $0x10] ss:$8 sps:$4 sm:$0xff] (!%p190_p2)   ;;  %v898_v4 = vld [vmem:[%s1255_s1 + $0x24] ss:$8 sps:$4 sm:$0xff] (!%p190_p2)   ;;  %s810_s30 = sshll.u32 (!%p190_p2), %s805_s19, 1 }
   0x7   : > { %444 = vmatpush1.bf16.msra.mxu0 (!%p190_p2), %v894_v1  ;;  %v900_v5 = vld [vmem:[%s1255_s1 + $0x20] ss:$8 sps:$4 sm:$0xff] (!%p190_p2)   ;;  %p220_p3 = scmp.lt.s32.totalorder (!%p190_p2), %s810_s30, 3  ;;  %v901_v6 = vld [vmem:[%s1255_s1 + $0x34] ss:$8 sps:$4 sm:$0xff] (!%p190_p2)  }
   0x8   : > { %445 = vmatprep.subr.bf16.mxu0 (!%p190_p2), %v895_v2  ;;  %v903_v7 = vld [vmem:[%s1255_s1 + $0x30] ss:$8 sps:$4 sm:$0xff] (!%p190_p2)   ;;  %v904_v8 = vld [vmem:[%s1255_s1 + $0x44] ss:$8 sps:$4 sm:$0xff] (!%p190_p2)   ;;  %v906_v9 = vld [vmem:[%s1255_s1 + $0x40] ss:$8 sps:$4 sm:$0xff] (!%p190_p2)  }
   0x9   : > { %v907_v10 = vld [vmem:[%s1255_s1 + $0x54] ss:$8 sps:$4 sm:$0xff] (!%p190_p2)   ;;  %v909_v11 = vld [vmem:[%s1255_s1 + $0x50] ss:$8 sps:$4 sm:$0xff] (!%p190_p2)   ;;  %v910_v12 = vld [vmem:[%s1255_s1 + $0x64] ss:$8 sps:$4 sm:$0xff] (!%p190_p2)  }
   0xa   : > { %v912_v15 = vld [vmem:[%s1255_s1 + $0x60] ss:$8 sps:$4 sm:$0xff] (!%p190_p2)   ;;  %v913_v16 = vld [vmem:[%s1255_s1 + $0x74] ss:$8 sps:$4 sm:$0xff] (!%p190_p2)   ;;  %v940_v18 = vld [vmem:[%s1257_s3 + $0x4] ss:$8 sps:$4 sm:$0xff] (!%p190_p2)  }
   0xb   : > { %446 = vmatpush1.bf16.msra.mxu0 (!%p190_p2), %v897_v3  ;;  %v942_v19 = vld [vmem:[%s1257_s3] ss:$8 sps:$4 sm:$0xff] (!%p190_p2)   ;;  %v943_v20 = vld [vmem:[%s1257_s3 + $0x14] ss:$8 sps:$4 sm:$0xff] (!%p190_p2)   ;;  %696 = vmatprep.subr.bf16.mxu1 (!%p190_p2), %v940_v18  ;;  %v945_v21 = vld [vmem:[%s1257_s3 + $0x10] ss:$8 sps:$4 sm:$0xff] (!%p190_p2)  }
   0xc   : > { %447 = vmatprep.subr.bf16.mxu0 (!%p190_p2), %v898_v4  ;;  %697 = vmatpush1.bf16.msra.mxu1 (!%p190_p2), %v942_v19  ;;  %v915_v22 = vld [vmem:[%s1255_s1 + $0x70] ss:$8 sps:$4 sm:$0xff] (!%p190_p2)   ;;  %v946_v23 = vld [vmem:[%s1257_s3 + $0x24] ss:$8 sps:$4 sm:$0xff] (!%p190_p2)   ;;  %v948_v25 = vld [vmem:[%s1257_s3 + $0x20] ss:$8 sps:$4 sm:$0xff] (!%p190_p2)  }
   0xd   : > { %s1261_s30 = smov (!%p220_p3, %s810_s30), 3  ;;  %698 = vmatprep.subr.bf16.mxu1 %v943_v20  ;;  %v916_v24 = vld [vmem:[%s1255_s1 + $0x84] ss:$8 sps:$4 sm:$0xff]   ;;  %v918_v26 = vld [vmem:[%s1255_s1 + $0x80] ss:$8 sps:$4 sm:$0xff]  }
   0xe   : > { %s882_s16 = sshll.u32 %s1261_s30, 4  ;;  %v949_v27 = vld [vmem:[%s1257_s3 + $0x34] ss:$8 sps:$4 sm:$0xff]   ;;  %v951_v29 = vld [vmem:[%s1257_s3 + $0x30] ss:$8 sps:$4 sm:$0xff]  }
   0xf   : > { %448 = vmatpush1.bf16.msra.mxu0 %v900_v5  ;;  %s1075_s22 = scalar_lea.vmem %s1254_s0, %s882_s16  ;;  %v919_v28 = vld [vmem:[%s1255_s1 + $0x94] ss:$8 sps:$4 sm:$0xff]   ;;  %v921_v30 = vld [vmem:[%s1255_s1 + $0x90] ss:$8 sps:$4 sm:$0xff]   ;;  %v952_v31 = vld [vmem:[%s1257_s3 + $0x44] ss:$8 sps:$4 sm:$0xff]   ;;  %s231_s28 = scalar_lea.vmem %s1259_s5, %s882_s16 }
  0x10   : > { %449 = vmatprep.subr.bf16.mxu0 %v901_v6  ;;  %v234_v13 = vld [vmem:[%s1075_s22 + $0x8] sm:$0xff]  ;;  %v236_v14 = vld [vmem:[%s1075_s22 + $0x18] sm:$0xff]  ;;  %699 = vmatpush1.bf16.msra.mxu1 %v945_v21  ;;  %v233_v55 = vld [vmem:[%s1075_s22] sm:$0xff]  ;;  %v273_v6 = vlaneseq }
  0x11   : > { %v238_v17 = vpack.c.bf16 %v236_v14, %v234_v13  ;;  %700 = vmatprep.subr.bf16.mxu1 %v946_v23  ;;  %v922_v32 = vld [vmem:[%s1255_s1 + $0xa4] ss:$8 sps:$4 sm:$0xff]   ;;  %v954_v33 = vld [vmem:[%s1257_s3 + $0x40] ss:$8 sps:$4 sm:$0xff]   ;;  %v955_v35 = vld [vmem:[%s1257_s3 + $0x54] ss:$8 sps:$4 sm:$0xff]  }
  0x12   : > { %v924_v34 = vld [vmem:[%s1255_s1 + $0xa0] ss:$8 sps:$4 sm:$0xff]   ;;  %v925_v36 = vld [vmem:[%s1255_s1 + $0xb4] ss:$8 sps:$4 sm:$0xff]   ;;  %v957_v37 = vld [vmem:[%s1257_s3 + $0x50] ss:$8 sps:$4 sm:$0xff]  }
  0x13   : > { %450 = vmatpush1.bf16.msra.mxu0 %v903_v7  ;;  %475 = vmatprep.mubr.bf16.mxu0 %v238_v17  ;;  %v927_v38 = vld [vmem:[%s1255_s1 + $0xb0] ss:$8 sps:$4 sm:$0xff]   ;;  %v958_v39 = vld [vmem:[%s1257_s3 + $0x64] ss:$8 sps:$4 sm:$0xff]   ;;  %v960_v41 = vld [vmem:[%s1257_s3 + $0x60] ss:$8 sps:$4 sm:$0xff]  }
  0x14   : > { %451 = vmatprep.subr.bf16.mxu0 %v904_v8  ;;  %701 = vmatpush1.bf16.msra.mxu1 %v948_v25  ;;  %v928_v40 = vld [vmem:[%s1255_s1 + $0xc4] ss:$8 sps:$4 sm:$0xff]   ;;  %v930_v42 = vld [vmem:[%s1255_s1 + $0xc0] ss:$8 sps:$4 sm:$0xff]   ;;  %v961_v43 = vld [vmem:[%s1257_s3 + $0x74] ss:$8 sps:$4 sm:$0xff]  }
  0x15   : > { %702 = vmatprep.subr.bf16.mxu1 %v949_v27  ;;  %v931_v44 = vld [vmem:[%s1255_s1 + $0xd4] ss:$8 sps:$4 sm:$0xff]   ;;  %v963_v45 = vld [vmem:[%s1257_s3 + $0x70] ss:$8 sps:$4 sm:$0xff]   ;;  %v964_v47 = vld [vmem:[%s1257_s3 + $0x84] ss:$8 sps:$4 sm:$0xff]  }
  0x16   : > { %v933_v46 = vld [vmem:[%s1255_s1 + $0xd0] ss:$8 sps:$4 sm:$0xff]   ;;  %v934_v48 = vld [vmem:[%s1255_s1 + $0xe4] ss:$8 sps:$4 sm:$0xff]   ;;  %v966_v49 = vld [vmem:[%s1257_s3 + $0x80] ss:$8 sps:$4 sm:$0xff]  }
  0x17   : > { %452 = vmatpush1.bf16.msra.mxu0 %v906_v9  ;;  %v936_v50 = vld [vmem:[%s1255_s1 + $0xe0] ss:$8 sps:$4 sm:$0xff]   ;;  %v967_v51 = vld [vmem:[%s1257_s3 + $0x94] ss:$8 sps:$4 sm:$0xff]   ;;  %v939_v53 = vld [vmem:[%s1255_s1 + $0xf0] ss:$8 sps:$4 sm:$0xff]  }
  0x18   : > { %453 = vmatprep.subr.bf16.mxu0 %v907_v10  ;;  %703 = vmatpush1.bf16.msra.mxu1 %v951_v29  ;;  %v937_v52 = vld [vmem:[%s1255_s1 + $0xf4] ss:$8 sps:$4 sm:$0xff]   ;;  %v969_v54 = vld [vmem:[%s1257_s3 + $0x90] ss:$8 sps:$4 sm:$0xff]   ;;  %v970_v57 = vld [vmem:[%s1257_s3 + $0xa4] ss:$8 sps:$4 sm:$0xff]  }
  0x19   : > { %704 = vmatprep.subr.bf16.mxu1 %v952_v31  ;;  %v235_v56 = vld [vmem:[%s1075_s22 + $0x10] sm:$0xff]  ;;  %v972_v59 = vld [vmem:[%s1257_s3 + $0xa0] ss:$8 sps:$4 sm:$0xff]   ;;  %v976_v62 = vld [vmem:[%s1257_s3 + $0xc4] ss:$8 sps:$4 sm:$0xff]   ;;  %v274_v7 = vshrl.u32 %v273_v6, 7 }
  0x1a   : > { %v237_v58 = vpack.c.bf16 %v235_v56, %v233_v55  ;;  %v973_v60 = vld [vmem:[%s1257_s3 + $0xb4] ss:$8 sps:$4 sm:$0xff]   ;;  %v975_v61 = vld [vmem:[%s1257_s3 + $0xb0] ss:$8 sps:$4 sm:$0xff]   ;;  %v978_v63 = vld [vmem:[%s1257_s3 + $0xc0] ss:$8 sps:$4 sm:$0xff]  }
  0x1b   : > { %454 = vmatpush1.bf16.msra.mxu0 %v909_v11  ;;  %v979_v0 = vld [vmem:[%s1257_s3 + $0xd4] ss:$8 sps:$4 sm:$0xff]   ;;  %v981_v1 = vld [vmem:[%s1257_s3 + $0xd0] ss:$8 sps:$4 sm:$0xff]   ;;  %v982_v2 = vld [vmem:[%s1257_s3 + $0xe4] ss:$8 sps:$4 sm:$0xff]  }
  0x1c   : > { %455 = vmatprep.subr.bf16.mxu0 %v910_v12  ;;  %705 = vmatpush1.bf16.msra.mxu1 %v954_v33  ;;  %v984_v3 = vld [vmem:[%s1257_s3 + $0xe0] ss:$8 sps:$4 sm:$0xff]   ;;  %v985_v4 = vld [vmem:[%s1257_s3 + $0xf4] ss:$8 sps:$4 sm:$0xff]   ;;  %v987_v5 = vld [vmem:[%s1257_s3 + $0xf0] ss:$8 sps:$4 sm:$0xff]  }
  0x1d   : > { %706 = vmatprep.subr.bf16.mxu1 %v955_v35  ;;  %v275_v8 = vsub.s32 0, %v274_v7  ;;  %v271_v9 = vld [vmem:[%s1256_s2] sm:$0x3]  ;;  %v279_v10 = vsub.s32 1, %v274_v7 }
  0x1e   : > { %v524_v27 = vld [vmem:[%s1258_s4] sm:$0x3] }
  0x1f   : > { %456 = vmatpush1.bf16.msra.mxu0 %v912_v15  ;;  %v276_v11 = vrot.slane %v271_v9, %v275_v8  ;;  %v280_v12 = vrot.slane %v271_v9, %v279_v10  ;;  %v533_v29 = vrot.slane %v524_v27, %v279_v10 }
  0x20   : > { %457 = vmatprep.subr.bf16.mxu0 %v913_v16  ;;  %707 = vmatpush1.bf16.msra.mxu1 %v957_v37 }
  0x21   : > { %708 = vmatprep.subr.bf16.mxu1 %v958_v39 }
  0x23   : > { %458 = vmatpush1.bf16.msra.mxu0 %v915_v22 }
  0x24   : > { %459 = vmatprep.subr.bf16.mxu0 %v916_v24  ;;  %709 = vmatpush1.bf16.msra.mxu1 %v960_v41 }
  0x25   : > { %710 = vmatprep.subr.bf16.mxu1 %v961_v43 }
  0x27   : > { %460 = vmatpush1.bf16.msra.mxu0 %v918_v26 }
  0x28   : > { %461 = vmatprep.subr.bf16.mxu0 %v919_v28  ;;  %711 = vmatpush1.bf16.msra.mxu1 %v963_v45  ;;  %v529_v28 = vrot.slane %v524_v27, %v275_v8 }
  0x29   : > { %712 = vmatprep.subr.bf16.mxu1 %v964_v47 }
  0x2b   : > { %462 = vmatpush1.bf16.msra.mxu0 %v921_v30 }
  0x2c   : > { %463 = vmatprep.subr.bf16.mxu0 %v922_v32  ;;  %713 = vmatpush1.bf16.msra.mxu1 %v966_v49 }
  0x2d   : > { %714 = vmatprep.subr.bf16.mxu1 %v967_v51 }
  0x2f   : > { %464 = vmatpush1.bf16.msra.mxu0 %v924_v34 }
  0x30   : > { %465 = vmatprep.subr.bf16.mxu0 %v925_v36  ;;  %715 = vmatpush1.bf16.msra.mxu1 %v969_v54 }
  0x31   : > { %716 = vmatprep.subr.bf16.mxu1 %v970_v57 }
  0x33   : > { %466 = vmatpush1.bf16.msra.mxu0 %v927_v38 }
  0x34   : > { %467 = vmatprep.subr.bf16.mxu0 %v928_v40  ;;  %717 = vmatpush1.bf16.msra.mxu1 %v972_v59 }
  0x35   : > { %718 = vmatprep.subr.bf16.mxu1 %v973_v60 }
  0x37   : > { %468 = vmatpush1.bf16.msra.mxu0 %v930_v42 }
  0x38   : > { %469 = vmatprep.subr.bf16.mxu0 %v931_v44  ;;  %719 = vmatpush1.bf16.msra.mxu1 %v975_v61 }
  0x39   : > { %720 = vmatprep.subr.bf16.mxu1 %v976_v62 }
  0x3b   : > { %470 = vmatpush1.bf16.msra.mxu0 %v933_v46 }
  0x3c   : > { %471 = vmatprep.subr.bf16.mxu0 %v934_v48  ;;  %721 = vmatpush1.bf16.msra.mxu1 %v978_v63 }
  0x3d   : > { %722 = vmatprep.subr.bf16.mxu1 %v979_v0 }
  0x3f   : > { %472 = vmatpush1.bf16.msra.mxu0 %v936_v50 }
  0x40   : > { %473 = vmatprep.subr.bf16.mxu0 %v937_v52  ;;  %723 = vmatpush1.bf16.msra.mxu1 %v981_v1 }
  0x41   : > { %724 = vmatprep.subr.bf16.mxu1 %v982_v2 }
  0x43   : > { %474 = vmatpush1.bf16.msra.mxu0 %v939_v53 }
  0x44   : > { %725 = vmatpush1.bf16.msra.mxu1 %v984_v3 }
  0x45   : > { %726 = vmatprep.subr.bf16.mxu1 %v985_v4 }
  0x46   : > { %476 = vmatmul.mubr.bf16.vlgmr.msra.gmra.mrb[0].mxu0 %v237_v58 }
  0x48   : > { %727 = vmatpush1.bf16.msra.mxu1 %v987_v5 }
 0x119   : > { %v477_v13 = vpop.f32.mrb[0].mxu0 }
 0x11a   : > { %v478_v14 = vadd.f32 %v477_v13, %v276_v11  ;;  %v479_v15 = vpop.f32.mrb[1].mxu0 }
 0x11b   : > { %v480_v16 = vadd.f32 %v479_v15, %v280_v12  ;;  %v481_v17 = vpop.f32.mrb[2].mxu0 }
 0x11c   : > { %v482_v18 = vadd.f32 %v481_v17, %v276_v11  ;;  %v483_v19 = vpop.f32.mrb[3].mxu0  ;;  %v486_v21 = vmax.f32 %v478_v14, 0.0 }
 0x11d   : > { %v484_v20 = vadd.f32 %v483_v19, %v280_v12  ;;  %v487_v23 = vmax.f32 %v480_v16, 0.0 }
 0x11e   : > { %v488_v22 = vmax.f32 %v482_v18, 0.0 }
 0x11f   : > { %v489_v24 = vmax.f32 %v484_v20, 0.0 }
 0x120   : > { %v490_v25 = vpack.c.bf16 %v488_v22, %v486_v21 }
 0x121   : > { %v491_v26 = vpack.c.bf16 %v489_v24, %v487_v23 }
 0x123   : > { %728 = vmatprep.mubr.bf16.mxu1 %v491_v26 }
 0x124   : > { %729 = vmatmul.mubr.bf16.vlgmr.msra.gmra.mrb[0].mxu1 %v490_v25 }
 0x1f7   : > { %v730_v30 = vpop.f32.mrb[0].mxu1 }
 0x1f8   : > { %v731_v31 = vadd.f32 %v730_v30, %v529_v28  ;;  %v732_v32 = vpop.f32.mrb[1].mxu1 }
 0x1f9   : > { %v733_v33 = vadd.f32 %v732_v32, %v533_v29  ;;  %v734_v34 = vpop.f32.mrb[2].mxu1 }
 0x1fa   : > { %v739_v35 = vmax.f32 %v731_v31, 0.0  ;;  %v735_v36 = vadd.f32 %v734_v34, %v529_v28  ;;  %v736_v37 = vpop.f32.mrb[3].mxu1 }
 0x1fb   : > { %v740_v38 = vmax.f32 %v733_v33, 0.0  ;;  %v737_v39 = vadd.f32 %v736_v37, %v533_v29 }
 0x1fc   : > { %743 = vst [vmem:[%s231_s28] sm:$0xff] %v739_v35  ;;  %v741_v40 = vmax.f32 %v735_v36, 0.0 }
 0x1fd   : > { %744 = vst [vmem:[%s231_s28 + $0x8] sm:$0xff] %v740_v38  ;;  %v742_v41 = vmax.f32 %v737_v39, 0.0 }
 0x1fe   : > { %745 = vst [vmem:[%s231_s28 + $0x10] sm:$0xff] %v741_v40 }
 0x1ff   : > { %746 = vst [vmem:[%s231_s28 + $0x18] sm:$0xff] %v742_v41 }
 0x200 PF: > { %s15_s18 = sadd.s32 1, %s994_s18  }
 0x201   : > { %p12_p4 = scmp.ge.s32.totalorder %s15_s18, 4  }
 0x203   :  { %14 = sbr.rel (!%p12_p4) target bundleno = 1 (0x1), region = 70 }

// kernel: pct_forward.9
= control target key start
LH: loop header
LB: loop body
LE: loop exit
PB: predicated region body
PF: predicated region fallthrough
CT: control target
= control target key end

     0   :  { %s19002_s0 = inlined_call_operand.vmem [shape: f32[2,16,256], index: 0, kind: input, shape index: {}]   ;;  %s19003_s1 = inlined_call_operand.vmem [shape: f32[2,16,256], index: 1, kind: input, shape index: {}]   ;;  %s19004_s2 = inlined_call_operand.vmem [shape: bf16[4,256,384], index: 2, kind: input, shape index: {}]   ;;  %s19005_s3 = inlined_call_operand.vmem [shape: f32[4,1,384], index: 3, kind: input, shape index: {}]   ;;  %s19006_s4 = inlined_call_operand.vmem [shape: bf16[4,256,256], index: 4, kind: input, shape index: {}]   ;;  %s19007_s5 = inlined_call_operand.vmem [shape: f32[4,1,256], index: 5, kind: input, shape index: {}]   ;;  %s19008_s6 = inlined_call_operand.vmem [shape: bf16[1280,1024], index: 6, kind: input, shape index: {}]   ;;  %s19009_s7 = inlined_call_operand.vmem [shape: f32[1,1024], index: 7, kind: input, shape index: {}]   ;;  %s19010_s8 = inlined_call_operand.vmem [shape: bf16[1024,512], index: 8, kind: input, shape index: {}]   ;;  %s19011_s9 = inlined_call_operand.vmem [shape: f32[1,512], index: 9, kind: input, shape index: {}]   ;;  %s19012_s10 = inlined_call_operand.vmem [shape: bf16[512,256], index: 10, kind: input, shape index: {}]   ;;  %s19013_s11 = inlined_call_operand.vmem [shape: f32[1,256], index: 11, kind: input, shape index: {}]   ;;  %s19014_s12 = inlined_call_operand.vmem [shape: bf16[256,128], index: 12, kind: input, shape index: {}]   ;;  %s19015_s13 = inlined_call_operand.vmem [shape: f32[1,128], index: 13, kind: input, shape index: {}]   ;;  %s19016_s14 = inlined_call_operand.hbm [shape: f32[2,1,128], index: 14, kind: output, shape index: {}]  }
   0x1   :  { %19022 = sst [smem:[#allocation10_spill]] %s19002_s0 }
   0x2   :  { %19 = vsyncpa [#allocation4], 0 }
   0x3   :  { %21 = vsyncpa [#allocation4 + $0x1], 0  ;;  %s14589_s29 = smov 0   ;;  %s14591_s30 = smov 0  }
   0x4   :  { %s14593_s15 = smov 0   ;;  %s14595_s16 = smov 0  }
   0x5 LB: > { %19023 = sst [smem:[#allocation6_spill]] %s14503_s15  ;;  %s14610_s17 = sadd.s32 4294967295, %s14507_s16   ;;  %s14507_s16 = sphi %s14595_s16, %s19032_s16   ;;  %s14503_s15 = sphi %s14593_s15, %s19034_s15   ;;  %s14499_s30 = sphi %s14591_s30, %s19036_s30   ;;  %s14495_s29 = sphi %s14589_s29, %s19035_s29  }
   0x6   : > { %s11504_s18 = sadd.s32 4294967294, %s14507_s16   ;;  %s14614_s19 = sadd.s32 1, %s14507_s16  }
   0x7   : > { %19024 = sst [smem:[#allocation7_spill]] %s14614_s19  ;;  %s338_s20 = sadd.s32 1, %s14503_s15 }
   0x8   : > { %s335_s21 = ssub.s32 %s14507_s16, %s14614_s19  ;;  %p348_p0 = scmp.ne.s32.totalorder %s14503_s15, %s14499_s30 }
   0x9   : > { %p336_p1 = scmp.eq.s32.totalorder %s335_s21, 0  ;;  %p349_p2 = scmp.eq.s32.totalorder %s14610_s17, 1 }
   0xa   : > { %p354_p3 = scmp.ne.s32.totalorder %s14499_s30, %s14495_s29  ;;  %p355_p4 = scmp.eq.s32.totalorder %s11504_s18, 1 }
   0xb   : > { %s14625_s22 = scalar_select %p336_p1, %s14503_s15, %s338_s20  }
   0xc   : > { %p14627_p5 = por %p349_p2, %p348_p0  ;;  %p14631_p6 = por %p355_p4, %p354_p3 }
   0xd   : > { %19025 = sst [smem:[#allocation8_spill]] %s14625_s22  ;;  %p11507_p7 = scmp.ge.s32.totalorder %s14507_s16, 1 }
   0xe   : > { %s19027_s24 = scalar_select %p14631_p6, 1, 0 }
   0xf   : > { %p425_p8 = scmp.lt.s32.totalorder %s14507_s16, 3 }
  0x10   : > { %19028 = sst [smem:[#allocation9_spill]] %s19027_s24 }
  0x11   : > { %p426_p9 = pnand %p11507_p7, %p425_p8 }
  0x12   : > { %v13448_v0 = vld [vmem:[%s19004_s2 + $0xc8] ss:$12 sps:$4 sm:$0xff] (!%p426_p9)   ;;  %v13450_v2 = vld [vmem:[%s19004_s2 + $0xe0] ss:$12 sps:$4 sm:$0xff] (!%p426_p9)   ;;  %v13452_v4 = vld [vmem:[%s19004_s2 + $0xf8] ss:$12 sps:$4 sm:$0xff] (!%p426_p9)   ;;  %v559_v55 = vlaneseq (!%p426_p9) }
  0x13   : > { %429 = sbr.rel (%p426_p9) target bundleno = 7299 (0x1c83), region = 76  ;;  %v13449_v1 = vld [vmem:[%s19004_s2 + $0x8] ss:$12 sps:$4 sm:$0xff] (!%p426_p9)   ;;  %13115 = vmatprep.subr.bf16.mxu1 (!%p426_p9), %v13448_v0  ;;  %v13451_v3 = vld [vmem:[%s19004_s2 + $0x20] ss:$12 sps:$4 sm:$0xff] (!%p426_p9)   ;;  %p475_p10 = scmp.lt.s32.totalorder (!%p426_p9), %s14610_s17, 1 }
  0x14   : > { %13116 = vmatpush3.bf16.msra.mxu1 (!%p426_p9), %v13449_v1  ;;  %v13453_v5 = vld [vmem:[%s19004_s2 + $0x38] ss:$12 sps:$4 sm:$0xff] (!%p426_p9)   ;;  %v13454_v6 = vld [vmem:[%s19004_s2 + $0x110] ss:$12 sps:$4 sm:$0xff] (!%p426_p9)   ;;  %v13456_v8 = vld [vmem:[%s19004_s2 + $0x128] ss:$12 sps:$4 sm:$0xff] (!%p426_p9)  }
  0x15   : > { %13117 = vmatprep.subr.bf16.mxu1 (!%p426_p9), %v13450_v2  ;;  %v13455_v7 = vld [vmem:[%s19004_s2 + $0x50] ss:$12 sps:$4 sm:$0xff] (!%p426_p9)   ;;  %v13457_v9 = vld [vmem:[%s19004_s2 + $0x68] ss:$12 sps:$4 sm:$0xff] (!%p426_p9)   ;;  %v13458_v10 = vld [vmem:[%s19004_s2 + $0x140] ss:$12 sps:$4 sm:$0xff] (!%p426_p9)  }
  0x16   : > { %v13464_v11 = vld [vmem:[%s19004_s2 + $0x4] ss:$12 sps:$4 sm:$0xff] (!%p426_p9)   ;;  %v13466_v12 = vld [vmem:[%s19004_s2] ss:$12 sps:$4 sm:$0xff] (!%p426_p9)   ;;  %v13467_v14 = vld [vmem:[%s19004_s2 + $0x1c] ss:$12 sps:$4 sm:$0xff] (!%p426_p9)  }
  0x17   : > { %v13459_v13 = vld [vmem:[%s19004_s2 + $0x80] ss:$12 sps:$4 sm:$0xff] (!%p426_p9)   ;;  %830 = vmatprep.subr.bf16.mxu0 (!%p426_p9), %v13464_v11  ;;  %v13460_v15 = vld [vmem:[%s19004_s2 + $0x158] ss:$12 sps:$4 sm:$0xff] (!%p426_p9)   ;;  %s19029_s0 = sld [smem:[#allocation10_spill]] (!%p426_p9)  ;;  %v14509_v54 = vmov (!%p426_p9), 0.0  }
  0x18   : > { %13118 = vmatpush3.bf16.msra.mxu1 (!%p426_p9), %v13451_v3  ;;  %831 = vmatpush1.bf16.msra.mxu0 (!%p426_p9), %v13466_v12  ;;  %v13469_v16 = vld [vmem:[%s19004_s2 + $0x18] ss:$12 sps:$4 sm:$0xff] (!%p426_p9)   ;;  %v13470_v17 = vld [vmem:[%s19004_s2 + $0x34] ss:$12 sps:$4 sm:$0xff] (!%p426_p9)   ;;  %v13462_v21 = vld [vmem:[%s19004_s2 + $0x170] ss:$12 sps:$4 sm:$0xff] (!%p426_p9)  }
  0x19   : > { %13119 = vmatprep.subr.bf16.mxu1 (!%p426_p9), %v13452_v4  ;;  %832 = vmatprep.subr.bf16.mxu0 (!%p426_p9), %v13467_v14  ;;  %v13461_v20 = vld [vmem:[%s19004_s2 + $0x98] ss:$12 sps:$4 sm:$0xff] (!%p426_p9)   ;;  %v13472_v23 = vld [vmem:[%s19004_s2 + $0x30] ss:$12 sps:$4 sm:$0xff] (!%p426_p9)   ;;  %v13475_v26 = vld [vmem:[%s19004_s2 + $0x48] ss:$12 sps:$4 sm:$0xff] (!%p426_p9)  }
  0x1a   : > { %s14681_s19 = scalar_select %p475_p10, %s14610_s17, 1  ;;  %v13473_v24 = vld [vmem:[%s19004_s2 + $0x4c] ss:$12 sps:$4 sm:$0xff]   ;;  %v13463_v25 = vld [vmem:[%s19004_s2 + $0xb0] ss:$12 sps:$4 sm:$0xff]   ;;  %vm14510_vm0 = vmmov 0  }
  0x1b   : > { %v13476_v29 = vld [vmem:[%s19004_s2 + $0x64] ss:$12 sps:$4 sm:$0xff]   ;;  %v13478_v31 = vld [vmem:[%s19004_s2 + $0x60] ss:$12 sps:$4 sm:$0xff]   ;;  %v13479_v32 = vld [vmem:[%s19004_s2 + $0x7c] ss:$12 sps:$4 sm:$0xff]  }
  0x1c   : > { %13120 = vmatpush3.bf16.msra.mxu1 %v13453_v5  ;;  %s19021_s18 = sshll.u32 %s14681_s19, 5  ;;  %833 = vmatpush1.bf16.msra.mxu0 %v13469_v16  ;;  %v13481_v33 = vld [vmem:[%s19004_s2 + $0x78] ss:$12 sps:$4 sm:$0xff]   ;;  %v13482_v34 = vld [vmem:[%s19004_s2 + $0x94] ss:$12 sps:$4 sm:$0xff]   ;;  %v14803_v56 = vshrl.u32 %v559_v55, 7 }
  0x1d   : > { %13121 = vmatprep.subr.bf16.mxu1 %v13454_v6  ;;  %s14701_s24 = scalar_lea.vmem %s19029_s0, %s19021_s18  ;;  %834 = vmatprep.subr.bf16.mxu0 %v13470_v17  ;;  %v13484_v35 = vld [vmem:[%s19004_s2 + $0x90] ss:$12 sps:$4 sm:$0xff]   ;;  %v13485_v36 = vld [vmem:[%s19004_s2 + $0xac] ss:$12 sps:$4 sm:$0xff]   ;;  %v13487_v37 = vld [vmem:[%s19004_s2 + $0xa8] ss:$12 sps:$4 sm:$0xff]  }
  0x1e   : > { %v488_v18 = vld [vmem:[%s14701_s24 + $0x8] sm:$0xff]  ;;  %v490_v19 = vld [vmem:[%s14701_s24 + $0x18] sm:$0xff]  ;;  %v487_v27 = vld [vmem:[%s14701_s24] sm:$0xff]  ;;  %v14809_v58 = vsub.s32 2, %v14803_v56  ;;  %v14813_v5 = vsub.s32 0, %v14803_v56  ;;  %v14816_v6 = vsub.s32 1, %v14803_v56 }
  0x1f   : > { %v492_v22 = vpack.c.bf16 %v490_v19, %v488_v18  ;;  %v489_v28 = vld [vmem:[%s14701_s24 + $0x10] sm:$0xff]  ;;  %v13490_v39 = vld [vmem:[%s19004_s2 + $0xc0] ss:$12 sps:$4 sm:$0xff]   ;;  %v13491_v40 = vld [vmem:[%s19004_s2 + $0xdc] ss:$12 sps:$4 sm:$0xff]   ;;  %vm956_vm1 = vcmask 130048  }
  0x20   : > { %13122 = vmatpush3.bf16.msra.mxu1 %v13455_v7  ;;  %835 = vmatpush1.bf16.msra.mxu0 %v13472_v23  ;;  %v491_v30 = vpack.c.bf16 %v489_v28, %v487_v27  ;;  %v13488_v38 = vld [vmem:[%s19004_s2 + $0xc4] ss:$12 sps:$4 sm:$0xff]   ;;  %v13494_v42 = vld [vmem:[%s19004_s2 + $0xf4] ss:$12 sps:$4 sm:$0xff]   ;;  %v13497_v44 = vld [vmem:[%s19004_s2 + $0x10c] ss:$12 sps:$4 sm:$0xff]  }
  0x21   : > { %13123 = vmatprep.subr.bf16.mxu1 %v13456_v8  ;;  %905 = vmatprep.mubr.bf16.mxu1 %v492_v22  ;;  %v13493_v41 = vld [vmem:[%s19004_s2 + $0xd8] ss:$12 sps:$4 sm:$0xff]   ;;  %v13496_v43 = vld [vmem:[%s19004_s2 + $0xf0] ss:$12 sps:$4 sm:$0xff]   ;;  %v13499_v45 = vld [vmem:[%s19004_s2 + $0x108] ss:$12 sps:$4 sm:$0xff]  }
  0x22   : > { %862 = vmatprep.mubr.bf16.mxu0 %v492_v22  ;;  %836 = vmatprep.subr.bf16.mxu0 %v13473_v24  ;;  %v13500_v46 = vld [vmem:[%s19004_s2 + $0x124] ss:$12 sps:$4 sm:$0xff]   ;;  %v13502_v47 = vld [vmem:[%s19004_s2 + $0x120] ss:$12 sps:$4 sm:$0xff]   ;;  %v13503_v48 = vld [vmem:[%s19004_s2 + $0x13c] ss:$12 sps:$4 sm:$0xff]  }
  0x23   : > { %v13505_v49 = vld [vmem:[%s19004_s2 + $0x138] ss:$12 sps:$4 sm:$0xff]   ;;  %v13506_v50 = vld [vmem:[%s19004_s2 + $0x154] ss:$12 sps:$4 sm:$0xff]   ;;  %v13508_v51 = vld [vmem:[%s19004_s2 + $0x150] ss:$12 sps:$4 sm:$0xff]  }
  0x24   : > { %13124 = vmatpush3.bf16.msra.mxu1 %v13457_v9  ;;  %837 = vmatpush1.bf16.msra.mxu0 %v13475_v26  ;;  %v13509_v52 = vld [vmem:[%s19004_s2 + $0x16c] ss:$12 sps:$4 sm:$0xff]   ;;  %v13511_v53 = vld [vmem:[%s19004_s2 + $0x168] ss:$12 sps:$4 sm:$0xff]   ;;  %v557_v57 = vld [vmem:[%s19005_s3] sm:$0x7] }
  0x25   : > { %13125 = vmatprep.subr.bf16.mxu1 %v13458_v10  ;;  %838 = vmatprep.subr.bf16.mxu0 %v13476_v29  ;;  %v570_v61 = vrot.slane %v557_v57, %v14809_v58  ;;  %v562_v7 = vrot.slane %v557_v57, %v14813_v5  ;;  %v566_v8 = vrot.slane %v557_v57, %v14816_v6  ;;  %v13524_v55 = vld [vmem:[%s19006_s4 + $0x40] ss:$8 sps:$4 sm:$0xff]   ;;  %v13529_v57 = vld [vmem:[%s19006_s4 + $0x54] ss:$8 sps:$4 sm:$0xff]   ;;  %s19030_s21 = sshll.u32 %s14681_s19, 5  ;;  %s473_s18 = sand.u32 1, %s14499_s30  }
  0x26   : > { %s16619_s26 = scalar_lea.vmem %s19003_s1, %s19030_s21  ;;  %s474_s27 = scalar_lea.vmem [#allocation3], %s473_s18 }
  0x27   : > { %s11437_s28 = sshll.u32 %s474_s27, 4  ;;  %s11425_s20 = scalar_lea.sflag [#allocation4], %s473_s18  ;;  %s18962_s28 = int_to_ptr.vmem [resolvable:$true] %s11437_s28 }
  0x28   : > { %13126 = vmatpush3.bf16.msra.mxu1 %v13459_v13  ;;  %839 = vmatpush1.bf16.msra.mxu0 %v13478_v31  ;;  %s14445_s15 = scalar_lea.vmem %s18962_s28, 16 }
  0x29   : > { %13127 = vmatprep.subr.bf16.mxu1 %v13460_v15  ;;  %840 = vmatprep.subr.bf16.mxu0 %v13479_v32  ;;  %p14446_p11 = scmp.ne.s32.totalorder %s18962_s28, %s14445_s15 }
  0x2b   : > { %p14447_p12 = pnand %p14446_p11, %p14627_p5 }
  0x2c   : > { %13128 = vmatpush3.bf16.msra.mxu1 %v13461_v20  ;;  %841 = vmatpush1.bf16.msra.mxu0 %v13481_v33 }
  0x2d   : > { %13129 = vmatprep.subr.bf16.mxu1 %v13462_v21  ;;  %842 = vmatprep.subr.bf16.mxu0 %v13482_v34  ;;  %p14448_p13 = pneg %p14447_p12 }
  0x30   : > { %13130 = vmatpush3.bf16.msra.mxu1 %v13463_v25  ;;  %843 = vmatpush1.bf16.msra.mxu0 %v13484_v35  ;;  %v14511_v35 = vmov 1065369472  }
  0x31   : > { %844 = vmatprep.subr.bf16.mxu0 %v13485_v36  ;;  %13247 = vmatprep.subr.bf16.mxu1 %v14509_v54  ;;  %v14512_v36 = vmov 0  }
  0x32   : > { %13446 = vset.pattern.permute.xlu1 %v14512_v36 }
  0x33   : > { %906 = vmatmul.mubr.bf16.vlgmr.msra.gmra.mrb[0].mxu1 %v491_v30 }
  0x34   : > { %845 = vmatpush1.bf16.msra.mxu0 %v13487_v37  ;;  %13249 = vmatprep.mubr.msk.bf16.mxu1 %vm14510_vm0, %v14509_v54 }
  0x35   : > { %846 = vmatprep.subr.bf16.mxu0 %v13488_v38  ;;  %13248 = vmatpush3.bf16.msra.mxu1 %v14511_v35 }
  0x38   : > { %847 = vmatpush1.bf16.msra.mxu0 %v13490_v39 }
  0x39   : > { %848 = vmatprep.subr.bf16.mxu0 %v13491_v40 }
  0x3c   : > { %849 = vmatpush1.bf16.msra.mxu0 %v13493_v41 }
  0x3d   : > { %850 = vmatprep.subr.bf16.mxu0 %v13494_v42 }
  0x40   : > { %851 = vmatpush1.bf16.msra.mxu0 %v13496_v43 }
  0x41   : > { %852 = vmatprep.subr.bf16.mxu0 %v13497_v44 }
  0x44   : > { %853 = vmatpush1.bf16.msra.mxu0 %v13499_v45  ;;  %v13512_v45 = vld [vmem:[%s19006_s4] ss:$8 sps:$4 sm:$0xff]  }
  0x45   : > { %854 = vmatprep.subr.bf16.mxu0 %v13500_v46  ;;  %v13514_v46 = vld [vmem:[%s19006_s4 + $0x4] ss:$8 sps:$4 sm:$0xff]  }
  0x46   : > { %1311 = vmatprep.subr.bf16.mxu1 %v13514_v46  ;;  %v13578_v46 = vld [vmem:[%s19004_s2 + $0x210] ss:$12 sps:$4 sm:$0xff]  }
  0x48   : > { %855 = vmatpush1.bf16.msra.mxu0 %v13502_v47  ;;  %v13517_v47 = vld [vmem:[%s19006_s4 + $0x14] ss:$8 sps:$4 sm:$0xff]  }
  0x49   : > { %856 = vmatprep.subr.bf16.mxu0 %v13503_v48  ;;  %v13515_v48 = vld [vmem:[%s19006_s4 + $0x10] ss:$8 sps:$4 sm:$0xff]  }
  0x4c   : > { %857 = vmatpush1.bf16.msra.mxu0 %v13505_v49  ;;  %v13520_v49 = vld [vmem:[%s19006_s4 + $0x24] ss:$8 sps:$4 sm:$0xff]  }
  0x4d   : > { %858 = vmatprep.subr.bf16.mxu0 %v13506_v50  ;;  %v13518_v50 = vld [vmem:[%s19006_s4 + $0x20] ss:$8 sps:$4 sm:$0xff]  }
  0x50   : > { %859 = vmatpush1.bf16.msra.mxu0 %v13508_v51  ;;  %v13523_v51 = vld [vmem:[%s19006_s4 + $0x34] ss:$8 sps:$4 sm:$0xff]  }
  0x51   : > { %860 = vmatprep.subr.bf16.mxu0 %v13509_v52  ;;  %v13521_v52 = vld [vmem:[%s19006_s4 + $0x30] ss:$8 sps:$4 sm:$0xff]  }
  0x54   : > { %861 = vmatpush1.bf16.msra.mxu0 %v13511_v53  ;;  %v13526_v53 = vld [vmem:[%s19006_s4 + $0x44] ss:$8 sps:$4 sm:$0xff]  }
  0x55   : > { %13241 = vmatprep.subr.bf16.mxu0 %v14509_v54 }
  0x57   : > { %863 = vmatmul.mubr.bf16.vlgmr.msra.gmra.mrb[0].mxu0 %v491_v30 }
  0x58   : > { %13243 = vmatprep.mubr.msk.bf16.mxu0 %vm14510_vm0, %v14509_v54 }
 0x106   : > { %v13131_v59 = vpop.f32.mrb[0].mxu1 }
 0x107   : > { %v13132_v60 = vpop.f32.mrb[1].mxu1 }
 0x108   : > { %v13133_v62 = vadd.f32 %v13132_v60, %v13131_v59  ;;  %v13134_v63 = vpop.f32.mrb[2].mxu1  ;;  %v13527_v59 = vld [vmem:[%s19006_s4 + $0x50] ss:$8 sps:$4 sm:$0xff]   ;;  %v13532_v60 = vld [vmem:[%s19006_s4 + $0x64] ss:$8 sps:$4 sm:$0xff]  }
 0x109   : > { %v13135_v0 = vpop.f32.mrb[3].mxu1 }
 0x10a   : > { %v13136_v1 = vadd.f32 %v13135_v0, %v13134_v63  ;;  %v908_v2 = vadd.f32 %v13133_v62, %v570_v61  ;;  %v13535_v62 = vld [vmem:[%s19006_s4 + $0x74] ss:$8 sps:$4 sm:$0xff]   ;;  %v13533_v63 = vld [vmem:[%s19006_s4 + $0x70] ss:$8 sps:$4 sm:$0xff]   ;;  %v13538_v0 = vld [vmem:[%s19006_s4 + $0x84] ss:$8 sps:$4 sm:$0xff]  }
 0x10c   : > { %v911_v3 = vadd.f32 %v13136_v1, %v570_v61  ;;  %v13530_v61 = vld [vmem:[%s19006_s4 + $0x60] ss:$8 sps:$4 sm:$0xff]  }
 0x10d   : > { %v13536_v1 = vld [vmem:[%s19006_s4 + $0x80] ss:$8 sps:$4 sm:$0xff]  }
 0x10e   : > { %v914_v4 = vpack.c.bf16 %v911_v3, %v908_v2  ;;  %v13541_v2 = vld [vmem:[%s19006_s4 + $0x94] ss:$8 sps:$4 sm:$0xff]   ;;  %v13539_v3 = vld [vmem:[%s19006_s4 + $0x90] ss:$8 sps:$4 sm:$0xff]  }
 0x110   : > { %13242 = vmatpush3.bf16.xpose.msra.mxu0 %v914_v4 }
 0x117   : > { %13244 = vmatmul.mubr.bf16.vlgmr.msra.gmra.mrb[4].mxu0 %v914_v4  ;;  %v13544_v4 = vld [vmem:[%s19006_s4 + $0xa4] ss:$8 sps:$4 sm:$0xff]  }
 0x118   : > { %1033 = vmatprep.mubr.bf16.mxu0 %v14512_v36 }
 0x12a   : > { %v864_v9 = vpop.f32.mrb[0].mxu0 }
 0x12b   : > { %v865_v10 = vadd.f32 %v864_v9, %v562_v7  ;;  %v866_v11 = vpop.f32.mrb[1].mxu0  ;;  %v13545_v9 = vld [vmem:[%s19006_s4 + $0xb0] ss:$8 sps:$4 sm:$0xff]  }
 0x12c   : > { %v867_v12 = vadd.f32 %v866_v11, %v566_v8  ;;  %v868_v13 = vpop.f32.mrb[2].mxu0  ;;  %v13548_v11 = vld [vmem:[%s19006_s4 + $0xc0] ss:$8 sps:$4 sm:$0xff]  }
 0x12d   : > { %v869_v14 = vadd.f32 %v868_v13, %v562_v7  ;;  %v870_v15 = vpop.f32.mrb[3].mxu0  ;;  %v13542_v7 = vld [vmem:[%s19006_s4 + $0xa0] ss:$8 sps:$4 sm:$0xff]   ;;  %v13551_v13 = vld [vmem:[%s19006_s4 + $0xd0] ss:$8 sps:$4 sm:$0xff]  }
 0x12e   : > { %v871_v16 = vadd.f32 %v870_v15, %v566_v8  ;;  %v13547_v8 = vld [vmem:[%s19006_s4 + $0xb4] ss:$8 sps:$4 sm:$0xff]  }
 0x12f   : > { %v980_v17 = vpack.c.bf16 %v869_v14, %v865_v10  ;;  %v13550_v10 = vld [vmem:[%s19006_s4 + $0xc4] ss:$8 sps:$4 sm:$0xff]  }
 0x130   : > { %v981_v18 = vpack.c.bf16 %v871_v16, %v867_v12  ;;  %v13553_v12 = vld [vmem:[%s19006_s4 + $0xd4] ss:$8 sps:$4 sm:$0xff]  }
 0x132   : > { %1001 = vmatprep.subr.bf16.mxu0 %v981_v18 }
 0x133   : > { %1002 = vmatpush1.bf16.msra.mxu0 %v980_v17 }
 0x1ea   : > { %v949_v19 = vpop.f32.mrb[4].mxu0 }
 0x1eb   : > { %v13245_v20 = vpop.f32.mrb[5].mxu0  ;;  %v957_v21 = vsel %vm956_vm1, %v949_v19, -inf }
 0x1ec   : > { %958 = vmax.xlane.f32.xlu0 %v957_v21  ;;  %v952_v22 = vpop.f32.mrb[6].mxu0 }
 0x1ed   : > { %v13246_v23 = vpop.f32.mrb[7].mxu0  ;;  %v960_v24 = vsel %vm956_vm1, %v952_v22, -inf }
 0x1f0   : > { %961 = vmax.xlane.f32.xlu0 %v960_v24 }
 0x279   : > { %v959_v25 = vpop.xlane.xlu0 %958 }
 0x27a   : > { %v963_v26 = vsub.f32 %v949_v19, %v959_v25  ;;  %v13556_v25 = vld [vmem:[%s19006_s4 + $0xe4] ss:$8 sps:$4 sm:$0xff]  }
 0x27c   : > { %v965_v27 = vmul.f32 1.442695, %v963_v26  ;;  %v13554_v26 = vld [vmem:[%s19006_s4 + $0xe0] ss:$8 sps:$4 sm:$0xff]  }
 0x27d   : > { %v962_v28 = vpop.xlane.xlu0 %961 }
 0x27e   : > { %14392 = vpow2.f32 %v965_v27  ;;  %v964_v29 = vsub.f32 %v952_v22, %v962_v28  ;;  %v13559_v28 = vld [vmem:[%s19006_s4 + $0xf4] ss:$8 sps:$4 sm:$0xff]  }
 0x280   : > { %v967_v30 = vmul.f32 1.442695, %v964_v29  ;;  %v13557_v29 = vld [vmem:[%s19006_s4 + $0xf0] ss:$8 sps:$4 sm:$0xff]  }
 0x282   : > { %14394 = vpow2.f32 %v967_v30  ;;  %v13560_v30 = vld [vmem:[%s19004_s2 + $0x180] ss:$12 sps:$4 sm:$0xff]  }
 0x288   : > { %v14393_v31 = vpop.eup %14392 }
 0x289   : > { %v969_v32 = vsel %vm956_vm1, %v14393_v31, 0.0 }
 0x28a   : > { %970 = vadd.xlane.f32.xlu1 %v969_v32  ;;  %v13565_v32 = vld [vmem:[%s19004_s2 + $0x19c] ss:$12 sps:$4 sm:$0xff]  }
 0x28c   : > { %v14395_v33 = vpop.eup %14394 }
 0x28d   : > { %v972_v34 = vsel %vm956_vm1, %v14395_v33, 0.0 }
 0x28e   : > { %973 = vadd.xlane.f32.xlu1 %v972_v34  ;;  %v13568_v34 = vld [vmem:[%s19004_s2 + $0x1b4] ss:$12 sps:$4 sm:$0xff]  }
 0x317   : > { %v971_v37 = vpop.xlane.xlu1 %970 }
 0x318   : > { %14396 = vrcp.f32 %v971_v37  ;;  %v13587_v37 = vld [vmem:[%s19004_s2 + $0x248] ss:$12 sps:$4 sm:$0xff]  }
 0x31b   : > { %v974_v38 = vpop.xlane.xlu1 %973 }
 0x31c   : > { %14398 = vrcp.f32 %v974_v38  ;;  %v13566_v38 = vld [vmem:[%s19004_s2 + $0x1b0] ss:$12 sps:$4 sm:$0xff]  }
 0x322   : > { %v14397_v39 = vpop.eup %14396 }
 0x323   : > { %v977_v41 = vmul.f32 %v14397_v39, %v14393_v31  ;;  %v13562_v31 = vld [vmem:[%s19004_s2 + $0x184] ss:$12 sps:$4 sm:$0xff]   ;;  %v13571_v39 = vld [vmem:[%s19004_s2 + $0x1cc] ss:$12 sps:$4 sm:$0xff]  }
 0x324   : > { %1705 = vmatprep.subr.bf16.mxu0 %v13562_v31  ;;  %v13614_v31 = vld [vmem:[%s19004_s2 + $0x2d0] ss:$12 sps:$4 sm:$0xff]  }
 0x326   : > { %v14399_v40 = vpop.eup %14398 }
 0x327   : > { %v978_v42 = vmul.f32 %v14399_v40, %v14395_v33  ;;  %v13563_v33 = vld [vmem:[%s19004_s2 + $0x198] ss:$12 sps:$4 sm:$0xff]   ;;  %v13569_v40 = vld [vmem:[%s19004_s2 + $0x1c8] ss:$12 sps:$4 sm:$0xff]  }
 0x329   : > { %v979_v43 = vpack.c.bf16 %v978_v42, %v977_v41  ;;  %v13574_v41 = vld [vmem:[%s19004_s2 + $0x1e4] ss:$12 sps:$4 sm:$0xff]   ;;  %v13572_v42 = vld [vmem:[%s19004_s2 + $0x1e0] ss:$12 sps:$4 sm:$0xff]  }
 0x32b   : > { %982 = vxpose.xlu0.c.b16.start.end [1/1] (short) (narrow) %v979_v43, 16  ;;  %v13577_v43 = vld [vmem:[%s19004_s2 + $0x1fc] ss:$12 sps:$4 sm:$0xff]  }
 0x334   : > { %13447 = vset.pattern.permute.xlu0 %v14512_v36 }
 0x391   : > { %v990_v44 = vpop.trf.xlu0 }
 0x392   : > { %11560 = vmatmul.mubr.msk.bf16.vlgmr.msra.gmra.mrb[8].mxu0 %vm956_vm1, %v990_v44  ;;  %13250 = vmatmul.mubr.msk.bf16.vlgmr.msra.gmra.mrb[4].mxu1 %vm956_vm1, %v990_v44  ;;  %v13575_v44 = vld [vmem:[%s19004_s2 + $0x1f8] ss:$12 sps:$4 sm:$0xff]  }
 0x393   : > { %1312 = vmatpush1.bf16.msra.mxu1 %v13512_v45  ;;  %1706 = vmatpush1.bf16.msra.mxu0 %v13560_v30  ;;  %v13580_v45 = vld [vmem:[%s19004_s2 + $0x214] ss:$12 sps:$4 sm:$0xff]   ;;  %v13617_v30 = vld [vmem:[%s19004_s2 + $0x2d8] ss:$12 sps:$4 sm:$0xff]  }
 0x394   : > { %1313 = vmatprep.subr.bf16.mxu1 %v13517_v47  ;;  %1707 = vmatprep.subr.bf16.mxu0 %v13565_v32  ;;  %v13583_v47 = vld [vmem:[%s19004_s2 + $0x22c] ss:$12 sps:$4 sm:$0xff]  }
 0x395   : > { %v13618_v32 = vld [vmem:[%s19004_s2 + $0x218] ss:$12 sps:$4 sm:$0xff]  }
 0x397   : > { %1314 = vmatpush1.bf16.msra.mxu1 %v13515_v48  ;;  %1708 = vmatpush1.bf16.msra.mxu0 %v13563_v33  ;;  %v13581_v48 = vld [vmem:[%s19004_s2 + $0x228] ss:$12 sps:$4 sm:$0xff]   ;;  %v13621_v33 = vld [vmem:[%s19004_s2 + $0x2ec] ss:$12 sps:$4 sm:$0xff]  }
 0x398   : > { %1315 = vmatprep.subr.bf16.mxu1 %v13520_v49  ;;  %1709 = vmatprep.subr.bf16.mxu0 %v13568_v34  ;;  %v13586_v49 = vld [vmem:[%s19004_s2 + $0x244] ss:$12 sps:$4 sm:$0xff]  }
 0x399   : > { %v13622_v34 = vld [vmem:[%s19004_s2 + $0x2f0] ss:$12 sps:$4 sm:$0xff]  }
 0x39b   : > { %1316 = vmatpush1.bf16.msra.mxu1 %v13518_v50  ;;  %1710 = vmatpush1.bf16.msra.mxu0 %v13566_v38  ;;  %v13584_v50 = vld [vmem:[%s19004_s2 + $0x240] ss:$12 sps:$4 sm:$0xff]   ;;  %v13623_v38 = vld [vmem:[%s19004_s2 + $0x230] ss:$12 sps:$4 sm:$0xff]  }
 0x39c   : > { %1317 = vmatprep.subr.bf16.mxu1 %v13523_v51  ;;  %1711 = vmatprep.subr.bf16.mxu0 %v13571_v39  ;;  %v13591_v51 = vld [vmem:[%s19004_s2 + $0x25c] ss:$12 sps:$4 sm:$0xff]   ;;  %v1139_v39 = vld [vmem:[%s19007_s5] sm:$0x3] }
 0x39f   : > { %1318 = vmatpush1.bf16.msra.mxu1 %v13521_v52  ;;  %1712 = vmatpush1.bf16.msra.mxu0 %v13569_v40  ;;  %v13589_v52 = vld [vmem:[%s19004_s2 + $0x258] ss:$12 sps:$4 sm:$0xff]   ;;  %v1144_v40 = vrot.slane %v1139_v39, %v14813_v5 }
 0x3a0   : > { %1319 = vmatprep.subr.bf16.mxu1 %v13526_v53  ;;  %1713 = vmatprep.subr.bf16.mxu0 %v13574_v41  ;;  %v13596_v53 = vld [vmem:[%s19004_s2 + $0x274] ss:$12 sps:$4 sm:$0xff]   ;;  %v1148_v41 = vrot.slane %v1139_v39, %v14816_v6 }
 0x3a3   : > { %1320 = vmatpush1.bf16.msra.mxu1 %v13524_v55  ;;  %1714 = vmatpush1.bf16.msra.mxu0 %v13572_v42  ;;  %v13594_v55 = vld [vmem:[%s19004_s2 + $0x270] ss:$12 sps:$4 sm:$0xff]  }
 0x3a4   : > { %1321 = vmatprep.subr.bf16.mxu1 %v13529_v57  ;;  %1715 = vmatprep.subr.bf16.mxu0 %v13577_v43  ;;  %v13601_v57 = vld [vmem:[%s19004_s2 + $0x28c] ss:$12 sps:$4 sm:$0xff]  }
 0x3a7   : > { %1322 = vmatpush1.bf16.msra.mxu1 %v13527_v59  ;;  %1716 = vmatpush1.bf16.msra.mxu0 %v13575_v44  ;;  %v13599_v59 = vld [vmem:[%s19004_s2 + $0x288] ss:$12 sps:$4 sm:$0xff]  }
 0x3a8   : > { %1323 = vmatprep.subr.bf16.mxu1 %v13532_v60  ;;  %1717 = vmatprep.subr.bf16.mxu0 %v13580_v45  ;;  %v13606_v60 = vld [vmem:[%s19004_s2 + $0x2a4] ss:$12 sps:$4 sm:$0xff]  }
 0x3ab   : > { %1324 = vmatpush1.bf16.msra.mxu1 %v13530_v61  ;;  %1718 = vmatpush1.bf16.msra.mxu0 %v13578_v46  ;;  %v13604_v61 = vld [vmem:[%s19004_s2 + $0x2a0] ss:$12 sps:$4 sm:$0xff]  }
 0x3ac   : > { %1325 = vmatprep.subr.bf16.mxu1 %v13535_v62  ;;  %1719 = vmatprep.subr.bf16.mxu0 %v13583_v47 }
 0x3af   : > { %1326 = vmatpush1.bf16.msra.mxu1 %v13533_v63  ;;  %1720 = vmatpush1.bf16.msra.mxu0 %v13581_v48 }
 0x3b0   : > { %1327 = vmatprep.subr.bf16.mxu1 %v13538_v0  ;;  %1721 = vmatprep.subr.bf16.mxu0 %v13586_v49 }
 0x3b3   : > { %1328 = vmatpush1.bf16.msra.mxu1 %v13536_v1  ;;  %1722 = vmatpush1.bf16.msra.mxu0 %v13584_v50 }
 0x3b4   : > { %1329 = vmatprep.subr.bf16.mxu1 %v13541_v2  ;;  %1723 = vmatprep.subr.bf16.mxu0 %v13591_v51 }
 0x3b7   : > { %1330 = vmatpush1.bf16.msra.mxu1 %v13539_v3  ;;  %1724 = vmatpush1.bf16.msra.mxu0 %v13589_v52 }
 0x3b8   : > { %1331 = vmatprep.subr.bf16.mxu1 %v13544_v4  ;;  %1725 = vmatprep.subr.bf16.mxu0 %v13596_v53  ;;  %v15020_v4 = vld [vmem:[%s14701_s24] sm:$0xff] }
 0x3bb   : > { %1332 = vmatpush1.bf16.msra.mxu1 %v13542_v7  ;;  %1726 = vmatpush1.bf16.msra.mxu0 %v13594_v55 }
 0x3bc   : > { %1333 = vmatprep.subr.bf16.mxu1 %v13547_v8  ;;  %1727 = vmatprep.subr.bf16.mxu0 %v13601_v57  ;;  %v15024_v8 = vld [vmem:[%s14701_s24 + $0x8] sm:$0xff] }
 0x3bf   : > { %1334 = vmatpush1.bf16.msra.mxu1 %v13545_v9  ;;  %1728 = vmatpush1.bf16.msra.mxu0 %v13599_v59 }
 0x3c0   : > { %1335 = vmatprep.subr.bf16.mxu1 %v13550_v10  ;;  %1729 = vmatprep.subr.bf16.mxu0 %v13606_v60  ;;  %v15028_v10 = vld [vmem:[%s14701_s24 + $0x10] sm:$0xff] }
 0x3c3   : > { %1336 = vmatpush1.bf16.msra.mxu1 %v13548_v11  ;;  %1730 = vmatpush1.bf16.msra.mxu0 %v13604_v61 }
 0x3c4   : > { %1337 = vmatprep.subr.bf16.mxu1 %v13553_v12  ;;  %v15032_v12 = vld [vmem:[%s14701_s24 + $0x18] sm:$0xff]  ;;  %s13110_s24 = sshll.u32 %s14610_s17, 4  ;;  %s14513_s17 = smov [#allocation3]  }
 0x3c5   : > { %s18960_s22 = scalar_lea.hbm %s19016_s14, %s13110_s24  ;;  %s14449_s0 = sshll.u32 %s14513_s17, 4  ;;  %s14450_s0 = int_to_ptr.vmem [resolvable:$false] %s14449_s0 }
 0x3c6   : > { %s14451_s21 = scalar_lea.vmem %s14450_s0, 32  ;;  %p14452_p0 = scmp.lt.s32.totalorder %s18962_s28, %s14450_s0 }
 0x3c7   : > { %1338 = vmatpush1.bf16.msra.mxu1 %v13551_v13  ;;  %p14453_p1 = scmp.lt.s32.totalorder %s14451_s21, %s14445_s15 }
 0x3c8   : > { %1339 = vmatprep.subr.bf16.mxu1 %v13556_v25  ;;  %v13611_v25 = vld [vmem:[%s19004_s2 + $0x2bc] ss:$12 sps:$4 sm:$0xff]  }
 0x3c9   : > { %1731 = vmatprep.subr.bf16.mxu0 %v13611_v25  ;;  %p14454_p2 = por %p14453_p1, %p14452_p0 }
 0x3cb   : > { %1340 = vmatpush1.bf16.msra.mxu1 %v13554_v26  ;;  %v13612_v26 = vld [vmem:[%s19004_s2 + $0x2c0] ss:$12 sps:$4 sm:$0xff]   ;;  %p14455_p3 = pnand %p14454_p2, %p14448_p13 }
 0x3cc   : > { %1341 = vmatprep.subr.bf16.mxu1 %v13559_v28  ;;  %v13613_v28 = vld [vmem:[%s19004_s2 + $0x200] ss:$12 sps:$4 sm:$0xff]  }
 0x3cf   : > { %1342 = vmatpush1.bf16.msra.mxu1 %v13557_v29  ;;  %v13616_v29 = vld [vmem:[%s19004_s2 + $0x2d4] ss:$12 sps:$4 sm:$0xff]  }
 0x3d0   : > { %13141 = vmatprep.subr.bf16.mxu1 %v13587_v37  ;;  %v13619_v37 = vld [vmem:[%s19004_s2 + $0x2e8] ss:$12 sps:$4 sm:$0xff]  }
 0x465   : > { %v14914_v14 = vpop.f32.mrb[8].mxu0  ;;  %v1078_v15 = vpop.f32.mrb[4].mxu1 }
 0x466   : > { %v1079_v16 = vadd.f32 1e-09, %v1078_v15  ;;  %v14916_v17 = vpop.f32.mrb[9].mxu0  ;;  %v13251_v18 = vpop.f32.mrb[5].mxu1 }
 0x467   : > { %v14918_v19 = vpop.f32.mrb[10].mxu0  ;;  %v1081_v20 = vpop.f32.mrb[6].mxu1  ;;  %v13593_v18 = vld [vmem:[%s19004_s2 + $0x1a0] ss:$12 sps:$4 sm:$0xff]  }
 0x468   : > { %14400 = vrcp.f32 %v1079_v16  ;;  %v1082_v21 = vadd.f32 1e-09, %v1081_v20  ;;  %v14920_v22 = vpop.f32.mrb[11].mxu0  ;;  %v13252_v23 = vpop.f32.mrb[7].mxu1  ;;  %v13588_v16 = vld [vmem:[%s19004_s2 + $0x188] ss:$12 sps:$4 sm:$0xff]  }
 0x469   : > { %v13598_v20 = vld [vmem:[%s19004_s2 + $0x1b8] ss:$12 sps:$4 sm:$0xff]   ;;  %v13607_v23 = vld [vmem:[%s19004_s2 + $0x2a8] ss:$12 sps:$4 sm:$0xff]  }
 0x46a   : > { %14402 = vrcp.f32 %v1082_v21  ;;  %v13602_v21 = vld [vmem:[%s19004_s2 + $0x290] ss:$12 sps:$4 sm:$0xff]  }
 0x472   : > { %v14401_v24 = vpop.eup %14400 }
 0x473   : > { %1089 = vperm.xlu1 %13446, %v14401_v24   ;;  %v13608_v24 = vld [vmem:[%s19004_s2 + $0x1e8] ss:$12 sps:$4 sm:$0xff]  }
 0x474   : > { %v14403_v27 = vpop.eup %14402 }
 0x477   : > { %1094 = vperm.xlu1 %13446, %v14403_v27   ;;  %v13609_v27 = vld [vmem:[%s19004_s2 + $0x2b8] ss:$12 sps:$4 sm:$0xff]  }
 0x478   : > { %1732 = vmatpush1.bf16.msra.mxu0 %v13609_v27 }
 0x479   : > { %1733 = vmatprep.subr.bf16.mxu0 %v13616_v29 }
 0x47c   : > { %1734 = vmatpush1.bf16.msra.mxu0 %v13614_v31 }
 0x47d   : > { %1735 = vmatprep.subr.bf16.mxu0 %v13621_v33 }
 0x480   : > { %1736 = vmatpush1.bf16.msra.mxu0 %v13619_v37 }
 0x481   : > { %13253 = vmatprep.subr.bf16.mxu0 %v14509_v54 }
 0x4f2   : > { %v1090_v62 = vpop.permute.xlu1 %1089 }
 0x4f3   : > { %v1097_v63 = vmul.f32 %v1090_v62, %v14914_v14  ;;  %v1098_v0 = vmul.f32 %v1090_v62, %v14916_v17  ;;  %v13592_v17 = vld [vmem:[%s19004_s2 + $0x260] ss:$12 sps:$4 sm:$0xff]  }
 0x4f5   : > { %v1101_v7 = vsub.f32 %v15020_v4, %v1097_v63  ;;  %v1102_v9 = vsub.f32 %v15024_v8, %v1098_v0  ;;  %v11658_v63 = vld [vmem:[%s19005_s3 + $0x3] sm:$0x7] }
 0x4f6   : > { %v1095_v1 = vpop.permute.xlu1 %1094  ;;  %v1437_v0 = vrot.slane %v11658_v63, %v14813_v5 }
 0x4f7   : > { %v1099_v2 = vmul.f32 %v1095_v1, %v14918_v19  ;;  %v1100_v3 = vmul.f32 %v1095_v1, %v14920_v22  ;;  %v13597_v19 = vld [vmem:[%s19004_s2 + $0x278] ss:$12 sps:$4 sm:$0xff]   ;;  %v13603_v22 = vld [vmem:[%s19004_s2 + $0x1d0] ss:$12 sps:$4 sm:$0xff]  }
 0x4f9   : > { %v1103_v11 = vsub.f32 %v15028_v10, %v1099_v2  ;;  %v1104_v13 = vsub.f32 %v15032_v12, %v1100_v3  ;;  %v1441_v3 = vrot.slane %v11658_v63, %v14816_v6 }
 0x4fb   : > { %v1105_v14 = vpack.c.bf16 %v1103_v11, %v1101_v7  ;;  %v1106_v15 = vpack.c.bf16 %v1104_v13, %v1102_v9 }
 0x4fd   : > { %1343 = vmatprep.mubr.bf16.mxu1 %v1106_v15 }
 0x4fe   : > { %1344 = vmatmul.mubr.bf16.vlgmr.msra.gmra.mrb[8].mxu1 %v1105_v14 }
 0x4ff   : > { %13142 = vmatpush3.bf16.msra.mxu1 %v13588_v16 }
 0x500   : > { %13143 = vmatprep.subr.bf16.mxu1 %v13592_v17 }
 0x503   : > { %13144 = vmatpush3.bf16.msra.mxu1 %v13593_v18 }
 0x504   : > { %13145 = vmatprep.subr.bf16.mxu1 %v13597_v19 }
 0x507   : > { %13146 = vmatpush3.bf16.msra.mxu1 %v13598_v20 }
 0x508   : > { %13147 = vmatprep.subr.bf16.mxu1 %v13602_v21 }
 0x50b   : > { %13148 = vmatpush3.bf16.msra.mxu1 %v13603_v22 }
 0x50c   : > { %13149 = vmatprep.subr.bf16.mxu1 %v13607_v23 }
 0x50f   : > { %13150 = vmatpush3.bf16.msra.mxu1 %v13608_v24 }
 0x510   : > { %13151 = vmatprep.subr.bf16.mxu1 %v13612_v26 }
 0x513   : > { %13152 = vmatpush3.bf16.msra.mxu1 %v13613_v28 }
 0x514   : > { %13153 = vmatprep.subr.bf16.mxu1 %v13617_v30 }
 0x517   : > { %13154 = vmatpush3.bf16.msra.mxu1 %v13618_v32 }
 0x518   : > { %13155 = vmatprep.subr.bf16.mxu1 %v13622_v34 }
 0x51b   : > { %13156 = vmatpush3.bf16.msra.mxu1 %v13623_v38 }
 0x5d1   : > { %v1345_v42 = vpop.f32.mrb[8].mxu1 }
 0x5d2   : > { %v1346_v43 = vadd.f32 %v1345_v42, %v1144_v40  ;;  %v1347_v44 = vpop.f32.mrb[9].mxu1 }
 0x5d3   : > { %v1348_v45 = vadd.f32 %v1347_v44, %v1148_v41  ;;  %v1349_v46 = vpop.f32.mrb[10].mxu1 }
 0x5d4   : > { %v1350_v47 = vadd.f32 %v1349_v46, %v1144_v40  ;;  %v1351_v48 = vpop.f32.mrb[11].mxu1  ;;  %v1354_v51 = vmax.f32 %v1346_v43, 0.0 }
 0x5d5   : > { %v1355_v49 = vmax.f32 %v1348_v45, 0.0  ;;  %v1352_v50 = vadd.f32 %v1351_v48, %v1148_v41 }
 0x5d6   : > { %v1356_v52 = vmax.f32 %v1350_v47, 0.0  ;;  %v15114_v60 = vadd.f32 %v15020_v4, %v1354_v51  ;;  %v13626_v51 = vld [vmem:[%s19006_s4 + $0x104] ss:$8 sps:$4 sm:$0xff]  }
 0x5d7   : > { %v1357_v53 = vmax.f32 %v1352_v50, 0.0  ;;  %v15108_v57 = vadd.f32 %v15024_v8, %v1355_v49  ;;  %v1445_v8 = vrot.slane %v11658_v63, %v14809_v58  ;;  %v13624_v50 = vld [vmem:[%s19006_s4 + $0x100] ss:$8 sps:$4 sm:$0xff]   ;;  %v13632_v63 = vld [vmem:[%s19006_s4 + $0x124] ss:$8 sps:$4 sm:$0xff]  }
 0x5d8   : > { %v15105_v55 = vadd.f32 %v15028_v10, %v1356_v52  ;;  %v13629_v52 = vld [vmem:[%s19006_s4 + $0x114] ss:$8 sps:$4 sm:$0xff]  }
 0x5d9   : > { %v15111_v59 = vadd.f32 %v15032_v12, %v1357_v53  ;;  %v13627_v53 = vld [vmem:[%s19006_s4 + $0x110] ss:$8 sps:$4 sm:$0xff]  }
 0x5da   : > { %v15122_v62 = vpack.c.bf16 %v15105_v55, %v15114_v60 }
 0x5db   : > { %v15118_v61 = vpack.c.bf16 %v15111_v59, %v15108_v57 }
 0x5dd   : > { %1737 = vmatprep.mubr.bf16.mxu0 %v15118_v61  ;;  %1780 = vmatprep.mubr.bf16.mxu1 %v15118_v61 }
 0x5de   : > { %1738 = vmatmul.mubr.bf16.vlgmr.msra.gmra.mrb[12].mxu0 %v15122_v62  ;;  %1781 = vmatmul.mubr.bf16.vlgmr.msra.gmra.mrb[12].mxu1 %v15122_v62 }
 0x5df   : > { %13255 = vmatprep.mubr.msk.bf16.mxu0 %vm14510_vm0, %v14509_v54 }
 0x6b1   : > { %v1739_v1 = vpop.f32.mrb[12].mxu0  ;;  %v13157_v2 = vpop.f32.mrb[12].mxu1 }
 0x6b2   : > { %v1741_v4 = vpop.f32.mrb[13].mxu0  ;;  %v13158_v7 = vpop.f32.mrb[13].mxu1  ;;  %v1740_v12 = vadd.f32 %v1739_v1, %v1437_v0  ;;  %v13635_v1 = vld [vmem:[%s19006_s4 + $0x134] ss:$8 sps:$4 sm:$0xff]  }
 0x6b3   : > { %v13159_v9 = vadd.f32 %v13158_v7, %v13157_v2  ;;  %v1743_v10 = vpop.f32.mrb[14].mxu0  ;;  %v13160_v11 = vpop.f32.mrb[14].mxu1  ;;  %v1742_v16 = vadd.f32 %v1741_v4, %v1441_v3  ;;  %v13633_v2 = vld [vmem:[%s19006_s4 + $0x130] ss:$8 sps:$4 sm:$0xff]   ;;  %v13636_v4 = vld [vmem:[%s19006_s4 + $0x140] ss:$8 sps:$4 sm:$0xff]  }
 0x6b4   : > { %v1744_v13 = vadd.f32 %v1743_v10, %v1437_v0  ;;  %v1745_v14 = vpop.f32.mrb[15].mxu0  ;;  %v13161_v15 = vpop.f32.mrb[15].mxu1  ;;  %v13630_v0 = vld [vmem:[%s19006_s4 + $0x120] ss:$8 sps:$4 sm:$0xff]   ;;  %v13641_v7 = vld [vmem:[%s19006_s4 + $0x154] ss:$8 sps:$4 sm:$0xff]  }
 0x6b5   : > { %v1746_v17 = vadd.f32 %v1745_v14, %v1441_v3  ;;  %v13162_v18 = vadd.f32 %v13161_v15, %v13160_v11  ;;  %v1783_v20 = vadd.f32 %v13159_v9, %v1445_v8  ;;  %v13638_v3 = vld [vmem:[%s19006_s4 + $0x144] ss:$8 sps:$4 sm:$0xff]   ;;  %v13642_v10 = vld [vmem:[%s19006_s4 + $0x160] ss:$8 sps:$4 sm:$0xff]   ;;  %v13647_v11 = vld [vmem:[%s19006_s4 + $0x174] ss:$8 sps:$4 sm:$0xff]  }
 0x6b6   : > { %v1854_v19 = vpack.c.bf16 %v1744_v13, %v1740_v12  ;;  %v13644_v9 = vld [vmem:[%s19006_s4 + $0x164] ss:$8 sps:$4 sm:$0xff]   ;;  %v13645_v12 = vld [vmem:[%s19006_s4 + $0x170] ss:$8 sps:$4 sm:$0xff]   ;;  %v13648_v14 = vld [vmem:[%s19006_s4 + $0x180] ss:$8 sps:$4 sm:$0xff]  }
 0x6b7   : > { %v1855_v21 = vpack.c.bf16 %v1746_v17, %v1742_v16  ;;  %v1786_v22 = vadd.f32 %v13162_v18, %v1445_v8  ;;  %v13639_v8 = vld [vmem:[%s19006_s4 + $0x150] ss:$8 sps:$4 sm:$0xff]   ;;  %v13650_v13 = vld [vmem:[%s19006_s4 + $0x184] ss:$8 sps:$4 sm:$0xff]   ;;  %v13653_v15 = vld [vmem:[%s19006_s4 + $0x194] ss:$8 sps:$4 sm:$0xff]  }
 0x6b8   : > { %v13651_v16 = vld [vmem:[%s19006_s4 + $0x190] ss:$8 sps:$4 sm:$0xff]   ;;  %v13656_v17 = vld [vmem:[%s19006_s4 + $0x1a4] ss:$8 sps:$4 sm:$0xff]   ;;  %v13654_v18 = vld [vmem:[%s19006_s4 + $0x1a0] ss:$8 sps:$4 sm:$0xff]  }
 0x6b9   : > { %v1789_v23 = vpack.c.bf16 %v1786_v22, %v1783_v20  ;;  %v13657_v20 = vld [vmem:[%s19006_s4 + $0x1b0] ss:$8 sps:$4 sm:$0xff]   ;;  %v13660_v22 = vld [vmem:[%s19006_s4 + $0x1c0] ss:$8 sps:$4 sm:$0xff]  }
 0x6bb   : > { %13254 = vmatpush3.bf16.xpose.msra.mxu0 %v1789_v23 }
 0x6bc   : > { %1875 = vmatprep.subr.bf16.mxu0 %v1855_v21  ;;  %v13662_v21 = vld [vmem:[%s19006_s4 + $0x1c4] ss:$8 sps:$4 sm:$0xff]  }
 0x6c2   : > { %13256 = vmatmul.mubr.bf16.vlgmr.msra.gmra.mrb[16].mxu0 %v1789_v23  ;;  %v13665_v23 = vld [vmem:[%s19006_s4 + $0x1d4] ss:$8 sps:$4 sm:$0xff]  }
 0x6c3   : > { %1876 = vmatpush1.bf16.msra.mxu0 %v1854_v19  ;;  %1907 = vmatprep.mubr.bf16.mxu0 %v14512_v36  ;;  %v13659_v19 = vld [vmem:[%s19006_s4 + $0x1b4] ss:$8 sps:$4 sm:$0xff]  }
 0x6c4   : > { %13259 = vmatprep.subr.bf16.mxu0 %v14509_v54 }
 0x795   : > { %v1824_v24 = vpop.f32.mrb[16].mxu0 }
 0x796   : > { %v13257_v25 = vpop.f32.mrb[17].mxu0  ;;  %v1831_v26 = vsel %vm956_vm1, %v1824_v24, -inf }
 0x797   : > { %1832 = vmax.xlane.f32.xlu1 %v1831_v26  ;;  %v1827_v27 = vpop.f32.mrb[18].mxu0 }
 0x798   : > { %v13258_v28 = vpop.f32.mrb[19].mxu0  ;;  %v1834_v29 = vsel %vm956_vm1, %v1827_v27, -inf }
 0x799   : > { %1835 = vmax.xlane.f32.xlu0 %v1834_v29 }
 0x824   : > { %v1833_v30 = vpop.xlane.xlu1 %1832 }
 0x825   : > { %v1837_v31 = vsub.f32 %v1824_v24, %v1833_v30  ;;  %v13663_v24 = vld [vmem:[%s19006_s4 + $0x1d0] ss:$8 sps:$4 sm:$0xff]  }
 0x826   : > { %v1836_v32 = vpop.xlane.xlu0 %1835 }
 0x827   : > { %v1839_v33 = vmul.f32 1.442695, %v1837_v31  ;;  %v1838_v34 = vsub.f32 %v1827_v27, %v1836_v32 }
 0x829   : > { %14404 = vpow2.f32 %v1839_v33  ;;  %v1841_v37 = vmul.f32 1.442695, %v1838_v34 }
 0x82b   : > { %14406 = vpow2.f32 %v1841_v37 }
 0x833   : > { %v14405_v38 = vpop.eup %14404 }
 0x834   : > { %v1843_v39 = vsel %vm956_vm1, %v14405_v38, 0.0 }
 0x835   : > { %v14407_v40 = vpop.eup %14406  ;;  %1844 = vadd.xlane.f32.xlu1 %v1843_v39  ;;  %v13666_v39 = vld [vmem:[%s19006_s4 + $0x1e0] ss:$8 sps:$4 sm:$0xff]  }
 0x836   : > { %v1846_v41 = vsel %vm956_vm1, %v14407_v40, 0.0 }
 0x837   : > { %1847 = vadd.xlane.f32.xlu0 %v1846_v41  ;;  %v13671_v41 = vld [vmem:[%s19006_s4 + $0x1f4] ss:$8 sps:$4 sm:$0xff]  }
 0x8c2   : > { %v1845_v42 = vpop.xlane.xlu1 %1844 }
 0x8c3   : > { %14408 = vrcp.f32 %v1845_v42  ;;  %v13669_v42 = vld [vmem:[%s19006_s4 + $0x1f0] ss:$8 sps:$4 sm:$0xff]  }
 0x8c4   : > { %v1848_v43 = vpop.xlane.xlu0 %1847 }
 0x8c5   : > { %14410 = vrcp.f32 %v1848_v43  ;;  %v13672_v43 = vld [vmem:[%s19004_s2 + $0x300] ss:$12 sps:$4 sm:$0xff]  }
 0x8cd   : > { %v14409_v44 = vpop.eup %14408 }
 0x8ce   : > { %v1851_v46 = vmul.f32 %v14409_v44, %v14405_v38  ;;  %v13668_v38 = vld [vmem:[%s19006_s4 + $0x1e4] ss:$8 sps:$4 sm:$0xff]  }
 0x8cf   : > { %v14411_v45 = vpop.eup %14410  ;;  %v13674_v44 = vld [vmem:[%s19004_s2 + $0x304] ss:$12 sps:$4 sm:$0xff]  }
 0x8d0   : > { %v1852_v47 = vmul.f32 %v14411_v45, %v14407_v40  ;;  %v13677_v45 = vld [vmem:[%s19004_s2 + $0x31c] ss:$12 sps:$4 sm:$0xff]   ;;  %2581 = vmatprep.subr.bf16.mxu1 %v13674_v44  ;;  %v13728_v44 = vld [vmem:[%s19004_s2 + $0x454] ss:$12 sps:$4 sm:$0xff]  }
 0x8d1   : > { %2582 = vmatpush1.bf16.msra.mxu1 %v13672_v43  ;;  %v13725_v43 = vld [vmem:[%s19004_s2 + $0x380] ss:$12 sps:$4 sm:$0xff]  }
 0x8d2   : > { %v1853_v48 = vpack.c.bf16 %v1852_v47, %v1851_v46  ;;  %v13675_v46 = vld [vmem:[%s19004_s2 + $0x318] ss:$12 sps:$4 sm:$0xff]   ;;  %2583 = vmatprep.subr.bf16.mxu1 %v13677_v45  ;;  %v13680_v47 = vld [vmem:[%s19004_s2 + $0x334] ss:$12 sps:$4 sm:$0xff]  }
 0x8d3   : > { %v13729_v45 = vld [vmem:[%s19004_s2 + $0x458] ss:$12 sps:$4 sm:$0xff]  }
 0x8d4   : > { %1856 = vxpose.xlu1.c.b16.start.end [1/1] (short) (narrow) %v1853_v48, 16  ;;  %v13699_v48 = vld [vmem:[%s19004_s2 + $0x3c8] ss:$12 sps:$4 sm:$0xff]  }
 0x8d5   : > { %2584 = vmatpush1.bf16.msra.mxu1 %v13675_v46  ;;  %v13726_v46 = vld [vmem:[%s19004_s2 + $0x450] ss:$12 sps:$4 sm:$0xff]  }
 0x8d6   : > { %2585 = vmatprep.subr.bf16.mxu1 %v13680_v47  ;;  %v13730_v47 = vld [vmem:[%s19004_s2 + $0x398] ss:$12 sps:$4 sm:$0xff]  }
 0x93a   : > { %v1864_v49 = vpop.trf.xlu1 }
 0x93b   : > { %11707 = vmatmul.mubr.msk.bf16.vlgmr.msra.gmra.mrb[20].mxu0 %vm956_vm1, %v1864_v49 }
 0x93c   : > { %13260 = vmatpush3.bf16.msra.mxu0 %v14511_v35  ;;  %13261 = vmatprep.mubr.msk.bf16.mxu0 %vm14510_vm0, %v14509_v54 }
 0x93d   : > { %2187 = vmatprep.subr.bf16.mxu0 %v13626_v51  ;;  %v13681_v51 = vld [vmem:[%s19004_s2 + $0x348] ss:$12 sps:$4 sm:$0xff]  }
 0x943   : > { %13262 = vmatmul.mubr.msk.bf16.vlgmr.msra.gmra.mrb[24].mxu0 %vm956_vm1, %v1864_v49  ;;  %v13678_v49 = vld [vmem:[%s19004_s2 + $0x330] ss:$12 sps:$4 sm:$0xff]  }
 0x944   : > { %2188 = vmatpush1.bf16.msra.mxu0 %v13624_v50  ;;  %v13683_v50 = vld [vmem:[%s19004_s2 + $0x34c] ss:$12 sps:$4 sm:$0xff]   ;;  %2586 = vmatpush1.bf16.msra.mxu1 %v13678_v49  ;;  %v13734_v49 = vld [vmem:[%s19004_s2 + $0x470] ss:$12 sps:$4 sm:$0xff]  }
 0x945   : > { %2189 = vmatprep.subr.bf16.mxu0 %v13629_v52  ;;  %2587 = vmatprep.subr.bf16.mxu1 %v13683_v50  ;;  %v13686_v52 = vld [vmem:[%s19004_s2 + $0x364] ss:$12 sps:$4 sm:$0xff]   ;;  %v13731_v50 = vld [vmem:[%s19004_s2 + $0x468] ss:$12 sps:$4 sm:$0xff]  }
 0x948   : > { %2190 = vmatpush1.bf16.msra.mxu0 %v13627_v53  ;;  %2588 = vmatpush1.bf16.msra.mxu1 %v13681_v51  ;;  %v13684_v53 = vld [vmem:[%s19004_s2 + $0x360] ss:$12 sps:$4 sm:$0xff]   ;;  %v13735_v51 = vld [vmem:[%s19004_s2 + $0x3b0] ss:$12 sps:$4 sm:$0xff]  }
 0x949   : > { %2191 = vmatprep.subr.bf16.mxu0 %v13632_v63  ;;  %2589 = vmatprep.subr.bf16.mxu1 %v13686_v52  ;;  %v13689_v63 = vld [vmem:[%s19004_s2 + $0x37c] ss:$12 sps:$4 sm:$0xff]   ;;  %v11741_v52 = vld [vmem:[%s19007_s5 + $0x2] sm:$0x3] }
 0x94c   : > { %2192 = vmatpush1.bf16.msra.mxu0 %v13630_v0  ;;  %2590 = vmatpush1.bf16.msra.mxu1 %v13684_v53  ;;  %v13687_v0 = vld [vmem:[%s19004_s2 + $0x378] ss:$12 sps:$4 sm:$0xff]   ;;  %v2020_v53 = vrot.slane %v11741_v52, %v14813_v5 }
 0x94d   : > { %2193 = vmatprep.subr.bf16.mxu0 %v13635_v1  ;;  %2591 = vmatprep.subr.bf16.mxu1 %v13689_v63  ;;  %v13692_v1 = vld [vmem:[%s19004_s2 + $0x394] ss:$12 sps:$4 sm:$0xff]   ;;  %v2024_v63 = vrot.slane %v11741_v52, %v14816_v6 }
 0x950   : > { %2194 = vmatpush1.bf16.msra.mxu0 %v13633_v2  ;;  %2592 = vmatpush1.bf16.msra.mxu1 %v13687_v0  ;;  %v13690_v2 = vld [vmem:[%s19004_s2 + $0x390] ss:$12 sps:$4 sm:$0xff]  }
 0x951   : > { %2195 = vmatprep.subr.bf16.mxu0 %v13638_v3  ;;  %2593 = vmatprep.subr.bf16.mxu1 %v13692_v1  ;;  %v13695_v3 = vld [vmem:[%s19004_s2 + $0x3ac] ss:$12 sps:$4 sm:$0xff]  }
 0x954   : > { %2196 = vmatpush1.bf16.msra.mxu0 %v13636_v4  ;;  %2594 = vmatpush1.bf16.msra.mxu1 %v13690_v2  ;;  %v13693_v4 = vld [vmem:[%s19004_s2 + $0x3a8] ss:$12 sps:$4 sm:$0xff]  }
 0x955   : > { %2197 = vmatprep.subr.bf16.mxu0 %v13641_v7  ;;  %2595 = vmatprep.subr.bf16.mxu1 %v13695_v3  ;;  %v13698_v7 = vld [vmem:[%s19004_s2 + $0x3c4] ss:$12 sps:$4 sm:$0xff]  }
 0x958   : > { %2198 = vmatpush1.bf16.msra.mxu0 %v13639_v8  ;;  %2596 = vmatpush1.bf16.msra.mxu1 %v13693_v4  ;;  %v13696_v8 = vld [vmem:[%s19004_s2 + $0x3c0] ss:$12 sps:$4 sm:$0xff]  }
 0x959   : > { %2199 = vmatprep.subr.bf16.mxu0 %v13644_v9  ;;  %2597 = vmatprep.subr.bf16.mxu1 %v13698_v7  ;;  %v13703_v9 = vld [vmem:[%s19004_s2 + $0x3dc] ss:$12 sps:$4 sm:$0xff]  }
 0x95c   : > { %2200 = vmatpush1.bf16.msra.mxu0 %v13642_v10  ;;  %2598 = vmatpush1.bf16.msra.mxu1 %v13696_v8  ;;  %v13701_v10 = vld [vmem:[%s19004_s2 + $0x3d8] ss:$12 sps:$4 sm:$0xff]  }
 0x95d   : > { %2201 = vmatprep.subr.bf16.mxu0 %v13647_v11  ;;  %2599 = vmatprep.subr.bf16.mxu1 %v13703_v9  ;;  %v13708_v11 = vld [vmem:[%s19004_s2 + $0x3f4] ss:$12 sps:$4 sm:$0xff]  }
 0x960   : > { %2202 = vmatpush1.bf16.msra.mxu0 %v13645_v12  ;;  %2600 = vmatpush1.bf16.msra.mxu1 %v13701_v10  ;;  %v13706_v12 = vld [vmem:[%s19004_s2 + $0x3f0] ss:$12 sps:$4 sm:$0xff]  }
 0x961   : > { %2203 = vmatprep.subr.bf16.mxu0 %v13650_v13  ;;  %2601 = vmatprep.subr.bf16.mxu1 %v13708_v11  ;;  %v13713_v13 = vld [vmem:[%s19004_s2 + $0x40c] ss:$12 sps:$4 sm:$0xff]  }
 0x964   : > { %2204 = vmatpush1.bf16.msra.mxu0 %v13648_v14  ;;  %2602 = vmatpush1.bf16.msra.mxu1 %v13706_v12  ;;  %v13711_v14 = vld [vmem:[%s19004_s2 + $0x408] ss:$12 sps:$4 sm:$0xff]  }
 0x965   : > { %2205 = vmatprep.subr.bf16.mxu0 %v13653_v15  ;;  %2603 = vmatprep.subr.bf16.mxu1 %v13713_v13  ;;  %v13718_v15 = vld [vmem:[%s19004_s2 + $0x424] ss:$12 sps:$4 sm:$0xff]  }
 0x968   : > { %2206 = vmatpush1.bf16.msra.mxu0 %v13651_v16  ;;  %2604 = vmatpush1.bf16.msra.mxu1 %v13711_v14  ;;  %v13716_v16 = vld [vmem:[%s19004_s2 + $0x420] ss:$12 sps:$4 sm:$0xff]  }
 0x969   : > { %2207 = vmatprep.subr.bf16.mxu0 %v13656_v17  ;;  %2605 = vmatprep.subr.bf16.mxu1 %v13718_v15 }
 0x96c   : > { %2208 = vmatpush1.bf16.msra.mxu0 %v13654_v18  ;;  %2606 = vmatpush1.bf16.msra.mxu1 %v13716_v16 }
 0x96d   : > { %2209 = vmatprep.subr.bf16.mxu0 %v13659_v19 }
 0x970   : > { %2210 = vmatpush1.bf16.msra.mxu0 %v13657_v20 }
 0x971   : > { %2211 = vmatprep.subr.bf16.mxu0 %v13662_v21 }
 0x974   : > { %2212 = vmatpush1.bf16.msra.mxu0 %v13660_v22 }
 0x975   : > { %2213 = vmatprep.subr.bf16.mxu0 %v13665_v23 }
 0x978   : > { %2214 = vmatpush1.bf16.msra.mxu0 %v13663_v24 }
 0x979   : > { %2215 = vmatprep.subr.bf16.mxu0 %v13668_v38  ;;  %v13719_v38 = vld [vmem:[%s19004_s2 + $0x428] ss:$12 sps:$4 sm:$0xff]  }
 0x97c   : > { %2216 = vmatpush1.bf16.msra.mxu0 %v13666_v39  ;;  %v13720_v39 = vld [vmem:[%s19004_s2 + $0x368] ss:$12 sps:$4 sm:$0xff]  }
 0x97d   : > { %2217 = vmatprep.subr.bf16.mxu0 %v13671_v41  ;;  %v13724_v41 = vld [vmem:[%s19004_s2 + $0x440] ss:$12 sps:$4 sm:$0xff]  }
 0x980   : > { %2218 = vmatpush1.bf16.msra.mxu0 %v13669_v42  ;;  %v13721_v42 = vld [vmem:[%s19004_s2 + $0x438] ss:$12 sps:$4 sm:$0xff]  }
 0x981   : > { %13167 = vmatprep.subr.bf16.mxu0 %v13699_v48  ;;  %v13733_v48 = vld [vmem:[%s19004_s2 + $0x46c] ss:$12 sps:$4 sm:$0xff]  }
 0xa0e   : > { %v15231_v25 = vpop.f32.mrb[20].mxu0 }
 0xa0f   : > { %v15233_v26 = vpop.f32.mrb[21].mxu0 }
 0xa10   : > { %v15235_v27 = vpop.f32.mrb[22].mxu0 }
 0xa11   : > { %v15237_v28 = vpop.f32.mrb[23].mxu0 }
 0xa16   : > { %v1952_v29 = vpop.f32.mrb[24].mxu0 }
 0xa17   : > { %v1953_v30 = vadd.f32 1e-09, %v1952_v29  ;;  %v13263_v31 = vpop.f32.mrb[25].mxu0 }
 0xa18   : > { %v1955_v32 = vpop.f32.mrb[26].mxu0 }
 0xa19   : > { %14412 = vrcp.f32 %v1953_v30  ;;  %v1956_v33 = vadd.f32 1e-09, %v1955_v32  ;;  %v13264_v34 = vpop.f32.mrb[27].mxu0 }
 0xa1a   : > { %v13714_v34 = vld [vmem:[%s19004_s2 + $0x410] ss:$12 sps:$4 sm:$0xff]  }
 0xa1b   : > { %14414 = vrcp.f32 %v1956_v33  ;;  %v13710_v33 = vld [vmem:[%s19004_s2 + $0x338] ss:$12 sps:$4 sm:$0xff]  }
 0xa23   : > { %v14413_v37 = vpop.eup %14412 }
 0xa24   : > { %1963 = vperm.xlu0 %13447, %v14413_v37   ;;  %v13715_v37 = vld [vmem:[%s19004_s2 + $0x350] ss:$12 sps:$4 sm:$0xff]  }
 0xa25   : > { %v14415_v40 = vpop.eup %14414 }
 0xa28   : > { %1968 = vperm.xlu0 %13447, %v14415_v40   ;;  %v13723_v40 = vld [vmem:[%s19004_s2 + $0x43c] ss:$12 sps:$4 sm:$0xff]  }
 0xa29   : > { %2607 = vmatprep.subr.bf16.mxu1 %v13723_v40 }
 0xa2a   : > { %2608 = vmatpush1.bf16.msra.mxu1 %v13721_v42 }
 0xa2b   : > { %2609 = vmatprep.subr.bf16.mxu1 %v13728_v44 }
 0xa2e   : > { %2610 = vmatpush1.bf16.msra.mxu1 %v13726_v46 }
 0xa2f   : > { %2611 = vmatprep.subr.bf16.mxu1 %v13733_v48 }
 0xa32   : > { %2612 = vmatpush1.bf16.msra.mxu1 %v13731_v50 }
 0xa33   : > { %13265 = vmatprep.subr.bf16.mxu1 %v14509_v54 }
 0xaa3   : > { %v1964_v17 = vpop.permute.xlu0 %1963 }
 0xaa4   : > { %v1971_v18 = vmul.f32 %v1964_v17, %v15231_v25  ;;  %v1972_v19 = vmul.f32 %v1964_v17, %v15233_v26  ;;  %v13700_v25 = vld [vmem:[%s19004_s2 + $0x308] ss:$12 sps:$4 sm:$0xff]   ;;  %v13704_v26 = vld [vmem:[%s19004_s2 + $0x3e0] ss:$12 sps:$4 sm:$0xff]  }
 0xaa6   : > { %v1975_v23 = vsub.f32 %v15114_v60, %v1971_v18  ;;  %v1976_v24 = vsub.f32 %v15108_v57, %v1972_v19 }
 0xaa7   : > { %v1969_v20 = vpop.permute.xlu0 %1968 }
 0xaa8   : > { %v1973_v21 = vmul.f32 %v1969_v20, %v15235_v27  ;;  %v1974_v22 = vmul.f32 %v1969_v20, %v15237_v28  ;;  %v13705_v27 = vld [vmem:[%s19004_s2 + $0x320] ss:$12 sps:$4 sm:$0xff]   ;;  %v13709_v28 = vld [vmem:[%s19004_s2 + $0x3f8] ss:$12 sps:$4 sm:$0xff]  }
 0xaaa   : > { %v1977_v29 = vsub.f32 %v15105_v55, %v1973_v21  ;;  %v1978_v30 = vsub.f32 %v15111_v59, %v1974_v22 }
 0xaac   : > { %v1979_v31 = vpack.c.bf16 %v1977_v29, %v1975_v23  ;;  %v1980_v32 = vpack.c.bf16 %v1978_v30, %v1976_v24 }
 0xaae   : > { %2219 = vmatprep.mubr.bf16.mxu0 %v1980_v32 }
 0xaaf   : > { %2220 = vmatmul.mubr.bf16.vlgmr.msra.gmra.mrb[28].mxu0 %v1979_v31 }
 0xab0   : > { %13168 = vmatpush3.bf16.msra.mxu0 %v13700_v25 }
 0xab1   : > { %13169 = vmatprep.subr.bf16.mxu0 %v13704_v26 }
 0xab4   : > { %13170 = vmatpush3.bf16.msra.mxu0 %v13705_v27 }
 0xab5   : > { %13171 = vmatprep.subr.bf16.mxu0 %v13709_v28 }
 0xab8   : > { %13172 = vmatpush3.bf16.msra.mxu0 %v13710_v33 }
 0xab9   : > { %13173 = vmatprep.subr.bf16.mxu0 %v13714_v34 }
 0xabc   : > { %13174 = vmatpush3.bf16.msra.mxu0 %v13715_v37 }
 0xabd   : > { %13175 = vmatprep.subr.bf16.mxu0 %v13719_v38 }
 0xac0   : > { %13176 = vmatpush3.bf16.msra.mxu0 %v13720_v39 }
 0xac1   : > { %13177 = vmatprep.subr.bf16.mxu0 %v13724_v41 }
 0xac4   : > { %13178 = vmatpush3.bf16.msra.mxu0 %v13725_v43 }
 0xac5   : > { %13179 = vmatprep.subr.bf16.mxu0 %v13729_v45 }
 0xac8   : > { %13180 = vmatpush3.bf16.msra.mxu0 %v13730_v47 }
 0xac9   : > { %13181 = vmatprep.subr.bf16.mxu0 %v13734_v49 }
 0xacc   : > { %13182 = vmatpush3.bf16.msra.mxu0 %v13735_v51 }
 0xb82   : > { %v2221_v0 = vpop.f32.mrb[28].mxu0 }
 0xb83   : > { %v2222_v1 = vadd.f32 %v2221_v0, %v2020_v53  ;;  %v2223_v2 = vpop.f32.mrb[29].mxu0 }
 0xb84   : > { %v2224_v3 = vadd.f32 %v2223_v2, %v2024_v63  ;;  %v2225_v4 = vpop.f32.mrb[30].mxu0 }
 0xb85   : > { %v2226_v7 = vadd.f32 %v2225_v4, %v2020_v53  ;;  %v2227_v8 = vpop.f32.mrb[31].mxu0  ;;  %v2230_v11 = vmax.f32 %v2222_v1, 0.0 }
 0xb86   : > { %v2231_v9 = vmax.f32 %v2224_v3, 0.0  ;;  %v2228_v10 = vadd.f32 %v2227_v8, %v2024_v63 }
 0xb87   : > { %v2232_v12 = vmax.f32 %v2226_v7, 0.0  ;;  %v15419_v17 = vadd.f32 %v2230_v11, %v15114_v60 }
 0xb88   : > { %v2233_v13 = vmax.f32 %v2228_v10, 0.0  ;;  %v15413_v15 = vadd.f32 %v2231_v9, %v15108_v57 }
 0xb89   : > { %v15410_v14 = vadd.f32 %v2232_v12, %v15105_v55  ;;  %v11838_v55 = vld [vmem:[%s19005_s3 + $0x6] sm:$0x7] }
 0xb8a   : > { %v15416_v16 = vadd.f32 %v2233_v13, %v15111_v59  ;;  %v2313_v57 = vrot.slane %v11838_v55, %v14813_v5  ;;  %v2317_v20 = vrot.slane %v11838_v55, %v14816_v6  ;;  %v2321_v23 = vrot.slane %v11838_v55, %v14809_v58  ;;  %v13736_v12 = vld [vmem:[%s19006_s4 + $0x200] ss:$8 sps:$4 sm:$0xff]   ;;  %v13738_v13 = vld [vmem:[%s19006_s4 + $0x204] ss:$8 sps:$4 sm:$0xff]   ;;  %v13741_v55 = vld [vmem:[%s19006_s4 + $0x214] ss:$8 sps:$4 sm:$0xff]  }
 0xb8b   : > { %v15427_v19 = vpack.c.bf16 %v15410_v14, %v15419_v17 }
 0xb8c   : > { %v15423_v18 = vpack.c.bf16 %v15416_v16, %v15413_v15 }
 0xb8e   : > { %2613 = vmatprep.mubr.bf16.mxu1 %v15423_v18  ;;  %2656 = vmatprep.mubr.bf16.mxu0 %v15423_v18 }
 0xb8f   : > { %2614 = vmatmul.mubr.bf16.vlgmr.msra.gmra.mrb[16].mxu1 %v15427_v19  ;;  %2657 = vmatmul.mubr.bf16.vlgmr.msra.gmra.mrb[32].mxu0 %v15427_v19 }
 0xb90   : > { %13267 = vmatprep.mubr.msk.bf16.mxu1 %vm14510_vm0, %v14509_v54 }
 0xc62   : > { %v2615_v59 = vpop.f32.mrb[16].mxu1  ;;  %v13183_v60 = vpop.f32.mrb[32].mxu0 }
 0xc63   : > { %v2617_v21 = vpop.f32.mrb[17].mxu1  ;;  %v13184_v22 = vpop.f32.mrb[33].mxu0  ;;  %v2616_v31 = vadd.f32 %v2615_v59, %v2313_v57  ;;  %v13744_v59 = vld [vmem:[%s19006_s4 + $0x224] ss:$8 sps:$4 sm:$0xff]  }
 0xc64   : > { %v13185_v24 = vadd.f32 %v13184_v22, %v13183_v60  ;;  %v2619_v29 = vpop.f32.mrb[18].mxu1  ;;  %v13186_v30 = vpop.f32.mrb[34].mxu0  ;;  %v2618_v27 = vadd.f32 %v2617_v21, %v2317_v20  ;;  %v13742_v60 = vld [vmem:[%s19006_s4 + $0x220] ss:$8 sps:$4 sm:$0xff]   ;;  %v13745_v21 = vld [vmem:[%s19006_s4 + $0x230] ss:$8 sps:$4 sm:$0xff]  }
 0xc65   : > { %v2620_v32 = vadd.f32 %v2619_v29, %v2313_v57  ;;  %v2621_v25 = vpop.f32.mrb[19].mxu1  ;;  %v13187_v26 = vpop.f32.mrb[35].mxu0  ;;  %v13739_v57 = vld [vmem:[%s19006_s4 + $0x210] ss:$8 sps:$4 sm:$0xff]   ;;  %v13750_v22 = vld [vmem:[%s19006_s4 + $0x244] ss:$8 sps:$4 sm:$0xff]  }
 0xc66   : > { %v2622_v28 = vadd.f32 %v2621_v25, %v2317_v20  ;;  %v13188_v33 = vadd.f32 %v13187_v26, %v13186_v30  ;;  %v2659_v37 = vadd.f32 %v13185_v24, %v2321_v23  ;;  %v13747_v20 = vld [vmem:[%s19006_s4 + $0x234] ss:$8 sps:$4 sm:$0xff]   ;;  %v13751_v29 = vld [vmem:[%s19006_s4 + $0x250] ss:$8 sps:$4 sm:$0xff]   ;;  %v13756_v30 = vld [vmem:[%s19006_s4 + $0x264] ss:$8 sps:$4 sm:$0xff]  }
 0xc67   : > { %v2730_v34 = vpack.c.bf16 %v2620_v32, %v2616_v31  ;;  %v13753_v24 = vld [vmem:[%s19006_s4 + $0x254] ss:$8 sps:$4 sm:$0xff]   ;;  %v13754_v31 = vld [vmem:[%s19006_s4 + $0x260] ss:$8 sps:$4 sm:$0xff]   ;;  %v13757_v25 = vld [vmem:[%s19006_s4 + $0x270] ss:$8 sps:$4 sm:$0xff]  }
 0xc68   : > { %v2731_v38 = vpack.c.bf16 %v2622_v28, %v2618_v27  ;;  %v2662_v39 = vadd.f32 %v13188_v33, %v2321_v23  ;;  %v13748_v23 = vld [vmem:[%s19006_s4 + $0x240] ss:$8 sps:$4 sm:$0xff]   ;;  %v13759_v32 = vld [vmem:[%s19006_s4 + $0x274] ss:$8 sps:$4 sm:$0xff]   ;;  %v13762_v26 = vld [vmem:[%s19006_s4 + $0x284] ss:$8 sps:$4 sm:$0xff]  }
 0xc69   : > { %v13760_v27 = vld [vmem:[%s19006_s4 + $0x280] ss:$8 sps:$4 sm:$0xff]   ;;  %v13765_v28 = vld [vmem:[%s19006_s4 + $0x294] ss:$8 sps:$4 sm:$0xff]   ;;  %v13763_v33 = vld [vmem:[%s19006_s4 + $0x290] ss:$8 sps:$4 sm:$0xff]  }
 0xc6a   : > { %v2665_v40 = vpack.c.bf16 %v2662_v39, %v2659_v37  ;;  %v13766_v37 = vld [vmem:[%s19006_s4 + $0x2a0] ss:$8 sps:$4 sm:$0xff]   ;;  %v13769_v39 = vld [vmem:[%s19006_s4 + $0x2b0] ss:$8 sps:$4 sm:$0xff]  }
 0xc6c   : > { %13266 = vmatpush3.bf16.xpose.msra.mxu1 %v2665_v40 }
 0xc6d   : > { %2751 = vmatprep.subr.bf16.mxu1 %v2731_v38  ;;  %v13771_v38 = vld [vmem:[%s19006_s4 + $0x2b4] ss:$8 sps:$4 sm:$0xff]  }
 0xc73   : > { %13268 = vmatmul.mubr.bf16.vlgmr.msra.gmra.mrb[20].mxu1 %v2665_v40  ;;  %v13774_v40 = vld [vmem:[%s19006_s4 + $0x2c4] ss:$8 sps:$4 sm:$0xff]  }
 0xc74   : > { %2752 = vmatpush1.bf16.msra.mxu1 %v2730_v34  ;;  %2783 = vmatprep.mubr.bf16.mxu1 %v14512_v36  ;;  %v13768_v34 = vld [vmem:[%s19006_s4 + $0x2a4] ss:$8 sps:$4 sm:$0xff]  }
 0xc75   : > { %13271 = vmatprep.subr.bf16.mxu1 %v14509_v54 }
 0xd46   : > { %v2700_v41 = vpop.f32.mrb[20].mxu1 }
 0xd47   : > { %v13269_v42 = vpop.f32.mrb[21].mxu1  ;;  %v2707_v43 = vsel %vm956_vm1, %v2700_v41, -inf }
 0xd48   : > { %2708 = vmax.xlane.f32.xlu1 %v2707_v43  ;;  %v2703_v44 = vpop.f32.mrb[22].mxu1  ;;  %v13777_v42 = vld [vmem:[%s19006_s4 + $0x2d4] ss:$8 sps:$4 sm:$0xff]   ;;  %v13775_v43 = vld [vmem:[%s19006_s4 + $0x2d0] ss:$8 sps:$4 sm:$0xff]  }
 0xd49   : > { %v13270_v45 = vpop.f32.mrb[23].mxu1  ;;  %v2710_v46 = vsel %vm956_vm1, %v2703_v44, -inf }
 0xd4a   : > { %2711 = vmax.xlane.f32.xlu0 %v2710_v46 }
 0xdd5   : > { %v2709_v47 = vpop.xlane.xlu1 %2708 }
 0xdd6   : > { %v2713_v48 = vsub.f32 %v2700_v41, %v2709_v47  ;;  %v13772_v41 = vld [vmem:[%s19006_s4 + $0x2c0] ss:$8 sps:$4 sm:$0xff]  }
 0xdd7   : > { %v2712_v49 = vpop.xlane.xlu0 %2711 }
 0xdd8   : > { %v2715_v50 = vmul.f32 1.442695, %v2713_v48  ;;  %v2714_v51 = vsub.f32 %v2703_v44, %v2712_v49 }
 0xdda   : > { %14416 = vpow2.f32 %v2715_v50  ;;  %v2717_v52 = vmul.f32 1.442695, %v2714_v51 }
 0xddc   : > { %14418 = vpow2.f32 %v2717_v52 }
 0xde4   : > { %v14417_v53 = vpop.eup %14416 }
 0xde5   : > { %v2719_v63 = vsel %vm956_vm1, %v14417_v53, 0.0 }
 0xde6   : > { %v14419_v0 = vpop.eup %14418  ;;  %2720 = vadd.xlane.f32.xlu1 %v2719_v63 }
 0xde7   : > { %v2722_v1 = vsel %vm956_vm1, %v14419_v0, 0.0 }
 0xdea   : > { %2723 = vadd.xlane.f32.xlu1 %v2722_v1  ;;  %v13778_v1 = vld [vmem:[%s19006_s4 + $0x2e0] ss:$8 sps:$4 sm:$0xff]  }
 0xe73   : > { %v2721_v2 = vpop.xlane.xlu1 %2720 }
 0xe74   : > { %14420 = vrcp.f32 %v2721_v2 }
 0xe77   : > { %v2724_v3 = vpop.xlane.xlu1 %2723 }
 0xe78   : > { %14422 = vrcp.f32 %v2724_v3  ;;  %v13783_v3 = vld [vmem:[%s19006_s4 + $0x2f4] ss:$8 sps:$4 sm:$0xff]  }
 0xe7e   : > { %v14421_v4 = vpop.eup %14420 }
 0xe7f   : > { %v2727_v8 = vmul.f32 %v14421_v4, %v14417_v53  ;;  %v13781_v4 = vld [vmem:[%s19006_s4 + $0x2f0] ss:$8 sps:$4 sm:$0xff]  }
 0xe82   : > { %v14423_v7 = vpop.eup %14422 }
 0xe83   : > { %v2728_v9 = vmul.f32 %v14423_v7, %v14419_v0  ;;  %v13780_v0 = vld [vmem:[%s19006_s4 + $0x2e4] ss:$8 sps:$4 sm:$0xff]  }
 0xe84   : > { %v13784_v7 = vld [vmem:[%s19004_s2 + $0x480] ss:$12 sps:$4 sm:$0xff]  }
 0xe85   : > { %v2729_v10 = vpack.c.bf16 %v2728_v9, %v2727_v8  ;;  %v13786_v8 = vld [vmem:[%s19004_s2 + $0x484] ss:$12 sps:$4 sm:$0xff]   ;;  %v13789_v9 = vld [vmem:[%s19004_s2 + $0x49c] ss:$12 sps:$4 sm:$0xff]  }
 0xe86   : > { %3457 = vmatprep.subr.bf16.mxu0 %v13786_v8  ;;  %v13837_v8 = vld [vmem:[%s19004_s2 + $0x500] ss:$12 sps:$4 sm:$0xff]  }
 0xe87   : > { %2732 = vxpose.xlu1.c.b16.start.end [1/1] (short) (narrow) %v2729_v10, 16  ;;  %3458 = vmatpush1.bf16.msra.mxu0 %v13784_v7  ;;  %v13787_v10 = vld [vmem:[%s19004_s2 + $0x498] ss:$12 sps:$4 sm:$0xff]   ;;  %v13836_v7 = vld [vmem:[%s19004_s2 + $0x5bc] ss:$12 sps:$4 sm:$0xff]  }
 0xe88   : > { %3459 = vmatprep.subr.bf16.mxu0 %v13789_v9  ;;  %v13834_v9 = vld [vmem:[%s19004_s2 + $0x5b8] ss:$12 sps:$4 sm:$0xff]  }
 0xe8b   : > { %3460 = vmatpush1.bf16.msra.mxu0 %v13787_v10  ;;  %v13838_v10 = vld [vmem:[%s19004_s2 + $0x5d8] ss:$12 sps:$4 sm:$0xff]  }
 0xeed   : > { %v2740_v11 = vpop.trf.xlu1 }
 0xeee   : > { %11887 = vmatmul.mubr.msk.bf16.vlgmr.msra.gmra.mrb[24].mxu1 %vm956_vm1, %v2740_v11 }
 0xeef   : > { %13272 = vmatpush3.bf16.msra.mxu1 %v14511_v35  ;;  %13273 = vmatprep.mubr.msk.bf16.mxu1 %vm14510_vm0, %v14509_v54 }
 0xef0   : > { %3063 = vmatprep.subr.bf16.mxu1 %v13738_v13  ;;  %v13790_v13 = vld [vmem:[%s19004_s2 + $0x4b0] ss:$12 sps:$4 sm:$0xff]  }
 0xef6   : > { %13274 = vmatmul.mubr.msk.bf16.vlgmr.msra.gmra.mrb[28].mxu1 %vm956_vm1, %v2740_v11  ;;  %v13792_v11 = vld [vmem:[%s19004_s2 + $0x4b4] ss:$12 sps:$4 sm:$0xff]  }
 0xef7   : > { %3064 = vmatpush1.bf16.msra.mxu1 %v13736_v12  ;;  %v13808_v12 = vld [vmem:[%s19004_s2 + $0x548] ss:$12 sps:$4 sm:$0xff]   ;;  %3461 = vmatprep.subr.bf16.mxu0 %v13792_v11 }
 0xef8   : > { %3065 = vmatprep.subr.bf16.mxu1 %v13741_v55  ;;  %v13795_v55 = vld [vmem:[%s19004_s2 + $0x4cc] ss:$12 sps:$4 sm:$0xff]   ;;  %3462 = vmatpush1.bf16.msra.mxu0 %v13790_v13  ;;  %v13841_v11 = vld [vmem:[%s19004_s2 + $0x5d4] ss:$12 sps:$4 sm:$0xff]   ;;  %v13839_v13 = vld [vmem:[%s19004_s2 + $0x5d0] ss:$12 sps:$4 sm:$0xff]  }
 0xef9   : > { %3463 = vmatprep.subr.bf16.mxu0 %v13795_v55  ;;  %v13843_v55 = vld [vmem:[%s19004_s2 + $0x5f0] ss:$12 sps:$4 sm:$0xff]  }
 0xefb   : > { %3066 = vmatpush1.bf16.msra.mxu1 %v13739_v57  ;;  %v13793_v57 = vld [vmem:[%s19004_s2 + $0x4c8] ss:$12 sps:$4 sm:$0xff]  }
 0xefc   : > { %3067 = vmatprep.subr.bf16.mxu1 %v13744_v59  ;;  %v13798_v59 = vld [vmem:[%s19004_s2 + $0x4e4] ss:$12 sps:$4 sm:$0xff]   ;;  %3464 = vmatpush1.bf16.msra.mxu0 %v13793_v57  ;;  %v13846_v57 = vld [vmem:[%s19004_s2 + $0x5ec] ss:$12 sps:$4 sm:$0xff]  }
 0xefd   : > { %3465 = vmatprep.subr.bf16.mxu0 %v13798_v59  ;;  %v13847_v59 = vld [vmem:[%s19004_s2 + $0x530] ss:$12 sps:$4 sm:$0xff]  }
 0xeff   : > { %3068 = vmatpush1.bf16.msra.mxu1 %v13742_v60  ;;  %v13796_v60 = vld [vmem:[%s19004_s2 + $0x4e0] ss:$12 sps:$4 sm:$0xff]  }
 0xf00   : > { %3069 = vmatprep.subr.bf16.mxu1 %v13747_v20  ;;  %v13801_v20 = vld [vmem:[%s19004_s2 + $0x4fc] ss:$12 sps:$4 sm:$0xff]   ;;  %3466 = vmatpush1.bf16.msra.mxu0 %v13796_v60 }
 0xf01   : > { %3467 = vmatprep.subr.bf16.mxu0 %v13801_v20  ;;  %v13844_v60 = vld [vmem:[%s19004_s2 + $0x5e8] ss:$12 sps:$4 sm:$0xff]   ;;  %v4012_v20 = vld [vmem:[%s19008_s6] sm:$0xff] }
 0xf03   : > { %3070 = vmatpush1.bf16.msra.mxu1 %v13745_v21  ;;  %v13799_v21 = vld [vmem:[%s19004_s2 + $0x4f8] ss:$12 sps:$4 sm:$0xff]  }
 0xf04   : > { %3071 = vmatprep.subr.bf16.mxu1 %v13750_v22  ;;  %v13804_v22 = vld [vmem:[%s19004_s2 + $0x514] ss:$12 sps:$4 sm:$0xff]   ;;  %3468 = vmatpush1.bf16.msra.mxu0 %v13799_v21 }
 0xf05   : > { %3469 = vmatprep.subr.bf16.mxu0 %v13804_v22  ;;  %v4016_v21 = vld [vmem:[%s19008_s6 + $0x20] sm:$0xff] }
 0xf06   : > { %v12135_v22 = vcombine.high %v4012_v20, %v4016_v21 }
 0xf07   : > { %3072 = vmatpush1.bf16.msra.mxu1 %v13748_v23  ;;  %v13802_v23 = vld [vmem:[%s19004_s2 + $0x510] ss:$12 sps:$4 sm:$0xff]  }
 0xf08   : > { %3073 = vmatprep.subr.bf16.mxu1 %v13753_v24  ;;  %v13807_v24 = vld [vmem:[%s19004_s2 + $0x52c] ss:$12 sps:$4 sm:$0xff]   ;;  %3470 = vmatpush1.bf16.msra.mxu0 %v13802_v23  ;;  %v12134_v23 = vcombine.low %v4012_v20, %v4016_v21  ;;  %v4080_v20 = vld [vmem:[%s19008_s6 + $0x220] sm:$0xff] }
 0xf09   : > { %3471 = vmatprep.subr.bf16.mxu0 %v13807_v24  ;;  %v11921_v24 = vld [vmem:[%s19007_s5 + $0x4] sm:$0x3] }
 0xf0b   : > { %3074 = vmatpush1.bf16.msra.mxu1 %v13751_v29  ;;  %v13805_v29 = vld [vmem:[%s19004_s2 + $0x528] ss:$12 sps:$4 sm:$0xff]  }
 0xf0c   : > { %3075 = vmatprep.subr.bf16.mxu1 %v13756_v30  ;;  %v13811_v30 = vld [vmem:[%s19004_s2 + $0x544] ss:$12 sps:$4 sm:$0xff]   ;;  %3472 = vmatpush1.bf16.msra.mxu0 %v13805_v29  ;;  %v2896_v29 = vrot.slane %v11921_v24, %v14813_v5 }
 0xf0d   : > { %3473 = vmatprep.subr.bf16.mxu0 %v13811_v30  ;;  %v2900_v30 = vrot.slane %v11921_v24, %v14816_v6  ;;  %v4088_v24 = vld [vmem:[%s19008_s6 + $0x260] sm:$0xff] }
 0xf0f   : > { %3076 = vmatpush1.bf16.msra.mxu1 %v13754_v31  ;;  %v13809_v31 = vld [vmem:[%s19004_s2 + $0x540] ss:$12 sps:$4 sm:$0xff]  }
 0xf10   : > { %3077 = vmatprep.subr.bf16.mxu1 %v13759_v32  ;;  %v13816_v32 = vld [vmem:[%s19004_s2 + $0x55c] ss:$12 sps:$4 sm:$0xff]   ;;  %3474 = vmatpush1.bf16.msra.mxu0 %v13809_v31 }
 0xf11   : > { %3475 = vmatprep.subr.bf16.mxu0 %v13816_v32 }
 0xf13   : > { %3078 = vmatpush1.bf16.msra.mxu1 %v13757_v25  ;;  %v13814_v25 = vld [vmem:[%s19004_s2 + $0x558] ss:$12 sps:$4 sm:$0xff]  }
 0xf14   : > { %3079 = vmatprep.subr.bf16.mxu1 %v13762_v26  ;;  %v13821_v26 = vld [vmem:[%s19004_s2 + $0x574] ss:$12 sps:$4 sm:$0xff]   ;;  %3476 = vmatpush1.bf16.msra.mxu0 %v13814_v25 }
 0xf15   : > { %3477 = vmatprep.subr.bf16.mxu0 %v13821_v26 }
 0xf17   : > { %3080 = vmatpush1.bf16.msra.mxu1 %v13760_v27  ;;  %v13819_v27 = vld [vmem:[%s19004_s2 + $0x570] ss:$12 sps:$4 sm:$0xff]  }
 0xf18   : > { %3081 = vmatprep.subr.bf16.mxu1 %v13765_v28  ;;  %v13826_v28 = vld [vmem:[%s19004_s2 + $0x58c] ss:$12 sps:$4 sm:$0xff]   ;;  %3478 = vmatpush1.bf16.msra.mxu0 %v13819_v27 }
 0xf19   : > { %3479 = vmatprep.subr.bf16.mxu0 %v13826_v28 }
 0xf1b   : > { %3082 = vmatpush1.bf16.msra.mxu1 %v13763_v33  ;;  %v13824_v33 = vld [vmem:[%s19004_s2 + $0x588] ss:$12 sps:$4 sm:$0xff]  }
 0xf1c   : > { %3083 = vmatprep.subr.bf16.mxu1 %v13768_v34  ;;  %v13831_v34 = vld [vmem:[%s19004_s2 + $0x5a4] ss:$12 sps:$4 sm:$0xff]   ;;  %3480 = vmatpush1.bf16.msra.mxu0 %v13824_v33 }
 0xf1d   : > { %3481 = vmatprep.subr.bf16.mxu0 %v13831_v34 }
 0xf1f   : > { %3084 = vmatpush1.bf16.msra.mxu1 %v13766_v37  ;;  %v13829_v37 = vld [vmem:[%s19004_s2 + $0x5a0] ss:$12 sps:$4 sm:$0xff]  }
 0xf20   : > { %3085 = vmatprep.subr.bf16.mxu1 %v13771_v38  ;;  %3482 = vmatpush1.bf16.msra.mxu0 %v13829_v37 }
 0xf21   : > { %3483 = vmatprep.subr.bf16.mxu0 %v13836_v7 }
 0xf23   : > { %3086 = vmatpush1.bf16.msra.mxu1 %v13769_v39 }
 0xf24   : > { %3087 = vmatprep.subr.bf16.mxu1 %v13774_v40  ;;  %3484 = vmatpush1.bf16.msra.mxu0 %v13834_v9  ;;  %v4060_v9 = vld [vmem:[%s19008_s6 + $0x180] sm:$0xff] }
 0xf25   : > { %3485 = vmatprep.subr.bf16.mxu0 %v13841_v11 }
 0xf27   : > { %3088 = vmatpush1.bf16.msra.mxu1 %v13772_v41 }
 0xf28   : > { %3089 = vmatprep.subr.bf16.mxu1 %v13777_v42  ;;  %3486 = vmatpush1.bf16.msra.mxu0 %v13839_v13  ;;  %v4068_v13 = vld [vmem:[%s19008_s6 + $0x1c0] sm:$0xff] }
 0xf29   : > { %3487 = vmatprep.subr.bf16.mxu0 %v13846_v57 }
 0xf2b   : > { %3090 = vmatpush1.bf16.msra.mxu1 %v13775_v43 }
 0xf2c   : > { %3091 = vmatprep.subr.bf16.mxu1 %v13780_v0  ;;  %v13823_v0 = vld [vmem:[%s19004_s2 + $0x590] ss:$12 sps:$4 sm:$0xff]   ;;  %3488 = vmatpush1.bf16.msra.mxu0 %v13844_v60  ;;  %v4076_v60 = vld [vmem:[%s19008_s6 + $0x200] sm:$0xff] }
 0xf2d   : > { %13277 = vmatprep.subr.bf16.mxu0 %v14509_v54 }
 0xf2f   : > { %3092 = vmatpush1.bf16.msra.mxu1 %v13778_v1  ;;  %v13827_v1 = vld [vmem:[%s19004_s2 + $0x4d0] ss:$12 sps:$4 sm:$0xff]  }
 0xf30   : > { %3093 = vmatprep.subr.bf16.mxu1 %v13783_v3  ;;  %v13832_v3 = vld [vmem:[%s19004_s2 + $0x4e8] ss:$12 sps:$4 sm:$0xff]  }
 0xf33   : > { %3094 = vmatpush1.bf16.msra.mxu1 %v13781_v4  ;;  %v13833_v4 = vld [vmem:[%s19004_s2 + $0x5c0] ss:$12 sps:$4 sm:$0xff]  }
 0xf34   : > { %13193 = vmatprep.subr.bf16.mxu1 %v13808_v12  ;;  %v13842_v12 = vld [vmem:[%s19004_s2 + $0x518] ss:$12 sps:$4 sm:$0xff]  }
 0xfc1   : > { %v15536_v44 = vpop.f32.mrb[24].mxu1 }
 0xfc2   : > { %v15538_v45 = vpop.f32.mrb[25].mxu1 }
 0xfc3   : > { %v15540_v46 = vpop.f32.mrb[26].mxu1 }
 0xfc4   : > { %v15542_v47 = vpop.f32.mrb[27].mxu1 }
 0xfc9   : > { %v2828_v48 = vpop.f32.mrb[28].mxu1 }
 0xfca   : > { %v2829_v49 = vadd.f32 1e-09, %v2828_v48  ;;  %v13275_v50 = vpop.f32.mrb[29].mxu1 }
 0xfcb   : > { %v2831_v51 = vpop.f32.mrb[30].mxu1 }
 0xfcc   : > { %14424 = vrcp.f32 %v2829_v49  ;;  %v2832_v52 = vadd.f32 1e-09, %v2831_v51  ;;  %v13276_v53 = vpop.f32.mrb[31].mxu1 }
 0xfce   : > { %14426 = vrcp.f32 %v2832_v52 }
 0xfd6   : > { %v14425_v63 = vpop.eup %14424 }
 0xfd7   : > { %2839 = vperm.xlu0 %13447, %v14425_v63   ;;  %v13822_v63 = vld [vmem:[%s19004_s2 + $0x4b8] ss:$12 sps:$4 sm:$0xff]  }
 0xfd8   : > { %v14427_v2 = vpop.eup %14426 }
 0xfdb   : > { %2844 = vperm.xlu0 %13447, %v14427_v2   ;;  %v13828_v2 = vld [vmem:[%s19004_s2 + $0x5a8] ss:$12 sps:$4 sm:$0xff]  }
0x1056   : > { %v2840_v38 = vpop.permute.xlu0 %2839 }
0x1057   : > { %v2847_v39 = vmul.f32 %v2840_v38, %v15536_v44  ;;  %v2848_v40 = vmul.f32 %v2840_v38, %v15538_v45  ;;  %v13812_v44 = vld [vmem:[%s19004_s2 + $0x488] ss:$12 sps:$4 sm:$0xff]   ;;  %v13813_v45 = vld [vmem:[%s19004_s2 + $0x560] ss:$12 sps:$4 sm:$0xff]  }
0x1059   : > { %v2851_v48 = vsub.f32 %v15419_v17, %v2847_v39  ;;  %v2852_v49 = vsub.f32 %v15413_v15, %v2848_v40 }
0x105a   : > { %v2845_v41 = vpop.permute.xlu0 %2844 }
0x105b   : > { %v2849_v42 = vmul.f32 %v2845_v41, %v15540_v46  ;;  %v2850_v43 = vmul.f32 %v2845_v41, %v15542_v47  ;;  %v13817_v46 = vld [vmem:[%s19004_s2 + $0x4a0] ss:$12 sps:$4 sm:$0xff]   ;;  %v13818_v47 = vld [vmem:[%s19004_s2 + $0x578] ss:$12 sps:$4 sm:$0xff]  }
0x105d   : > { %v2853_v50 = vsub.f32 %v15410_v14, %v2849_v42  ;;  %v2854_v51 = vsub.f32 %v15416_v16, %v2850_v43 }
0x105f   : > { %v2855_v52 = vpack.c.bf16 %v2853_v50, %v2851_v48  ;;  %v2856_v53 = vpack.c.bf16 %v2854_v51, %v2852_v49  ;;  %v4020_v48 = vld [vmem:[%s19008_s6 + $0x40] sm:$0xff] }
0x1060   : > { %v4024_v49 = vld [vmem:[%s19008_s6 + $0x60] sm:$0xff] }
0x1061   : > { %3095 = vmatprep.mubr.bf16.mxu1 %v2856_v53  ;;  %v4028_v51 = vld [vmem:[%s19008_s6 + $0x80] sm:$0xff] }
0x1062   : > { %3096 = vmatmul.mubr.bf16.vlgmr.msra.gmra.mrb[32].mxu1 %v2855_v52  ;;  %v12142_v52 = vcombine.low %v4020_v48, %v4024_v49 }
0x1063   : > { %13194 = vmatpush3.bf16.msra.mxu1 %v13812_v44  ;;  %v4036_v44 = vld [vmem:[%s19008_s6 + $0xc0] sm:$0xff] }
0x1064   : > { %13195 = vmatprep.subr.bf16.mxu1 %v13813_v45  ;;  %v4040_v45 = vld [vmem:[%s19008_s6 + $0xe0] sm:$0xff] }
0x1067   : > { %13196 = vmatpush3.bf16.msra.mxu1 %v13817_v46 }
0x1068   : > { %13197 = vmatprep.subr.bf16.mxu1 %v13818_v47  ;;  %v12159_v47 = vcombine.high %v4036_v44, %v4040_v45 }
0x106b   : > { %13198 = vmatpush3.bf16.msra.mxu1 %v13822_v63  ;;  %v4044_v63 = vld [vmem:[%s19008_s6 + $0x100] sm:$0xff] }
0x106c   : > { %13199 = vmatprep.subr.bf16.mxu1 %v13823_v0  ;;  %v4048_v0 = vld [vmem:[%s19008_s6 + $0x120] sm:$0xff] }
0x106d   : > { %v12166_v7 = vcombine.low %v4044_v63, %v4048_v0 }
0x106f   : > { %13200 = vmatpush3.bf16.msra.mxu1 %v13827_v1  ;;  %v12158_v1 = vcombine.low %v4036_v44, %v4040_v45  ;;  %v4132_v45 = vld [vmem:[%s19008_s6 + $0x3c0] sm:$0xff] }
0x1070   : > { %13201 = vmatprep.subr.bf16.mxu1 %v13828_v2  ;;  %v12167_v2 = vcombine.high %v4044_v63, %v4048_v0  ;;  %v4140_v0 = vld [vmem:[%s19008_s6 + $0x400] sm:$0xff] }
0x1073   : > { %13202 = vmatpush3.bf16.msra.mxu1 %v13832_v3  ;;  %v4052_v3 = vld [vmem:[%s19008_s6 + $0x140] sm:$0xff] }
0x1074   : > { %13203 = vmatprep.subr.bf16.mxu1 %v13833_v4  ;;  %v4056_v4 = vld [vmem:[%s19008_s6 + $0x160] sm:$0xff] }
0x1075   : > { %v12174_v11 = vcombine.low %v4052_v3, %v4056_v4 }
0x1077   : > { %13204 = vmatpush3.bf16.msra.mxu1 %v13837_v8  ;;  %v12175_v8 = vcombine.high %v4052_v3, %v4056_v4  ;;  %v4148_v4 = vld [vmem:[%s19008_s6 + $0x440] sm:$0xff] }
0x1078   : > { %13205 = vmatprep.subr.bf16.mxu1 %v13838_v10  ;;  %v4064_v10 = vld [vmem:[%s19008_s6 + $0x1a0] sm:$0xff] }
0x1079   : > { %v12182_v57 = vcombine.low %v4060_v9, %v4064_v10 }
0x107b   : > { %13206 = vmatpush3.bf16.msra.mxu1 %v13842_v12  ;;  %v12183_v12 = vcombine.high %v4060_v9, %v4064_v10  ;;  %v4156_v10 = vld [vmem:[%s19008_s6 + $0x480] sm:$0xff] }
0x107c   : > { %13207 = vmatprep.subr.bf16.mxu1 %v13843_v55  ;;  %v4072_v55 = vld [vmem:[%s19008_s6 + $0x1e0] sm:$0xff] }
0x107d   : > { %v12190_v21 = vcombine.low %v4068_v13, %v4072_v55 }
0x107f   : > { %13208 = vmatpush3.bf16.msra.mxu1 %v13847_v59  ;;  %v12191_v59 = vcombine.high %v4068_v13, %v4072_v55  ;;  %v4164_v55 = vld [vmem:[%s19008_s6 + $0x4c0] sm:$0xff] }
0x1080   : > { %7894 = vmatprep.subr.bf16.mxu1 %v12135_v22  ;;  %v12199_v22 = vcombine.high %v4076_v60, %v4080_v20 }
0x1135   : > { %v3097_v31 = vpop.f32.mrb[32].mxu1 }
0x1136   : > { %v3098_v32 = vadd.f32 %v3097_v31, %v2896_v29  ;;  %v3099_v25 = vpop.f32.mrb[33].mxu1  ;;  %v4092_v31 = vld [vmem:[%s19008_s6 + $0x280] sm:$0xff] }
0x1137   : > { %v3100_v26 = vadd.f32 %v3099_v25, %v2900_v30  ;;  %v3101_v27 = vpop.f32.mrb[34].mxu1 }
0x1138   : > { %v3102_v28 = vadd.f32 %v3101_v27, %v2896_v29  ;;  %v3103_v33 = vpop.f32.mrb[35].mxu1  ;;  %v3106_v38 = vmax.f32 %v3098_v32, 0.0  ;;  %v12198_v29 = vcombine.low %v4076_v60, %v4080_v20  ;;  %v4096_v32 = vld [vmem:[%s19008_s6 + $0x2a0] sm:$0xff] }
0x1139   : > { %v3107_v34 = vmax.f32 %v3100_v26, 0.0  ;;  %v3104_v37 = vadd.f32 %v3103_v33, %v2900_v30  ;;  %v12215_v26 = vcombine.high %v4092_v31, %v4096_v32  ;;  %v4100_v27 = vld [vmem:[%s19008_s6 + $0x2c0] sm:$0xff]  ;;  %v12214_v33 = vcombine.low %v4092_v31, %v4096_v32 }
0x113a   : > { %v3108_v39 = vmax.f32 %v3102_v28, 0.0  ;;  %v15736_v50 = vadd.f32 %v3106_v38, %v15419_v17  ;;  %v4032_v17 = vld [vmem:[%s19008_s6 + $0xa0] sm:$0xff] }
0x113b   : > { %v3109_v40 = vmax.f32 %v3104_v37, 0.0  ;;  %v15724_v42 = vadd.f32 %v3107_v34, %v15413_v15  ;;  %v12151_v53 = vcombine.high %v4028_v51, %v4032_v17  ;;  %v12150_v46 = vcombine.low %v4028_v51, %v4032_v17  ;;  %v4104_v28 = vld [vmem:[%s19008_s6 + $0x2e0] sm:$0xff] }
0x113c   : > { %v15721_v41 = vadd.f32 %v3108_v39, %v15410_v14  ;;  %v12223_v34 = vcombine.high %v4100_v27, %v4104_v28  ;;  %v4108_v37 = vld [vmem:[%s19008_s6 + $0x300] sm:$0xff]  ;;  %v12222_v39 = vcombine.low %v4100_v27, %v4104_v28 }
0x113d   : > { %v15727_v43 = vadd.f32 %v3109_v40, %v15416_v16  ;;  %v12143_v16 = vcombine.high %v4020_v48, %v4024_v49  ;;  %v4112_v38 = vld [vmem:[%s19008_s6 + $0x320] sm:$0xff] }
0x113e   : > { %v15744_v15 = vpack.c.bf16 %v15721_v41, %v15736_v50  ;;  %v12231_v40 = vcombine.high %v4108_v37, %v4112_v38  ;;  %v4116_v48 = vld [vmem:[%s19008_s6 + $0x340] sm:$0xff] }
0x113f   : > { %v15740_v14 = vpack.c.bf16 %v15727_v43, %v15724_v42  ;;  %v4120_v49 = vld [vmem:[%s19008_s6 + $0x360] sm:$0xff] }
0x1140   : > { %v12239_v51 = vcombine.high %v4116_v48, %v4120_v49  ;;  %v4124_v17 = vld [vmem:[%s19008_s6 + $0x380] sm:$0xff] }
0x1141   : > { %3489 = vmatprep.mubr.bf16.mxu0 %v15740_v14  ;;  %3532 = vmatprep.mubr.bf16.mxu1 %v15740_v14  ;;  %v4172_v20 = vld [vmem:[%s19008_s6 + $0x500] sm:$0xff] }
0x1142   : > { %3490 = vmatmul.mubr.bf16.vlgmr.msra.gmra.mrb[36].mxu0 %v15744_v15  ;;  %3533 = vmatmul.mubr.bf16.vlgmr.msra.gmra.mrb[36].mxu1 %v15744_v15  ;;  %v4188_v32 = vld [vmem:[%s19008_s6 + $0x580] sm:$0xff] }
0x1143   : > { %7895 = vmatpush1.bf16.msra.mxu1 %v12134_v23  ;;  %7926 = vmatprep.mubr.bf16.mxu1 %v15118_v61  ;;  %v4084_v23 = vld [vmem:[%s19008_s6 + $0x240] sm:$0xff] }
0x1144   : > { %7896 = vmatprep.subr.bf16.mxu1 %v12143_v16  ;;  %13279 = vmatprep.mubr.msk.bf16.mxu0 %vm14510_vm0, %v14509_v54  ;;  %v12207_v30 = vcombine.high %v4084_v23, %v4088_v24  ;;  %v12206_v25 = vcombine.low %v4084_v23, %v4088_v24  ;;  %v12230_v16 = vcombine.low %v4108_v37, %v4112_v38  ;;  %v4180_v24 = vld [vmem:[%s19008_s6 + $0x540] sm:$0xff] }
0x1145   : > { %v4196_v28 = vld [vmem:[%s19008_s6 + $0x5c0] sm:$0xff] }
0x1146   : > { %v4204_v38 = vld [vmem:[%s19008_s6 + $0x600] sm:$0xff] }
0x1147   : > { %7897 = vmatpush1.bf16.msra.mxu1 %v12142_v52  ;;  %v4128_v52 = vld [vmem:[%s19008_s6 + $0x3a0] sm:$0xff] }
0x1148   : > { %7898 = vmatprep.subr.bf16.mxu1 %v12151_v53  ;;  %v12238_v53 = vcombine.low %v4116_v48, %v4120_v49  ;;  %v12247_v44 = vcombine.high %v4124_v17, %v4128_v52  ;;  %v4212_v49 = vld [vmem:[%s19008_s6 + $0x640] sm:$0xff] }
0x114b   : > { %7899 = vmatpush1.bf16.msra.mxu1 %v12150_v46  ;;  %v4136_v46 = vld [vmem:[%s19008_s6 + $0x3e0] sm:$0xff] }
0x114c   : > { %7900 = vmatprep.subr.bf16.mxu1 %v12159_v47  ;;  %v12246_v47 = vcombine.low %v4124_v17, %v4128_v52  ;;  %v12255_v63 = vcombine.high %v4132_v45, %v4136_v46  ;;  %v4220_v52 = vld [vmem:[%s19008_s6 + $0x680] sm:$0xff] }
0x114f   : > { %7901 = vmatpush1.bf16.msra.mxu1 %v12158_v1  ;;  %v4144_v1 = vld [vmem:[%s19008_s6 + $0x420] sm:$0xff] }
0x1150   : > { %7902 = vmatprep.subr.bf16.mxu1 %v12167_v2  ;;  %v12254_v2 = vcombine.low %v4132_v45, %v4136_v46  ;;  %v12263_v3 = vcombine.high %v4140_v0, %v4144_v1  ;;  %v4228_v46 = vld [vmem:[%s19008_s6 + $0x6c0] sm:$0xff] }
0x1153   : > { %7903 = vmatpush1.bf16.msra.mxu1 %v12166_v7  ;;  %v4152_v7 = vld [vmem:[%s19008_s6 + $0x460] sm:$0xff] }
0x1154   : > { %7904 = vmatprep.subr.bf16.mxu1 %v12175_v8  ;;  %v12262_v8 = vcombine.low %v4140_v0, %v4144_v1  ;;  %v12271_v9 = vcombine.high %v4148_v4, %v4152_v7  ;;  %v4236_v1 = vld [vmem:[%s19008_s6 + $0x700] sm:$0xff] }
0x1157   : > { %7905 = vmatpush1.bf16.msra.mxu1 %v12174_v11  ;;  %v4160_v11 = vld [vmem:[%s19008_s6 + $0x4a0] sm:$0xff] }
0x1158   : > { %7906 = vmatprep.subr.bf16.mxu1 %v12183_v12  ;;  %v12270_v12 = vcombine.low %v4148_v4, %v4152_v7  ;;  %v12279_v13 = vcombine.high %v4156_v10, %v4160_v11  ;;  %v4244_v7 = vld [vmem:[%s19008_s6 + $0x740] sm:$0xff] }
0x115b   : > { %7907 = vmatpush1.bf16.msra.mxu1 %v12182_v57  ;;  %v4168_v57 = vld [vmem:[%s19008_s6 + $0x4e0] sm:$0xff] }
0x115c   : > { %7908 = vmatprep.subr.bf16.mxu1 %v12191_v59  ;;  %v12278_v59 = vcombine.low %v4156_v10, %v4160_v11  ;;  %v12287_v60 = vcombine.high %v4164_v55, %v4168_v57  ;;  %v4252_v11 = vld [vmem:[%s19008_s6 + $0x780] sm:$0xff] }
0x115f   : > { %7909 = vmatpush1.bf16.msra.mxu1 %v12190_v21  ;;  %v4176_v21 = vld [vmem:[%s19008_s6 + $0x520] sm:$0xff] }
0x1160   : > { %7910 = vmatprep.subr.bf16.mxu1 %v12199_v22  ;;  %v12286_v22 = vcombine.low %v4164_v55, %v4168_v57  ;;  %v12295_v23 = vcombine.high %v4172_v20, %v4176_v21  ;;  %v4260_v57 = vld [vmem:[%s19008_s6 + $0x7c0] sm:$0xff] }
0x1163   : > { %7911 = vmatpush1.bf16.msra.mxu1 %v12198_v29  ;;  %v4184_v29 = vld [vmem:[%s19008_s6 + $0x560] sm:$0xff] }
0x1164   : > { %7912 = vmatprep.subr.bf16.mxu1 %v12207_v30  ;;  %v12294_v30 = vcombine.low %v4172_v20, %v4176_v21  ;;  %v12303_v31 = vcombine.high %v4180_v24, %v4184_v29  ;;  %v4268_v21 = vld [vmem:[%s19008_s6 + $0x800] sm:$0xff] }
0x1167   : > { %7913 = vmatpush1.bf16.msra.mxu1 %v12206_v25  ;;  %v4192_v25 = vld [vmem:[%s19008_s6 + $0x5a0] sm:$0xff] }
0x1168   : > { %7914 = vmatprep.subr.bf16.mxu1 %v12215_v26  ;;  %v12302_v26 = vcombine.low %v4180_v24, %v4184_v29  ;;  %v12311_v27 = vcombine.high %v4188_v32, %v4192_v25  ;;  %v4276_v29 = vld [vmem:[%s19008_s6 + $0x840] sm:$0xff] }
0x116b   : > { %7915 = vmatpush1.bf16.msra.mxu1 %v12214_v33  ;;  %v4200_v33 = vld [vmem:[%s19008_s6 + $0x5e0] sm:$0xff] }
0x116c   : > { %7916 = vmatprep.subr.bf16.mxu1 %v12223_v34  ;;  %v12310_v34 = vcombine.low %v4188_v32, %v4192_v25  ;;  %v12319_v37 = vcombine.high %v4196_v28, %v4200_v33  ;;  %v4284_v25 = vld [vmem:[%s19008_s6 + $0x880] sm:$0xff] }
0x116f   : > { %7917 = vmatpush1.bf16.msra.mxu1 %v12222_v39  ;;  %v4208_v39 = vld [vmem:[%s19008_s6 + $0x620] sm:$0xff] }
0x1170   : > { %7918 = vmatprep.subr.bf16.mxu1 %v12231_v40  ;;  %v12318_v40 = vcombine.low %v4196_v28, %v4200_v33  ;;  %v12327_v48 = vcombine.high %v4204_v38, %v4208_v39  ;;  %v4292_v33 = vld [vmem:[%s19008_s6 + $0x8c0] sm:$0xff] }
0x1173   : > { %7919 = vmatpush1.bf16.msra.mxu1 %v12230_v16  ;;  %v4216_v16 = vld [vmem:[%s19008_s6 + $0x660] sm:$0xff] }
0x1174   : > { %7920 = vmatprep.subr.bf16.mxu1 %v12239_v51  ;;  %v12326_v51 = vcombine.low %v4204_v38, %v4208_v39  ;;  %v12335_v17 = vcombine.high %v4212_v49, %v4216_v16  ;;  %v4300_v39 = vld [vmem:[%s19008_s6 + $0x900] sm:$0xff] }
0x1177   : > { %7921 = vmatpush1.bf16.msra.mxu1 %v12238_v53  ;;  %v4224_v53 = vld [vmem:[%s19008_s6 + $0x6a0] sm:$0xff] }
0x1178   : > { %7922 = vmatprep.subr.bf16.mxu1 %v12247_v44  ;;  %v12334_v44 = vcombine.low %v4212_v49, %v4216_v16  ;;  %v12343_v45 = vcombine.high %v4220_v52, %v4224_v53  ;;  %v4308_v16 = vld [vmem:[%s19008_s6 + $0x940] sm:$0xff] }
0x117b   : > { %7923 = vmatpush1.bf16.msra.mxu1 %v12246_v47  ;;  %v4232_v47 = vld [vmem:[%s19008_s6 + $0x6e0] sm:$0xff] }
0x117c   : > { %7924 = vmatprep.subr.bf16.mxu1 %v12255_v63  ;;  %v12342_v63 = vcombine.low %v4220_v52, %v4224_v53  ;;  %v12351_v0 = vcombine.high %v4228_v46, %v4232_v47  ;;  %v4316_v53 = vld [vmem:[%s19008_s6 + $0x980] sm:$0xff] }
0x117f   : > { %7925 = vmatpush1.bf16.msra.mxu1 %v12254_v2  ;;  %v4240_v2 = vld [vmem:[%s19008_s6 + $0x720] sm:$0xff] }
0x1180   : > { %7937 = vmatprep.subr.bf16.mxu1 %v12263_v3  ;;  %v12350_v3 = vcombine.low %v4228_v46, %v4232_v47  ;;  %v12359_v4 = vcombine.high %v4236_v1, %v4240_v2  ;;  %v4324_v47 = vld [vmem:[%s19008_s6 + $0x9c0] sm:$0xff] }
0x1182   : > { %7927 = vmatmul.mubr.bf16.vlgmr.msra.gmra.mrb[40].mxu1 %v15122_v62 }
0x1183   : > { %7938 = vmatpush1.bf16.msra.mxu1 %v12262_v8  ;;  %7969 = vmatprep.mubr.bf16.mxu1 %v15423_v18  ;;  %v4248_v8 = vld [vmem:[%s19008_s6 + $0x760] sm:$0xff] }
0x1184   : > { %7939 = vmatprep.subr.bf16.mxu1 %v12271_v9  ;;  %v12358_v9 = vcombine.low %v4236_v1, %v4240_v2  ;;  %v12367_v10 = vcombine.high %v4244_v7, %v4248_v8  ;;  %v4332_v2 = vld [vmem:[%s19008_s6 + $0xa00] sm:$0xff] }
0x1187   : > { %7940 = vmatpush1.bf16.msra.mxu1 %v12270_v12  ;;  %v4256_v12 = vld [vmem:[%s19008_s6 + $0x7a0] sm:$0xff] }
0x1188   : > { %7941 = vmatprep.subr.bf16.mxu1 %v12279_v13  ;;  %v12366_v13 = vcombine.low %v4244_v7, %v4248_v8  ;;  %v12375_v55 = vcombine.high %v4252_v11, %v4256_v12  ;;  %v4340_v8 = vld [vmem:[%s19008_s6 + $0xa40] sm:$0xff] }
0x118b   : > { %7942 = vmatpush1.bf16.msra.mxu1 %v12278_v59  ;;  %v4264_v59 = vld [vmem:[%s19008_s6 + $0x7e0] sm:$0xff] }
0x118c   : > { %7943 = vmatprep.subr.bf16.mxu1 %v12287_v60  ;;  %v12374_v60 = vcombine.low %v4252_v11, %v4256_v12  ;;  %v12383_v20 = vcombine.high %v4260_v57, %v4264_v59  ;;  %v4348_v12 = vld [vmem:[%s19008_s6 + $0xa80] sm:$0xff] }
0x118f   : > { %7944 = vmatpush1.bf16.msra.mxu1 %v12286_v22  ;;  %v4272_v22 = vld [vmem:[%s19008_s6 + $0x820] sm:$0xff] }
0x1190   : > { %7945 = vmatprep.subr.bf16.mxu1 %v12295_v23  ;;  %v12382_v23 = vcombine.low %v4260_v57, %v4264_v59  ;;  %v12391_v24 = vcombine.high %v4268_v21, %v4272_v22  ;;  %v4356_v59 = vld [vmem:[%s19008_s6 + $0xac0] sm:$0xff] }
0x1193   : > { %7946 = vmatpush1.bf16.msra.mxu1 %v12294_v30  ;;  %v4280_v30 = vld [vmem:[%s19008_s6 + $0x860] sm:$0xff] }
0x1194   : > { %7947 = vmatprep.subr.bf16.mxu1 %v12303_v31  ;;  %v12390_v31 = vcombine.low %v4268_v21, %v4272_v22  ;;  %v12399_v32 = vcombine.high %v4276_v29, %v4280_v30  ;;  %v4364_v22 = vld [vmem:[%s19008_s6 + $0xb00] sm:$0xff] }
0x1197   : > { %7948 = vmatpush1.bf16.msra.mxu1 %v12302_v26  ;;  %v4288_v26 = vld [vmem:[%s19008_s6 + $0x8a0] sm:$0xff] }
0x1198   : > { %7949 = vmatprep.subr.bf16.mxu1 %v12311_v27  ;;  %v12398_v27 = vcombine.low %v4276_v29, %v4280_v30  ;;  %v12407_v28 = vcombine.high %v4284_v25, %v4288_v26  ;;  %v4372_v30 = vld [vmem:[%s19008_s6 + $0xb40] sm:$0xff] }
0x119b   : > { %7950 = vmatpush1.bf16.msra.mxu1 %v12310_v34  ;;  %v4296_v34 = vld [vmem:[%s19008_s6 + $0x8e0] sm:$0xff] }
0x119c   : > { %7951 = vmatprep.subr.bf16.mxu1 %v12319_v37  ;;  %v12406_v37 = vcombine.low %v4284_v25, %v4288_v26  ;;  %v12415_v38 = vcombine.high %v4292_v33, %v4296_v34  ;;  %v4380_v26 = vld [vmem:[%s19008_s6 + $0xb80] sm:$0xff] }
0x119f   : > { %7952 = vmatpush1.bf16.msra.mxu1 %v12318_v40  ;;  %v4304_v40 = vld [vmem:[%s19008_s6 + $0x920] sm:$0xff] }
0x11a0   : > { %7953 = vmatprep.subr.bf16.mxu1 %v12327_v48  ;;  %v12414_v48 = vcombine.low %v4292_v33, %v4296_v34  ;;  %v12423_v49 = vcombine.high %v4300_v39, %v4304_v40  ;;  %v4388_v34 = vld [vmem:[%s19008_s6 + $0xbc0] sm:$0xff] }
0x11a3   : > { %7954 = vmatpush1.bf16.msra.mxu1 %v12326_v51  ;;  %v4312_v51 = vld [vmem:[%s19008_s6 + $0x960] sm:$0xff] }
0x11a4   : > { %7955 = vmatprep.subr.bf16.mxu1 %v12335_v17  ;;  %v12422_v17 = vcombine.low %v4300_v39, %v4304_v40  ;;  %v12431_v52 = vcombine.high %v4308_v16, %v4312_v51 }
0x11a7   : > { %7956 = vmatpush1.bf16.msra.mxu1 %v12334_v44  ;;  %v4320_v44 = vld [vmem:[%s19008_s6 + $0x9a0] sm:$0xff] }
0x11a8   : > { %7957 = vmatprep.subr.bf16.mxu1 %v12343_v45  ;;  %v12430_v45 = vcombine.low %v4308_v16, %v4312_v51  ;;  %v12439_v46 = vcombine.high %v4316_v53, %v4320_v44 }
0x11ab   : > { %7958 = vmatpush1.bf16.msra.mxu1 %v12342_v63  ;;  %v4328_v63 = vld [vmem:[%s19008_s6 + $0x9e0] sm:$0xff] }
0x11ac   : > { %7959 = vmatprep.subr.bf16.mxu1 %v12351_v0  ;;  %v12438_v0 = vcombine.low %v4316_v53, %v4320_v44  ;;  %v12447_v1 = vcombine.high %v4324_v47, %v4328_v63 }
0x11af   : > { %7960 = vmatpush1.bf16.msra.mxu1 %v12350_v3  ;;  %v4336_v3 = vld [vmem:[%s19008_s6 + $0xa20] sm:$0xff] }
0x11b0   : > { %7961 = vmatprep.subr.bf16.mxu1 %v12359_v4  ;;  %v12446_v4 = vcombine.low %v4324_v47, %v4328_v63  ;;  %v12455_v7 = vcombine.high %v4332_v2, %v4336_v3 }
0x11b3   : > { %7962 = vmatpush1.bf16.msra.mxu1 %v12358_v9  ;;  %v4344_v9 = vld [vmem:[%s19008_s6 + $0xa60] sm:$0xff] }
0x11b4   : > { %7963 = vmatprep.subr.bf16.mxu1 %v12367_v10  ;;  %v12454_v10 = vcombine.low %v4332_v2, %v4336_v3  ;;  %v12463_v11 = vcombine.high %v4340_v8, %v4344_v9 }
0x11b7   : > { %7964 = vmatpush1.bf16.msra.mxu1 %v12366_v13  ;;  %v4352_v13 = vld [vmem:[%s19008_s6 + $0xaa0] sm:$0xff] }
0x11b8   : > { %7965 = vmatprep.subr.bf16.mxu1 %v12375_v55  ;;  %v12462_v55 = vcombine.low %v4340_v8, %v4344_v9  ;;  %v12471_v57 = vcombine.high %v4348_v12, %v4352_v13 }
0x11bb   : > { %7966 = vmatpush1.bf16.msra.mxu1 %v12374_v60  ;;  %v4360_v60 = vld [vmem:[%s19008_s6 + $0xae0] sm:$0xff] }
0x11bc   : > { %7967 = vmatprep.subr.bf16.mxu1 %v12383_v20  ;;  %v12470_v20 = vcombine.low %v4348_v12, %v4352_v13  ;;  %v12479_v21 = vcombine.high %v4356_v59, %v4360_v60 }
0x11bf   : > { %7968 = vmatpush1.bf16.msra.mxu1 %v12382_v23  ;;  %v4368_v23 = vld [vmem:[%s19008_s6 + $0xb20] sm:$0xff] }
0x11c0   : > { %7980 = vmatprep.subr.bf16.mxu1 %v12391_v24  ;;  %v12478_v24 = vcombine.low %v4356_v59, %v4360_v60  ;;  %v12487_v29 = vcombine.high %v4364_v22, %v4368_v23 }
0x11c2   : > { %7970 = vmatmul.mubr.bf16.vlgmr.msra.gmra.mrb[40].mxu1 %v15427_v19 }
0x11c3   : > { %7981 = vmatpush1.bf16.msra.mxu1 %v12390_v31  ;;  %8012 = vmatprep.mubr.bf16.mxu1 %v15740_v14  ;;  %v4376_v31 = vld [vmem:[%s19008_s6 + $0xb60] sm:$0xff] }
0x11c4   : > { %7982 = vmatprep.subr.bf16.mxu1 %v12399_v32  ;;  %v12486_v32 = vcombine.low %v4364_v22, %v4368_v23  ;;  %v12495_v25 = vcombine.high %v4372_v30, %v4376_v31 }
0x11c7   : > { %7983 = vmatpush1.bf16.msra.mxu1 %v12398_v27  ;;  %v4384_v27 = vld [vmem:[%s19008_s6 + $0xba0] sm:$0xff] }
0x11c8   : > { %7984 = vmatprep.subr.bf16.mxu1 %v12407_v28  ;;  %v12494_v28 = vcombine.low %v4372_v30, %v4376_v31  ;;  %v12503_v33 = vcombine.high %v4380_v26, %v4384_v27 }
0x11cb   : > { %7985 = vmatpush1.bf16.msra.mxu1 %v12406_v37  ;;  %v4392_v37 = vld [vmem:[%s19008_s6 + $0xbe0] sm:$0xff] }
0x11cc   : > { %7986 = vmatprep.subr.bf16.mxu1 %v12415_v38  ;;  %v12502_v38 = vcombine.low %v4380_v26, %v4384_v27  ;;  %v12511_v39 = vcombine.high %v4388_v34, %v4392_v37  ;;  %v12510_v40 = vcombine.low %v4388_v34, %v4392_v37 }
0x11cf   : > { %7987 = vmatpush1.bf16.msra.mxu1 %v12414_v48  ;;  %v12018_v48 = vld [vmem:[%s19005_s3 + $0x9] sm:$0x7] }
0x11d0   : > { %7988 = vmatprep.subr.bf16.mxu1 %v12423_v49  ;;  %v3189_v49 = vrot.slane %v12018_v48, %v14813_v5  ;;  %v3197_v44 = vrot.slane %v12018_v48, %v14809_v58 }
0x11d3   : > { %7989 = vmatpush1.bf16.msra.mxu1 %v12422_v17  ;;  %v3193_v17 = vrot.slane %v12018_v48, %v14816_v6  ;;  %v13850_v48 = vld [vmem:[%s19006_s4 + $0x304] ss:$8 sps:$4 sm:$0xff]  }
0x11d4   : > { %7990 = vmatprep.subr.bf16.mxu1 %v12431_v52 }
0x11d7   : > { %7991 = vmatpush1.bf16.msra.mxu1 %v12430_v45 }
0x11d8   : > { %7992 = vmatprep.subr.bf16.mxu1 %v12439_v46 }
0x11db   : > { %7993 = vmatpush1.bf16.msra.mxu1 %v12438_v0 }
0x11dc   : > { %7994 = vmatprep.subr.bf16.mxu1 %v12447_v1 }
0x11df   : > { %7995 = vmatpush1.bf16.msra.mxu1 %v12446_v4 }
0x11e0   : > { %7996 = vmatprep.subr.bf16.mxu1 %v12455_v7 }
0x11e3   : > { %7997 = vmatpush1.bf16.msra.mxu1 %v12454_v10 }
0x11e4   : > { %7998 = vmatprep.subr.bf16.mxu1 %v12463_v11 }
0x11e7   : > { %7999 = vmatpush1.bf16.msra.mxu1 %v12462_v55 }
0x11e8   : > { %8000 = vmatprep.subr.bf16.mxu1 %v12471_v57 }
0x11eb   : > { %8001 = vmatpush1.bf16.msra.mxu1 %v12470_v20 }
0x11ec   : > { %8002 = vmatprep.subr.bf16.mxu1 %v12479_v21 }
0x11ef   : > { %8003 = vmatpush1.bf16.msra.mxu1 %v12478_v24 }
0x11f0   : > { %8004 = vmatprep.subr.bf16.mxu1 %v12487_v29 }
0x11f3   : > { %8005 = vmatpush1.bf16.msra.mxu1 %v12486_v32 }
0x11f4   : > { %8006 = vmatprep.subr.bf16.mxu1 %v12495_v25 }
0x11f7   : > { %8007 = vmatpush1.bf16.msra.mxu1 %v12494_v28 }
0x11f8   : > { %8008 = vmatprep.subr.bf16.mxu1 %v12503_v33 }
0x11fb   : > { %8009 = vmatpush1.bf16.msra.mxu1 %v12502_v38 }
0x11fc   : > { %8010 = vmatprep.subr.bf16.mxu1 %v12511_v39 }
0x11ff   : > { %8011 = vmatpush1.bf16.msra.mxu1 %v12510_v40  ;;  %v13848_v40 = vld [vmem:[%s19006_s4 + $0x300] ss:$8 sps:$4 sm:$0xff]  }
0x1202   : > { %8013 = vmatmul.mubr.bf16.vlgmr.msra.gmra.mrb[40].mxu1 %v15744_v15 }
0x1215   : > { %v3491_v16 = vpop.f32.mrb[36].mxu0  ;;  %v13209_v51 = vpop.f32.mrb[36].mxu1 }
0x1216   : > { %v3493_v52 = vpop.f32.mrb[37].mxu0  ;;  %v13210_v53 = vpop.f32.mrb[37].mxu1  ;;  %v3492_v63 = vadd.f32 %v3491_v16, %v3189_v49  ;;  %v13854_v16 = vld [vmem:[%s19006_s4 + $0x320] ss:$8 sps:$4 sm:$0xff]  }
0x1217   : > { %v13211_v45 = vadd.f32 %v13210_v53, %v13209_v51  ;;  %v3495_v46 = vpop.f32.mrb[38].mxu0  ;;  %v13212_v47 = vpop.f32.mrb[38].mxu1  ;;  %v3494_v3 = vadd.f32 %v3493_v52, %v3193_v17  ;;  %v13859_v51 = vld [vmem:[%s19006_s4 + $0x334] ss:$8 sps:$4 sm:$0xff]   ;;  %v13862_v52 = vld [vmem:[%s19006_s4 + $0x344] ss:$8 sps:$4 sm:$0xff]  }
0x1218   : > { %v3496_v0 = vadd.f32 %v3495_v46, %v3189_v49  ;;  %v3497_v1 = vpop.f32.mrb[39].mxu0  ;;  %v13213_v2 = vpop.f32.mrb[39].mxu1  ;;  %v13853_v49 = vld [vmem:[%s19006_s4 + $0x314] ss:$8 sps:$4 sm:$0xff]   ;;  %v13860_v53 = vld [vmem:[%s19006_s4 + $0x340] ss:$8 sps:$4 sm:$0xff]  }
0x1219   : > { %v3498_v4 = vadd.f32 %v3497_v1, %v3193_v17  ;;  %v13214_v7 = vadd.f32 %v13213_v2, %v13212_v47  ;;  %v3535_v9 = vadd.f32 %v13211_v45, %v3197_v44  ;;  %v13857_v17 = vld [vmem:[%s19006_s4 + $0x330] ss:$8 sps:$4 sm:$0xff]   ;;  %v13868_v46 = vld [vmem:[%s19006_s4 + $0x364] ss:$8 sps:$4 sm:$0xff]   ;;  %v13866_v47 = vld [vmem:[%s19006_s4 + $0x360] ss:$8 sps:$4 sm:$0xff]  }
0x121a   : > { %v3606_v8 = vpack.c.bf16 %v3496_v0, %v3492_v63  ;;  %v13863_v45 = vld [vmem:[%s19006_s4 + $0x350] ss:$8 sps:$4 sm:$0xff]   ;;  %v13871_v63 = vld [vmem:[%s19006_s4 + $0x374] ss:$8 sps:$4 sm:$0xff]   ;;  %v13874_v1 = vld [vmem:[%s19006_s4 + $0x384] ss:$8 sps:$4 sm:$0xff]  }
0x121b   : > { %v3607_v10 = vpack.c.bf16 %v3498_v4, %v3494_v3  ;;  %v3538_v11 = vadd.f32 %v13214_v7, %v3197_v44  ;;  %v13865_v44 = vld [vmem:[%s19006_s4 + $0x354] ss:$8 sps:$4 sm:$0xff]   ;;  %v13869_v0 = vld [vmem:[%s19006_s4 + $0x370] ss:$8 sps:$4 sm:$0xff]   ;;  %v13872_v2 = vld [vmem:[%s19006_s4 + $0x380] ss:$8 sps:$4 sm:$0xff]  }
0x121c   : > { %v13877_v3 = vld [vmem:[%s19006_s4 + $0x394] ss:$8 sps:$4 sm:$0xff]   ;;  %v13875_v4 = vld [vmem:[%s19006_s4 + $0x390] ss:$8 sps:$4 sm:$0xff]   ;;  %v13880_v7 = vld [vmem:[%s19006_s4 + $0x3a4] ss:$8 sps:$4 sm:$0xff]  }
0x121d   : > { %v3541_v12 = vpack.c.bf16 %v3538_v11, %v3535_v9  ;;  %v13883_v9 = vld [vmem:[%s19006_s4 + $0x3b4] ss:$8 sps:$4 sm:$0xff]   ;;  %v13886_v11 = vld [vmem:[%s19006_s4 + $0x3c4] ss:$8 sps:$4 sm:$0xff]  }
0x121f   : > { %13278 = vmatpush3.bf16.xpose.msra.mxu0 %v3541_v12 }
0x1220   : > { %3627 = vmatprep.subr.bf16.mxu0 %v3607_v10  ;;  %v13881_v10 = vld [vmem:[%s19006_s4 + $0x3b0] ss:$8 sps:$4 sm:$0xff]  }
0x1226   : > { %13280 = vmatmul.mubr.bf16.vlgmr.msra.gmra.mrb[40].mxu0 %v3541_v12  ;;  %v13884_v12 = vld [vmem:[%s19006_s4 + $0x3c0] ss:$8 sps:$4 sm:$0xff]  }
0x1227   : > { %3628 = vmatpush1.bf16.msra.mxu0 %v3606_v8  ;;  %3659 = vmatprep.mubr.bf16.mxu0 %v14512_v36  ;;  %v13878_v8 = vld [vmem:[%s19006_s4 + $0x3a0] ss:$8 sps:$4 sm:$0xff]  }
0x1228   : > { %13283 = vmatprep.subr.bf16.mxu0 %v14509_v54 }
0x12f9   : > { %v3576_v13 = vpop.f32.mrb[40].mxu0 }
0x12fa   : > { %v13281_v55 = vpop.f32.mrb[41].mxu0  ;;  %v3583_v57 = vsel %vm956_vm1, %v3576_v13, -inf }
0x12fb   : > { %3584 = vmax.xlane.f32.xlu0 %v3583_v57  ;;  %v3579_v59 = vpop.f32.mrb[42].mxu0  ;;  %v13887_v55 = vld [vmem:[%s19006_s4 + $0x3d0] ss:$8 sps:$4 sm:$0xff]  }
0x12fc   : > { %v13282_v60 = vpop.f32.mrb[43].mxu0  ;;  %v3586_v20 = vsel %vm956_vm1, %v3579_v59, -inf }
0x12fd   : > { %3587 = vmax.xlane.f32.xlu1 %v3586_v20 }
0x1388   : > { %v3585_v21 = vpop.xlane.xlu0 %3584 }
0x1389   : > { %v3589_v22 = vsub.f32 %v3576_v13, %v3585_v21  ;;  %v13889_v13 = vld [vmem:[%s19006_s4 + $0x3d4] ss:$8 sps:$4 sm:$0xff]  }
0x138a   : > { %v3588_v23 = vpop.xlane.xlu1 %3587 }
0x138b   : > { %v3591_v24 = vmul.f32 1.442695, %v3589_v22  ;;  %v3590_v29 = vsub.f32 %v3579_v59, %v3588_v23 }
0x138d   : > { %14428 = vpow2.f32 %v3591_v24  ;;  %v3593_v30 = vmul.f32 1.442695, %v3590_v29 }
0x138f   : > { %14430 = vpow2.f32 %v3593_v30 }
0x1397   : > { %v14429_v36 = vpop.eup %14428 }
0x1398   : > { %v3595_v31 = vsel %vm956_vm1, %v14429_v36, 0.0 }
0x1399   : > { %v14431_v32 = vpop.eup %14430  ;;  %3596 = vadd.xlane.f32.xlu1 %v3595_v31  ;;  %v13892_v31 = vld [vmem:[%s19006_s4 + $0x3e4] ss:$8 sps:$4 sm:$0xff]  }
0x139a   : > { %v3598_v25 = vsel %vm956_vm1, %v14431_v32, 0.0 }
0x139d   : > { %3599 = vadd.xlane.f32.xlu1 %v3598_v25 }
0x1426   : > { %v3597_v26 = vpop.xlane.xlu1 %3596 }
0x1427   : > { %14432 = vrcp.f32 %v3597_v26  ;;  %v13895_v26 = vld [vmem:[%s19006_s4 + $0x3f4] ss:$8 sps:$4 sm:$0xff]  }
0x142a   : > { %v3600_v27 = vpop.xlane.xlu1 %3599 }
0x142b   : > { %14434 = vrcp.f32 %v3600_v27  ;;  %v13893_v27 = vld [vmem:[%s19006_s4 + $0x3f0] ss:$8 sps:$4 sm:$0xff]  }
0x1431   : > { %v14433_v28 = vpop.eup %14432 }
0x1432   : > { %v3603_v34 = vmul.f32 %v14433_v28, %v14429_v36  ;;  %v4013_v28 = vld [vmem:[%s19008_s6 + $0x8] sm:$0xff] }
0x1435   : > { %v14435_v33 = vpop.eup %14434 }
0x1436   : > { %v3604_v37 = vmul.f32 %v14435_v33, %v14431_v32  ;;  %v13890_v32 = vld [vmem:[%s19006_s4 + $0x3e0] ss:$8 sps:$4 sm:$0xff]  }
0x1437   : > { %v4017_v33 = vld [vmem:[%s19008_s6 + $0x28] sm:$0xff] }
0x1438   : > { %v3605_v38 = vpack.c.bf16 %v3604_v37, %v3603_v34  ;;  %v12137_v34 = vcombine.high %v4013_v28, %v4017_v33  ;;  %v12136_v37 = vcombine.low %v4013_v28, %v4017_v33  ;;  %v4396_v28 = vld [vmem:[%s19008_s6 + $0xc00] sm:$0xff] }
0x1439   : > { %v4400_v33 = vld [vmem:[%s19008_s6 + $0xc20] sm:$0xff] }
0x143a   : > { %3608 = vxpose.xlu1.c.b16.start.end [1/1] (short) (narrow) %v3605_v38, 16 }
0x14a0   : > { %v3616_v39 = vpop.trf.xlu1 }
0x14a1   : > { %12067 = vmatmul.mubr.msk.bf16.vlgmr.msra.gmra.mrb[44].mxu0 %vm956_vm1, %v3616_v39 }
0x14a2   : > { %13284 = vmatpush3.bf16.msra.mxu0 %v14511_v35  ;;  %13285 = vmatprep.mubr.msk.bf16.mxu0 %vm14510_vm0, %v14509_v54  ;;  %v13851_v54 = vld [vmem:[%s19006_s4 + $0x310] ss:$8 sps:$4 sm:$0xff]   ;;  %v13856_v35 = vld [vmem:[%s19006_s4 + $0x324] ss:$8 sps:$4 sm:$0xff]  }
0x14a3   : > { %3939 = vmatprep.subr.bf16.mxu0 %v13850_v48 }
0x14a9   : > { %13286 = vmatmul.mubr.msk.bf16.vlgmr.msra.gmra.mrb[48].mxu0 %vm956_vm1, %v3616_v39 }
0x14aa   : > { %3940 = vmatpush1.bf16.msra.mxu0 %v13848_v40 }
0x14ab   : > { %3941 = vmatprep.subr.bf16.mxu0 %v13853_v49 }
0x14ae   : > { %3942 = vmatpush1.bf16.msra.mxu0 %v13851_v54 }
0x14af   : > { %3943 = vmatprep.subr.bf16.mxu0 %v13856_v35 }
0x14b2   : > { %3944 = vmatpush1.bf16.msra.mxu0 %v13854_v16 }
0x14b3   : > { %3945 = vmatprep.subr.bf16.mxu0 %v13859_v51 }
0x14b6   : > { %3946 = vmatpush1.bf16.msra.mxu0 %v13857_v17 }
0x14b7   : > { %3947 = vmatprep.subr.bf16.mxu0 %v13862_v52  ;;  %v4021_v52 = vld [vmem:[%s19008_s6 + $0x48] sm:$0xff] }
0x14ba   : > { %3948 = vmatpush1.bf16.msra.mxu0 %v13860_v53  ;;  %v4025_v53 = vld [vmem:[%s19008_s6 + $0x68] sm:$0xff] }
0x14bb   : > { %3949 = vmatprep.subr.bf16.mxu0 %v13865_v44 }
0x14be   : > { %3950 = vmatpush1.bf16.msra.mxu0 %v13863_v45 }
0x14bf   : > { %3951 = vmatprep.subr.bf16.mxu0 %v13868_v46  ;;  %v12145_v46 = vcombine.high %v4021_v52, %v4025_v53 }
0x14c2   : > { %3952 = vmatpush1.bf16.msra.mxu0 %v13866_v47  ;;  %v4029_v47 = vld [vmem:[%s19008_s6 + $0x88] sm:$0xff] }
0x14c3   : > { %3953 = vmatprep.subr.bf16.mxu0 %v13871_v63  ;;  %v4033_v63 = vld [vmem:[%s19008_s6 + $0xa8] sm:$0xff] }
0x14c6   : > { %3954 = vmatpush1.bf16.msra.mxu0 %v13869_v0  ;;  %v12144_v0 = vcombine.low %v4021_v52, %v4025_v53  ;;  %v4105_v52 = vld [vmem:[%s19008_s6 + $0x2e8] sm:$0xff] }
0x14c7   : > { %3955 = vmatprep.subr.bf16.mxu0 %v13874_v1  ;;  %v12153_v1 = vcombine.high %v4029_v47, %v4033_v63 }
0x14ca   : > { %3956 = vmatpush1.bf16.msra.mxu0 %v13872_v2  ;;  %v4037_v2 = vld [vmem:[%s19008_s6 + $0xc8] sm:$0xff] }
0x14cb   : > { %3957 = vmatprep.subr.bf16.mxu0 %v13877_v3  ;;  %v4041_v3 = vld [vmem:[%s19008_s6 + $0xe8] sm:$0xff] }
0x14ce   : > { %3958 = vmatpush1.bf16.msra.mxu0 %v13875_v4  ;;  %v12152_v4 = vcombine.low %v4029_v47, %v4033_v63 }
0x14cf   : > { %3959 = vmatprep.subr.bf16.mxu0 %v13880_v7  ;;  %v12161_v7 = vcombine.high %v4037_v2, %v4041_v3 }
0x14d2   : > { %3960 = vmatpush1.bf16.msra.mxu0 %v13878_v8  ;;  %v4045_v8 = vld [vmem:[%s19008_s6 + $0x108] sm:$0xff] }
0x14d3   : > { %3961 = vmatprep.subr.bf16.mxu0 %v13883_v9  ;;  %v4049_v9 = vld [vmem:[%s19008_s6 + $0x128] sm:$0xff] }
0x14d6   : > { %3962 = vmatpush1.bf16.msra.mxu0 %v13881_v10  ;;  %v12160_v10 = vcombine.low %v4037_v2, %v4041_v3  ;;  %v4420_v3 = vld [vmem:[%s19008_s6 + $0xcc0] sm:$0xff] }
0x14d7   : > { %3963 = vmatprep.subr.bf16.mxu0 %v13886_v11  ;;  %v12169_v11 = vcombine.high %v4045_v8, %v4049_v9 }
0x14da   : > { %3964 = vmatpush1.bf16.msra.mxu0 %v13884_v12  ;;  %v4053_v12 = vld [vmem:[%s19008_s6 + $0x148] sm:$0xff] }
0x14db   : > { %3965 = vmatprep.subr.bf16.mxu0 %v13889_v13  ;;  %v4057_v13 = vld [vmem:[%s19008_s6 + $0x168] sm:$0xff] }
0x14de   : > { %3966 = vmatpush1.bf16.msra.mxu0 %v13887_v55  ;;  %v12168_v55 = vcombine.low %v4045_v8, %v4049_v9 }
0x14df   : > { %3967 = vmatprep.subr.bf16.mxu0 %v13892_v31 }
0x14e2   : > { %3968 = vmatpush1.bf16.msra.mxu0 %v13890_v32 }
0x14e3   : > { %3969 = vmatprep.subr.bf16.mxu0 %v13895_v26  ;;  %v4089_v26 = vld [vmem:[%s19008_s6 + $0x268] sm:$0xff] }
0x14e6   : > { %3970 = vmatpush1.bf16.msra.mxu0 %v13893_v27 }
0x14e7   : > { %8109 = vmatprep.subr.bf16.mxu0 %v12137_v34 }
0x1574   : > { %v3661_v57 = vpop.f32.mrb[44].mxu0 }
0x1575   : > { %v3663_v59 = vpop.f32.mrb[45].mxu0 }
0x1576   : > { %v3665_v60 = vpop.f32.mrb[46].mxu0 }
0x1577   : > { %v3667_v20 = vpop.f32.mrb[47].mxu0 }
0x157c   : > { %v3704_v21 = vpop.f32.mrb[48].mxu0 }
0x157d   : > { %v3705_v22 = vadd.f32 1e-09, %v3704_v21  ;;  %v13287_v23 = vpop.f32.mrb[49].mxu0 }
0x157e   : > { %v3707_v24 = vpop.f32.mrb[50].mxu0  ;;  %v4073_v23 = vld [vmem:[%s19008_s6 + $0x1e8] sm:$0xff] }
0x157f   : > { %14436 = vrcp.f32 %v3705_v22  ;;  %v3708_v29 = vadd.f32 1e-09, %v3707_v24  ;;  %v13288_v30 = vpop.f32.mrb[51].mxu0  ;;  %v4069_v22 = vld [vmem:[%s19008_s6 + $0x1c8] sm:$0xff] }
0x1580   : > { %v4077_v30 = vld [vmem:[%s19008_s6 + $0x208] sm:$0xff]  ;;  %v12192_v31 = vcombine.low %v4069_v22, %v4073_v23 }
0x1581   : > { %14438 = vrcp.f32 %v3708_v29  ;;  %v12193_v29 = vcombine.high %v4069_v22, %v4073_v23  ;;  %v4436_v23 = vld [vmem:[%s19008_s6 + $0xd40] sm:$0xff] }
0x1589   : > { %v14437_v36 = vpop.eup %14436 }
0x158a   : > { %3715 = vperm.xlu0 %13447, %v14437_v36   ;;  %v4081_v36 = vld [vmem:[%s19008_s6 + $0x228] sm:$0xff] }
0x158b   : > { %v14439_v25 = vpop.eup %14438  ;;  %v12201_v32 = vcombine.high %v4077_v30, %v4081_v36  ;;  %v12200_v27 = vcombine.low %v4077_v30, %v4081_v36 }
0x158e   : > { %3720 = vperm.xlu0 %13447, %v14439_v25   ;;  %v4085_v25 = vld [vmem:[%s19008_s6 + $0x248] sm:$0xff] }
0x158f   : > { %v12209_v34 = vcombine.high %v4085_v25, %v4089_v26 }
0x1609   : > { %v3716_v38 = vpop.permute.xlu0 %3715 }
0x160a   : > { %v3723_v39 = vmul.f32 %v3716_v38, %v3661_v57  ;;  %v3724_v40 = vmul.f32 %v3716_v38, %v3663_v59  ;;  %v12177_v57 = vcombine.high %v4053_v12, %v4057_v13  ;;  %v4061_v59 = vld [vmem:[%s19008_s6 + $0x188] sm:$0xff]  ;;  %v12519_v38 = vcombine.high %v4396_v28, %v4400_v33 }
0x160c   : > { %v3727_v35 = vsub.f32 %v15736_v50, %v3723_v39  ;;  %v3728_v16 = vsub.f32 %v15724_v42, %v3724_v40  ;;  %v4093_v39 = vld [vmem:[%s19008_s6 + $0x288] sm:$0xff]  ;;  %8023 = vmatprep.subr.bf16.mxu1 %v12519_v38 }
0x160d   : > { %v3721_v48 = vpop.permute.xlu0 %3720  ;;  %v4097_v40 = vld [vmem:[%s19008_s6 + $0x2a8] sm:$0xff] }
0x160e   : > { %v3725_v49 = vmul.f32 %v3721_v48, %v3665_v60  ;;  %v3726_v54 = vmul.f32 %v3721_v48, %v3667_v20  ;;  %v4065_v60 = vld [vmem:[%s19008_s6 + $0x1a8] sm:$0xff]  ;;  %v12176_v20 = vcombine.low %v4053_v12, %v4057_v13  ;;  %v12208_v48 = vcombine.low %v4085_v25, %v4089_v26  ;;  %v4428_v13 = vld [vmem:[%s19008_s6 + $0xd00] sm:$0xff] }
0x160f   : > { %v12185_v21 = vcombine.high %v4061_v59, %v4065_v60  ;;  %v12184_v24 = vcombine.low %v4061_v59, %v4065_v60  ;;  %v12216_v53 = vcombine.low %v4093_v39, %v4097_v40  ;;  %v4444_v26 = vld [vmem:[%s19008_s6 + $0xd80] sm:$0xff]  ;;  %v4145_v38 = vld [vmem:[%s19008_s6 + $0x428] sm:$0xff] }
0x1610   : > { %v3729_v51 = vsub.f32 %v15721_v41, %v3725_v49  ;;  %v3730_v17 = vsub.f32 %v15727_v43, %v3726_v54  ;;  %v4404_v49 = vld [vmem:[%s19008_s6 + $0xc40] sm:$0xff] }
0x1611   : > { %v4408_v54 = vld [vmem:[%s19008_s6 + $0xc60] sm:$0xff] }
0x1612   : > { %v3731_v44 = vpack.c.bf16 %v3729_v51, %v3727_v35  ;;  %v3732_v45 = vpack.c.bf16 %v3730_v17, %v3728_v16  ;;  %v12217_v35 = vcombine.high %v4093_v39, %v4097_v40  ;;  %v12526_v16 = vcombine.low %v4404_v49, %v4408_v54  ;;  %v4101_v17 = vld [vmem:[%s19008_s6 + $0x2c8] sm:$0xff]  ;;  %v4452_v40 = vld [vmem:[%s19008_s6 + $0xdc0] sm:$0xff] }
0x1613   : > { %v12527_v51 = vcombine.high %v4404_v49, %v4408_v54  ;;  %v12224_v2 = vcombine.low %v4101_v17, %v4105_v52 }
0x1614   : > { %3971 = vmatprep.mubr.bf16.mxu0 %v3732_v45  ;;  %v4416_v45 = vld [vmem:[%s19008_s6 + $0xca0] sm:$0xff] }
0x1615   : > { %3972 = vmatmul.mubr.bf16.vlgmr.msra.gmra.mrb[52].mxu0 %v3731_v44  ;;  %v4412_v44 = vld [vmem:[%s19008_s6 + $0xc80] sm:$0xff] }
0x1616   : > { %8110 = vmatpush1.bf16.msra.mxu0 %v12136_v37  ;;  %8141 = vmatprep.mubr.bf16.mxu0 %v15118_v61  ;;  %v12518_v37 = vcombine.low %v4396_v28, %v4400_v33  ;;  %v12534_v47 = vcombine.low %v4412_v44, %v4416_v45  ;;  %v12535_v63 = vcombine.high %v4412_v44, %v4416_v45 }
0x1617   : > { %8111 = vmatprep.subr.bf16.mxu0 %v12145_v46  ;;  %v12225_v46 = vcombine.high %v4101_v17, %v4105_v52  ;;  %v4460_v52 = vld [vmem:[%s19008_s6 + $0xe00] sm:$0xff] }
0x1618   : > { %8024 = vmatpush1.bf16.msra.mxu1 %v12518_v37  ;;  %v4141_v37 = vld [vmem:[%s19008_s6 + $0x408] sm:$0xff] }
0x1619   : > { %8025 = vmatprep.subr.bf16.mxu1 %v12527_v51  ;;  %v12265_v49 = vcombine.high %v4141_v37, %v4145_v38  ;;  %v4153_v51 = vld [vmem:[%s19008_s6 + $0x468] sm:$0xff]  ;;  %v12264_v17 = vcombine.low %v4141_v37, %v4145_v38  ;;  %v4500_v38 = vld [vmem:[%s19008_s6 + $0xf40] sm:$0xff] }
0x161a   : > { %8112 = vmatpush1.bf16.msra.mxu0 %v12144_v0  ;;  %v4109_v0 = vld [vmem:[%s19008_s6 + $0x308] sm:$0xff] }
0x161b   : > { %8113 = vmatprep.subr.bf16.mxu0 %v12153_v1  ;;  %v4113_v1 = vld [vmem:[%s19008_s6 + $0x328] sm:$0xff] }
0x161c   : > { %8026 = vmatpush1.bf16.msra.mxu1 %v12526_v16  ;;  %v12232_v12 = vcombine.low %v4109_v0, %v4113_v1  ;;  %v4149_v16 = vld [vmem:[%s19008_s6 + $0x448] sm:$0xff] }
0x161d   : > { %8027 = vmatprep.subr.bf16.mxu1 %v12535_v63  ;;  %v12273_v44 = vcombine.high %v4149_v16, %v4153_v51  ;;  %v4161_v63 = vld [vmem:[%s19008_s6 + $0x4a8] sm:$0xff] }
0x161e   : > { %8114 = vmatpush1.bf16.msra.mxu0 %v12152_v4  ;;  %v4424_v4 = vld [vmem:[%s19008_s6 + $0xce0] sm:$0xff] }
0x161f   : > { %8115 = vmatprep.subr.bf16.mxu0 %v12161_v7  ;;  %v12233_v7 = vcombine.high %v4109_v0, %v4113_v1  ;;  %v12542_v8 = vcombine.low %v4420_v3, %v4424_v4  ;;  %v12543_v9 = vcombine.high %v4420_v3, %v4424_v4  ;;  %v12272_v0 = vcombine.low %v4149_v16, %v4153_v51  ;;  %v4468_v1 = vld [vmem:[%s19008_s6 + $0xe40] sm:$0xff] }
0x1620   : > { %8028 = vmatpush1.bf16.msra.mxu1 %v12534_v47  ;;  %v4157_v47 = vld [vmem:[%s19008_s6 + $0x488] sm:$0xff]  ;;  %v4508_v51 = vld [vmem:[%s19008_s6 + $0xf80] sm:$0xff] }
0x1621   : > { %8029 = vmatprep.subr.bf16.mxu1 %v12543_v9  ;;  %v12281_v3 = vcombine.high %v4157_v47, %v4161_v63  ;;  %v4169_v9 = vld [vmem:[%s19008_s6 + $0x4e8] sm:$0xff] }
0x1622   : > { %8116 = vmatpush1.bf16.msra.mxu0 %v12160_v10  ;;  %v4117_v10 = vld [vmem:[%s19008_s6 + $0x348] sm:$0xff] }
0x1623   : > { %8117 = vmatprep.subr.bf16.mxu0 %v12169_v11  ;;  %v4121_v11 = vld [vmem:[%s19008_s6 + $0x368] sm:$0xff] }
0x1624   : > { %8030 = vmatpush1.bf16.msra.mxu1 %v12542_v8  ;;  %v12240_v22 = vcombine.low %v4117_v10, %v4121_v11  ;;  %v4165_v8 = vld [vmem:[%s19008_s6 + $0x4c8] sm:$0xff] }
0x1626   : > { %8118 = vmatpush1.bf16.msra.mxu0 %v12168_v55  ;;  %v4432_v55 = vld [vmem:[%s19008_s6 + $0xd20] sm:$0xff] }
0x1627   : > { %8119 = vmatprep.subr.bf16.mxu0 %v12177_v57  ;;  %v12241_v57 = vcombine.high %v4117_v10, %v4121_v11  ;;  %v12550_v59 = vcombine.low %v4428_v13, %v4432_v55  ;;  %v12551_v60 = vcombine.high %v4428_v13, %v4432_v55  ;;  %v12280_v10 = vcombine.low %v4157_v47, %v4161_v63  ;;  %v4476_v11 = vld [vmem:[%s19008_s6 + $0xe80] sm:$0xff] }
0x1628   : > { %v12289_v13 = vcombine.high %v4165_v8, %v4169_v9  ;;  %v4516_v63 = vld [vmem:[%s19008_s6 + $0xfc0] sm:$0xff] }
0x1629   : > { %8031 = vmatprep.subr.bf16.mxu1 %v12551_v60  ;;  %v4177_v60 = vld [vmem:[%s19008_s6 + $0x528] sm:$0xff] }
0x162a   : > { %8120 = vmatpush1.bf16.msra.mxu0 %v12176_v20  ;;  %v4125_v20 = vld [vmem:[%s19008_s6 + $0x388] sm:$0xff]  ;;  %8032 = vmatpush1.bf16.msra.mxu1 %v12550_v59 }
0x162b   : > { %8121 = vmatprep.subr.bf16.mxu0 %v12185_v21  ;;  %v4129_v21 = vld [vmem:[%s19008_s6 + $0x3a8] sm:$0xff] }
0x162c   : > { %v12248_v25 = vcombine.low %v4125_v20, %v4129_v21  ;;  %v4173_v59 = vld [vmem:[%s19008_s6 + $0x508] sm:$0xff] }
0x162e   : > { %8122 = vmatpush1.bf16.msra.mxu0 %v12184_v24  ;;  %v4440_v24 = vld [vmem:[%s19008_s6 + $0xd60] sm:$0xff] }
0x162f   : > { %8123 = vmatprep.subr.bf16.mxu0 %v12193_v29  ;;  %v12249_v29 = vcombine.high %v4125_v20, %v4129_v21  ;;  %v12558_v30 = vcombine.low %v4436_v23, %v4440_v24  ;;  %v12559_v36 = vcombine.high %v4436_v23, %v4440_v24  ;;  %v12288_v20 = vcombine.low %v4165_v8, %v4169_v9  ;;  %v4484_v21 = vld [vmem:[%s19008_s6 + $0xec0] sm:$0xff] }
0x1630   : > { %v12297_v23 = vcombine.high %v4173_v59, %v4177_v60  ;;  %v16409_v9 = vld [vmem:[%s19008_s6 + $0x1000] sm:$0xff] }
0x1631   : > { %8033 = vmatprep.subr.bf16.mxu1 %v12559_v36  ;;  %v4185_v36 = vld [vmem:[%s19008_s6 + $0x568] sm:$0xff] }
0x1632   : > { %8124 = vmatpush1.bf16.msra.mxu0 %v12192_v31  ;;  %v4133_v31 = vld [vmem:[%s19008_s6 + $0x3c8] sm:$0xff]  ;;  %8034 = vmatpush1.bf16.msra.mxu1 %v12558_v30 }
0x1633   : > { %8125 = vmatprep.subr.bf16.mxu0 %v12201_v32  ;;  %v4137_v32 = vld [vmem:[%s19008_s6 + $0x3e8] sm:$0xff] }
0x1634   : > { %v12257_v28 = vcombine.high %v4133_v31, %v4137_v32  ;;  %v12256_v39 = vcombine.low %v4133_v31, %v4137_v32  ;;  %v4181_v30 = vld [vmem:[%s19008_s6 + $0x548] sm:$0xff]  ;;  %v12296_v31 = vcombine.low %v4173_v59, %v4177_v60  ;;  %v4492_v32 = vld [vmem:[%s19008_s6 + $0xf00] sm:$0xff] }
0x1635   : > { %v12304_v37 = vcombine.low %v4181_v30, %v4185_v36 }
0x1636   : > { %8126 = vmatpush1.bf16.msra.mxu0 %v12200_v27  ;;  %v4448_v27 = vld [vmem:[%s19008_s6 + $0xda0] sm:$0xff] }
0x1637   : > { %8127 = vmatprep.subr.bf16.mxu0 %v12209_v34  ;;  %v12566_v33 = vcombine.low %v4444_v26, %v4448_v27  ;;  %v12567_v34 = vcombine.high %v4444_v26, %v4448_v27  ;;  %v12305_v26 = vcombine.high %v4181_v30, %v4185_v36 }
0x1639   : > { %8035 = vmatprep.subr.bf16.mxu1 %v12567_v34  ;;  %v4193_v34 = vld [vmem:[%s19008_s6 + $0x5a8] sm:$0xff] }
0x163a   : > { %8128 = vmatpush1.bf16.msra.mxu0 %v12208_v48  ;;  %8036 = vmatpush1.bf16.msra.mxu1 %v12566_v33  ;;  %v4456_v48 = vld [vmem:[%s19008_s6 + $0xde0] sm:$0xff]  ;;  %v4189_v33 = vld [vmem:[%s19008_s6 + $0x588] sm:$0xff] }
0x163b   : > { %8129 = vmatprep.subr.bf16.mxu0 %v12217_v35  ;;  %v12574_v54 = vcombine.low %v4452_v40, %v4456_v48  ;;  %v12575_v35 = vcombine.high %v4452_v40, %v4456_v48  ;;  %v12313_v40 = vcombine.high %v4189_v33, %v4193_v34  ;;  %v12312_v16 = vcombine.low %v4189_v33, %v4193_v34 }
0x163d   : > { %8037 = vmatprep.subr.bf16.mxu1 %v12575_v35 }
0x163e   : > { %8130 = vmatpush1.bf16.msra.mxu0 %v12216_v53  ;;  %8038 = vmatpush1.bf16.msra.mxu1 %v12574_v54  ;;  %v4464_v53 = vld [vmem:[%s19008_s6 + $0xe20] sm:$0xff]  ;;  %v4201_v54 = vld [vmem:[%s19008_s6 + $0x5e8] sm:$0xff] }
0x163f   : > { %8131 = vmatprep.subr.bf16.mxu0 %v12225_v46  ;;  %v12582_v45 = vcombine.low %v4460_v52, %v4464_v53  ;;  %v12583_v46 = vcombine.high %v4460_v52, %v4464_v53 }
0x1641   : > { %8039 = vmatprep.subr.bf16.mxu1 %v12583_v46 }
0x1642   : > { %8132 = vmatpush1.bf16.msra.mxu0 %v12224_v2  ;;  %v4472_v2 = vld [vmem:[%s19008_s6 + $0xe60] sm:$0xff]  ;;  %8040 = vmatpush1.bf16.msra.mxu1 %v12582_v45  ;;  %v4209_v45 = vld [vmem:[%s19008_s6 + $0x628] sm:$0xff] }
0x1643   : > { %8133 = vmatprep.subr.bf16.mxu0 %v12233_v7  ;;  %v12590_v4 = vcombine.low %v4468_v1, %v4472_v2  ;;  %v12591_v7 = vcombine.high %v4468_v1, %v4472_v2 }
0x1645   : > { %8041 = vmatprep.subr.bf16.mxu1 %v12591_v7 }
0x1646   : > { %8134 = vmatpush1.bf16.msra.mxu0 %v12232_v12  ;;  %v4480_v12 = vld [vmem:[%s19008_s6 + $0xea0] sm:$0xff]  ;;  %8042 = vmatpush1.bf16.msra.mxu1 %v12590_v4  ;;  %v4217_v4 = vld [vmem:[%s19008_s6 + $0x668] sm:$0xff] }
0x1647   : > { %8135 = vmatprep.subr.bf16.mxu0 %v12241_v57  ;;  %v12598_v55 = vcombine.low %v4476_v11, %v4480_v12  ;;  %v12599_v57 = vcombine.high %v4476_v11, %v4480_v12 }
0x1649   : > { %8043 = vmatprep.subr.bf16.mxu1 %v12599_v57 }
0x164a   : > { %8136 = vmatpush1.bf16.msra.mxu0 %v12240_v22  ;;  %v4488_v22 = vld [vmem:[%s19008_s6 + $0xee0] sm:$0xff]  ;;  %8044 = vmatpush1.bf16.msra.mxu1 %v12598_v55  ;;  %v4225_v55 = vld [vmem:[%s19008_s6 + $0x6a8] sm:$0xff] }
0x164b   : > { %8137 = vmatprep.subr.bf16.mxu0 %v12249_v29  ;;  %v12606_v24 = vcombine.low %v4484_v21, %v4488_v22  ;;  %v12607_v29 = vcombine.high %v4484_v21, %v4488_v22  ;;  %v4233_v21 = vld [vmem:[%s19008_s6 + $0x6e8] sm:$0xff] }
0x164d   : > { %8045 = vmatprep.subr.bf16.mxu1 %v12607_v29  ;;  %v4241_v29 = vld [vmem:[%s19008_s6 + $0x728] sm:$0xff] }
0x164e   : > { %8138 = vmatpush1.bf16.msra.mxu0 %v12248_v25  ;;  %v4496_v25 = vld [vmem:[%s19008_s6 + $0xf20] sm:$0xff]  ;;  %8046 = vmatpush1.bf16.msra.mxu1 %v12606_v24  ;;  %v4237_v24 = vld [vmem:[%s19008_s6 + $0x708] sm:$0xff] }
0x164f   : > { %8139 = vmatprep.subr.bf16.mxu0 %v12257_v28  ;;  %v12614_v27 = vcombine.low %v4492_v32, %v4496_v25  ;;  %v12615_v28 = vcombine.high %v4492_v32, %v4496_v25  ;;  %v12361_v36 = vcombine.high %v4237_v24, %v4241_v29  ;;  %v4249_v32 = vld [vmem:[%s19008_s6 + $0x768] sm:$0xff]  ;;  %v12360_v25 = vcombine.low %v4237_v24, %v4241_v29 }
0x1650   : > { %v4333_v29 = vld [vmem:[%s19008_s6 + $0xa08] sm:$0xff] }
0x1651   : > { %8047 = vmatprep.subr.bf16.mxu1 %v12615_v28  ;;  %v4257_v28 = vld [vmem:[%s19008_s6 + $0x7a8] sm:$0xff] }
0x1652   : > { %8140 = vmatpush1.bf16.msra.mxu0 %v12256_v39  ;;  %v4504_v39 = vld [vmem:[%s19008_s6 + $0xf60] sm:$0xff]  ;;  %8048 = vmatpush1.bf16.msra.mxu1 %v12614_v27  ;;  %v4253_v27 = vld [vmem:[%s19008_s6 + $0x788] sm:$0xff] }
0x1653   : > { %8152 = vmatprep.subr.bf16.mxu0 %v12265_v49  ;;  %v12623_v48 = vcombine.high %v4500_v38, %v4504_v39  ;;  %v4197_v49 = vld [vmem:[%s19008_s6 + $0x5c8] sm:$0xff]  ;;  %v12622_v35 = vcombine.low %v4500_v38, %v4504_v39  ;;  %v12377_v34 = vcombine.high %v4253_v27, %v4257_v28  ;;  %v12376_v39 = vcombine.low %v4253_v27, %v4257_v28 }
0x1654   : > { %v12321_v52 = vcombine.high %v4197_v49, %v4201_v54  ;;  %v12320_v47 = vcombine.low %v4197_v49, %v4201_v54  ;;  %v4265_v38 = vld [vmem:[%s19008_s6 + $0x7e8] sm:$0xff] }
0x1655   : > { %8142 = vmatmul.mubr.bf16.vlgmr.msra.gmra.mrb[56].mxu0 %v15122_v62  ;;  %8049 = vmatprep.subr.bf16.mxu1 %v12623_v48  ;;  %v4269_v48 = vld [vmem:[%s19008_s6 + $0x808] sm:$0xff] }
0x1656   : > { %8153 = vmatpush1.bf16.msra.mxu0 %v12264_v17  ;;  %8184 = vmatprep.mubr.bf16.mxu0 %v15423_v18  ;;  %v4512_v17 = vld [vmem:[%s19008_s6 + $0xfa0] sm:$0xff]  ;;  %v4273_v49 = vld [vmem:[%s19008_s6 + $0x828] sm:$0xff] }
0x1657   : > { %8154 = vmatprep.subr.bf16.mxu0 %v12273_v44  ;;  %8050 = vmatpush1.bf16.msra.mxu1 %v12622_v35  ;;  %v12631_v53 = vcombine.high %v4508_v51, %v4512_v17  ;;  %v4205_v44 = vld [vmem:[%s19008_s6 + $0x608] sm:$0xff]  ;;  %v12630_v46 = vcombine.low %v4508_v51, %v4512_v17  ;;  %v12393_v35 = vcombine.high %v4269_v48, %v4273_v49 }
0x1658   : > { %v12329_v1 = vcombine.high %v4205_v44, %v4209_v45  ;;  %v12328_v8 = vcombine.low %v4205_v44, %v4209_v45  ;;  %v4281_v51 = vld [vmem:[%s19008_s6 + $0x868] sm:$0xff]  ;;  %v12392_v17 = vcombine.low %v4269_v48, %v4273_v49 }
0x1659   : > { %8051 = vmatprep.subr.bf16.mxu1 %v12631_v53  ;;  %v4285_v53 = vld [vmem:[%s19008_s6 + $0x888] sm:$0xff] }
0x165a   : > { %8155 = vmatpush1.bf16.msra.mxu0 %v12272_v0  ;;  %v4520_v0 = vld [vmem:[%s19008_s6 + $0xfe0] sm:$0xff]  ;;  %v4289_v44 = vld [vmem:[%s19008_s6 + $0x8a8] sm:$0xff] }
0x165b   : > { %8156 = vmatprep.subr.bf16.mxu0 %v12281_v3  ;;  %8052 = vmatpush1.bf16.msra.mxu1 %v12630_v46  ;;  %v12639_v2 = vcombine.high %v4516_v63, %v4520_v0  ;;  %v4213_v3 = vld [vmem:[%s19008_s6 + $0x648] sm:$0xff]  ;;  %v12638_v7 = vcombine.low %v4516_v63, %v4520_v0  ;;  %v12409_v46 = vcombine.high %v4285_v53, %v4289_v44 }
0x165c   : > { %v12337_v11 = vcombine.high %v4213_v3, %v4217_v4  ;;  %v12336_v59 = vcombine.low %v4213_v3, %v4217_v4  ;;  %v4297_v63 = vld [vmem:[%s19008_s6 + $0x8e8] sm:$0xff]  ;;  %v12408_v0 = vcombine.low %v4285_v53, %v4289_v44 }
0x165d   : > { %8053 = vmatprep.subr.bf16.mxu1 %v12639_v2  ;;  %v4301_v2 = vld [vmem:[%s19008_s6 + $0x908] sm:$0xff] }
0x165e   : > { %8157 = vmatpush1.bf16.msra.mxu0 %v12280_v10  ;;  %v16414_v10 = vld [vmem:[%s19008_s6 + $0x1020] sm:$0xff]  ;;  %v4305_v3 = vld [vmem:[%s19008_s6 + $0x928] sm:$0xff] }
0x165f   : > { %8158 = vmatprep.subr.bf16.mxu0 %v12289_v13  ;;  %8054 = vmatpush1.bf16.msra.mxu1 %v12638_v7  ;;  %v12647_v12 = vcombine.high %v16409_v9, %v16414_v10  ;;  %v4221_v13 = vld [vmem:[%s19008_s6 + $0x688] sm:$0xff]  ;;  %v12646_v57 = vcombine.low %v16409_v9, %v16414_v10  ;;  %v12425_v7 = vcombine.high %v4301_v2, %v4305_v3 }
0x1660   : > { %v12345_v60 = vcombine.high %v4221_v13, %v4225_v55  ;;  %v12344_v22 = vcombine.low %v4221_v13, %v4225_v55  ;;  %v4317_v55 = vld [vmem:[%s19008_s6 + $0x988] sm:$0xff] }
0x1661   : > { %8066 = vmatprep.subr.bf16.mxu1 %v12647_v12  ;;  %v12424_v12 = vcombine.low %v4301_v2, %v4305_v3  ;;  %v4349_v28 = vld [vmem:[%s19008_s6 + $0xa88] sm:$0xff] }
0x1662   : > { %8159 = vmatpush1.bf16.msra.mxu0 %v12288_v20  ;;  %v4229_v20 = vld [vmem:[%s19008_s6 + $0x6c8] sm:$0xff] }
0x1663   : > { %8160 = vmatprep.subr.bf16.mxu0 %v12297_v23  ;;  %v12353_v23 = vcombine.high %v4229_v20, %v4233_v21  ;;  %v12352_v30 = vcombine.low %v4229_v20, %v4233_v21  ;;  %v4325_v21 = vld [vmem:[%s19008_s6 + $0x9c8] sm:$0xff] }
0x1664   : > { %v4365_v49 = vld [vmem:[%s19008_s6 + $0xb08] sm:$0xff] }
0x1665   : > { %v4381_v44 = vld [vmem:[%s19008_s6 + $0xb88] sm:$0xff] }
0x1666   : > { %8161 = vmatpush1.bf16.msra.mxu0 %v12296_v31  ;;  %v4245_v31 = vld [vmem:[%s19008_s6 + $0x748] sm:$0xff] }
0x1667   : > { %8162 = vmatprep.subr.bf16.mxu0 %v12305_v26  ;;  %v12369_v26 = vcombine.high %v4245_v31, %v4249_v32  ;;  %v12368_v33 = vcombine.low %v4245_v31, %v4249_v32  ;;  %v4341_v32 = vld [vmem:[%s19008_s6 + $0xa48] sm:$0xff] }
0x1668   : > { %v4397_v3 = vld [vmem:[%s19008_s6 + $0xc08] sm:$0xff] }
0x1669   : > { %v4485_v9 = vld [vmem:[%s19008_s6 + $0xec8] sm:$0xff] }
0x166a   : > { %8163 = vmatpush1.bf16.msra.mxu0 %v12304_v37  ;;  %v4261_v37 = vld [vmem:[%s19008_s6 + $0x7c8] sm:$0xff] }
0x166b   : > { %8164 = vmatprep.subr.bf16.mxu0 %v12313_v40  ;;  %v12385_v40 = vcombine.high %v4261_v37, %v4265_v38  ;;  %v12384_v54 = vcombine.low %v4261_v37, %v4265_v38  ;;  %v4357_v38 = vld [vmem:[%s19008_s6 + $0xac8] sm:$0xff] }
0x166c   : > { %v4489_v10 = vld [vmem:[%s19008_s6 + $0xee8] sm:$0xff] }
0x166e   : > { %8165 = vmatpush1.bf16.msra.mxu0 %v12312_v16  ;;  %v4277_v16 = vld [vmem:[%s19008_s6 + $0x848] sm:$0xff] }
0x166f   : > { %8166 = vmatprep.subr.bf16.mxu0 %v12321_v52  ;;  %v12401_v52 = vcombine.high %v4277_v16, %v4281_v51  ;;  %v12400_v45 = vcombine.low %v4277_v16, %v4281_v51  ;;  %v4373_v51 = vld [vmem:[%s19008_s6 + $0xb48] sm:$0xff] }
0x1672   : > { %8167 = vmatpush1.bf16.msra.mxu0 %v12320_v47  ;;  %v4293_v47 = vld [vmem:[%s19008_s6 + $0x8c8] sm:$0xff] }
0x1673   : > { %8168 = vmatprep.subr.bf16.mxu0 %v12329_v1  ;;  %v12417_v1 = vcombine.high %v4293_v47, %v4297_v63  ;;  %v12416_v4 = vcombine.low %v4293_v47, %v4297_v63  ;;  %v4389_v63 = vld [vmem:[%s19008_s6 + $0xbc8] sm:$0xff] }
0x1676   : > { %8169 = vmatpush1.bf16.msra.mxu0 %v12328_v8  ;;  %v4309_v8 = vld [vmem:[%s19008_s6 + $0x948] sm:$0xff] }
0x1677   : > { %8170 = vmatprep.subr.bf16.mxu0 %v12337_v11  ;;  %v4313_v11 = vld [vmem:[%s19008_s6 + $0x968] sm:$0xff] }
0x1678   : > { %v12433_v13 = vcombine.high %v4309_v8, %v4313_v11 }
0x167a   : > { %8171 = vmatpush1.bf16.msra.mxu0 %v12336_v59  ;;  %v4321_v59 = vld [vmem:[%s19008_s6 + $0x9a8] sm:$0xff] }
0x167b   : > { %8172 = vmatprep.subr.bf16.mxu0 %v12345_v60  ;;  %v12432_v60 = vcombine.low %v4309_v8, %v4313_v11  ;;  %v12441_v20 = vcombine.high %v4317_v55, %v4321_v59  ;;  %v4405_v11 = vld [vmem:[%s19008_s6 + $0xc48] sm:$0xff] }
0x167e   : > { %8173 = vmatpush1.bf16.msra.mxu0 %v12344_v22  ;;  %v4329_v22 = vld [vmem:[%s19008_s6 + $0x9e8] sm:$0xff] }
0x167f   : > { %8174 = vmatprep.subr.bf16.mxu0 %v12353_v23  ;;  %v12440_v23 = vcombine.low %v4317_v55, %v4321_v59  ;;  %v12449_v24 = vcombine.high %v4325_v21, %v4329_v22  ;;  %v4413_v59 = vld [vmem:[%s19008_s6 + $0xc88] sm:$0xff] }
0x1682   : > { %8175 = vmatpush1.bf16.msra.mxu0 %v12352_v30  ;;  %v4337_v30 = vld [vmem:[%s19008_s6 + $0xa28] sm:$0xff] }
0x1683   : > { %8176 = vmatprep.subr.bf16.mxu0 %v12361_v36  ;;  %v12448_v36 = vcombine.low %v4325_v21, %v4329_v22  ;;  %v12457_v31 = vcombine.high %v4333_v29, %v4337_v30  ;;  %v4421_v22 = vld [vmem:[%s19008_s6 + $0xcc8] sm:$0xff] }
0x1686   : > { %8177 = vmatpush1.bf16.msra.mxu0 %v12360_v25  ;;  %v4345_v25 = vld [vmem:[%s19008_s6 + $0xa68] sm:$0xff] }
0x1687   : > { %8178 = vmatprep.subr.bf16.mxu0 %v12369_v26  ;;  %v12456_v26 = vcombine.low %v4333_v29, %v4337_v30  ;;  %v12465_v27 = vcombine.high %v4341_v32, %v4345_v25  ;;  %v4429_v30 = vld [vmem:[%s19008_s6 + $0xd08] sm:$0xff] }
0x168a   : > { %8179 = vmatpush1.bf16.msra.mxu0 %v12368_v33  ;;  %v4353_v33 = vld [vmem:[%s19008_s6 + $0xaa8] sm:$0xff] }
0x168b   : > { %8180 = vmatprep.subr.bf16.mxu0 %v12377_v34  ;;  %v12464_v34 = vcombine.low %v4341_v32, %v4345_v25  ;;  %v12473_v37 = vcombine.high %v4349_v28, %v4353_v33  ;;  %v4437_v25 = vld [vmem:[%s19008_s6 + $0xd48] sm:$0xff] }
0x168e   : > { %8181 = vmatpush1.bf16.msra.mxu0 %v12376_v39  ;;  %v4361_v39 = vld [vmem:[%s19008_s6 + $0xae8] sm:$0xff] }
0x168f   : > { %8182 = vmatprep.subr.bf16.mxu0 %v12385_v40  ;;  %v12472_v40 = vcombine.low %v4349_v28, %v4353_v33  ;;  %v12481_v48 = vcombine.high %v4357_v38, %v4361_v39  ;;  %v12101_v28 = vld [vmem:[%s19007_s5 + $0x6] sm:$0x3] }
0x1692   : > { %8183 = vmatpush1.bf16.msra.mxu0 %v12384_v54  ;;  %v4369_v54 = vld [vmem:[%s19008_s6 + $0xb28] sm:$0xff] }
0x1693   : > { %8195 = vmatprep.subr.bf16.mxu0 %v12393_v35  ;;  %v12480_v35 = vcombine.low %v4357_v38, %v4361_v39  ;;  %v12489_v16 = vcombine.high %v4365_v49, %v4369_v54  ;;  %v3772_v38 = vrot.slane %v12101_v28, %v14813_v5 }
0x1695   : > { %8185 = vmatmul.mubr.bf16.vlgmr.msra.gmra.mrb[56].mxu0 %v15427_v19 }
0x1696   : > { %8196 = vmatpush1.bf16.msra.mxu0 %v12392_v17  ;;  %8227 = vmatprep.mubr.bf16.mxu0 %v15740_v14  ;;  %v4377_v17 = vld [vmem:[%s19008_s6 + $0xb68] sm:$0xff] }
0x1697   : > { %8197 = vmatprep.subr.bf16.mxu0 %v12401_v52  ;;  %v12488_v52 = vcombine.low %v4365_v49, %v4369_v54  ;;  %v12497_v53 = vcombine.high %v4373_v51, %v4377_v17  ;;  %v4453_v54 = vld [vmem:[%s19008_s6 + $0xdc8] sm:$0xff] }
0x169a   : > { %8198 = vmatpush1.bf16.msra.mxu0 %v12400_v45  ;;  %v4385_v45 = vld [vmem:[%s19008_s6 + $0xba8] sm:$0xff] }
0x169b   : > { %8199 = vmatprep.subr.bf16.mxu0 %v12409_v46  ;;  %v12496_v46 = vcombine.low %v4373_v51, %v4377_v17  ;;  %v12505_v47 = vcombine.high %v4381_v44, %v4385_v45 }
0x169e   : > { %8200 = vmatpush1.bf16.msra.mxu0 %v12408_v0  ;;  %v4393_v0 = vld [vmem:[%s19008_s6 + $0xbe8] sm:$0xff] }
0x169f   : > { %8201 = vmatprep.subr.bf16.mxu0 %v12417_v1  ;;  %v12504_v1 = vcombine.low %v4381_v44, %v4385_v45  ;;  %v12513_v2 = vcombine.high %v4389_v63, %v4393_v0 }
0x16a2   : > { %8202 = vmatpush1.bf16.msra.mxu0 %v12416_v4  ;;  %v4401_v4 = vld [vmem:[%s19008_s6 + $0xc28] sm:$0xff] }
0x16a3   : > { %8203 = vmatprep.subr.bf16.mxu0 %v12425_v7  ;;  %v12512_v7 = vcombine.low %v4389_v63, %v4393_v0  ;;  %v12521_v8 = vcombine.high %v4397_v3, %v4401_v4 }
0x16a6   : > { %8204 = vmatpush1.bf16.msra.mxu0 %v12424_v12  ;;  %v4409_v12 = vld [vmem:[%s19008_s6 + $0xc68] sm:$0xff] }
0x16a7   : > { %8205 = vmatprep.subr.bf16.mxu0 %v12433_v13  ;;  %v12520_v13 = vcombine.low %v4397_v3, %v4401_v4  ;;  %v12529_v55 = vcombine.high %v4405_v11, %v4409_v12 }
0x16aa   : > { %8206 = vmatpush1.bf16.msra.mxu0 %v12432_v60  ;;  %v4417_v60 = vld [vmem:[%s19008_s6 + $0xca8] sm:$0xff] }
0x16ab   : > { %8207 = vmatprep.subr.bf16.mxu0 %v12441_v20  ;;  %v12528_v20 = vcombine.low %v4405_v11, %v4409_v12  ;;  %v12537_v21 = vcombine.high %v4413_v59, %v4417_v60 }
0x16ae   : > { %8208 = vmatpush1.bf16.msra.mxu0 %v12440_v23  ;;  %v4425_v23 = vld [vmem:[%s19008_s6 + $0xce8] sm:$0xff] }
0x16af   : > { %8209 = vmatprep.subr.bf16.mxu0 %v12449_v24  ;;  %v12536_v24 = vcombine.low %v4413_v59, %v4417_v60  ;;  %v12545_v29 = vcombine.high %v4421_v22, %v4425_v23  ;;  %v4536_v60 = vld [vmem:[%s19008_s6 + $0x1060] sm:$0xff] }
0x16b2   : > { %8210 = vmatpush1.bf16.msra.mxu0 %v12448_v36  ;;  %v4433_v36 = vld [vmem:[%s19008_s6 + $0xd28] sm:$0xff] }
0x16b3   : > { %8211 = vmatprep.subr.bf16.mxu0 %v12457_v31  ;;  %v12544_v31 = vcombine.low %v4421_v22, %v4425_v23  ;;  %v12553_v32 = vcombine.high %v4429_v30, %v4433_v36  ;;  %v3997_v22 = vld [vmem:[%s16619_s26 + $0x18] sm:$0xff] }
0x16b6   : > { %8212 = vmatpush1.bf16.msra.mxu0 %v12456_v26  ;;  %v4441_v26 = vld [vmem:[%s19008_s6 + $0xd68] sm:$0xff] }
0x16b7   : > { %8213 = vmatprep.subr.bf16.mxu0 %v12465_v27  ;;  %v12552_v27 = vcombine.low %v4429_v30, %v4433_v36  ;;  %v12561_v33 = vcombine.high %v4437_v25, %v4441_v26  ;;  %v12560_v39 = vcombine.low %v4437_v25, %v4441_v26  ;;  %v4544_v30 = vld [vmem:[%s19008_s6 + $0x10a0] sm:$0xff]  ;;  %v4477_v36 = vld [vmem:[%s19008_s6 + $0xe88] sm:$0xff] }
0x16ba   : > { %8214 = vmatpush1.bf16.msra.mxu0 %v12464_v34  ;;  %v4445_v34 = vld [vmem:[%s19008_s6 + $0xd88] sm:$0xff] }
0x16bb   : > { %8215 = vmatprep.subr.bf16.mxu0 %v12473_v37  ;;  %v4449_v37 = vld [vmem:[%s19008_s6 + $0xda8] sm:$0xff] }
0x16be   : > { %8216 = vmatpush1.bf16.msra.mxu0 %v12472_v40  ;;  %v3776_v40 = vrot.slane %v12101_v28, %v14816_v6 }
0x16bf   : > { %8217 = vmatprep.subr.bf16.mxu0 %v12481_v48  ;;  %v12569_v48 = vcombine.high %v4445_v34, %v4449_v37 }
0x16c2   : > { %8218 = vmatpush1.bf16.msra.mxu0 %v12480_v35  ;;  %v4457_v35 = vld [vmem:[%s19008_s6 + $0xde8] sm:$0xff] }
0x16c3   : > { %8219 = vmatprep.subr.bf16.mxu0 %v12489_v16 }
0x16c6   : > { %8220 = vmatpush1.bf16.msra.mxu0 %v12488_v52 }
0x16c7   : > { %8221 = vmatprep.subr.bf16.mxu0 %v12497_v53  ;;  %v12568_v53 = vcombine.low %v4445_v34, %v4449_v37  ;;  %v4552_v34 = vld [vmem:[%s19008_s6 + $0x10e0] sm:$0xff] }
0x16ca   : > { %8222 = vmatpush1.bf16.msra.mxu0 %v12496_v46 }
0x16cb   : > { %8223 = vmatprep.subr.bf16.mxu0 %v12505_v47  ;;  %v12577_v47 = vcombine.high %v4453_v54, %v4457_v35 }
0x16ce   : > { %8224 = vmatpush1.bf16.msra.mxu0 %v12504_v1  ;;  %v4461_v1 = vld [vmem:[%s19008_s6 + $0xe08] sm:$0xff] }
0x16cf   : > { %8225 = vmatprep.subr.bf16.mxu0 %v12513_v2  ;;  %v4465_v2 = vld [vmem:[%s19008_s6 + $0xe28] sm:$0xff] }
0x16d0   : > { %v12585_v12 = vcombine.high %v4461_v1, %v4465_v2 }
0x16d2   : > { %8226 = vmatpush1.bf16.msra.mxu0 %v12512_v7  ;;  %v12576_v7 = vcombine.low %v4453_v54, %v4457_v35  ;;  %v4497_v54 = vld [vmem:[%s19008_s6 + $0xf28] sm:$0xff] }
0x16d3   : > { %8238 = vmatprep.subr.bf16.mxu0 %v12521_v8 }
0x16d5   : > { %8228 = vmatmul.mubr.bf16.vlgmr.msra.gmra.mrb[56].mxu0 %v15744_v15 }
0x16d6   : > { %8239 = vmatpush1.bf16.msra.mxu0 %v12520_v13  ;;  %v4532_v13 = vld [vmem:[%s19008_s6 + $0x1040] sm:$0xff] }
0x16d7   : > { %8240 = vmatprep.subr.bf16.mxu0 %v12529_v55  ;;  %v12654_v25 = vcombine.low %v4532_v13, %v4536_v60 }
0x16da   : > { %8241 = vmatpush1.bf16.msra.mxu0 %v12528_v20 }
0x16db   : > { %8242 = vmatprep.subr.bf16.mxu0 %v12537_v21  ;;  %v3995_v21 = vld [vmem:[%s16619_s26 + $0x8] sm:$0xff] }
0x16de   : > { %8243 = vmatpush1.bf16.msra.mxu0 %v12536_v24 }
0x16df   : > { %8244 = vmatprep.subr.bf16.mxu0 %v12545_v29  ;;  %v4540_v29 = vld [vmem:[%s19008_s6 + $0x1080] sm:$0xff] }
0x16e2   : > { %8245 = vmatpush1.bf16.msra.mxu0 %v12544_v31  ;;  %v4481_v31 = vld [vmem:[%s19008_s6 + $0xea8] sm:$0xff] }
0x16e3   : > { %8246 = vmatprep.subr.bf16.mxu0 %v12553_v32  ;;  %v16657_v32 = vpack.c.bf16 %v3997_v22, %v3995_v21  ;;  %v12601_v28 = vcombine.high %v4477_v36, %v4481_v31  ;;  %v12600_v37 = vcombine.low %v4477_v36, %v4481_v31 }
0x16e6   : > { %8247 = vmatpush1.bf16.msra.mxu0 %v12552_v27  ;;  %v12663_v27 = vcombine.high %v4540_v29, %v4544_v30 }
0x16e7   : > { %8248 = vmatprep.subr.bf16.mxu0 %v12561_v33  ;;  %v4548_v33 = vld [vmem:[%s19008_s6 + $0x10c0] sm:$0xff] }
0x16e8   : > { %v3973_v49 = vpop.f32.mrb[52].mxu0  ;;  %v12670_v35 = vcombine.low %v4548_v33, %v4552_v34 }
0x16e9   : > { %v3974_v16 = vadd.f32 %v3973_v49, %v3772_v38  ;;  %v3975_v51 = vpop.f32.mrb[53].mxu0  ;;  %v4493_v49 = vld [vmem:[%s19008_s6 + $0xf08] sm:$0xff] }
0x16ea   : > { %v3976_v17 = vadd.f32 %v3975_v51, %v3776_v40  ;;  %8249 = vmatpush1.bf16.msra.mxu0 %v12560_v39  ;;  %v3977_v52 = vpop.f32.mrb[54].mxu0  ;;  %v12609_v39 = vcombine.high %v4485_v9, %v4489_v10 }
0x16eb   : > { %v3982_v44 = vmax.f32 %v3974_v16, 0.0  ;;  %v3978_v45 = vadd.f32 %v3977_v52, %v3772_v38  ;;  %v3979_v46 = vpop.f32.mrb[55].mxu0  ;;  %8250 = vmatprep.subr.bf16.mxu0 %v12569_v48  ;;  %v12671_v38 = vcombine.high %v4548_v33, %v4552_v34  ;;  %v4560_v48 = vld [vmem:[%s19008_s6 + $0x1120] sm:$0xff]  ;;  %v12608_v16 = vcombine.low %v4485_v9, %v4489_v10  ;;  %v4537_v33 = vld [vmem:[%s19008_s6 + $0x1068] sm:$0xff] }
0x16ec   : > { %v3983_v63 = vmax.f32 %v3976_v17, 0.0  ;;  %v3980_v0 = vadd.f32 %v3979_v46, %v3776_v40  ;;  %v4556_v40 = vld [vmem:[%s19008_s6 + $0x1100] sm:$0xff]  ;;  %v12617_v17 = vcombine.high %v4493_v49, %v4497_v54 }
0x16ed   : > { %v3984_v3 = vmax.f32 %v3978_v45, 0.0  ;;  %v3986_v8 = vadd.f32 %v3982_v44, %v15736_v50  ;;  %v4469_v50 = vld [vmem:[%s19008_s6 + $0xe48] sm:$0xff]  ;;  %v12679_v51 = vcombine.high %v4556_v40, %v4560_v48  ;;  %v4564_v52 = vld [vmem:[%s19008_s6 + $0x1140] sm:$0xff]  ;;  %v12678_v46 = vcombine.low %v4556_v40, %v4560_v48 }
0x16ee   : > { %v3985_v4 = vmax.f32 %v3980_v0, 0.0  ;;  %8251 = vmatpush1.bf16.msra.mxu0 %v12568_v53  ;;  %v3987_v55 = vadd.f32 %v3983_v63, %v15724_v42  ;;  %v12584_v42 = vcombine.low %v4461_v1, %v4465_v2  ;;  %v4568_v53 = vld [vmem:[%s19008_s6 + $0x1160] sm:$0xff]  ;;  %v4501_v44 = vld [vmem:[%s19008_s6 + $0xf48] sm:$0xff] }
0x16ef   : > { %v3988_v11 = vadd.f32 %v3984_v3, %v15721_v41  ;;  %8252 = vmatprep.subr.bf16.mxu0 %v12577_v47  ;;  %v4473_v41 = vld [vmem:[%s19008_s6 + $0xe68] sm:$0xff]  ;;  %v12616_v47 = vcombine.low %v4493_v49, %v4497_v54  ;;  %v12687_v63 = vcombine.high %v4564_v52, %v4568_v53  ;;  %v4572_v1 = vld [vmem:[%s19008_s6 + $0x1180] sm:$0xff] }
0x16f0   : > { %v3989_v59 = vadd.f32 %v3985_v4, %v15727_v43  ;;  %v12655_v43 = vcombine.high %v4532_v13, %v4536_v60  ;;  %v12593_v24 = vcombine.high %v4469_v50, %v4473_v41  ;;  %v12592_v26 = vcombine.low %v4469_v50, %v4473_v41  ;;  %v4505_v45 = vld [vmem:[%s19008_s6 + $0xf68] sm:$0xff]  ;;  %v4576_v2 = vld [vmem:[%s19008_s6 + $0x11a0] sm:$0xff] }
0x16f1   : > { %v16637_v20 = vpack.c.bf16 %v3988_v11, %v3986_v8  ;;  %v12625_v0 = vcombine.high %v4501_v44, %v4505_v45  ;;  %v4509_v3 = vld [vmem:[%s19008_s6 + $0xf88] sm:$0xff]  ;;  %v12624_v8 = vcombine.low %v4501_v44, %v4505_v45  ;;  %v12695_v11 = vcombine.high %v4572_v1, %v4576_v2  ;;  %v4580_v13 = vld [vmem:[%s19008_s6 + $0x11c0] sm:$0xff] }
0x16f2   : > { %v16641_v23 = vpack.c.bf16 %v3989_v59, %v3987_v55  ;;  %8253 = vmatpush1.bf16.msra.mxu0 %v12576_v7  ;;  %v4513_v4 = vld [vmem:[%s19008_s6 + $0xfa8] sm:$0xff]  ;;  %v12686_v7 = vcombine.low %v4564_v52, %v4568_v53  ;;  %v4584_v55 = vld [vmem:[%s19008_s6 + $0x11e0] sm:$0xff]  ;;  %v12694_v50 = vcombine.low %v4572_v1, %v4576_v2 }
0x16f3   : > { %8254 = vmatprep.subr.bf16.mxu0 %v12585_v12  ;;  %v12633_v12 = vcombine.high %v4509_v3, %v4513_v4  ;;  %v4517_v59 = vld [vmem:[%s19008_s6 + $0xfc8] sm:$0xff]  ;;  %v12632_v41 = vcombine.low %v4509_v3, %v4513_v4  ;;  %v12703_v21 = vcombine.high %v4580_v13, %v4584_v55 }
0x16f4   : > { %8055 = vmatprep.mubr.bf16.mxu1 %v16641_v23  ;;  %8270 = vmatprep.mubr.bf16.mxu0 %v16641_v23  ;;  %v4521_v60 = vld [vmem:[%s19008_s6 + $0xfe8] sm:$0xff] }
0x16f5   : > { %8056 = vmatmul.mubr.bf16.vlgmr.msra.gmra.mrb[40].mxu1 %v16637_v20  ;;  %v12641_v22 = vcombine.high %v4517_v59, %v4521_v60  ;;  %v12640_v36 = vcombine.low %v4517_v59, %v4521_v60  ;;  %v4545_v40 = vld [vmem:[%s19008_s6 + $0x10a8] sm:$0xff] }
0x16f6   : > { %8067 = vmatpush1.bf16.msra.mxu1 %v12646_v57  ;;  %8255 = vmatpush1.bf16.msra.mxu0 %v12584_v42  ;;  %v12662_v57 = vcombine.low %v4540_v29, %v4544_v30  ;;  %v4588_v42 = vld [vmem:[%s19008_s6 + $0x1200] sm:$0xff]  ;;  %v4529_v29 = vld [vmem:[%s19008_s6 + $0x1028] sm:$0xff]  ;;  %v12702_v30 = vcombine.low %v4580_v13, %v4584_v55 }
0x16f7   : > { %8068 = vmatprep.subr.bf16.mxu1 %v12655_v43  ;;  %8256 = vmatprep.subr.bf16.mxu0 %v12593_v24  ;;  %v4592_v43 = vld [vmem:[%s19008_s6 + $0x1220] sm:$0xff]  ;;  %v4525_v24 = vld [vmem:[%s19008_s6 + $0x1008] sm:$0xff] }
0x16f8   : > { %8098 = vmatprep.mubr.bf16.mxu1 %v16657_v32  ;;  %v12711_v31 = vcombine.high %v4588_v42, %v4592_v43  ;;  %v12710_v34 = vcombine.low %v4588_v42, %v4592_v43  ;;  %v12648_v9 = vcombine.low %v4525_v24, %v4529_v29  ;;  %v4553_v52 = vld [vmem:[%s19008_s6 + $0x10e8] sm:$0xff] }
0x16f9   : > { %v4561_v1 = vld [vmem:[%s19008_s6 + $0x1128] sm:$0xff] }
0x16fa   : > { %8069 = vmatpush1.bf16.msra.mxu1 %v12654_v25  ;;  %8257 = vmatpush1.bf16.msra.mxu0 %v12592_v26  ;;  %v12649_v25 = vcombine.high %v4525_v24, %v4529_v29  ;;  %v4596_v26 = vld [vmem:[%s19008_s6 + $0x1240] sm:$0xff]  ;;  %v4569_v13 = vld [vmem:[%s19008_s6 + $0x1168] sm:$0xff] }
0x16fb   : > { %8070 = vmatprep.subr.bf16.mxu1 %v12663_v27  ;;  %8258 = vmatprep.subr.bf16.mxu0 %v12601_v28  ;;  %v4600_v27 = vld [vmem:[%s19008_s6 + $0x1260] sm:$0xff]  ;;  %v4533_v28 = vld [vmem:[%s19008_s6 + $0x1048] sm:$0xff] }
0x16fc   : > { %v12719_v10 = vcombine.high %v4596_v26, %v4600_v27  ;;  %v12718_v48 = vcombine.low %v4596_v26, %v4600_v27  ;;  %v12656_v49 = vcombine.low %v4533_v28, %v4537_v33  ;;  %v4577_v42 = vld [vmem:[%s19008_s6 + $0x11a8] sm:$0xff] }
0x16fd   : > { %v4585_v26 = vld [vmem:[%s19008_s6 + $0x11e8] sm:$0xff] }
0x16fe   : > { %8071 = vmatpush1.bf16.msra.mxu1 %v12662_v57  ;;  %8259 = vmatpush1.bf16.msra.mxu0 %v12600_v37  ;;  %v12657_v57 = vcombine.high %v4533_v28, %v4537_v33  ;;  %v4604_v37 = vld [vmem:[%s19008_s6 + $0x1280] sm:$0xff] }
0x16ff   : > { %8072 = vmatprep.subr.bf16.mxu1 %v12671_v38  ;;  %8260 = vmatprep.subr.bf16.mxu0 %v12609_v39  ;;  %v4608_v38 = vld [vmem:[%s19008_s6 + $0x12a0] sm:$0xff]  ;;  %v4541_v39 = vld [vmem:[%s19008_s6 + $0x1088] sm:$0xff] }
0x1700   : > { %v12727_v54 = vcombine.high %v4604_v37, %v4608_v38  ;;  %v12726_v53 = vcombine.low %v4604_v37, %v4608_v38  ;;  %v12664_v44 = vcombine.low %v4541_v39, %v4545_v40  ;;  %v4018_v37 = vld [vmem:[%s19008_s6 + $0x30] sm:$0xff] }
0x1702   : > { %8073 = vmatpush1.bf16.msra.mxu1 %v12670_v35  ;;  %8261 = vmatpush1.bf16.msra.mxu0 %v12608_v16  ;;  %v12665_v35 = vcombine.high %v4541_v39, %v4545_v40  ;;  %v4612_v16 = vld [vmem:[%s19008_s6 + $0x12c0] sm:$0xff] }
0x1703   : > { %8074 = vmatprep.subr.bf16.mxu1 %v12679_v51  ;;  %8262 = vmatprep.subr.bf16.mxu0 %v12617_v17  ;;  %v4616_v51 = vld [vmem:[%s19008_s6 + $0x12e0] sm:$0xff]  ;;  %v4549_v17 = vld [vmem:[%s19008_s6 + $0x10c8] sm:$0xff] }
0x1704   : > { %v12735_v45 = vcombine.high %v4612_v16, %v4616_v51  ;;  %v12734_v2 = vcombine.low %v4612_v16, %v4616_v51  ;;  %v12672_v3 = vcombine.low %v4549_v17, %v4553_v52  ;;  %v3994_v40 = vld [vmem:[%s16619_s26] sm:$0xff]  ;;  %v4601_v16 = vld [vmem:[%s19008_s6 + $0x1268] sm:$0xff] }
0x1706   : > { %8075 = vmatpush1.bf16.msra.mxu1 %v12678_v46  ;;  %8263 = vmatpush1.bf16.msra.mxu0 %v12616_v47  ;;  %v12673_v46 = vcombine.high %v4549_v17, %v4553_v52  ;;  %v4620_v47 = vld [vmem:[%s19008_s6 + $0x1300] sm:$0xff]  ;;  %v4022_v17 = vld [vmem:[%s19008_s6 + $0x50] sm:$0xff] }
0x1707   : > { %8076 = vmatprep.subr.bf16.mxu1 %v12687_v63  ;;  %8264 = vmatprep.subr.bf16.mxu0 %v12625_v0  ;;  %v4624_v63 = vld [vmem:[%s19008_s6 + $0x1320] sm:$0xff]  ;;  %v4557_v0 = vld [vmem:[%s19008_s6 + $0x1108] sm:$0xff]  ;;  %v4026_v52 = vld [vmem:[%s19008_s6 + $0x70] sm:$0xff] }
0x1708   : > { %v12743_v4 = vcombine.high %v4620_v47, %v4624_v63  ;;  %v12742_v55 = vcombine.low %v4620_v47, %v4624_v63  ;;  %v12680_v59 = vcombine.low %v4557_v0, %v4561_v1  ;;  %v12147_v47 = vcombine.high %v4022_v17, %v4026_v52  ;;  %v4609_v63 = vld [vmem:[%s19008_s6 + $0x12a8] sm:$0xff] }
0x170a   : > { %8077 = vmatpush1.bf16.msra.mxu1 %v12686_v7  ;;  %8265 = vmatpush1.bf16.msra.mxu0 %v12624_v8  ;;  %v12681_v7 = vcombine.high %v4557_v0, %v4561_v1  ;;  %v4628_v8 = vld [vmem:[%s19008_s6 + $0x1340] sm:$0xff]  ;;  %v4030_v0 = vld [vmem:[%s19008_s6 + $0x90] sm:$0xff] }
0x170b   : > { %8078 = vmatprep.subr.bf16.mxu1 %v12695_v11  ;;  %8266 = vmatprep.subr.bf16.mxu0 %v12633_v12  ;;  %v4632_v11 = vld [vmem:[%s19008_s6 + $0x1360] sm:$0xff]  ;;  %v4565_v12 = vld [vmem:[%s19008_s6 + $0x1148] sm:$0xff]  ;;  %v4034_v1 = vld [vmem:[%s19008_s6 + $0xb0] sm:$0xff] }
0x170c   : > { %v12751_v60 = vcombine.high %v4628_v8, %v4632_v11  ;;  %v12750_v43 = vcombine.low %v4628_v8, %v4632_v11  ;;  %v12688_v24 = vcombine.low %v4565_v12, %v4569_v13  ;;  %v4613_v8 = vld [vmem:[%s19008_s6 + $0x12c8] sm:$0xff] }
0x170d   : > { %v4617_v11 = vld [vmem:[%s19008_s6 + $0x12e8] sm:$0xff] }
0x170e   : > { %8079 = vmatpush1.bf16.msra.mxu1 %v12694_v50  ;;  %8267 = vmatpush1.bf16.msra.mxu0 %v12632_v41  ;;  %v12689_v50 = vcombine.high %v4565_v12, %v4569_v13  ;;  %v4636_v41 = vld [vmem:[%s19008_s6 + $0x1380] sm:$0xff]  ;;  %v4038_v12 = vld [vmem:[%s19008_s6 + $0xd0] sm:$0xff] }
0x170f   : > { %8080 = vmatprep.subr.bf16.mxu1 %v12703_v21  ;;  %8268 = vmatprep.subr.bf16.mxu0 %v12641_v22  ;;  %v4640_v21 = vld [vmem:[%s19008_s6 + $0x13a0] sm:$0xff]  ;;  %v4573_v22 = vld [vmem:[%s19008_s6 + $0x1188] sm:$0xff]  ;;  %v4042_v13 = vld [vmem:[%s19008_s6 + $0xf0] sm:$0xff] }
0x1710   : > { %v12759_v29 = vcombine.high %v4636_v41, %v4640_v21  ;;  %v12758_v27 = vcombine.low %v4636_v41, %v4640_v21  ;;  %v12696_v28 = vcombine.low %v4573_v22, %v4577_v42  ;;  %v4621_v41 = vld [vmem:[%s19008_s6 + $0x1308] sm:$0xff] }
0x1711   : > { %v4625_v21 = vld [vmem:[%s19008_s6 + $0x1328] sm:$0xff] }
0x1712   : > { %8081 = vmatpush1.bf16.msra.mxu1 %v12702_v30  ;;  %8269 = vmatpush1.bf16.msra.mxu0 %v12640_v36  ;;  %v12697_v30 = vcombine.high %v4573_v22, %v4577_v42  ;;  %v4644_v36 = vld [vmem:[%s19008_s6 + $0x13c0] sm:$0xff]  ;;  %v4046_v22 = vld [vmem:[%s19008_s6 + $0x110] sm:$0xff] }
0x1713   : > { %8082 = vmatprep.subr.bf16.mxu1 %v12711_v31  ;;  %8281 = vmatprep.subr.bf16.mxu0 %v12649_v25  ;;  %v4648_v31 = vld [vmem:[%s19008_s6 + $0x13e0] sm:$0xff]  ;;  %v4581_v25 = vld [vmem:[%s19008_s6 + $0x11c8] sm:$0xff]  ;;  %v4050_v42 = vld [vmem:[%s19008_s6 + $0x130] sm:$0xff] }
0x1714   : > { %v12767_v33 = vcombine.high %v4644_v36, %v4648_v31  ;;  %v12766_v38 = vcombine.low %v4644_v36, %v4648_v31  ;;  %v12704_v39 = vcombine.low %v4581_v25, %v4585_v26  ;;  %v4629_v36 = vld [vmem:[%s19008_s6 + $0x1348] sm:$0xff] }
0x1715   : > { %8271 = vmatmul.mubr.bf16.vlgmr.msra.gmra.mrb[56].mxu0 %v16637_v20  ;;  %v4633_v31 = vld [vmem:[%s19008_s6 + $0x1368] sm:$0xff] }
0x1716   : > { %8083 = vmatpush1.bf16.msra.mxu1 %v12710_v34  ;;  %8282 = vmatpush1.bf16.msra.mxu0 %v12648_v9  ;;  %v12705_v34 = vcombine.high %v4581_v25, %v4585_v26  ;;  %v4589_v9 = vld [vmem:[%s19008_s6 + $0x1208] sm:$0xff]  ;;  %v4054_v25 = vld [vmem:[%s19008_s6 + $0x150] sm:$0xff] }
0x1717   : > { %8084 = vmatprep.subr.bf16.mxu1 %v12719_v10  ;;  %8283 = vmatprep.subr.bf16.mxu0 %v12657_v57  ;;  %v4593_v10 = vld [vmem:[%s19008_s6 + $0x1228] sm:$0xff]  ;;  %v4014_v57 = vld [vmem:[%s19008_s6 + $0x10] sm:$0xff] }
0x1718   : > { %8313 = vmatprep.mubr.bf16.mxu0 %v16657_v32  ;;  %v4058_v26 = vld [vmem:[%s19008_s6 + $0x170] sm:$0xff] }
0x171a   : > { %8085 = vmatpush1.bf16.msra.mxu1 %v12718_v48  ;;  %8284 = vmatpush1.bf16.msra.mxu0 %v12656_v49  ;;  %v3996_v48 = vld [vmem:[%s16619_s26 + $0x10] sm:$0xff]  ;;  %v12713_v49 = vcombine.high %v4589_v9, %v4593_v10 }
0x171b   : > { %8086 = vmatprep.subr.bf16.mxu1 %v12727_v54  ;;  %8285 = vmatprep.subr.bf16.mxu0 %v12665_v35  ;;  %v12139_v54 = vcombine.high %v4014_v57, %v4018_v37  ;;  %v4597_v35 = vld [vmem:[%s19008_s6 + $0x1248] sm:$0xff]  ;;  %v16842_v51 = vpack.c.bf16 %v3996_v48, %v3994_v40 }
0x171e   : > { %8087 = vmatpush1.bf16.msra.mxu1 %v12726_v53  ;;  %8286 = vmatpush1.bf16.msra.mxu0 %v12664_v44  ;;  %v12712_v53 = vcombine.low %v4589_v9, %v4593_v10  ;;  %v12138_v44 = vcombine.low %v4014_v57, %v4018_v37  ;;  %v4637_v9 = vld [vmem:[%s19008_s6 + $0x1388] sm:$0xff]  ;;  %v4062_v57 = vld [vmem:[%s19008_s6 + $0x190] sm:$0xff] }
0x171f   : > { %8088 = vmatprep.subr.bf16.mxu1 %v12735_v45  ;;  %8287 = vmatprep.subr.bf16.mxu0 %v12673_v46  ;;  %v12721_v45 = vcombine.high %v4597_v35, %v4601_v16  ;;  %v4605_v46 = vld [vmem:[%s19008_s6 + $0x1288] sm:$0xff]  ;;  %v4066_v37 = vld [vmem:[%s19008_s6 + $0x1b0] sm:$0xff] }
0x1720   : > { %v4641_v10 = vld [vmem:[%s19008_s6 + $0x13a8] sm:$0xff]  ;;  %v12187_v48 = vcombine.high %v4062_v57, %v4066_v37 }
0x1721   : > { %v12761_v40 = vcombine.high %v4637_v9, %v4641_v10 }
0x1722   : > { %8089 = vmatpush1.bf16.msra.mxu1 %v12734_v2  ;;  %8288 = vmatpush1.bf16.msra.mxu0 %v12672_v3  ;;  %v12720_v2 = vcombine.low %v4597_v35, %v4601_v16  ;;  %v12146_v3 = vcombine.low %v4022_v17, %v4026_v52  ;;  %v4070_v35 = vld [vmem:[%s19008_s6 + $0x1d0] sm:$0xff]  ;;  %v12760_v17 = vcombine.low %v4637_v9, %v4641_v10  ;;  %v4051_v9 = vld [vmem:[%s19008_s6 + $0x138] sm:$0xff] }
0x1723   : > { %8090 = vmatprep.subr.bf16.mxu1 %v12743_v4  ;;  %8289 = vmatprep.subr.bf16.mxu0 %v12681_v7  ;;  %v12729_v4 = vcombine.high %v4605_v46, %v4609_v63  ;;  %v12155_v7 = vcombine.high %v4030_v0, %v4034_v1  ;;  %v4074_v16 = vld [vmem:[%s19008_s6 + $0x1f0] sm:$0xff]  ;;  %v12186_v52 = vcombine.low %v4062_v57, %v4066_v37 }
0x1726   : > { %8091 = vmatpush1.bf16.msra.mxu1 %v12742_v55  ;;  %8290 = vmatpush1.bf16.msra.mxu0 %v12680_v59  ;;  %v12728_v55 = vcombine.low %v4605_v46, %v4609_v63  ;;  %v12154_v59 = vcombine.low %v4030_v0, %v4034_v1  ;;  %v4082_v46 = vld [vmem:[%s19008_s6 + $0x230] sm:$0xff]  ;;  %v4019_v63 = vld [vmem:[%s19008_s6 + $0x38] sm:$0xff]  ;;  %v12194_v1 = vcombine.low %v4070_v35, %v4074_v16 }
0x1727   : > { %8092 = vmatprep.subr.bf16.mxu1 %v12751_v60  ;;  %8291 = vmatprep.subr.bf16.mxu0 %v12689_v50  ;;  %v12737_v60 = vcombine.high %v4613_v8, %v4617_v11  ;;  %v12163_v50 = vcombine.high %v4038_v12, %v4042_v13 }
0x172a   : > { %8093 = vmatpush1.bf16.msra.mxu1 %v12750_v43  ;;  %8292 = vmatpush1.bf16.msra.mxu0 %v12688_v24  ;;  %v12736_v43 = vcombine.low %v4613_v8, %v4617_v11  ;;  %v12162_v24 = vcombine.low %v4038_v12, %v4042_v13  ;;  %v4023_v8 = vld [vmem:[%s19008_s6 + $0x58] sm:$0xff] }
0x172b   : > { %8094 = vmatprep.subr.bf16.mxu1 %v12759_v29  ;;  %8293 = vmatprep.subr.bf16.mxu0 %v12697_v30  ;;  %v12745_v29 = vcombine.high %v4621_v41, %v4625_v21  ;;  %v12171_v30 = vcombine.high %v4046_v22, %v4050_v42  ;;  %v4027_v11 = vld [vmem:[%s19008_s6 + $0x78] sm:$0xff] }
0x172e   : > { %8095 = vmatpush1.bf16.msra.mxu1 %v12758_v27  ;;  %8294 = vmatpush1.bf16.msra.mxu0 %v12696_v28  ;;  %v12744_v27 = vcombine.low %v4621_v41, %v4625_v21  ;;  %v12170_v28 = vcombine.low %v4046_v22, %v4050_v42  ;;  %v4031_v41 = vld [vmem:[%s19008_s6 + $0x98] sm:$0xff]  ;;  %v12148_v42 = vcombine.low %v4023_v8, %v4027_v11 }
0x172f   : > { %8096 = vmatprep.subr.bf16.mxu1 %v12767_v33  ;;  %8295 = vmatprep.subr.bf16.mxu0 %v12705_v34  ;;  %v12753_v33 = vcombine.high %v4629_v36, %v4633_v31  ;;  %v12179_v34 = vcombine.high %v4054_v25, %v4058_v26  ;;  %v4035_v21 = vld [vmem:[%s19008_s6 + $0xb8] sm:$0xff] }
0x1732   : > { %8097 = vmatpush1.bf16.msra.mxu1 %v12766_v38  ;;  %8296 = vmatpush1.bf16.msra.mxu0 %v12704_v39  ;;  %v12752_v38 = vcombine.low %v4629_v36, %v4633_v31  ;;  %v12178_v39 = vcombine.low %v4054_v25, %v4058_v26  ;;  %v4039_v36 = vld [vmem:[%s19008_s6 + $0xd8] sm:$0xff]  ;;  %v12156_v25 = vcombine.low %v4031_v41, %v4035_v21 }
0x1733   : > { %8297 = vmatprep.subr.bf16.mxu0 %v12713_v49  ;;  %8324 = vmatprep.subr.bf16.mxu1 %v12139_v54  ;;  %v4645_v49 = vld [vmem:[%s19008_s6 + $0x13c8] sm:$0xff] }
0x1734   : > { %v4649_v54 = vld [vmem:[%s19008_s6 + $0x13e8] sm:$0xff] }
0x1735   : > { %8099 = vmatmul.mubr.bf16.vlgmr.msra.gmra.mrb[40].mxu1 %v16842_v51  ;;  %v12768_v0 = vcombine.low %v4645_v49, %v4649_v54 }
0x1736   : > { %8298 = vmatpush1.bf16.msra.mxu0 %v12712_v53  ;;  %8325 = vmatpush1.bf16.msra.mxu1 %v12138_v44  ;;  %v12769_v53 = vcombine.high %v4645_v49, %v4649_v54  ;;  %v12195_v44 = vcombine.high %v4070_v35, %v4074_v16  ;;  %v4059_v49 = vld [vmem:[%s19008_s6 + $0x178] sm:$0xff] }
0x1737   : > { %8356 = vmatprep.mubr.bf16.mxu1 %v15118_v61  ;;  %8299 = vmatprep.subr.bf16.mxu0 %v12721_v45  ;;  %v4078_v45 = vld [vmem:[%s19008_s6 + $0x210] sm:$0xff] }
0x1738   : > { %8326 = vmatprep.subr.bf16.mxu1 %v12147_v47  ;;  %v4015_v47 = vld [vmem:[%s19008_s6 + $0x18] sm:$0xff]  ;;  %v12202_v12 = vcombine.low %v4078_v45, %v4082_v46 }
0x1739   : > { %v12140_v13 = vcombine.low %v4015_v47, %v4019_v63 }
0x173a   : > { %8300 = vmatpush1.bf16.msra.mxu0 %v12720_v2  ;;  %8327 = vmatpush1.bf16.msra.mxu1 %v12146_v3  ;;  %v12203_v2 = vcombine.high %v4078_v45, %v4082_v46  ;;  %v12141_v3 = vcombine.high %v4015_v47, %v4019_v63  ;;  %v4067_v45 = vld [vmem:[%s19008_s6 + $0x1b8] sm:$0xff] }
0x173b   : > { %8301 = vmatprep.subr.bf16.mxu0 %v12729_v4  ;;  %8328 = vmatprep.subr.bf16.mxu1 %v12155_v7  ;;  %v4086_v4 = vld [vmem:[%s19008_s6 + $0x250] sm:$0xff] }
0x173c   : > { %v4090_v7 = vld [vmem:[%s19008_s6 + $0x270] sm:$0xff] }
0x173d   : > { %v12210_v22 = vcombine.low %v4086_v4, %v4090_v7 }
0x173e   : > { %8302 = vmatpush1.bf16.msra.mxu0 %v12728_v55  ;;  %8329 = vmatpush1.bf16.msra.mxu1 %v12154_v59  ;;  %v12211_v55 = vcombine.high %v4086_v4, %v4090_v7  ;;  %v4094_v59 = vld [vmem:[%s19008_s6 + $0x290] sm:$0xff]  ;;  %v4075_v4 = vld [vmem:[%s19008_s6 + $0x1f8] sm:$0xff] }
0x173f   : > { %8303 = vmatprep.subr.bf16.mxu0 %v12737_v60  ;;  %8330 = vmatprep.subr.bf16.mxu1 %v12163_v50  ;;  %v12149_v60 = vcombine.high %v4023_v8, %v4027_v11  ;;  %v4098_v50 = vld [vmem:[%s19008_s6 + $0x2b0] sm:$0xff] }
0x1740   : > { %v12218_v31 = vcombine.low %v4094_v59, %v4098_v50 }
0x1742   : > { %8304 = vmatpush1.bf16.msra.mxu0 %v12736_v43  ;;  %8331 = vmatpush1.bf16.msra.mxu1 %v12162_v24  ;;  %v12219_v43 = vcombine.high %v4094_v59, %v4098_v50  ;;  %v12157_v24 = vcombine.high %v4031_v41, %v4035_v21  ;;  %v4079_v59 = vld [vmem:[%s19008_s6 + $0x218] sm:$0xff] }
0x1743   : > { %8305 = vmatprep.subr.bf16.mxu0 %v12745_v29  ;;  %8332 = vmatprep.subr.bf16.mxu1 %v12171_v30  ;;  %v4102_v29 = vld [vmem:[%s19008_s6 + $0x2d0] sm:$0xff] }
0x1744   : > { %v4106_v30 = vld [vmem:[%s19008_s6 + $0x2f0] sm:$0xff] }
0x1745   : > { %v12227_v26 = vcombine.high %v4102_v29, %v4106_v30  ;;  %v12226_v10 = vcombine.low %v4102_v29, %v4106_v30  ;;  %v4091_v29 = vld [vmem:[%s19008_s6 + $0x278] sm:$0xff] }
0x1746   : > { %8306 = vmatpush1.bf16.msra.mxu0 %v12744_v27  ;;  %8333 = vmatpush1.bf16.msra.mxu1 %v12170_v28  ;;  %v4110_v28 = vld [vmem:[%s19008_s6 + $0x310] sm:$0xff] }
0x1747   : > { %8307 = vmatprep.subr.bf16.mxu0 %v12753_v33  ;;  %8334 = vmatprep.subr.bf16.mxu1 %v12179_v34  ;;  %v4114_v33 = vld [vmem:[%s19008_s6 + $0x330] sm:$0xff]  ;;  %v4047_v34 = vld [vmem:[%s19008_s6 + $0x118] sm:$0xff] }
0x1748   : > { %v12235_v37 = vcombine.high %v4110_v28, %v4114_v33  ;;  %v12234_v54 = vcombine.low %v4110_v28, %v4114_v33  ;;  %v12172_v35 = vcombine.low %v4047_v34, %v4051_v9  ;;  %v4099_v28 = vld [vmem:[%s19008_s6 + $0x2b8] sm:$0xff] }
0x174a   : > { %8308 = vmatpush1.bf16.msra.mxu0 %v12752_v38  ;;  %8335 = vmatpush1.bf16.msra.mxu1 %v12178_v39  ;;  %v12173_v38 = vcombine.high %v4047_v34, %v4051_v9  ;;  %v4118_v39 = vld [vmem:[%s19008_s6 + $0x350] sm:$0xff] }
0x174b   : > { %8309 = vmatprep.subr.bf16.mxu0 %v12761_v40  ;;  %8336 = vmatprep.subr.bf16.mxu1 %v12187_v48  ;;  %v4122_v40 = vld [vmem:[%s19008_s6 + $0x370] sm:$0xff]  ;;  %v4055_v48 = vld [vmem:[%s19008_s6 + $0x158] sm:$0xff] }
0x174c   : > { %v12243_v16 = vcombine.high %v4118_v39, %v4122_v40  ;;  %v12242_v46 = vcombine.low %v4118_v39, %v4122_v40  ;;  %v12180_v47 = vcombine.low %v4055_v48, %v4059_v49  ;;  %v4107_v39 = vld [vmem:[%s19008_s6 + $0x2f8] sm:$0xff] }
0x174e   : > { %8310 = vmatpush1.bf16.msra.mxu0 %v12760_v17  ;;  %8337 = vmatpush1.bf16.msra.mxu1 %v12186_v52  ;;  %v12181_v17 = vcombine.high %v4055_v48, %v4059_v49  ;;  %v4126_v52 = vld [vmem:[%s19008_s6 + $0x390] sm:$0xff] }
0x174f   : > { %8311 = vmatprep.subr.bf16.mxu0 %v12769_v53  ;;  %8338 = vmatprep.subr.bf16.mxu1 %v12195_v44  ;;  %v4130_v53 = vld [vmem:[%s19008_s6 + $0x3b0] sm:$0xff]  ;;  %v4063_v44 = vld [vmem:[%s19008_s6 + $0x198] sm:$0xff] }
0x1750   : > { %v12251_v63 = vcombine.high %v4126_v52, %v4130_v53  ;;  %v12250_v7 = vcombine.low %v4126_v52, %v4130_v53  ;;  %v12188_v8 = vcombine.low %v4063_v44, %v4067_v45  ;;  %v4115_v52 = vld [vmem:[%s19008_s6 + $0x338] sm:$0xff] }
0x1752   : > { %8312 = vmatpush1.bf16.msra.mxu0 %v12768_v0  ;;  %8339 = vmatpush1.bf16.msra.mxu1 %v12194_v1  ;;  %v12189_v0 = vcombine.high %v4063_v44, %v4067_v45  ;;  %v4134_v1 = vld [vmem:[%s19008_s6 + $0x3d0] sm:$0xff] }
0x1753   : > { %8340 = vmatprep.subr.bf16.mxu1 %v12203_v2  ;;  %8539 = vmatprep.subr.bf16.mxu0 %v12141_v3  ;;  %v4138_v2 = vld [vmem:[%s19008_s6 + $0x3f0] sm:$0xff]  ;;  %v4071_v3 = vld [vmem:[%s19008_s6 + $0x1d8] sm:$0xff] }
0x1754   : > { %v12259_v11 = vcombine.high %v4134_v1, %v4138_v2  ;;  %v12258_v50 = vcombine.low %v4134_v1, %v4138_v2  ;;  %v12196_v41 = vcombine.low %v4071_v3, %v4075_v4  ;;  %v4123_v1 = vld [vmem:[%s19008_s6 + $0x378] sm:$0xff] }
0x1755   : > { %8314 = vmatmul.mubr.bf16.vlgmr.msra.gmra.mrb[56].mxu0 %v16842_v51 }
0x1756   : > { %8341 = vmatpush1.bf16.msra.mxu1 %v12202_v12  ;;  %8540 = vmatpush1.bf16.msra.mxu0 %v12140_v13  ;;  %v12197_v12 = vcombine.high %v4071_v3, %v4075_v4  ;;  %v4142_v13 = vld [vmem:[%s19008_s6 + $0x410] sm:$0xff] }
0x1757   : > { %8571 = vmatprep.mubr.bf16.mxu0 %v15118_v61  ;;  %8342 = vmatprep.subr.bf16.mxu1 %v12211_v55  ;;  %v4043_v61 = vld [vmem:[%s19008_s6 + $0xf8] sm:$0xff]  ;;  %v4146_v55 = vld [vmem:[%s19008_s6 + $0x430] sm:$0xff] }
0x1758   : > { %8541 = vmatprep.subr.bf16.mxu0 %v12149_v60  ;;  %v12165_v27 = vcombine.high %v4039_v36, %v4043_v61  ;;  %v12164_v57 = vcombine.low %v4039_v36, %v4043_v61  ;;  %v4083_v60 = vld [vmem:[%s19008_s6 + $0x238] sm:$0xff]  ;;  %v12267_v21 = vcombine.high %v4142_v13, %v4146_v55  ;;  %v12266_v30 = vcombine.low %v4142_v13, %v4146_v55 }
0x1759   : > { %v12204_v36 = vcombine.low %v4079_v59, %v4083_v60  ;;  %v4131_v13 = vld [vmem:[%s19008_s6 + $0x3b8] sm:$0xff] }
0x175a   : > { %8343 = vmatpush1.bf16.msra.mxu1 %v12210_v22  ;;  %8542 = vmatpush1.bf16.msra.mxu0 %v12148_v42  ;;  %v12205_v22 = vcombine.high %v4079_v59, %v4083_v60  ;;  %v4150_v42 = vld [vmem:[%s19008_s6 + $0x450] sm:$0xff] }
0x175b   : > { %8344 = vmatprep.subr.bf16.mxu1 %v12219_v43  ;;  %8543 = vmatprep.subr.bf16.mxu0 %v12157_v24  ;;  %v4154_v43 = vld [vmem:[%s19008_s6 + $0x470] sm:$0xff]  ;;  %v4087_v24 = vld [vmem:[%s19008_s6 + $0x258] sm:$0xff] }
0x175c   : > { %v12275_v61 = vcombine.high %v4150_v42, %v4154_v43  ;;  %v12274_v33 = vcombine.low %v4150_v42, %v4154_v43  ;;  %v12212_v34 = vcombine.low %v4087_v24, %v4091_v29  ;;  %v4139_v42 = vld [vmem:[%s19008_s6 + $0x3f8] sm:$0xff] }
0x175e   : > { %8345 = vmatpush1.bf16.msra.mxu1 %v12218_v31  ;;  %8544 = vmatpush1.bf16.msra.mxu0 %v12156_v25  ;;  %v12213_v31 = vcombine.high %v4087_v24, %v4091_v29  ;;  %v4158_v25 = vld [vmem:[%s19008_s6 + $0x490] sm:$0xff] }
0x175f   : > { %8346 = vmatprep.subr.bf16.mxu1 %v12227_v26  ;;  %8545 = vmatprep.subr.bf16.mxu0 %v12165_v27  ;;  %v4162_v26 = vld [vmem:[%s19008_s6 + $0x4b0] sm:$0xff]  ;;  %v4095_v27 = vld [vmem:[%s19008_s6 + $0x298] sm:$0xff] }
0x1760   : > { %v12283_v9 = vcombine.high %v4158_v25, %v4162_v26  ;;  %v12282_v40 = vcombine.low %v4158_v25, %v4162_v26  ;;  %v12220_v48 = vcombine.low %v4095_v27, %v4099_v28  ;;  %v4147_v25 = vld [vmem:[%s19008_s6 + $0x438] sm:$0xff] }
0x1762   : > { %8347 = vmatpush1.bf16.msra.mxu1 %v12226_v10  ;;  %8546 = vmatpush1.bf16.msra.mxu0 %v12164_v57  ;;  %v12221_v10 = vcombine.high %v4095_v27, %v4099_v28  ;;  %v4166_v57 = vld [vmem:[%s19008_s6 + $0x4d0] sm:$0xff] }
0x1763   : > { %8348 = vmatprep.subr.bf16.mxu1 %v12235_v37  ;;  %8547 = vmatprep.subr.bf16.mxu0 %v12173_v38  ;;  %v4170_v37 = vld [vmem:[%s19008_s6 + $0x4f0] sm:$0xff]  ;;  %v4103_v38 = vld [vmem:[%s19008_s6 + $0x2d8] sm:$0xff] }
0x1764   : > { %v12291_v49 = vcombine.high %v4166_v57, %v4170_v37  ;;  %v12290_v53 = vcombine.low %v4166_v57, %v4170_v37  ;;  %v12228_v44 = vcombine.low %v4103_v38, %v4107_v39  ;;  %v4155_v57 = vld [vmem:[%s19008_s6 + $0x478] sm:$0xff] }
0x1766   : > { %8349 = vmatpush1.bf16.msra.mxu1 %v12234_v54  ;;  %8548 = vmatpush1.bf16.msra.mxu0 %v12172_v35  ;;  %v12229_v54 = vcombine.high %v4103_v38, %v4107_v39  ;;  %v4174_v35 = vld [vmem:[%s19008_s6 + $0x510] sm:$0xff] }
0x1767   : > { %8350 = vmatprep.subr.bf16.mxu1 %v12243_v16  ;;  %8549 = vmatprep.subr.bf16.mxu0 %v12181_v17  ;;  %v4178_v16 = vld [vmem:[%s19008_s6 + $0x530] sm:$0xff]  ;;  %v4111_v17 = vld [vmem:[%s19008_s6 + $0x318] sm:$0xff] }
0x1768   : > { %v12299_v45 = vcombine.high %v4174_v35, %v4178_v16  ;;  %v12298_v2 = vcombine.low %v4174_v35, %v4178_v16  ;;  %v12236_v3 = vcombine.low %v4111_v17, %v4115_v52  ;;  %v4163_v35 = vld [vmem:[%s19008_s6 + $0x4b8] sm:$0xff] }
0x176a   : > { %8351 = vmatpush1.bf16.msra.mxu1 %v12242_v46  ;;  %8550 = vmatpush1.bf16.msra.mxu0 %v12180_v47  ;;  %v12237_v46 = vcombine.high %v4111_v17, %v4115_v52  ;;  %v4182_v47 = vld [vmem:[%s19008_s6 + $0x550] sm:$0xff] }
0x176b   : > { %8352 = vmatprep.subr.bf16.mxu1 %v12251_v63  ;;  %8551 = vmatprep.subr.bf16.mxu0 %v12189_v0  ;;  %v4186_v63 = vld [vmem:[%s19008_s6 + $0x570] sm:$0xff]  ;;  %v4119_v0 = vld [vmem:[%s19008_s6 + $0x358] sm:$0xff] }
0x176c   : > { %v12307_v4 = vcombine.high %v4182_v47, %v4186_v63  ;;  %v12306_v55 = vcombine.low %v4182_v47, %v4186_v63  ;;  %v12244_v59 = vcombine.low %v4119_v0, %v4123_v1 }
0x176e   : > { %8353 = vmatpush1.bf16.msra.mxu1 %v12250_v7  ;;  %8552 = vmatpush1.bf16.msra.mxu0 %v12188_v8  ;;  %v12245_v7 = vcombine.high %v4119_v0, %v4123_v1  ;;  %v4190_v8 = vld [vmem:[%s19008_s6 + $0x590] sm:$0xff] }
0x176f   : > { %8354 = vmatprep.subr.bf16.mxu1 %v12259_v11  ;;  %8553 = vmatprep.subr.bf16.mxu0 %v12197_v12  ;;  %v4194_v11 = vld [vmem:[%s19008_s6 + $0x5b0] sm:$0xff]  ;;  %v4127_v12 = vld [vmem:[%s19008_s6 + $0x398] sm:$0xff] }
0x1770   : > { %v12315_v60 = vcombine.high %v4190_v8, %v4194_v11  ;;  %v12314_v43 = vcombine.low %v4190_v8, %v4194_v11  ;;  %v12252_v24 = vcombine.low %v4127_v12, %v4131_v13  ;;  %v4238_v1 = vld [vmem:[%s19008_s6 + $0x710] sm:$0xff] }
0x1772   : > { %8355 = vmatpush1.bf16.msra.mxu1 %v12258_v50  ;;  %8554 = vmatpush1.bf16.msra.mxu0 %v12196_v41  ;;  %v12253_v50 = vcombine.high %v4127_v12, %v4131_v13  ;;  %v4198_v41 = vld [vmem:[%s19008_s6 + $0x5d0] sm:$0xff] }
0x1773   : > { %8367 = vmatprep.subr.bf16.mxu1 %v12267_v21  ;;  %8555 = vmatprep.subr.bf16.mxu0 %v12205_v22  ;;  %v4202_v21 = vld [vmem:[%s19008_s6 + $0x5f0] sm:$0xff]  ;;  %v4135_v22 = vld [vmem:[%s19008_s6 + $0x3d8] sm:$0xff] }
0x1774   : > { %v12323_v29 = vcombine.high %v4198_v41, %v4202_v21  ;;  %v12322_v26 = vcombine.low %v4198_v41, %v4202_v21  ;;  %v12260_v27 = vcombine.low %v4135_v22, %v4139_v42  ;;  %v4246_v13 = vld [vmem:[%s19008_s6 + $0x750] sm:$0xff] }
0x1775   : > { %8357 = vmatmul.mubr.bf16.vlgmr.msra.gmra.mrb[44].mxu1 %v15122_v62 }
0x1776   : > { %8368 = vmatpush1.bf16.msra.mxu1 %v12266_v30  ;;  %8399 = vmatprep.mubr.bf16.mxu1 %v15423_v18  ;;  %v12261_v30 = vcombine.high %v4135_v22, %v4139_v42  ;;  %v4254_v42 = vld [vmem:[%s19008_s6 + $0x790] sm:$0xff] }
0x1777   : > { %8556 = vmatpush1.bf16.msra.mxu0 %v12204_v36  ;;  %8369 = vmatprep.subr.bf16.mxu1 %v12275_v61  ;;  %v4206_v36 = vld [vmem:[%s19008_s6 + $0x610] sm:$0xff] }
0x1778   : > { %8557 = vmatprep.subr.bf16.mxu0 %v12213_v31  ;;  %v4210_v61 = vld [vmem:[%s19008_s6 + $0x630] sm:$0xff]  ;;  %v4143_v31 = vld [vmem:[%s19008_s6 + $0x418] sm:$0xff] }
0x1779   : > { %v12331_v28 = vcombine.high %v4206_v36, %v4210_v61  ;;  %v12330_v37 = vcombine.low %v4206_v36, %v4210_v61  ;;  %v12268_v38 = vcombine.low %v4143_v31, %v4147_v25 }
0x177a   : > { %8370 = vmatpush1.bf16.msra.mxu1 %v12274_v33  ;;  %v12269_v33 = vcombine.high %v4143_v31, %v4147_v25  ;;  %v4262_v25 = vld [vmem:[%s19008_s6 + $0x7d0] sm:$0xff] }
0x177b   : > { %8558 = vmatpush1.bf16.msra.mxu0 %v12212_v34  ;;  %8371 = vmatprep.subr.bf16.mxu1 %v12283_v9  ;;  %v4214_v34 = vld [vmem:[%s19008_s6 + $0x650] sm:$0xff] }
0x177c   : > { %8559 = vmatprep.subr.bf16.mxu0 %v12221_v10  ;;  %v4218_v9 = vld [vmem:[%s19008_s6 + $0x670] sm:$0xff]  ;;  %v4151_v10 = vld [vmem:[%s19008_s6 + $0x458] sm:$0xff] }
0x177d   : > { %v12339_v39 = vcombine.high %v4214_v34, %v4218_v9  ;;  %v12338_v16 = vcombine.low %v4214_v34, %v4218_v9  ;;  %v12276_v17 = vcombine.low %v4151_v10, %v4155_v57 }
0x177e   : > { %8372 = vmatpush1.bf16.msra.mxu1 %v12282_v40  ;;  %v12277_v40 = vcombine.high %v4151_v10, %v4155_v57  ;;  %v4270_v57 = vld [vmem:[%s19008_s6 + $0x810] sm:$0xff] }
0x177f   : > { %8560 = vmatpush1.bf16.msra.mxu0 %v12220_v48  ;;  %8373 = vmatprep.subr.bf16.mxu1 %v12291_v49  ;;  %v4222_v48 = vld [vmem:[%s19008_s6 + $0x690] sm:$0xff] }
0x1780   : > { %8561 = vmatprep.subr.bf16.mxu0 %v12229_v54  ;;  %v4226_v49 = vld [vmem:[%s19008_s6 + $0x6b0] sm:$0xff]  ;;  %v4159_v54 = vld [vmem:[%s19008_s6 + $0x498] sm:$0xff] }
0x1781   : > { %v12347_v52 = vcombine.high %v4222_v48, %v4226_v49  ;;  %v12284_v47 = vcombine.low %v4159_v54, %v4163_v35 }
0x1782   : > { %8374 = vmatpush1.bf16.msra.mxu1 %v12290_v53  ;;  %v12285_v53 = vcombine.high %v4159_v54, %v4163_v35  ;;  %v4278_v35 = vld [vmem:[%s19008_s6 + $0x850] sm:$0xff] }
0x1783   : > { %8562 = vmatpush1.bf16.msra.mxu0 %v12228_v44  ;;  %8375 = vmatprep.subr.bf16.mxu1 %v12299_v45  ;;  %v4230_v44 = vld [vmem:[%s19008_s6 + $0x6d0] sm:$0xff] }
0x1784   : > { %8563 = vmatprep.subr.bf16.mxu0 %v12237_v46  ;;  %v4234_v45 = vld [vmem:[%s19008_s6 + $0x6f0] sm:$0xff]  ;;  %v12346_v46 = vcombine.low %v4222_v48, %v4226_v49 }
0x1785   : > { %v12355_v63 = vcombine.high %v4230_v44, %v4234_v45 }
0x1786   : > { %8376 = vmatpush1.bf16.msra.mxu1 %v12298_v2  ;;  %v4242_v2 = vld [vmem:[%s19008_s6 + $0x730] sm:$0xff] }
0x1787   : > { %8564 = vmatpush1.bf16.msra.mxu0 %v12236_v3  ;;  %8377 = vmatprep.subr.bf16.mxu1 %v12307_v4  ;;  %v4175_v3 = vld [vmem:[%s19008_s6 + $0x518] sm:$0xff]  ;;  %v12363_v11 = vcombine.high %v4238_v1, %v4242_v2 }
0x1788   : > { %8565 = vmatprep.subr.bf16.mxu0 %v12245_v7  ;;  %v4179_v4 = vld [vmem:[%s19008_s6 + $0x538] sm:$0xff]  ;;  %v12354_v7 = vcombine.low %v4230_v44, %v4234_v45 }
0x1789   : > { %v12301_v12 = vcombine.high %v4175_v3, %v4179_v4  ;;  %v12300_v41 = vcombine.low %v4175_v3, %v4179_v4  ;;  %v4294_v4 = vld [vmem:[%s19008_s6 + $0x8d0] sm:$0xff] }
0x178a   : > { %8378 = vmatpush1.bf16.msra.mxu1 %v12306_v55  ;;  %v4250_v55 = vld [vmem:[%s19008_s6 + $0x770] sm:$0xff] }
0x178b   : > { %8566 = vmatpush1.bf16.msra.mxu0 %v12244_v59  ;;  %8379 = vmatprep.subr.bf16.mxu1 %v12315_v60  ;;  %v4183_v59 = vld [vmem:[%s19008_s6 + $0x558] sm:$0xff]  ;;  %v12371_v21 = vcombine.high %v4246_v13, %v4250_v55 }
0x178c   : > { %8567 = vmatprep.subr.bf16.mxu0 %v12253_v50  ;;  %v4187_v60 = vld [vmem:[%s19008_s6 + $0x578] sm:$0xff]  ;;  %v12362_v50 = vcombine.low %v4238_v1, %v4242_v2 }
0x178d   : > { %v12309_v22 = vcombine.high %v4183_v59, %v4187_v60  ;;  %v12308_v36 = vcombine.low %v4183_v59, %v4187_v60  ;;  %v4302_v60 = vld [vmem:[%s19008_s6 + $0x910] sm:$0xff] }
0x178e   : > { %8380 = vmatpush1.bf16.msra.mxu1 %v12314_v43  ;;  %v4258_v43 = vld [vmem:[%s19008_s6 + $0x7b0] sm:$0xff] }
0x178f   : > { %8568 = vmatpush1.bf16.msra.mxu0 %v12252_v24  ;;  %8381 = vmatprep.subr.bf16.mxu1 %v12323_v29  ;;  %v4191_v24 = vld [vmem:[%s19008_s6 + $0x598] sm:$0xff]  ;;  %v12379_v61 = vcombine.high %v4254_v42, %v4258_v43 }
0x1790   : > { %8569 = vmatprep.subr.bf16.mxu0 %v12261_v30  ;;  %v4195_v29 = vld [vmem:[%s19008_s6 + $0x5b8] sm:$0xff]  ;;  %v12370_v30 = vcombine.low %v4246_v13, %v4250_v55 }
0x1791   : > { %v12317_v31 = vcombine.high %v4191_v24, %v4195_v29  ;;  %v12316_v34 = vcombine.low %v4191_v24, %v4195_v29  ;;  %v4310_v29 = vld [vmem:[%s19008_s6 + $0x950] sm:$0xff] }
0x1792   : > { %8382 = vmatpush1.bf16.msra.mxu1 %v12322_v26  ;;  %v4266_v26 = vld [vmem:[%s19008_s6 + $0x7f0] sm:$0xff] }
0x1793   : > { %8570 = vmatpush1.bf16.msra.mxu0 %v12260_v27  ;;  %8383 = vmatprep.subr.bf16.mxu1 %v12331_v28  ;;  %v4199_v27 = vld [vmem:[%s19008_s6 + $0x5d8] sm:$0xff]  ;;  %v12387_v9 = vcombine.high %v4262_v25, %v4266_v26 }
0x1794   : > { %8582 = vmatprep.subr.bf16.mxu0 %v12269_v33  ;;  %v4203_v28 = vld [vmem:[%s19008_s6 + $0x5f8] sm:$0xff]  ;;  %v12378_v33 = vcombine.low %v4254_v42, %v4258_v43 }
0x1795   : > { %v12325_v10 = vcombine.high %v4199_v27, %v4203_v28  ;;  %v12324_v48 = vcombine.low %v4199_v27, %v4203_v28  ;;  %v4318_v28 = vld [vmem:[%s19008_s6 + $0x990] sm:$0xff] }
0x1796   : > { %8572 = vmatmul.mubr.bf16.vlgmr.msra.gmra.mrb[60].mxu0 %v15122_v62  ;;  %8384 = vmatpush1.bf16.msra.mxu1 %v12330_v37  ;;  %v4167_v62 = vld [vmem:[%s19008_s6 + $0x4d8] sm:$0xff]  ;;  %v4274_v37 = vld [vmem:[%s19008_s6 + $0x830] sm:$0xff] }
0x1797   : > { %8583 = vmatpush1.bf16.msra.mxu0 %v12268_v38  ;;  %8614 = vmatprep.mubr.bf16.mxu0 %v15423_v18  ;;  %v4171_v18 = vld [vmem:[%s19008_s6 + $0x4f8] sm:$0xff]  ;;  %v12395_v49 = vcombine.high %v4270_v57, %v4274_v37 }
0x1798   : > { %8385 = vmatprep.subr.bf16.mxu1 %v12339_v39  ;;  %8584 = vmatprep.subr.bf16.mxu0 %v12277_v40  ;;  %v12293_v0 = vcombine.high %v4167_v62, %v4171_v18  ;;  %v12292_v8 = vcombine.low %v4167_v62, %v4171_v18  ;;  %v4207_v38 = vld [vmem:[%s19008_s6 + $0x618] sm:$0xff]  ;;  %v12386_v40 = vcombine.low %v4262_v25, %v4266_v26  ;;  %v4286_v18 = vld [vmem:[%s19008_s6 + $0x890] sm:$0xff] }
0x1799   : > { %v4211_v39 = vld [vmem:[%s19008_s6 + $0x638] sm:$0xff] }
0x179a   : > { %8386 = vmatpush1.bf16.msra.mxu1 %v12338_v16  ;;  %v12333_v54 = vcombine.high %v4207_v38, %v4211_v39  ;;  %v4282_v16 = vld [vmem:[%s19008_s6 + $0x870] sm:$0xff]  ;;  %v12332_v44 = vcombine.low %v4207_v38, %v4211_v39 }
0x179b   : > { %8585 = vmatpush1.bf16.msra.mxu0 %v12276_v17  ;;  %8387 = vmatprep.subr.bf16.mxu1 %v12347_v52  ;;  %v4215_v17 = vld [vmem:[%s19008_s6 + $0x658] sm:$0xff]  ;;  %v12403_v45 = vcombine.high %v4278_v35, %v4282_v16  ;;  %v4326_v39 = vld [vmem:[%s19008_s6 + $0x9d0] sm:$0xff] }
0x179c   : > { %8586 = vmatprep.subr.bf16.mxu0 %v12285_v53  ;;  %v4219_v52 = vld [vmem:[%s19008_s6 + $0x678] sm:$0xff]  ;;  %v12394_v53 = vcombine.low %v4270_v57, %v4274_v37 }
0x179d   : > { %v12341_v62 = vcombine.high %v4215_v17, %v4219_v52  ;;  %v12340_v1 = vcombine.low %v4215_v17, %v4219_v52  ;;  %v4334_v52 = vld [vmem:[%s19008_s6 + $0xa10] sm:$0xff] }
0x179e   : > { %8388 = vmatpush1.bf16.msra.mxu1 %v12346_v46  ;;  %v4290_v46 = vld [vmem:[%s19008_s6 + $0x8b0] sm:$0xff] }
0x179f   : > { %8587 = vmatpush1.bf16.msra.mxu0 %v12284_v47  ;;  %8389 = vmatprep.subr.bf16.mxu1 %v12355_v63  ;;  %v4223_v47 = vld [vmem:[%s19008_s6 + $0x698] sm:$0xff]  ;;  %v12411_v2 = vcombine.high %v4286_v18, %v4290_v46 }
0x17a0   : > { %8588 = vmatprep.subr.bf16.mxu0 %v12293_v0  ;;  %v4227_v63 = vld [vmem:[%s19008_s6 + $0x6b8] sm:$0xff]  ;;  %v12402_v0 = vcombine.low %v4278_v35, %v4282_v16 }
0x17a1   : > { %v12349_v3 = vcombine.high %v4223_v47, %v4227_v63  ;;  %v12348_v13 = vcombine.low %v4223_v47, %v4227_v63  ;;  %v4342_v63 = vld [vmem:[%s19008_s6 + $0xa50] sm:$0xff] }
0x17a2   : > { %8390 = vmatpush1.bf16.msra.mxu1 %v12354_v7  ;;  %v4298_v7 = vld [vmem:[%s19008_s6 + $0x8f0] sm:$0xff] }
0x17a3   : > { %8589 = vmatpush1.bf16.msra.mxu0 %v12292_v8  ;;  %8391 = vmatprep.subr.bf16.mxu1 %v12363_v11  ;;  %v4231_v8 = vld [vmem:[%s19008_s6 + $0x6d8] sm:$0xff]  ;;  %v12419_v55 = vcombine.high %v4294_v4, %v4298_v7 }
0x17a4   : > { %8590 = vmatprep.subr.bf16.mxu0 %v12301_v12  ;;  %v4235_v11 = vld [vmem:[%s19008_s6 + $0x6f8] sm:$0xff]  ;;  %v12410_v12 = vcombine.low %v4286_v18, %v4290_v46 }
0x17a5   : > { %v12357_v59 = vcombine.high %v4231_v8, %v4235_v11  ;;  %v12356_v42 = vcombine.low %v4231_v8, %v4235_v11  ;;  %v4350_v11 = vld [vmem:[%s19008_s6 + $0xa90] sm:$0xff] }
0x17a6   : > { %8392 = vmatpush1.bf16.msra.mxu1 %v12362_v50  ;;  %v4306_v50 = vld [vmem:[%s19008_s6 + $0x930] sm:$0xff] }
0x17a7   : > { %8591 = vmatpush1.bf16.msra.mxu0 %v12300_v41  ;;  %8393 = vmatprep.subr.bf16.mxu1 %v12371_v21  ;;  %v4239_v41 = vld [vmem:[%s19008_s6 + $0x718] sm:$0xff]  ;;  %v12427_v43 = vcombine.high %v4302_v60, %v4306_v50 }
0x17a8   : > { %8592 = vmatprep.subr.bf16.mxu0 %v12309_v22  ;;  %v4243_v21 = vld [vmem:[%s19008_s6 + $0x738] sm:$0xff]  ;;  %v12418_v22 = vcombine.low %v4294_v4, %v4298_v7 }
0x17a9   : > { %v12365_v24 = vcombine.high %v4239_v41, %v4243_v21  ;;  %v12364_v25 = vcombine.low %v4239_v41, %v4243_v21  ;;  %v4358_v21 = vld [vmem:[%s19008_s6 + $0xad0] sm:$0xff] }
0x17aa   : > { %8394 = vmatpush1.bf16.msra.mxu1 %v12370_v30  ;;  %v4314_v30 = vld [vmem:[%s19008_s6 + $0x970] sm:$0xff] }
0x17ab   : > { %8593 = vmatpush1.bf16.msra.mxu0 %v12308_v36  ;;  %8395 = vmatprep.subr.bf16.mxu1 %v12379_v61  ;;  %v4247_v36 = vld [vmem:[%s19008_s6 + $0x758] sm:$0xff]  ;;  %v12435_v26 = vcombine.high %v4310_v29, %v4314_v30 }
0x17ac   : > { %8594 = vmatprep.subr.bf16.mxu0 %v12317_v31  ;;  %v4251_v61 = vld [vmem:[%s19008_s6 + $0x778] sm:$0xff]  ;;  %v12426_v31 = vcombine.low %v4302_v60, %v4306_v50 }
0x17ad   : > { %v12373_v27 = vcombine.high %v4247_v36, %v4251_v61  ;;  %v12372_v57 = vcombine.low %v4247_v36, %v4251_v61  ;;  %v4370_v36 = vld [vmem:[%s19008_s6 + $0xb30] sm:$0xff]  ;;  %v4303_v61 = vld [vmem:[%s19008_s6 + $0x918] sm:$0xff] }
0x17ae   : > { %8396 = vmatpush1.bf16.msra.mxu1 %v12378_v33  ;;  %v4322_v33 = vld [vmem:[%s19008_s6 + $0x9b0] sm:$0xff] }
0x17af   : > { %8595 = vmatpush1.bf16.msra.mxu0 %v12316_v34  ;;  %8397 = vmatprep.subr.bf16.mxu1 %v12387_v9  ;;  %v4255_v34 = vld [vmem:[%s19008_s6 + $0x798] sm:$0xff]  ;;  %v12443_v37 = vcombine.high %v4318_v28, %v4322_v33 }
0x17b0   : > { %8596 = vmatprep.subr.bf16.mxu0 %v12325_v10  ;;  %v4259_v9 = vld [vmem:[%s19008_s6 + $0x7b8] sm:$0xff]  ;;  %v12434_v10 = vcombine.low %v4310_v29, %v4314_v30  ;;  %v4366_v30 = vld [vmem:[%s19008_s6 + $0xb10] sm:$0xff] }
0x17b1   : > { %v12381_v38 = vcombine.high %v4255_v34, %v4259_v9  ;;  %v12380_v35 = vcombine.low %v4255_v34, %v4259_v9  ;;  %v4378_v34 = vld [vmem:[%s19008_s6 + $0xb70] sm:$0xff]  ;;  %v4311_v9 = vld [vmem:[%s19008_s6 + $0x958] sm:$0xff] }
0x17b2   : > { %8398 = vmatpush1.bf16.msra.mxu1 %v12386_v40  ;;  %v4330_v40 = vld [vmem:[%s19008_s6 + $0x9f0] sm:$0xff] }
0x17b3   : > { %8597 = vmatpush1.bf16.msra.mxu0 %v12324_v48  ;;  %8410 = vmatprep.subr.bf16.mxu1 %v12395_v49  ;;  %v4263_v48 = vld [vmem:[%s19008_s6 + $0x7d8] sm:$0xff]  ;;  %v12451_v16 = vcombine.high %v4326_v39, %v4330_v40 }
0x17b4   : > { %8598 = vmatprep.subr.bf16.mxu0 %v12333_v54  ;;  %v4267_v49 = vld [vmem:[%s19008_s6 + $0x7f8] sm:$0xff]  ;;  %v12442_v54 = vcombine.low %v4318_v28, %v4322_v33  ;;  %v4374_v33 = vld [vmem:[%s19008_s6 + $0xb50] sm:$0xff] }
0x17b5   : > { %8400 = vmatmul.mubr.bf16.vlgmr.msra.gmra.mrb[44].mxu1 %v15427_v19  ;;  %v12389_v17 = vcombine.high %v4263_v48, %v4267_v49  ;;  %v12388_v18 = vcombine.low %v4263_v48, %v4267_v49  ;;  %v4386_v48 = vld [vmem:[%s19008_s6 + $0xbb0] sm:$0xff]  ;;  %v4319_v49 = vld [vmem:[%s19008_s6 + $0x998] sm:$0xff] }
0x17b6   : > { %8411 = vmatpush1.bf16.msra.mxu1 %v12394_v53  ;;  %8442 = vmatprep.mubr.bf16.mxu1 %v15740_v14  ;;  %v4338_v53 = vld [vmem:[%s19008_s6 + $0xa30] sm:$0xff] }
0x17b7   : > { %8599 = vmatpush1.bf16.msra.mxu0 %v12332_v44  ;;  %8412 = vmatprep.subr.bf16.mxu1 %v12403_v45  ;;  %v4271_v44 = vld [vmem:[%s19008_s6 + $0x818] sm:$0xff]  ;;  %v12459_v46 = vcombine.high %v4334_v52, %v4338_v53 }
0x17b8   : > { %8600 = vmatprep.subr.bf16.mxu0 %v12341_v62  ;;  %v4275_v45 = vld [vmem:[%s19008_s6 + $0x838] sm:$0xff]  ;;  %v12450_v62 = vcombine.low %v4326_v39, %v4330_v40  ;;  %v4382_v40 = vld [vmem:[%s19008_s6 + $0xb90] sm:$0xff] }
0x17b9   : > { %v12397_v47 = vcombine.high %v4271_v44, %v4275_v45  ;;  %v12396_v4 = vcombine.low %v4271_v44, %v4275_v45  ;;  %v4394_v44 = vld [vmem:[%s19008_s6 + $0xbf0] sm:$0xff]  ;;  %v4327_v45 = vld [vmem:[%s19008_s6 + $0x9d8] sm:$0xff] }
0x17ba   : > { %8413 = vmatpush1.bf16.msra.mxu1 %v12402_v0  ;;  %v4346_v0 = vld [vmem:[%s19008_s6 + $0xa70] sm:$0xff] }
0x17bb   : > { %8601 = vmatpush1.bf16.msra.mxu0 %v12340_v1  ;;  %8414 = vmatprep.subr.bf16.mxu1 %v12411_v2  ;;  %v4279_v1 = vld [vmem:[%s19008_s6 + $0x858] sm:$0xff]  ;;  %v12467_v7 = vcombine.high %v4342_v63, %v4346_v0 }
0x17bc   : > { %8602 = vmatprep.subr.bf16.mxu0 %v12349_v3  ;;  %v4283_v2 = vld [vmem:[%s19008_s6 + $0x878] sm:$0xff]  ;;  %v12458_v3 = vcombine.low %v4334_v52, %v4338_v53  ;;  %v4390_v53 = vld [vmem:[%s19008_s6 + $0xbd0] sm:$0xff] }
0x17bd   : > { %v12405_v8 = vcombine.high %v4279_v1, %v4283_v2  ;;  %v12404_v60 = vcombine.low %v4279_v1, %v4283_v2  ;;  %v4402_v1 = vld [vmem:[%s19008_s6 + $0xc30] sm:$0xff]  ;;  %v4335_v2 = vld [vmem:[%s19008_s6 + $0xa18] sm:$0xff] }
0x17be   : > { %8415 = vmatpush1.bf16.msra.mxu1 %v12410_v12  ;;  %v4354_v12 = vld [vmem:[%s19008_s6 + $0xab0] sm:$0xff] }
0x17bf   : > { %8603 = vmatpush1.bf16.msra.mxu0 %v12348_v13  ;;  %8416 = vmatprep.subr.bf16.mxu1 %v12419_v55  ;;  %v4287_v13 = vld [vmem:[%s19008_s6 + $0x898] sm:$0xff]  ;;  %v12475_v50 = vcombine.high %v4350_v11, %v4354_v12 }
0x17c0   : > { %8604 = vmatprep.subr.bf16.mxu0 %v12357_v59  ;;  %v4291_v55 = vld [vmem:[%s19008_s6 + $0x8b8] sm:$0xff]  ;;  %v12466_v59 = vcombine.low %v4342_v63, %v4346_v0  ;;  %v4398_v0 = vld [vmem:[%s19008_s6 + $0xc10] sm:$0xff] }
0x17c1   : > { %v12413_v41 = vcombine.high %v4287_v13, %v4291_v55 }
0x17c2   : > { %8417 = vmatpush1.bf16.msra.mxu1 %v12418_v22  ;;  %v4362_v22 = vld [vmem:[%s19008_s6 + $0xaf0] sm:$0xff] }
0x17c3   : > { %8605 = vmatpush1.bf16.msra.mxu0 %v12356_v42  ;;  %8418 = vmatprep.subr.bf16.mxu1 %v12427_v43  ;;  %v12474_v42 = vcombine.low %v4350_v11, %v4354_v12  ;;  %v12412_v43 = vcombine.low %v4287_v13, %v4291_v55  ;;  %v4406_v12 = vld [vmem:[%s19008_s6 + $0xc50] sm:$0xff]  ;;  %v4343_v55 = vld [vmem:[%s19008_s6 + $0xa58] sm:$0xff] }
0x17c4   : > { %8606 = vmatprep.subr.bf16.mxu0 %v12365_v24  ;;  %v12483_v24 = vcombine.high %v4358_v21, %v4362_v22  ;;  %v4410_v13 = vld [vmem:[%s19008_s6 + $0xc70] sm:$0xff] }
0x17c6   : > { %8419 = vmatpush1.bf16.msra.mxu1 %v12426_v31  ;;  %v4307_v31 = vld [vmem:[%s19008_s6 + $0x938] sm:$0xff] }
0x17c7   : > { %8607 = vmatpush1.bf16.msra.mxu0 %v12364_v25  ;;  %8420 = vmatprep.subr.bf16.mxu1 %v12435_v26  ;;  %v12482_v25 = vcombine.low %v4358_v21, %v4362_v22  ;;  %v12429_v28 = vcombine.high %v4303_v61, %v4307_v31  ;;  %v4414_v22 = vld [vmem:[%s19008_s6 + $0xc90] sm:$0xff] }
0x17c8   : > { %8608 = vmatprep.subr.bf16.mxu0 %v12373_v27  ;;  %v12491_v27 = vcombine.high %v4366_v30, %v4370_v36 }
0x17ca   : > { %8421 = vmatpush1.bf16.msra.mxu1 %v12434_v10  ;;  %v4315_v10 = vld [vmem:[%s19008_s6 + $0x978] sm:$0xff] }
0x17cb   : > { %8609 = vmatpush1.bf16.msra.mxu0 %v12372_v57  ;;  %8422 = vmatprep.subr.bf16.mxu1 %v12443_v37  ;;  %v12490_v57 = vcombine.low %v4366_v30, %v4370_v36  ;;  %v12428_v37 = vcombine.low %v4303_v61, %v4307_v31  ;;  %v12437_v39 = vcombine.high %v4311_v9, %v4315_v10  ;;  %v4422_v36 = vld [vmem:[%s19008_s6 + $0xcd0] sm:$0xff]  ;;  %v4359_v31 = vld [vmem:[%s19008_s6 + $0xad8] sm:$0xff] }
0x17cc   : > { %8610 = vmatprep.subr.bf16.mxu0 %v12381_v38  ;;  %v12499_v38 = vcombine.high %v4374_v33, %v4378_v34  ;;  %v4426_v61 = vld [vmem:[%s19008_s6 + $0xcf0] sm:$0xff] }
0x17ce   : > { %8423 = vmatpush1.bf16.msra.mxu1 %v12442_v54  ;;  %v4323_v54 = vld [vmem:[%s19008_s6 + $0x9b8] sm:$0xff] }
0x17cf   : > { %8611 = vmatpush1.bf16.msra.mxu0 %v12380_v35  ;;  %8424 = vmatprep.subr.bf16.mxu1 %v12451_v16  ;;  %v12498_v35 = vcombine.low %v4374_v33, %v4378_v34  ;;  %v12436_v16 = vcombine.low %v4311_v9, %v4315_v10  ;;  %v12445_v52 = vcombine.high %v4319_v49, %v4323_v54  ;;  %v4430_v34 = vld [vmem:[%s19008_s6 + $0xd10] sm:$0xff]  ;;  %v4367_v10 = vld [vmem:[%s19008_s6 + $0xb18] sm:$0xff] }
0x17d0   : > { %8612 = vmatprep.subr.bf16.mxu0 %v12389_v17  ;;  %v12507_v17 = vcombine.high %v4382_v40, %v4386_v48  ;;  %v4434_v9 = vld [vmem:[%s19008_s6 + $0xd30] sm:$0xff] }
0x17d2   : > { %8425 = vmatpush1.bf16.msra.mxu1 %v12450_v62  ;;  %v4331_v62 = vld [vmem:[%s19008_s6 + $0x9f8] sm:$0xff] }
0x17d3   : > { %8613 = vmatpush1.bf16.msra.mxu0 %v12388_v18  ;;  %8426 = vmatprep.subr.bf16.mxu1 %v12459_v46  ;;  %v12506_v18 = vcombine.low %v4382_v40, %v4386_v48  ;;  %v12444_v46 = vcombine.low %v4319_v49, %v4323_v54  ;;  %v12453_v63 = vcombine.high %v4327_v45, %v4331_v62  ;;  %v4438_v48 = vld [vmem:[%s19008_s6 + $0xd50] sm:$0xff]  ;;  %v4375_v54 = vld [vmem:[%s19008_s6 + $0xb58] sm:$0xff] }
0x17d4   : > { %8625 = vmatprep.subr.bf16.mxu0 %v12397_v47  ;;  %v12515_v47 = vcombine.high %v4390_v53, %v4394_v44  ;;  %v4442_v49 = vld [vmem:[%s19008_s6 + $0xd70] sm:$0xff] }
0x17d6   : > { %8615 = vmatmul.mubr.bf16.vlgmr.msra.gmra.mrb[60].mxu0 %v15427_v19  ;;  %8427 = vmatpush1.bf16.msra.mxu1 %v12458_v3  ;;  %v4295_v19 = vld [vmem:[%s19008_s6 + $0x8d8] sm:$0xff] }
0x17d7   : > { %8626 = vmatpush1.bf16.msra.mxu0 %v12396_v4  ;;  %8657 = vmatprep.mubr.bf16.mxu0 %v15740_v14  ;;  %v4299_v14 = vld [vmem:[%s19008_s6 + $0x8f8] sm:$0xff]  ;;  %v12514_v4 = vcombine.low %v4390_v53, %v4394_v44  ;;  %v12563_v53 = vcombine.high %v4438_v48, %v4442_v49 }
0x17d8   : > { %8428 = vmatprep.subr.bf16.mxu1 %v12467_v7  ;;  %8627 = vmatprep.subr.bf16.mxu0 %v12405_v8  ;;  %v12421_v29 = vcombine.high %v4295_v19, %v4299_v14  ;;  %v12420_v26 = vcombine.low %v4295_v19, %v4299_v14  ;;  %v4339_v3 = vld [vmem:[%s19008_s6 + $0xa38] sm:$0xff]  ;;  %v12452_v7 = vcombine.low %v4327_v45, %v4331_v62  ;;  %v4418_v19 = vld [vmem:[%s19008_s6 + $0xcb0] sm:$0xff] }
0x17d9   : > { %v12523_v8 = vcombine.high %v4398_v0, %v4402_v1  ;;  %v12461_v11 = vcombine.high %v4335_v2, %v4339_v3  ;;  %v4351_v14 = vld [vmem:[%s19008_s6 + $0xa98] sm:$0xff]  ;;  %v4446_v45 = vld [vmem:[%s19008_s6 + $0xd90] sm:$0xff] }
0x17da   : > { %8429 = vmatpush1.bf16.msra.mxu1 %v12466_v59  ;;  %v4347_v59 = vld [vmem:[%s19008_s6 + $0xa78] sm:$0xff]  ;;  %v4450_v62 = vld [vmem:[%s19008_s6 + $0xdb0] sm:$0xff] }
0x17db   : > { %8628 = vmatpush1.bf16.msra.mxu0 %v12404_v60  ;;  %8430 = vmatprep.subr.bf16.mxu1 %v12475_v50  ;;  %v12522_v60 = vcombine.low %v4398_v0, %v4402_v1  ;;  %v12460_v50 = vcombine.low %v4335_v2, %v4339_v3  ;;  %v12469_v21 = vcombine.high %v4343_v55, %v4347_v59 }
0x17dc   : > { %8629 = vmatprep.subr.bf16.mxu0 %v12413_v41  ;;  %v12531_v41 = vcombine.high %v4406_v12, %v4410_v13  ;;  %v12562_v0 = vcombine.low %v4438_v48, %v4442_v49  ;;  %v12571_v2 = vcombine.high %v4446_v45, %v4450_v62  ;;  %v4407_v48 = vld [vmem:[%s19008_s6 + $0xc58] sm:$0xff] }
0x17dd   : > { %v4411_v49 = vld [vmem:[%s19008_s6 + $0xc78] sm:$0xff] }
0x17de   : > { %8431 = vmatpush1.bf16.msra.mxu1 %v12474_v42  ;;  %v4355_v42 = vld [vmem:[%s19008_s6 + $0xab8] sm:$0xff] }
0x17df   : > { %8630 = vmatpush1.bf16.msra.mxu0 %v12412_v43  ;;  %8432 = vmatprep.subr.bf16.mxu1 %v12483_v24  ;;  %v12530_v43 = vcombine.low %v4406_v12, %v4410_v13  ;;  %v12468_v24 = vcombine.low %v4343_v55, %v4347_v59  ;;  %v12477_v30 = vcombine.high %v4351_v14, %v4355_v42  ;;  %v4391_v13 = vld [vmem:[%s19008_s6 + $0xbd8] sm:$0xff] }
0x17e0   : > { %8631 = vmatprep.subr.bf16.mxu0 %v12421_v29  ;;  %v12539_v29 = vcombine.high %v4414_v22, %v4418_v19  ;;  %v4395_v55 = vld [vmem:[%s19008_s6 + $0xbf8] sm:$0xff] }
0x17e2   : > { %8433 = vmatpush1.bf16.msra.mxu1 %v12482_v25  ;;  %v4363_v25 = vld [vmem:[%s19008_s6 + $0xaf8] sm:$0xff] }
0x17e3   : > { %8632 = vmatpush1.bf16.msra.mxu0 %v12420_v26  ;;  %8434 = vmatprep.subr.bf16.mxu1 %v12491_v27  ;;  %v12538_v26 = vcombine.low %v4414_v22, %v4418_v19  ;;  %v12476_v27 = vcombine.low %v4351_v14, %v4355_v42  ;;  %v12485_v33 = vcombine.high %v4359_v31, %v4363_v25 }
0x17e4   : > { %8633 = vmatprep.subr.bf16.mxu0 %v12429_v28  ;;  %v12547_v28 = vcombine.high %v4422_v36, %v4426_v61 }
0x17e6   : > { %8435 = vmatpush1.bf16.msra.mxu1 %v12490_v57  ;;  %v4371_v57 = vld [vmem:[%s19008_s6 + $0xb38] sm:$0xff] }
0x17e7   : > { %8634 = vmatpush1.bf16.msra.mxu0 %v12428_v37  ;;  %8436 = vmatprep.subr.bf16.mxu1 %v12499_v38  ;;  %v12546_v37 = vcombine.low %v4422_v36, %v4426_v61  ;;  %v12484_v38 = vcombine.low %v4359_v31, %v4363_v25  ;;  %v12493_v40 = vcombine.high %v4367_v10, %v4371_v57  ;;  %v4399_v61 = vld [vmem:[%s19008_s6 + $0xc18] sm:$0xff] }
0x17e8   : > { %8635 = vmatprep.subr.bf16.mxu0 %v12437_v39  ;;  %v12555_v39 = vcombine.high %v4430_v34, %v4434_v9  ;;  %v4403_v31 = vld [vmem:[%s19008_s6 + $0xc38] sm:$0xff] }
0x17ea   : > { %8437 = vmatpush1.bf16.msra.mxu1 %v12498_v35  ;;  %v4379_v35 = vld [vmem:[%s19008_s6 + $0xb78] sm:$0xff] }
0x17eb   : > { %8636 = vmatpush1.bf16.msra.mxu0 %v12436_v16  ;;  %8438 = vmatprep.subr.bf16.mxu1 %v12507_v17  ;;  %v12554_v16 = vcombine.low %v4430_v34, %v4434_v9  ;;  %v17491_v17 = vld [vmem:[%s19009_s7] sm:$0xff]  ;;  %v12501_v44 = vcombine.high %v4375_v54, %v4379_v35  ;;  %v12500_v1 = vcombine.low %v4375_v54, %v4379_v35 }
0x17ec   : > { %8637 = vmatprep.subr.bf16.mxu0 %v12445_v52  ;;  %v12492_v52 = vcombine.low %v4367_v10, %v4371_v57  ;;  %v12524_v35 = vcombine.low %v4399_v61, %v4403_v31 }
0x17ee   : > { %8439 = vmatpush1.bf16.msra.mxu1 %v12506_v18  ;;  %v4657_v18 = vrot.slane %v17491_v17, %v14813_v5 }
0x17ef   : > { %8638 = vmatpush1.bf16.msra.mxu0 %v12444_v46  ;;  %8440 = vmatprep.subr.bf16.mxu1 %v12515_v47  ;;  %v4383_v46 = vld [vmem:[%s19008_s6 + $0xb98] sm:$0xff] }
0x17f0   : > { %8639 = vmatprep.subr.bf16.mxu0 %v12453_v63  ;;  %v4387_v47 = vld [vmem:[%s19008_s6 + $0xbb8] sm:$0xff]  ;;  %v4661_v63 = vrot.slane %v17491_v17, %v14816_v6 }
0x17f1   : > { %v12508_v19 = vcombine.low %v4383_v46, %v4387_v47 }
0x17f2   : > { %8441 = vmatpush1.bf16.msra.mxu1 %v12514_v4  ;;  %v12509_v4 = vcombine.high %v4383_v46, %v4387_v47  ;;  %v12532_v46 = vcombine.low %v4407_v48, %v4411_v49 }
0x17f3   : > { %8640 = vmatpush1.bf16.msra.mxu0 %v12452_v7  ;;  %8453 = vmatprep.subr.bf16.mxu1 %v12523_v8  ;;  %v4454_v7 = vld [vmem:[%s19008_s6 + $0xdd0] sm:$0xff] }
0x17f4   : > { %8641 = vmatprep.subr.bf16.mxu0 %v12461_v11  ;;  %v4458_v8 = vld [vmem:[%s19008_s6 + $0xdf0] sm:$0xff] }
0x17f5   : > { %8443 = vmatmul.mubr.bf16.vlgmr.msra.gmra.mrb[44].mxu1 %v15744_v15  ;;  %v12579_v14 = vcombine.high %v4454_v7, %v4458_v8 }
0x17f6   : > { %8454 = vmatpush1.bf16.msra.mxu1 %v12522_v60  ;;  %8485 = vmatprep.mubr.bf16.mxu1 %v16641_v23 }
0x17f7   : > { %8642 = vmatpush1.bf16.msra.mxu0 %v12460_v50  ;;  %8455 = vmatprep.subr.bf16.mxu1 %v12531_v41  ;;  %v12570_v50 = vcombine.low %v4446_v45, %v4450_v62  ;;  %v4415_v45 = vld [vmem:[%s19008_s6 + $0xc98] sm:$0xff] }
0x17f8   : > { %8643 = vmatprep.subr.bf16.mxu0 %v12469_v21  ;;  %v4419_v62 = vld [vmem:[%s19008_s6 + $0xcb8] sm:$0xff] }
0x17fa   : > { %8456 = vmatpush1.bf16.msra.mxu1 %v12530_v43 }
0x17fb   : > { %8644 = vmatpush1.bf16.msra.mxu0 %v12468_v24  ;;  %8457 = vmatprep.subr.bf16.mxu1 %v12539_v29  ;;  %v12517_v24 = vcombine.high %v4391_v13, %v4395_v55  ;;  %v4462_v29 = vld [vmem:[%s19008_s6 + $0xe10] sm:$0xff] }
0x17fc   : > { %8645 = vmatprep.subr.bf16.mxu0 %v12477_v30  ;;  %v4466_v30 = vld [vmem:[%s19008_s6 + $0xe30] sm:$0xff] }
0x17fd   : > { %v12587_v34 = vcombine.high %v4462_v29, %v4466_v30  ;;  %v12586_v54 = vcombine.low %v4462_v29, %v4466_v30  ;;  %v4510_v30 = vld [vmem:[%s19008_s6 + $0xf90] sm:$0xff] }
0x17fe   : > { %8458 = vmatpush1.bf16.msra.mxu1 %v12538_v26  ;;  %v12578_v26 = vcombine.low %v4454_v7, %v4458_v8  ;;  %v4494_v8 = vld [vmem:[%s19008_s6 + $0xf10] sm:$0xff] }
0x17ff   : > { %8646 = vmatpush1.bf16.msra.mxu0 %v12476_v27  ;;  %8459 = vmatprep.subr.bf16.mxu1 %v12547_v28  ;;  %v12516_v27 = vcombine.low %v4391_v13, %v4395_v55  ;;  %v4435_v13 = vld [vmem:[%s19008_s6 + $0xd38] sm:$0xff] }
0x1800   : > { %8647 = vmatprep.subr.bf16.mxu0 %v12485_v33 }
0x1802   : > { %8460 = vmatpush1.bf16.msra.mxu1 %v12546_v37  ;;  %v12525_v37 = vcombine.high %v4399_v61, %v4403_v31  ;;  %v4665_v61 = vrot.slane %v17491_v17, %v14809_v58  ;;  %v4447_v31 = vld [vmem:[%s19008_s6 + $0xd98] sm:$0xff] }
0x1803   : > { %8648 = vmatpush1.bf16.msra.mxu0 %v12484_v38  ;;  %8461 = vmatprep.subr.bf16.mxu1 %v12555_v39  ;;  %v4470_v38 = vld [vmem:[%s19008_s6 + $0xe50] sm:$0xff] }
0x1804   : > { %8649 = vmatprep.subr.bf16.mxu0 %v12493_v40  ;;  %v4474_v40 = vld [vmem:[%s19008_s6 + $0xe70] sm:$0xff] }
0x1806   : > { %8462 = vmatpush1.bf16.msra.mxu1 %v12554_v16  ;;  %v12595_v16 = vcombine.high %v4470_v38, %v4474_v40 }
0x1807   : > { %8650 = vmatpush1.bf16.msra.mxu0 %v12492_v52  ;;  %8463 = vmatprep.subr.bf16.mxu1 %v12563_v53  ;;  %v12533_v52 = vcombine.high %v4407_v48, %v4411_v49  ;;  %v4478_v53 = vld [vmem:[%s19008_s6 + $0xe90] sm:$0xff]  ;;  %v4459_v48 = vld [vmem:[%s19008_s6 + $0xdf8] sm:$0xff] }
0x1808   : > { %v8100_v3 = vpop.f32.mrb[40].mxu1  ;;  %8651 = vmatprep.subr.bf16.mxu0 %v12501_v44  ;;  %v4482_v44 = vld [vmem:[%s19008_s6 + $0xeb0] sm:$0xff] }
0x1809   : > { %v13289_v11 = vadd.f32 %v8100_v3, %v4657_v18  ;;  %v8102_v12 = vpop.f32.mrb[41].mxu1  ;;  %v12603_v47 = vcombine.high %v4478_v53, %v4482_v44  ;;  %v12540_v3 = vcombine.low %v4415_v45, %v4419_v62 }
0x180a   : > { %v13290_v59 = vadd.f32 %v8102_v12, %v4661_v63  ;;  %v8104_v60 = vpop.f32.mrb[42].mxu1  ;;  %8464 = vmatpush1.bf16.msra.mxu1 %v12562_v0  ;;  %v4486_v0 = vld [vmem:[%s19008_s6 + $0xed0] sm:$0xff]  ;;  %v4431_v12 = vld [vmem:[%s19008_s6 + $0xd18] sm:$0xff] }
0x180b   : > { %v8770_v41 = vmul.f32 0.2, %v13289_v11  ;;  %v13291_v21 = vadd.f32 %v8104_v60, %v4657_v18  ;;  %8652 = vmatpush1.bf16.msra.mxu0 %v12500_v1  ;;  %v8106_v22 = vpop.f32.mrb[43].mxu1  ;;  %8465 = vmatprep.subr.bf16.mxu1 %v12571_v2  ;;  %vm8754_vm2 = vcmp.ge.f32.partialorder %v13289_v11, 0.0  ;;  %v12594_v18 = vcombine.low %v4470_v38, %v4474_v40  ;;  %v4490_v1 = vld [vmem:[%s19008_s6 + $0xef0] sm:$0xff] }
0x180c   : > { %v8771_v42 = vmul.f32 0.2, %v13290_v59  ;;  %v13292_v43 = vadd.f32 %v8106_v22, %v4661_v63  ;;  %8653 = vmatprep.subr.bf16.mxu0 %v12509_v4  ;;  %vm8755_vm3 = vcmp.ge.f32.partialorder %v13290_v59, 0.0  ;;  %v12541_v63 = vcombine.high %v4415_v45, %v4419_v62  ;;  %v4439_v22 = vld [vmem:[%s19008_s6 + $0xd58] sm:$0xff] }
0x180d   : > { %vm8762_vm4 = vcmp.ge.f32.partialorder %v13291_v21, 0.0  ;;  %v8778_v36 = vmul.f32 0.2, %v13291_v21  ;;  %v8786_v28 = vsel %vm8754_vm2, %v13289_v11, %v8770_v41  ;;  %v12602_v2 = vcombine.low %v4478_v53, %v4482_v44  ;;  %v4498_v11 = vld [vmem:[%s19008_s6 + $0xf30] sm:$0xff] }
0x180e   : > { %vm8763_vm5 = vcmp.ge.f32.partialorder %v13292_v43, 0.0  ;;  %v8779_v25 = vmul.f32 0.2, %v13292_v43  ;;  %8466 = vmatpush1.bf16.msra.mxu1 %v12570_v50  ;;  %v8787_v9 = vsel %vm8755_vm3, %v13290_v59, %v8771_v42  ;;  %v12611_v4 = vcombine.high %v4486_v0, %v4490_v1  ;;  %v4502_v41 = vld [vmem:[%s19008_s6 + $0xf50] sm:$0xff] }
0x180f   : > { %v8794_v33 = vsel %vm8762_vm4, %v13291_v21, %v8778_v36  ;;  %8654 = vmatpush1.bf16.msra.mxu0 %v12508_v19  ;;  %8467 = vmatprep.subr.bf16.mxu1 %v12579_v14  ;;  %v12610_v55 = vcombine.low %v4486_v0, %v4490_v1  ;;  %v12619_v60 = vcombine.high %v4494_v8, %v4498_v11  ;;  %v4506_v21 = vld [vmem:[%s19008_s6 + $0xf70] sm:$0xff]  ;;  %v4443_v19 = vld [vmem:[%s19008_s6 + $0xd78] sm:$0xff]  ;;  %v4668_v42 = vsub.s32 3, %v14803_v56 }
0x1810   : > { %v17534_v10 = vmax.f32 %v8786_v28, %v8794_v33  ;;  %v8795_v57 = vsel %vm8763_vm5, %v13292_v43, %v8779_v25  ;;  %8655 = vmatprep.subr.bf16.mxu0 %v12517_v24  ;;  %v12557_v50 = vcombine.high %v4431_v12, %v4435_v13  ;;  %v12618_v14 = vcombine.low %v4494_v8, %v4498_v11  ;;  %v4514_v36 = vld [vmem:[%s19008_s6 + $0xfb0] sm:$0xff]  ;;  %v4451_v25 = vld [vmem:[%s19008_s6 + $0xdb8] sm:$0xff] }
0x1811   : > { %v17539_v39 = vmax.f32 %v8787_v9, %v8795_v57  ;;  %v12556_v43 = vcombine.low %v4431_v12, %v4435_v13  ;;  %v12627_v24 = vcombine.high %v4502_v41, %v4506_v21  ;;  %v12565_v29 = vcombine.high %v4439_v22, %v4443_v19  ;;  %v4518_v57 = vld [vmem:[%s19008_s6 + $0xfd0] sm:$0xff]  ;;  %v4463_v1 = vld [vmem:[%s19008_s6 + $0xe18] sm:$0xff] }
0x1812   : > { %8468 = vmatpush1.bf16.msra.mxu1 %v12578_v26  ;;  %v4669_v26 = vrot.slane %v17491_v17, %v4668_v42  ;;  %v12564_v28 = vcombine.low %v4439_v22, %v4443_v19  ;;  %v12635_v33 = vcombine.high %v4510_v30, %v4514_v36  ;;  %v12573_v9 = vcombine.high %v4447_v31, %v4451_v25  ;;  %v4455_v17 = vld [vmem:[%s19008_s6 + $0xdd8] sm:$0xff] }
0x1813   : > { %8656 = vmatpush1.bf16.msra.mxu0 %v12516_v27  ;;  %8469 = vmatprep.subr.bf16.mxu1 %v12587_v34  ;;  %v12626_v27 = vcombine.low %v4502_v41, %v4506_v21  ;;  %v12572_v44 = vcombine.low %v4447_v31, %v4451_v25  ;;  %v4471_v41 = vld [vmem:[%s19008_s6 + $0xe58] sm:$0xff] }
0x1814   : > { %8668 = vmatprep.subr.bf16.mxu0 %v12525_v37  ;;  %v4522_v37 = vld [vmem:[%s19008_s6 + $0xff0] sm:$0xff]  ;;  %v4475_v21 = vld [vmem:[%s19008_s6 + $0xe78] sm:$0xff] }
0x1815   : > { %v12643_v45 = vcombine.high %v4518_v57, %v4522_v37  ;;  %v12596_v31 = vcombine.low %v4471_v41, %v4475_v21 }
0x1816   : > { %8658 = vmatmul.mubr.bf16.vlgmr.msra.gmra.mrb[60].mxu0 %v15744_v15  ;;  %8470 = vmatpush1.bf16.msra.mxu1 %v12586_v54  ;;  %v4423_v15 = vld [vmem:[%s19008_s6 + $0xcd8] sm:$0xff] }
0x1817   : > { %8669 = vmatpush1.bf16.msra.mxu0 %v12524_v35  ;;  %8700 = vmatprep.mubr.bf16.mxu0 %v16641_v23  ;;  %v4427_v23 = vld [vmem:[%s19008_s6 + $0xcf8] sm:$0xff]  ;;  %v12634_v35 = vcombine.low %v4510_v30, %v4514_v36 }
0x1818   : > { %8471 = vmatprep.subr.bf16.mxu1 %v12595_v16  ;;  %8670 = vmatprep.subr.bf16.mxu0 %v12533_v52  ;;  %v12549_v7 = vcombine.high %v4423_v15, %v4427_v23  ;;  %v12548_v59 = vcombine.low %v4423_v15, %v4427_v23  ;;  %v4467_v15 = vld [vmem:[%s19008_s6 + $0xe38] sm:$0xff] }
0x1819   : > { %v12588_v19 = vcombine.low %v4463_v1, %v4467_v15  ;;  %v4479_v30 = vld [vmem:[%s19008_s6 + $0xe98] sm:$0xff] }
0x181a   : > { %8472 = vmatpush1.bf16.msra.mxu1 %v12594_v18  ;;  %v4483_v36 = vld [vmem:[%s19008_s6 + $0xeb8] sm:$0xff] }
0x181b   : > { %8671 = vmatpush1.bf16.msra.mxu0 %v12532_v46  ;;  %8473 = vmatprep.subr.bf16.mxu1 %v12603_v47  ;;  %v12581_v46 = vcombine.high %v4455_v17, %v4459_v48  ;;  %v4526_v47 = vld [vmem:[%s19008_s6 + $0x1010] sm:$0xff] }
0x181c   : > { %8672 = vmatprep.subr.bf16.mxu0 %v12541_v63  ;;  %v4530_v63 = vld [vmem:[%s19008_s6 + $0x1030] sm:$0xff] }
0x181d   : > { %v12651_v8 = vcombine.high %v4526_v47, %v4530_v63  ;;  %v12650_v22 = vcombine.low %v4526_v47, %v4530_v63 }
0x181e   : > { %8474 = vmatpush1.bf16.msra.mxu1 %v12602_v2  ;;  %v12642_v2 = vcombine.low %v4518_v57, %v4522_v37  ;;  %v12604_v57 = vcombine.low %v4479_v30, %v4483_v36 }
0x181f   : > { %8673 = vmatpush1.bf16.msra.mxu0 %v12540_v3  ;;  %8475 = vmatprep.subr.bf16.mxu1 %v12611_v4  ;;  %v12580_v3 = vcombine.low %v4455_v17, %v4459_v48  ;;  %v4562_v17 = vld [vmem:[%s19008_s6 + $0x1130] sm:$0xff]  ;;  %v4495_v48 = vld [vmem:[%s19008_s6 + $0xf18] sm:$0xff] }
0x1820   : > { %8674 = vmatprep.subr.bf16.mxu0 %v12549_v7 }
0x1822   : > { %8476 = vmatpush1.bf16.msra.mxu1 %v12610_v55  ;;  %v12589_v55 = vcombine.high %v4463_v1, %v4467_v15  ;;  %v4578_v1 = vld [vmem:[%s19008_s6 + $0x11b0] sm:$0xff]  ;;  %v4511_v15 = vld [vmem:[%s19008_s6 + $0xf98] sm:$0xff] }
0x1823   : > { %8675 = vmatpush1.bf16.msra.mxu0 %v12548_v59  ;;  %8477 = vmatprep.subr.bf16.mxu1 %v12619_v60  ;;  %v4534_v59 = vld [vmem:[%s19008_s6 + $0x1050] sm:$0xff] }
0x1824   : > { %8676 = vmatprep.subr.bf16.mxu0 %v12557_v50  ;;  %v4538_v60 = vld [vmem:[%s19008_s6 + $0x1070] sm:$0xff] }
0x1826   : > { %8478 = vmatpush1.bf16.msra.mxu1 %v12618_v14  ;;  %v12659_v14 = vcombine.high %v4534_v59, %v4538_v60 }
0x1827   : > { %8677 = vmatpush1.bf16.msra.mxu0 %v12556_v43  ;;  %8479 = vmatprep.subr.bf16.mxu1 %v12627_v24  ;;  %v12597_v43 = vcombine.high %v4471_v41, %v4475_v21  ;;  %v4542_v24 = vld [vmem:[%s19008_s6 + $0x1090] sm:$0xff] }
0x1828   : > { %v8315_v34 = vpop.f32.mrb[56].mxu0  ;;  %8678 = vmatprep.subr.bf16.mxu0 %v12565_v29  ;;  %v4546_v29 = vld [vmem:[%s19008_s6 + $0x10b0] sm:$0xff] }
0x1829   : > { %v13293_v38 = vadd.f32 %v8315_v34, %v4665_v61  ;;  %v8317_v40 = vpop.f32.mrb[57].mxu0  ;;  %v12667_v25 = vcombine.high %v4542_v24, %v4546_v29  ;;  %v4491_v34 = vld [vmem:[%s19008_s6 + $0xef8] sm:$0xff] }
0x182a   : > { %v13294_v49 = vadd.f32 %v8317_v40, %v4669_v26  ;;  %v8319_v54 = vpop.f32.mrb[58].mxu0  ;;  %8480 = vmatpush1.bf16.msra.mxu1 %v12626_v27  ;;  %v4550_v27 = vld [vmem:[%s19008_s6 + $0x10d0] sm:$0xff] }
0x182b   : > { %v8772_v16 = vmul.f32 0.2, %v13293_v38  ;;  %v13295_v52 = vadd.f32 %v8319_v54, %v4665_v61  ;;  %8679 = vmatpush1.bf16.msra.mxu0 %v12564_v28  ;;  %v8321_v53 = vpop.f32.mrb[59].mxu0  ;;  %8481 = vmatprep.subr.bf16.mxu1 %v12635_v33  ;;  %vm8756_vm6 = vcmp.ge.f32.partialorder %v13293_v38, 0.0  ;;  %v12658_v61 = vcombine.low %v4534_v59, %v4538_v60  ;;  %v4554_v28 = vld [vmem:[%s19008_s6 + $0x10f0] sm:$0xff]  ;;  %v4487_v33 = vld [vmem:[%s19008_s6 + $0xed8] sm:$0xff] }
0x182c   : > { %v8773_v62 = vmul.f32 0.2, %v13294_v49  ;;  %v13296_v18 = vadd.f32 %v8321_v53, %v4669_v26  ;;  %8680 = vmatprep.subr.bf16.mxu0 %v12573_v9  ;;  %vm8757_vm7 = vcmp.ge.f32.partialorder %v13294_v49, 0.0  ;;  %v12605_v26 = vcombine.high %v4479_v30, %v4483_v36  ;;  %v4558_v40 = vld [vmem:[%s19008_s6 + $0x1110] sm:$0xff] }
0x182d   : > { %vm8764_vm8 = vcmp.ge.f32.partialorder %v13295_v52, 0.0  ;;  %v8780_v0 = vmul.f32 0.2, %v13295_v52  ;;  %v8788_v4 = vsel %vm8756_vm6, %v13293_v38, %v8772_v16  ;;  %v12666_v9 = vcombine.low %v4542_v24, %v4546_v29  ;;  %v4566_v53 = vld [vmem:[%s19008_s6 + $0x1150] sm:$0xff] }
0x182e   : > { %vm8765_vm9 = vcmp.ge.f32.partialorder %v13296_v18, 0.0  ;;  %v8781_v23 = vmul.f32 0.2, %v13296_v18  ;;  %8482 = vmatpush1.bf16.msra.mxu1 %v12634_v35  ;;  %v8789_v11 = vsel %vm8757_vm7, %v13294_v49, %v8773_v62  ;;  %v12675_v37 = vcombine.high %v4550_v27, %v4554_v28  ;;  %v4499_v49 = vld [vmem:[%s19008_s6 + $0xf38] sm:$0xff] }
0x182f   : > { %v8796_v7 = vsel %vm8764_vm8, %v13295_v52, %v8780_v0  ;;  %8681 = vmatpush1.bf16.msra.mxu0 %v12572_v44  ;;  %8483 = vmatprep.subr.bf16.mxu1 %v12643_v45  ;;  %v12613_v38 = vcombine.high %v4487_v33, %v4491_v34  ;;  %v12674_v54 = vcombine.low %v4550_v27, %v4554_v28  ;;  %v4570_v44 = vld [vmem:[%s19008_s6 + $0x1170] sm:$0xff]  ;;  %v4503_v45 = vld [vmem:[%s19008_s6 + $0xf58] sm:$0xff] }
0x1830   : > { %v17643_v12 = vmax.f32 %v8788_v4, %v8796_v7  ;;  %v8797_v13 = vsel %vm8765_vm9, %v13296_v18, %v8781_v23  ;;  %8682 = vmatprep.subr.bf16.mxu0 %v12581_v46  ;;  %v12612_v35 = vcombine.low %v4487_v33, %v4491_v34  ;;  %v12683_v16 = vcombine.high %v4558_v40, %v4562_v17  ;;  %v4507_v62 = vld [vmem:[%s19008_s6 + $0xf78] sm:$0xff]  ;;  %v4574_v0 = vld [vmem:[%s19008_s6 + $0x1190] sm:$0xff] }
0x1831   : > { %v17651_v50 = vmax.f32 %v8789_v11, %v8797_v13  ;;  %v12621_v52 = vcombine.high %v4495_v48, %v4499_v49  ;;  %v12682_v18 = vcombine.low %v4558_v40, %v4562_v17  ;;  %v12620_v46 = vcombine.low %v4495_v48, %v4499_v49  ;;  %v4515_v23 = vld [vmem:[%s19008_s6 + $0xfb8] sm:$0xff]  ;;  %v4586_v11 = vld [vmem:[%s19008_s6 + $0x11f0] sm:$0xff] }
0x1832   : > { %8484 = vmatpush1.bf16.msra.mxu1 %v12642_v2  ;;  %v12691_v47 = vcombine.high %v4566_v53, %v4570_v44  ;;  %v12629_v63 = vcombine.high %v4503_v45, %v4507_v62  ;;  %v12690_v2 = vcombine.low %v4566_v53, %v4570_v44  ;;  %v12699_v4 = vcombine.high %v4574_v0, %v4578_v1  ;;  %v4519_v13 = vld [vmem:[%s19008_s6 + $0xfd8] sm:$0xff] }
0x1833   : > { %8683 = vmatpush1.bf16.msra.mxu0 %v12580_v3  ;;  %8496 = vmatprep.subr.bf16.mxu1 %v12651_v8  ;;  %v12628_v3 = vcombine.low %v4503_v45, %v4507_v62  ;;  %v12637_v7 = vcombine.high %v4511_v15, %v4515_v23  ;;  %v4582_v8 = vld [vmem:[%s19008_s6 + $0x11d0] sm:$0xff]  ;;  %v12698_v59 = vcombine.low %v4574_v0, %v4578_v1  ;;  %v8810_v45 = vrot.slane %v17539_v39, 4 }
0x1834   : > { %8684 = vmatprep.subr.bf16.mxu0 %v12589_v55  ;;  %v4523_v55 = vld [vmem:[%s19008_s6 + $0xff8] sm:$0xff]  ;;  %v12636_v60 = vcombine.low %v4511_v15, %v4515_v23  ;;  %v12707_v41 = vcombine.high %v4582_v8, %v4586_v11  ;;  %v12706_v24 = vcombine.low %v4582_v8, %v4586_v11 }
0x1835   : > { %8486 = vmatmul.mubr.bf16.vlgmr.msra.gmra.mrb[44].mxu1 %v16637_v20  ;;  %v12645_v21 = vcombine.high %v4519_v13, %v4523_v55  ;;  %v12644_v29 = vcombine.low %v4519_v13, %v4523_v55  ;;  %v8811_v15 = vmax.f32 %v17539_v39, %v8810_v45  ;;  %v4638_v55 = vld [vmem:[%s19008_s6 + $0x1390] sm:$0xff] }
0x1836   : > { %8497 = vmatpush1.bf16.msra.mxu1 %v12650_v22  ;;  %8528 = vmatprep.mubr.bf16.mxu1 %v16657_v32  ;;  %v4590_v22 = vld [vmem:[%s19008_s6 + $0x1210] sm:$0xff] }
0x1837   : > { %8685 = vmatpush1.bf16.msra.mxu0 %v12588_v19  ;;  %8498 = vmatprep.subr.bf16.mxu1 %v12659_v14  ;;  %v4594_v19 = vld [vmem:[%s19008_s6 + $0x1230] sm:$0xff]  ;;  %v4527_v14 = vld [vmem:[%s19008_s6 + $0x1018] sm:$0xff] }
0x1838   : > { %8686 = vmatprep.subr.bf16.mxu0 %v12597_v43  ;;  %v4531_v43 = vld [vmem:[%s19008_s6 + $0x1038] sm:$0xff]  ;;  %v12715_v30 = vcombine.high %v4590_v22, %v4594_v19  ;;  %v12714_v27 = vcombine.low %v4590_v22, %v4594_v19 }
0x1839   : > { %v12653_v36 = vcombine.high %v4527_v14, %v4531_v43  ;;  %v12652_v28 = vcombine.low %v4527_v14, %v4531_v43 }
0x183a   : > { %8499 = vmatpush1.bf16.msra.mxu1 %v12658_v61  ;;  %v4598_v61 = vld [vmem:[%s19008_s6 + $0x1250] sm:$0xff] }
0x183b   : > { %8687 = vmatpush1.bf16.msra.mxu0 %v12596_v31  ;;  %8500 = vmatprep.subr.bf16.mxu1 %v12667_v25  ;;  %v4602_v31 = vld [vmem:[%s19008_s6 + $0x1270] sm:$0xff]  ;;  %v4535_v25 = vld [vmem:[%s19008_s6 + $0x1058] sm:$0xff] }
0x183c   : > { %8688 = vmatprep.subr.bf16.mxu0 %v12605_v26  ;;  %v4539_v26 = vld [vmem:[%s19008_s6 + $0x1078] sm:$0xff]  ;;  %v12723_v33 = vcombine.high %v4598_v61, %v4602_v31  ;;  %v12722_v40 = vcombine.low %v4598_v61, %v4602_v31 }
0x183d   : > { %v12661_v34 = vcombine.high %v4535_v25, %v4539_v26  ;;  %v12660_v17 = vcombine.low %v4535_v25, %v4539_v26  ;;  %v4587_v61 = vld [vmem:[%s19008_s6 + $0x11f8] sm:$0xff] }
0x183e   : > { %8501 = vmatpush1.bf16.msra.mxu1 %v12666_v9  ;;  %v4606_v9 = vld [vmem:[%s19008_s6 + $0x1290] sm:$0xff] }
0x183f   : > { %8689 = vmatpush1.bf16.msra.mxu0 %v12604_v57  ;;  %8502 = vmatprep.subr.bf16.mxu1 %v12675_v37  ;;  %v4610_v57 = vld [vmem:[%s19008_s6 + $0x12b0] sm:$0xff]  ;;  %v4543_v37 = vld [vmem:[%s19008_s6 + $0x1098] sm:$0xff] }
0x1840   : > { %8690 = vmatprep.subr.bf16.mxu0 %v12613_v38  ;;  %v4547_v38 = vld [vmem:[%s19008_s6 + $0x10b8] sm:$0xff]  ;;  %v12731_v48 = vcombine.high %v4606_v9, %v4610_v57 }
0x1841   : > { %v12669_v49 = vcombine.high %v4543_v37, %v4547_v38  ;;  %v12668_v53 = vcombine.low %v4543_v37, %v4547_v38  ;;  %v13898_v37 = vld [vmem:[%s19010_s8 + $0x4] ss:$16 sps:$4 sm:$0xff]  }
0x1842   : > { %8503 = vmatpush1.bf16.msra.mxu1 %v12674_v54  ;;  %v4614_v54 = vld [vmem:[%s19008_s6 + $0x12d0] sm:$0xff] }
0x1843   : > { %8691 = vmatpush1.bf16.msra.mxu0 %v12612_v35  ;;  %8504 = vmatprep.subr.bf16.mxu1 %v12683_v16  ;;  %v4618_v35 = vld [vmem:[%s19008_s6 + $0x12f0] sm:$0xff]  ;;  %v4555_v16 = vld [vmem:[%s19008_s6 + $0x10f8] sm:$0xff] }
0x1844   : > { %8692 = vmatprep.subr.bf16.mxu0 %v12621_v52  ;;  %v12730_v52 = vcombine.low %v4606_v9, %v4610_v57  ;;  %v12739_v44 = vcombine.high %v4614_v54, %v4618_v35 }
0x1846   : > { %8505 = vmatpush1.bf16.msra.mxu1 %v12682_v18  ;;  %v4626_v18 = vld [vmem:[%s19008_s6 + $0x1330] sm:$0xff] }
0x1847   : > { %8693 = vmatpush1.bf16.msra.mxu0 %v12620_v46  ;;  %8506 = vmatprep.subr.bf16.mxu1 %v12691_v47  ;;  %v4559_v46 = vld [vmem:[%s19008_s6 + $0x1118] sm:$0xff] }
0x1848   : > { %8694 = vmatprep.subr.bf16.mxu0 %v12629_v63  ;;  %v4563_v47 = vld [vmem:[%s19008_s6 + $0x1138] sm:$0xff]  ;;  %v12738_v63 = vcombine.low %v4614_v54, %v4618_v35  ;;  %v13901_v35 = vld [vmem:[%s19010_s8 + $0x24] ss:$16 sps:$4 sm:$0xff]  }
0x1849   : > { %v12685_v23 = vcombine.high %v4559_v46, %v4563_v47  ;;  %v12684_v8 = vcombine.low %v4559_v46, %v4563_v47  ;;  %v4619_v46 = vld [vmem:[%s19008_s6 + $0x12f8] sm:$0xff]  ;;  %v13902_v47 = vld [vmem:[%s19010_s8 + $0x40] ss:$16 sps:$4 sm:$0xff]  }
0x184a   : > { %8507 = vmatpush1.bf16.msra.mxu1 %v12690_v2  ;;  %v4630_v2 = vld [vmem:[%s19008_s6 + $0x1350] sm:$0xff] }
0x184b   : > { %8695 = vmatpush1.bf16.msra.mxu0 %v12628_v3  ;;  %8508 = vmatprep.subr.bf16.mxu1 %v12699_v4  ;;  %v4634_v3 = vld [vmem:[%s19008_s6 + $0x1370] sm:$0xff]  ;;  %v4567_v4 = vld [vmem:[%s19008_s6 + $0x1158] sm:$0xff] }
0x184c   : > { %8696 = vmatprep.subr.bf16.mxu0 %v12637_v7  ;;  %v4571_v7 = vld [vmem:[%s19008_s6 + $0x1178] sm:$0xff]  ;;  %v12755_v11 = vcombine.high %v4630_v2, %v4634_v3  ;;  %v12754_v22 = vcombine.low %v4630_v2, %v4634_v3  ;;  %v13905_v2 = vld [vmem:[%s19010_s8 + $0x60] ss:$16 sps:$4 sm:$0xff]  }
0x184d   : > { %v12693_v13 = vcombine.high %v4567_v4, %v4571_v7  ;;  %v12692_v19 = vcombine.low %v4567_v4, %v4571_v7  ;;  %v13910_v4 = vld [vmem:[%s19010_s8 + $0x84] ss:$16 sps:$4 sm:$0xff]  }
0x184e   : > { %8509 = vmatpush1.bf16.msra.mxu1 %v12698_v59  ;;  %v4642_v59 = vld [vmem:[%s19008_s6 + $0x13b0] sm:$0xff] }
0x184f   : > { %8697 = vmatpush1.bf16.msra.mxu0 %v12636_v60  ;;  %8510 = vmatprep.subr.bf16.mxu1 %v12707_v41  ;;  %v8812_v60 = vrot.slane %v8811_v15, 2  ;;  %v4575_v41 = vld [vmem:[%s19008_s6 + $0x1198] sm:$0xff]  ;;  %v12763_v14 = vcombine.high %v4638_v55, %v4642_v59  ;;  %v12762_v31 = vcombine.low %v4638_v55, %v4642_v59  ;;  %v13913_v55 = vld [vmem:[%s19010_s8 + $0xa4] ss:$16 sps:$4 sm:$0xff]  }
0x1850   : > { %8698 = vmatprep.subr.bf16.mxu0 %v12645_v21  ;;  %v4579_v21 = vld [vmem:[%s19008_s6 + $0x11b8] sm:$0xff] }
0x1851   : > { %v12701_v43 = vcombine.high %v4575_v41, %v4579_v21  ;;  %v12700_v25 = vcombine.low %v4575_v41, %v4579_v21  ;;  %v4643_v41 = vld [vmem:[%s19008_s6 + $0x13b8] sm:$0xff]  ;;  %v13911_v21 = vld [vmem:[%s19010_s8 + $0xa0] ss:$16 sps:$4 sm:$0xff]  }
0x1852   : > { %8511 = vmatpush1.bf16.msra.mxu1 %v12706_v24  ;;  %v4646_v24 = vld [vmem:[%s19008_s6 + $0x13d0] sm:$0xff] }
0x1853   : > { %8699 = vmatpush1.bf16.msra.mxu0 %v12644_v29  ;;  %8512 = vmatprep.subr.bf16.mxu1 %v12715_v30  ;;  %v4650_v29 = vld [vmem:[%s19008_s6 + $0x13f0] sm:$0xff]  ;;  %v8813_v30 = vmax.f32 %v8811_v15, %v8812_v60  ;;  %v4623_v15 = vld [vmem:[%s19008_s6 + $0x1318] sm:$0xff] }
0x1854   : > { %8711 = vmatprep.subr.bf16.mxu0 %v12653_v36  ;;  %v4583_v36 = vld [vmem:[%s19008_s6 + $0x11d8] sm:$0xff]  ;;  %v12771_v26 = vcombine.high %v4646_v24, %v4650_v29  ;;  %v12770_v9 = vcombine.low %v4646_v24, %v4650_v29  ;;  %v13914_v29 = vld [vmem:[%s19010_s8 + $0xc0] ss:$16 sps:$4 sm:$0xff]  }
0x1855   : > { %v12708_v57 = vcombine.low %v4583_v36, %v4587_v61  ;;  %v4639_v60 = vld [vmem:[%s19008_s6 + $0x1398] sm:$0xff] }
0x1856   : > { %8701 = vmatmul.mubr.bf16.vlgmr.msra.gmra.mrb[60].mxu0 %v16637_v20  ;;  %8513 = vmatpush1.bf16.msra.mxu1 %v12714_v27  ;;  %v4551_v20 = vld [vmem:[%s19008_s6 + $0x10d8] sm:$0xff]  ;;  %v12709_v27 = vcombine.high %v4583_v36, %v4587_v61  ;;  %v13919_v36 = vld [vmem:[%s19010_s8 + $0xe4] ss:$16 sps:$4 sm:$0xff]  }
0x1857   : > { %8712 = vmatpush1.bf16.msra.mxu0 %v12652_v28  ;;  %8514 = vmatprep.subr.bf16.mxu1 %v12723_v33  ;;  %v12677_v62 = vcombine.high %v4551_v20, %v4555_v16  ;;  %v12676_v0 = vcombine.low %v4551_v20, %v4555_v16  ;;  %v8814_v28 = vrot.slane %v8813_v30, 1  ;;  %v4591_v33 = vld [vmem:[%s19008_s6 + $0x1218] sm:$0xff] }
0x1858   : > { %8713 = vmatprep.subr.bf16.mxu0 %v12661_v34  ;;  %8743 = vmatprep.mubr.bf16.mxu0 %v16657_v32  ;;  %v4622_v32 = vld [vmem:[%s19008_s6 + $0x1310] sm:$0xff]  ;;  %v4595_v34 = vld [vmem:[%s19008_s6 + $0x1238] sm:$0xff] }
0x1859   : > { %v12747_v1 = vcombine.high %v4622_v32, %v4626_v18  ;;  %v12746_v39 = vcombine.low %v4622_v32, %v4626_v18  ;;  %v12717_v38 = vcombine.high %v4591_v33, %v4595_v34  ;;  %v12716_v54 = vcombine.low %v4591_v33, %v4595_v34  ;;  %v4615_v18 = vld [vmem:[%s19008_s6 + $0x12d8] sm:$0xff]  ;;  %v13928_v34 = vld [vmem:[%s19010_s8 + $0x124] ss:$16 sps:$4 sm:$0xff]  }
0x185a   : > { %8515 = vmatpush1.bf16.msra.mxu1 %v12722_v40  ;;  %v8815_v40 = vmax.f32 %v8813_v30, %v8814_v28  ;;  %v12740_v3 = vcombine.low %v4615_v18, %v4619_v46  ;;  %v4651_v24 = vld [vmem:[%s19008_s6 + $0x13f8] sm:$0xff]  ;;  %v12764_v30 = vcombine.low %v4639_v60, %v4643_v41  ;;  %v13920_v28 = vld [vmem:[%s19010_s8 + $0x100] ss:$16 sps:$4 sm:$0xff]  }
0x185b   : > { %8714 = vmatpush1.bf16.msra.mxu0 %v12660_v17  ;;  %8516 = vmatprep.subr.bf16.mxu1 %v12731_v48  ;;  %v4599_v17 = vld [vmem:[%s19008_s6 + $0x1258] sm:$0xff] }
0x185c   : > { %8715 = vmatprep.subr.bf16.mxu0 %v12669_v49  ;;  %v4603_v48 = vld [vmem:[%s19008_s6 + $0x1278] sm:$0xff]  ;;  %v13896_v49 = vld [vmem:[%s19010_s8] ss:$16 sps:$4 sm:$0xff]   ;;  %v17854_v20 = vpack.c.bf16 %v8815_v40, %v8815_v40 }
0x185d   : > { %v12725_v16 = vcombine.high %v4599_v17, %v4603_v48  ;;  %v12724_v45 = vcombine.low %v4599_v17, %v4603_v48  ;;  %v13923_v33 = vld [vmem:[%s19010_s8 + $0x8] ss:$16 sps:$4 sm:$0xff]   ;;  %v13932_v40 = vld [vmem:[%s19010_s8 + $0x140] ss:$16 sps:$4 sm:$0xff]   ;;  %v8803_v17 = vrot.slane %v17534_v10, 4 }
0x185e   : > { %8517 = vmatpush1.bf16.msra.mxu1 %v12730_v52  ;;  %v4607_v52 = vld [vmem:[%s19008_s6 + $0x1298] sm:$0xff] }
0x185f   : > { %8716 = vmatpush1.bf16.msra.mxu0 %v12668_v53  ;;  %8518 = vmatprep.subr.bf16.mxu1 %v12739_v44  ;;  %v4611_v53 = vld [vmem:[%s19008_s6 + $0x12b8] sm:$0xff]  ;;  %v13899_v44 = vld [vmem:[%s19010_s8 + $0x20] ss:$16 sps:$4 sm:$0xff]  }
0x1860   : > { %8717 = vmatprep.subr.bf16.mxu0 %v12677_v62  ;;  %v13904_v62 = vld [vmem:[%s19010_s8 + $0x44] ss:$16 sps:$4 sm:$0xff]   ;;  %v12733_v32 = vcombine.high %v4607_v52, %v4611_v53  ;;  %v13935_v48 = vld [vmem:[%s19010_s8 + $0x48] ss:$16 sps:$4 sm:$0xff]  }
0x1862   : > { %8519 = vmatpush1.bf16.msra.mxu1 %v12738_v63  ;;  %v12732_v63 = vcombine.low %v4607_v52, %v4611_v53  ;;  %v13941_v52 = vld [vmem:[%s19010_s8 + $0x68] ss:$16 sps:$4 sm:$0xff]   ;;  %v13946_v53 = vld [vmem:[%s19010_s8 + $0x184] ss:$16 sps:$4 sm:$0xff]  }
0x1863   : > { %8718 = vmatpush1.bf16.msra.mxu0 %v12676_v0  ;;  %8520 = vmatprep.subr.bf16.mxu1 %v12747_v1  ;;  %v13907_v0 = vld [vmem:[%s19010_s8 + $0x64] ss:$16 sps:$4 sm:$0xff]   ;;  %v12741_v1 = vcombine.high %v4615_v18, %v4619_v46  ;;  %v13955_v18 = vld [vmem:[%s19010_s8 + $0xac] ss:$16 sps:$4 sm:$0xff]  }
0x1864   : > { %8719 = vmatprep.subr.bf16.mxu0 %v12685_v23  ;;  %v4627_v23 = vld [vmem:[%s19008_s6 + $0x1338] sm:$0xff] }
0x1865   : > { %v12749_v7 = vcombine.high %v4623_v15, %v4627_v23 }
0x1866   : > { %8521 = vmatpush1.bf16.msra.mxu1 %v12746_v39  ;;  %v4631_v39 = vld [vmem:[%s19008_s6 + $0x1358] sm:$0xff] }
0x1867   : > { %8720 = vmatpush1.bf16.msra.mxu0 %v12684_v8  ;;  %8522 = vmatprep.subr.bf16.mxu1 %v12755_v11  ;;  %v4635_v8 = vld [vmem:[%s19008_s6 + $0x1378] sm:$0xff]  ;;  %v13908_v11 = vld [vmem:[%s19010_s8 + $0x80] ss:$16 sps:$4 sm:$0xff]  }
0x1868   : > { %8721 = vmatprep.subr.bf16.mxu0 %v12693_v13  ;;  %v12748_v13 = vcombine.low %v4623_v15, %v4627_v23  ;;  %v12757_v59 = vcombine.high %v4631_v39, %v4635_v8  ;;  %v13961_v15 = vld [vmem:[%s19010_s8 + $0xcc] ss:$16 sps:$4 sm:$0xff]  }
0x186a   : > { %8523 = vmatpush1.bf16.msra.mxu1 %v12754_v22  ;;  %v12756_v22 = vcombine.low %v4631_v39, %v4635_v8  ;;  %v13967_v39 = vld [vmem:[%s19010_s8 + $0xec] ss:$16 sps:$4 sm:$0xff]  }
0x186b   : > { %8722 = vmatpush1.bf16.msra.mxu0 %v12692_v19  ;;  %8524 = vmatprep.subr.bf16.mxu1 %v12763_v14  ;;  %v13916_v19 = vld [vmem:[%s19010_s8 + $0xc4] ss:$16 sps:$4 sm:$0xff]   ;;  %v12765_v14 = vcombine.high %v4639_v60, %v4643_v41  ;;  %v13973_v60 = vld [vmem:[%s19010_s8 + $0x10c] ss:$16 sps:$4 sm:$0xff]  }
0x186c   : > { %8723 = vmatprep.subr.bf16.mxu0 %v12701_v43  ;;  %v4647_v43 = vld [vmem:[%s19008_s6 + $0x13d8] sm:$0xff] }
0x186d   : > { %v12773_v61 = vcombine.high %v4647_v43, %v4651_v24 }
0x186e   : > { %8525 = vmatpush1.bf16.msra.mxu1 %v12762_v31  ;;  %v13917_v31 = vld [vmem:[%s19010_s8 + $0xe0] ss:$16 sps:$4 sm:$0xff]  }
0x186f   : > { %8724 = vmatpush1.bf16.msra.mxu0 %v12700_v25  ;;  %8526 = vmatprep.subr.bf16.mxu1 %v12771_v26  ;;  %v12772_v25 = vcombine.low %v4647_v43, %v4651_v24  ;;  %v13922_v26 = vld [vmem:[%s19010_s8 + $0x104] ss:$16 sps:$4 sm:$0xff]   ;;  %v13979_v24 = vld [vmem:[%s19010_s8 + $0x12c] ss:$16 sps:$4 sm:$0xff]  }
0x1870   : > { %8725 = vmatprep.subr.bf16.mxu0 %v12709_v27  ;;  %v13925_v27 = vld [vmem:[%s19010_s8 + $0xc] ss:$16 sps:$4 sm:$0xff]  }
0x1872   : > { %8527 = vmatpush1.bf16.msra.mxu1 %v12770_v9  ;;  %v13931_v9 = vld [vmem:[%s19010_s8 + $0x2c] ss:$16 sps:$4 sm:$0xff]  }
0x1873   : > { %8726 = vmatpush1.bf16.msra.mxu0 %v12708_v57  ;;  %10424 = vmatprep.subr.bf16.mxu1 %v13898_v37  ;;  %v13926_v57 = vld [vmem:[%s19010_s8 + $0x120] ss:$16 sps:$4 sm:$0xff]   ;;  %v13929_v37 = vld [vmem:[%s19010_s8 + $0x28] ss:$16 sps:$4 sm:$0xff]  }
0x1874   : > { %8727 = vmatprep.subr.bf16.mxu0 %v12717_v38  ;;  %v13934_v38 = vld [vmem:[%s19010_s8 + $0x144] ss:$16 sps:$4 sm:$0xff]  }
0x1875   : > { %8529 = vmatmul.mubr.bf16.vlgmr.msra.gmra.mrb[44].mxu1 %v16842_v51 }
0x1876   : > { %10425 = vmatpush1.bf16.msra.mxu1 %v13896_v49  ;;  %10456 = vmatprep.mubr.bf16.mxu1 %v17854_v20  ;;  %v13940_v49 = vld [vmem:[%s19010_s8 + $0x164] ss:$16 sps:$4 sm:$0xff]  }
0x1877   : > { %8728 = vmatpush1.bf16.msra.mxu0 %v12716_v54  ;;  %10426 = vmatprep.subr.bf16.mxu1 %v13901_v35  ;;  %v8824_v54 = vrot.slane %v17651_v50, 4  ;;  %v13943_v35 = vld [vmem:[%s19010_s8 + $0x6c] ss:$16 sps:$4 sm:$0xff]  }
0x1878   : > { %8729 = vmatprep.subr.bf16.mxu0 %v12725_v16  ;;  %v8804_v16 = vmax.f32 %v17534_v10, %v8803_v17  ;;  %v13944_v10 = vld [vmem:[%s19010_s8 + $0x180] ss:$16 sps:$4 sm:$0xff]   ;;  %v14001_v17 = vld [vmem:[%s19010_s8 + $0x1a8] ss:$16 sps:$4 sm:$0xff]  }
0x187a   : > { %10427 = vmatpush1.bf16.msra.mxu1 %v13899_v44  ;;  %v8825_v44 = vmax.f32 %v17651_v50, %v8824_v54  ;;  %v13952_v50 = vld [vmem:[%s19010_s8 + $0x1a4] ss:$16 sps:$4 sm:$0xff]   ;;  %v14004_v54 = vld [vmem:[%s19010_s8 + $0x2c0] ss:$16 sps:$4 sm:$0xff]  }
0x187b   : > { %8730 = vmatpush1.bf16.msra.mxu0 %v12724_v45  ;;  %10428 = vmatprep.subr.bf16.mxu1 %v13904_v62  ;;  %v13949_v45 = vld [vmem:[%s19010_s8 + $0x8c] ss:$16 sps:$4 sm:$0xff]   ;;  %v8805_v62 = vrot.slane %v8804_v16, 2 }
0x187c   : > { %8731 = vmatprep.subr.bf16.mxu0 %v12733_v32  ;;  %v13947_v32 = vld [vmem:[%s19010_s8 + $0x88] ss:$16 sps:$4 sm:$0xff]   ;;  %v8826_v46 = vrot.slane %v8825_v44, 2 }
0x187e   : > { %10429 = vmatpush1.bf16.msra.mxu1 %v13902_v47  ;;  %v13950_v47 = vld [vmem:[%s19010_s8 + $0x1a0] ss:$16 sps:$4 sm:$0xff]   ;;  %v8827_v23 = vmax.f32 %v8825_v44, %v8826_v46  ;;  %v14018_v44 = vld [vmem:[%s19010_s8 + $0x304] ss:$16 sps:$4 sm:$0xff]   ;;  %v14025_v46 = vld [vmem:[%s19010_s8 + $0x228] ss:$16 sps:$4 sm:$0xff]  }
0x187f   : > { %8732 = vmatpush1.bf16.msra.mxu0 %v12732_v63  ;;  %10430 = vmatprep.subr.bf16.mxu1 %v13907_v0  ;;  %v13953_v63 = vld [vmem:[%s19010_s8 + $0xa8] ss:$16 sps:$4 sm:$0xff]   ;;  %v13958_v0 = vld [vmem:[%s19010_s8 + $0x1c4] ss:$16 sps:$4 sm:$0xff]  }
0x1880   : > { %8733 = vmatprep.subr.bf16.mxu0 %v12741_v1  ;;  %v8806_v1 = vmax.f32 %v8804_v16, %v8805_v62  ;;  %v8828_v8 = vrot.slane %v8827_v23, 1  ;;  %v14015_v16 = vld [vmem:[%s19010_s8 + $0x1ec] ss:$16 sps:$4 sm:$0xff]   ;;  %v14019_v62 = vld [vmem:[%s19010_s8 + $0x208] ss:$16 sps:$4 sm:$0xff]  }
0x1882   : > { %10431 = vmatpush1.bf16.msra.mxu1 %v13905_v2  ;;  %v13956_v2 = vld [vmem:[%s19010_s8 + $0x1c0] ss:$16 sps:$4 sm:$0xff]   ;;  %v8829_v41 = vmax.f32 %v8827_v23, %v8828_v8  ;;  %v14036_v23 = vld [vmem:[%s19010_s8 + $0x364] ss:$16 sps:$4 sm:$0xff]   ;;  %v14045_v8 = vld [vmem:[%s19010_s8 + $0x28c] ss:$16 sps:$4 sm:$0xff]  }
0x1883   : > { %8734 = vmatpush1.bf16.msra.mxu0 %v12740_v3  ;;  %10432 = vmatprep.subr.bf16.mxu1 %v13910_v4  ;;  %v13959_v3 = vld [vmem:[%s19010_s8 + $0xc8] ss:$16 sps:$4 sm:$0xff]   ;;  %v13964_v4 = vld [vmem:[%s19010_s8 + $0x1e4] ss:$16 sps:$4 sm:$0xff]  }
0x1884   : > { %8735 = vmatprep.subr.bf16.mxu0 %v12749_v7  ;;  %v8807_v7 = vrot.slane %v8806_v1, 1  ;;  %v18052_v43 = vpack.c.bf16 %v8829_v41, %v8829_v41  ;;  %v14049_v41 = vld [vmem:[%s19010_s8 + $0x2a8] ss:$16 sps:$4 sm:$0xff]  }
0x1886   : > { %10433 = vmatpush1.bf16.msra.mxu1 %v13908_v11  ;;  %v13962_v11 = vld [vmem:[%s19010_s8 + $0x1e0] ss:$16 sps:$4 sm:$0xff]  }
0x1887   : > { %8736 = vmatpush1.bf16.msra.mxu0 %v12748_v13  ;;  %10434 = vmatprep.subr.bf16.mxu1 %v13913_v55  ;;  %v13965_v13 = vld [vmem:[%s19010_s8 + $0xe8] ss:$16 sps:$4 sm:$0xff]   ;;  %v8808_v55 = vmax.f32 %v8806_v1, %v8807_v7  ;;  %v8817_v1 = vrot.slane %v17643_v12, 4 }
0x1888   : > { %8737 = vmatprep.subr.bf16.mxu0 %v12757_v59  ;;  %v13970_v59 = vld [vmem:[%s19010_s8 + $0x204] ss:$16 sps:$4 sm:$0xff]   ;;  %v14037_v7 = vld [vmem:[%s19010_s8 + $0x268] ss:$16 sps:$4 sm:$0xff]  }
0x188a   : > { %10435 = vmatpush1.bf16.msra.mxu1 %v13911_v21  ;;  %v13968_v21 = vld [vmem:[%s19010_s8 + $0x200] ss:$16 sps:$4 sm:$0xff]  }
0x188b   : > { %8738 = vmatpush1.bf16.msra.mxu0 %v12756_v22  ;;  %10436 = vmatprep.subr.bf16.mxu1 %v13916_v19  ;;  %v18044_v22 = vpack.c.bf16 %v8808_v55, %v8808_v55  ;;  %v13971_v19 = vld [vmem:[%s19010_s8 + $0x108] ss:$16 sps:$4 sm:$0xff]   ;;  %v14048_v55 = vld [vmem:[%s19010_s8 + $0x3a4] ss:$16 sps:$4 sm:$0xff]  }
0x188c   : > { %8739 = vmatprep.subr.bf16.mxu0 %v12765_v14  ;;  %v13976_v14 = vld [vmem:[%s19010_s8 + $0x224] ss:$16 sps:$4 sm:$0xff]  }
0x188e   : > { %10437 = vmatpush1.bf16.msra.mxu1 %v13914_v29  ;;  %v13974_v29 = vld [vmem:[%s19010_s8 + $0x220] ss:$16 sps:$4 sm:$0xff]  }
0x188f   : > { %8740 = vmatpush1.bf16.msra.mxu0 %v12764_v30  ;;  %10438 = vmatprep.subr.bf16.mxu1 %v13919_v36  ;;  %v13977_v30 = vld [vmem:[%s19010_s8 + $0x128] ss:$16 sps:$4 sm:$0xff]   ;;  %v13982_v36 = vld [vmem:[%s19010_s8 + $0x244] ss:$16 sps:$4 sm:$0xff]  }
0x1890   : > { %8741 = vmatprep.subr.bf16.mxu0 %v12773_v61  ;;  %v13985_v61 = vld [vmem:[%s19010_s8 + $0x14c] ss:$16 sps:$4 sm:$0xff]  }
0x1892   : > { %10439 = vmatpush1.bf16.msra.mxu1 %v13917_v31  ;;  %v13980_v31 = vld [vmem:[%s19010_s8 + $0x240] ss:$16 sps:$4 sm:$0xff]  }
0x1893   : > { %8742 = vmatpush1.bf16.msra.mxu0 %v12772_v25  ;;  %10440 = vmatprep.subr.bf16.mxu1 %v13922_v26  ;;  %v13983_v25 = vld [vmem:[%s19010_s8 + $0x148] ss:$16 sps:$4 sm:$0xff]   ;;  %v13988_v26 = vld [vmem:[%s19010_s8 + $0x264] ss:$16 sps:$4 sm:$0xff]  }
0x1894   : > { %10588 = vmatprep.subr.bf16.mxu0 %v13925_v27  ;;  %v13991_v27 = vld [vmem:[%s19010_s8 + $0x16c] ss:$16 sps:$4 sm:$0xff]  }
0x1896   : > { %8744 = vmatmul.mubr.bf16.vlgmr.msra.gmra.mrb[60].mxu0 %v16842_v51  ;;  %10441 = vmatpush1.bf16.msra.mxu1 %v13920_v28  ;;  %v13937_v51 = vld [vmem:[%s19010_s8 + $0x4c] ss:$16 sps:$4 sm:$0xff]   ;;  %v13986_v28 = vld [vmem:[%s19010_s8 + $0x260] ss:$16 sps:$4 sm:$0xff]  }
0x1897   : > { %10589 = vmatpush1.bf16.msra.mxu0 %v13923_v33  ;;  %10620 = vmatprep.mubr.bf16.mxu0 %v17854_v20  ;;  %v13938_v20 = vld [vmem:[%s19010_s8 + $0x160] ss:$16 sps:$4 sm:$0xff]   ;;  %v13989_v33 = vld [vmem:[%s19010_s8 + $0x168] ss:$16 sps:$4 sm:$0xff]  }
0x1898   : > { %10442 = vmatprep.subr.bf16.mxu1 %v13928_v34  ;;  %10590 = vmatprep.subr.bf16.mxu0 %v13931_v9  ;;  %v13994_v34 = vld [vmem:[%s19010_s8 + $0x284] ss:$16 sps:$4 sm:$0xff]   ;;  %v13997_v9 = vld [vmem:[%s19010_s8 + $0x18c] ss:$16 sps:$4 sm:$0xff]  }
0x189a   : > { %10443 = vmatpush1.bf16.msra.mxu1 %v13926_v57  ;;  %v13992_v57 = vld [vmem:[%s19010_s8 + $0x280] ss:$16 sps:$4 sm:$0xff]  }
0x189b   : > { %10591 = vmatpush1.bf16.msra.mxu0 %v13929_v37  ;;  %10444 = vmatprep.subr.bf16.mxu1 %v13934_v38  ;;  %v13995_v37 = vld [vmem:[%s19010_s8 + $0x188] ss:$16 sps:$4 sm:$0xff]   ;;  %v14000_v38 = vld [vmem:[%s19010_s8 + $0x2a4] ss:$16 sps:$4 sm:$0xff]  }
0x189c   : > { %10592 = vmatprep.subr.bf16.mxu0 %v13937_v51  ;;  %v14003_v51 = vld [vmem:[%s19010_s8 + $0x1ac] ss:$16 sps:$4 sm:$0xff]  }
0x189e   : > { %10445 = vmatpush1.bf16.msra.mxu1 %v13932_v40  ;;  %v13998_v40 = vld [vmem:[%s19010_s8 + $0x2a0] ss:$16 sps:$4 sm:$0xff]  }
0x189f   : > { %10593 = vmatpush1.bf16.msra.mxu0 %v13935_v48  ;;  %10446 = vmatprep.subr.bf16.mxu1 %v13940_v49  ;;  %v14006_v48 = vld [vmem:[%s19010_s8 + $0x2c4] ss:$16 sps:$4 sm:$0xff]   ;;  %v14009_v49 = vld [vmem:[%s19010_s8 + $0x1cc] ss:$16 sps:$4 sm:$0xff]  }
0x18a0   : > { %10594 = vmatprep.subr.bf16.mxu0 %v13943_v35  ;;  %v14007_v35 = vld [vmem:[%s19010_s8 + $0x1c8] ss:$16 sps:$4 sm:$0xff]  }
0x18a2   : > { %10447 = vmatpush1.bf16.msra.mxu1 %v13938_v20  ;;  %v14012_v20 = vld [vmem:[%s19010_s8 + $0x2e4] ss:$16 sps:$4 sm:$0xff]  }
0x18a3   : > { %10595 = vmatpush1.bf16.msra.mxu0 %v13941_v52  ;;  %10448 = vmatprep.subr.bf16.mxu1 %v13946_v53  ;;  %v14010_v52 = vld [vmem:[%s19010_s8 + $0x2e0] ss:$16 sps:$4 sm:$0xff]   ;;  %v14013_v53 = vld [vmem:[%s19010_s8 + $0x1e8] ss:$16 sps:$4 sm:$0xff]  }
0x18a4   : > { %10596 = vmatprep.subr.bf16.mxu0 %v13949_v45  ;;  %v14021_v45 = vld [vmem:[%s19010_s8 + $0x20c] ss:$16 sps:$4 sm:$0xff]  }
0x18a6   : > { %10449 = vmatpush1.bf16.msra.mxu1 %v13944_v10  ;;  %v14016_v10 = vld [vmem:[%s19010_s8 + $0x300] ss:$16 sps:$4 sm:$0xff]  }
0x18a7   : > { %10597 = vmatpush1.bf16.msra.mxu0 %v13947_v32  ;;  %10450 = vmatprep.subr.bf16.mxu1 %v13952_v50  ;;  %v14024_v32 = vld [vmem:[%s19010_s8 + $0x324] ss:$16 sps:$4 sm:$0xff]   ;;  %v14027_v50 = vld [vmem:[%s19010_s8 + $0x22c] ss:$16 sps:$4 sm:$0xff]  }
0x18a8   : > { %10598 = vmatprep.subr.bf16.mxu0 %v13955_v18  ;;  %v14022_v18 = vld [vmem:[%s19010_s8 + $0x320] ss:$16 sps:$4 sm:$0xff]  }
0x18aa   : > { %10451 = vmatpush1.bf16.msra.mxu1 %v13950_v47  ;;  %v14030_v47 = vld [vmem:[%s19010_s8 + $0x344] ss:$16 sps:$4 sm:$0xff]  }
0x18ab   : > { %10599 = vmatpush1.bf16.msra.mxu0 %v13953_v63  ;;  %10452 = vmatprep.subr.bf16.mxu1 %v13958_v0  ;;  %v14033_v63 = vld [vmem:[%s19010_s8 + $0x24c] ss:$16 sps:$4 sm:$0xff]   ;;  %v14028_v0 = vld [vmem:[%s19010_s8 + $0x340] ss:$16 sps:$4 sm:$0xff]  }
0x18ac   : > { %10600 = vmatprep.subr.bf16.mxu0 %v13961_v15  ;;  %v14031_v15 = vld [vmem:[%s19010_s8 + $0x248] ss:$16 sps:$4 sm:$0xff]  }
0x18ae   : > { %10453 = vmatpush1.bf16.msra.mxu1 %v13956_v2  ;;  %v14039_v2 = vld [vmem:[%s19010_s8 + $0x26c] ss:$16 sps:$4 sm:$0xff]  }
0x18af   : > { %10601 = vmatpush1.bf16.msra.mxu0 %v13959_v3  ;;  %10454 = vmatprep.subr.bf16.mxu1 %v13964_v4  ;;  %v14034_v3 = vld [vmem:[%s19010_s8 + $0x360] ss:$16 sps:$4 sm:$0xff]   ;;  %v8818_v4 = vmax.f32 %v17643_v12, %v8817_v1  ;;  %v14085_v1 = vld [vmem:[%s19010_s8 + $0x3e8] ss:$16 sps:$4 sm:$0xff]  }
0x18b0   : > { %10602 = vmatprep.subr.bf16.mxu0 %v13967_v39  ;;  %v14042_v39 = vld [vmem:[%s19010_s8 + $0x384] ss:$16 sps:$4 sm:$0xff]   ;;  %v14040_v12 = vld [vmem:[%s19010_s8 + $0x380] ss:$16 sps:$4 sm:$0xff]  }
0x18b2   : > { %10455 = vmatpush1.bf16.msra.mxu1 %v13962_v11  ;;  %v8819_v11 = vrot.slane %v8818_v4, 2 }
0x18b3   : > { %10603 = vmatpush1.bf16.msra.mxu0 %v13965_v13  ;;  %10465 = vmatprep.subr.bf16.mxu1 %v13970_v59  ;;  %v14043_v13 = vld [vmem:[%s19010_s8 + $0x288] ss:$16 sps:$4 sm:$0xff]   ;;  %v14051_v59 = vld [vmem:[%s19010_s8 + $0x2ac] ss:$16 sps:$4 sm:$0xff]  }
0x18b4   : > { %10604 = vmatprep.subr.bf16.mxu0 %v13973_v60  ;;  %v14046_v60 = vld [vmem:[%s19010_s8 + $0x3a0] ss:$16 sps:$4 sm:$0xff]  }
0x18b5   : > { %10457 = vmatmul.mubr.bf16.vlgmr.msra.gmra.mrb[48].mxu1 %v18044_v22 }
0x18b6   : > { %10466 = vmatpush1.bf16.msra.mxu1 %v13968_v21  ;;  %10497 = vmatprep.mubr.bf16.mxu1 %v18052_v43  ;;  %v14054_v21 = vld [vmem:[%s19010_s8 + $0x3c4] ss:$16 sps:$4 sm:$0xff]  }
0x18b7   : > { %10605 = vmatpush1.bf16.msra.mxu0 %v13971_v19  ;;  %10467 = vmatprep.subr.bf16.mxu1 %v13976_v14  ;;  %v14057_v19 = vld [vmem:[%s19010_s8 + $0x2cc] ss:$16 sps:$4 sm:$0xff]   ;;  %v14052_v14 = vld [vmem:[%s19010_s8 + $0x3c0] ss:$16 sps:$4 sm:$0xff]  }
0x18b8   : > { %10606 = vmatprep.subr.bf16.mxu0 %v13979_v24  ;;  %v14060_v24 = vld [vmem:[%s19010_s8 + $0x3e4] ss:$16 sps:$4 sm:$0xff]  }
0x18ba   : > { %10468 = vmatpush1.bf16.msra.mxu1 %v13974_v29 }
0x18bb   : > { %10607 = vmatpush1.bf16.msra.mxu0 %v13977_v30  ;;  %10469 = vmatprep.subr.bf16.mxu1 %v13982_v36  ;;  %v14063_v30 = vld [vmem:[%s19010_s8 + $0x2ec] ss:$16 sps:$4 sm:$0xff]   ;;  %v14058_v36 = vld [vmem:[%s19010_s8 + $0x3e0] ss:$16 sps:$4 sm:$0xff]  }
0x18bc   : > { %10608 = vmatprep.subr.bf16.mxu0 %v13985_v61  ;;  %v14061_v61 = vld [vmem:[%s19010_s8 + $0x2e8] ss:$16 sps:$4 sm:$0xff]  }
0x18be   : > { %10470 = vmatpush1.bf16.msra.mxu1 %v13980_v31 }
0x18bf   : > { %10609 = vmatpush1.bf16.msra.mxu0 %v13983_v25  ;;  %10471 = vmatprep.subr.bf16.mxu1 %v13988_v26  ;;  %v14090_v25 = vld [vmem:[%s19010_s8 + $0x404] ss:$16 sps:$4 sm:$0xff]   ;;  %v14066_v26 = vld [vmem:[%s19010_s8 + $0x30c] ss:$16 sps:$4 sm:$0xff]  }
0x18c0   : > { %10610 = vmatprep.subr.bf16.mxu0 %v13991_v27  ;;  %v14088_v27 = vld [vmem:[%s19010_s8 + $0x400] ss:$16 sps:$4 sm:$0xff]  }
0x18c2   : > { %10472 = vmatpush1.bf16.msra.mxu1 %v13986_v28 }
0x18c3   : > { %10611 = vmatpush1.bf16.msra.mxu0 %v13989_v33  ;;  %10473 = vmatprep.subr.bf16.mxu1 %v13994_v34  ;;  %v14064_v33 = vld [vmem:[%s19010_s8 + $0x308] ss:$16 sps:$4 sm:$0xff]   ;;  %v14096_v34 = vld [vmem:[%s19010_s8 + $0x424] ss:$16 sps:$4 sm:$0xff]  }
0x18c4   : > { %10612 = vmatprep.subr.bf16.mxu0 %v13997_v9  ;;  %v14069_v9 = vld [vmem:[%s19010_s8 + $0x32c] ss:$16 sps:$4 sm:$0xff]  }
0x18c6   : > { %10474 = vmatpush1.bf16.msra.mxu1 %v13992_v57  ;;  %v14094_v57 = vld [vmem:[%s19010_s8 + $0x420] ss:$16 sps:$4 sm:$0xff]  }
0x18c7   : > { %10613 = vmatpush1.bf16.msra.mxu0 %v13995_v37  ;;  %10475 = vmatprep.subr.bf16.mxu1 %v14000_v38  ;;  %v14067_v37 = vld [vmem:[%s19010_s8 + $0x328] ss:$16 sps:$4 sm:$0xff]   ;;  %v14102_v38 = vld [vmem:[%s19010_s8 + $0x444] ss:$16 sps:$4 sm:$0xff]  }
0x18c8   : > { %10614 = vmatprep.subr.bf16.mxu0 %v14003_v51  ;;  %v14072_v51 = vld [vmem:[%s19010_s8 + $0x34c] ss:$16 sps:$4 sm:$0xff]  }
0x18ca   : > { %10476 = vmatpush1.bf16.msra.mxu1 %v13998_v40  ;;  %v14100_v40 = vld [vmem:[%s19010_s8 + $0x440] ss:$16 sps:$4 sm:$0xff]  }
0x18cb   : > { %10615 = vmatpush1.bf16.msra.mxu0 %v14001_v17  ;;  %10477 = vmatprep.subr.bf16.mxu1 %v14006_v48  ;;  %v14070_v17 = vld [vmem:[%s19010_s8 + $0x348] ss:$16 sps:$4 sm:$0xff]   ;;  %v14108_v48 = vld [vmem:[%s19010_s8 + $0x464] ss:$16 sps:$4 sm:$0xff]  }
0x18cc   : > { %10616 = vmatprep.subr.bf16.mxu0 %v14009_v49  ;;  %v14075_v49 = vld [vmem:[%s19010_s8 + $0x36c] ss:$16 sps:$4 sm:$0xff]  }
0x18ce   : > { %10478 = vmatpush1.bf16.msra.mxu1 %v14004_v54  ;;  %v14106_v54 = vld [vmem:[%s19010_s8 + $0x460] ss:$16 sps:$4 sm:$0xff]  }
0x18cf   : > { %10617 = vmatpush1.bf16.msra.mxu0 %v14007_v35  ;;  %10479 = vmatprep.subr.bf16.mxu1 %v14012_v20  ;;  %v14073_v35 = vld [vmem:[%s19010_s8 + $0x368] ss:$16 sps:$4 sm:$0xff]   ;;  %v14114_v20 = vld [vmem:[%s19010_s8 + $0x484] ss:$16 sps:$4 sm:$0xff]  }
0x18d0   : > { %10618 = vmatprep.subr.bf16.mxu0 %v14015_v16  ;;  %v14078_v16 = vld [vmem:[%s19010_s8 + $0x38c] ss:$16 sps:$4 sm:$0xff]  }
0x18d2   : > { %10480 = vmatpush1.bf16.msra.mxu1 %v14010_v52  ;;  %v14112_v52 = vld [vmem:[%s19010_s8 + $0x480] ss:$16 sps:$4 sm:$0xff]  }
0x18d3   : > { %10619 = vmatpush1.bf16.msra.mxu0 %v14013_v53  ;;  %10481 = vmatprep.subr.bf16.mxu1 %v14018_v44  ;;  %v14076_v53 = vld [vmem:[%s19010_s8 + $0x388] ss:$16 sps:$4 sm:$0xff]   ;;  %v14120_v44 = vld [vmem:[%s19010_s8 + $0x4a4] ss:$16 sps:$4 sm:$0xff]  }
0x18d4   : > { %10629 = vmatprep.subr.bf16.mxu0 %v14021_v45  ;;  %v14081_v45 = vld [vmem:[%s19010_s8 + $0x3ac] ss:$16 sps:$4 sm:$0xff]  }
0x18d6   : > { %10621 = vmatmul.mubr.bf16.vlgmr.msra.gmra.mrb[64].mxu0 %v18044_v22  ;;  %10482 = vmatpush1.bf16.msra.mxu1 %v14016_v10  ;;  %v8820_v22 = vmax.f32 %v8818_v4, %v8819_v11  ;;  %v14118_v10 = vld [vmem:[%s19010_s8 + $0x4a0] ss:$16 sps:$4 sm:$0xff]   ;;  %v14144_v4 = vld [vmem:[%s19010_s8 + $0x524] ss:$16 sps:$4 sm:$0xff]   ;;  %v14105_v11 = vld [vmem:[%s19010_s8 + $0x44c] ss:$16 sps:$4 sm:$0xff]  }
0x18d7   : > { %10630 = vmatpush1.bf16.msra.mxu0 %v14019_v62  ;;  %10661 = vmatprep.mubr.bf16.mxu0 %v18052_v43  ;;  %v14055_v43 = vld [vmem:[%s19010_s8 + $0x2c8] ss:$16 sps:$4 sm:$0xff]  }
0x18d8   : > { %10483 = vmatprep.subr.bf16.mxu1 %v14024_v32  ;;  %10631 = vmatprep.subr.bf16.mxu0 %v14027_v50  ;;  %v8821_v29 = vrot.slane %v8820_v22, 1  ;;  %v14079_v62 = vld [vmem:[%s19010_s8 + $0x3a8] ss:$16 sps:$4 sm:$0xff]   ;;  %v14126_v32 = vld [vmem:[%s19010_s8 + $0x4c4] ss:$16 sps:$4 sm:$0xff]  }
0x18d9   : > { %v14084_v50 = vld [vmem:[%s19010_s8 + $0x3cc] ss:$16 sps:$4 sm:$0xff]  }
0x18da   : > { %10484 = vmatpush1.bf16.msra.mxu1 %v14022_v18  ;;  %v8822_v31 = vmax.f32 %v8820_v22, %v8821_v29  ;;  %v14124_v18 = vld [vmem:[%s19010_s8 + $0x4c0] ss:$16 sps:$4 sm:$0xff]   ;;  %v14162_v22 = vld [vmem:[%s19010_s8 + $0x584] ss:$16 sps:$4 sm:$0xff]   ;;  %v14123_v29 = vld [vmem:[%s19010_s8 + $0x4ac] ss:$16 sps:$4 sm:$0xff]  }
0x18db   : > { %10632 = vmatpush1.bf16.msra.mxu0 %v14025_v46  ;;  %10485 = vmatprep.subr.bf16.mxu1 %v14030_v47  ;;  %v14082_v46 = vld [vmem:[%s19010_s8 + $0x3c8] ss:$16 sps:$4 sm:$0xff]   ;;  %v14132_v47 = vld [vmem:[%s19010_s8 + $0x4e4] ss:$16 sps:$4 sm:$0xff]  }
0x18dc   : > { %10633 = vmatprep.subr.bf16.mxu0 %v14033_v63  ;;  %v18246_v28 = vpack.c.bf16 %v8822_v31, %v8822_v31  ;;  %v14087_v63 = vld [vmem:[%s19010_s8 + $0x3ec] ss:$16 sps:$4 sm:$0xff]  }
0x18dd   : > { %v14129_v31 = vld [vmem:[%s19010_s8 + $0x4cc] ss:$16 sps:$4 sm:$0xff]  }
0x18de   : > { %10486 = vmatpush1.bf16.msra.mxu1 %v14028_v0  ;;  %v14130_v0 = vld [vmem:[%s19010_s8 + $0x4e0] ss:$16 sps:$4 sm:$0xff]  }
0x18df   : > { %10634 = vmatpush1.bf16.msra.mxu0 %v14031_v15  ;;  %10487 = vmatprep.subr.bf16.mxu1 %v14036_v23  ;;  %v14138_v15 = vld [vmem:[%s19010_s8 + $0x504] ss:$16 sps:$4 sm:$0xff]   ;;  %v14093_v23 = vld [vmem:[%s19010_s8 + $0x40c] ss:$16 sps:$4 sm:$0xff]  }
0x18e0   : > { %10635 = vmatprep.subr.bf16.mxu0 %v14039_v2  ;;  %v14136_v2 = vld [vmem:[%s19010_s8 + $0x500] ss:$16 sps:$4 sm:$0xff]  }
0x18e2   : > { %10488 = vmatpush1.bf16.msra.mxu1 %v14034_v3  ;;  %v14091_v3 = vld [vmem:[%s19010_s8 + $0x408] ss:$16 sps:$4 sm:$0xff]  }
0x18e3   : > { %10636 = vmatpush1.bf16.msra.mxu0 %v14037_v7  ;;  %10489 = vmatprep.subr.bf16.mxu1 %v14042_v39  ;;  %v14099_v7 = vld [vmem:[%s19010_s8 + $0x42c] ss:$16 sps:$4 sm:$0xff]   ;;  %v14142_v39 = vld [vmem:[%s19010_s8 + $0x520] ss:$16 sps:$4 sm:$0xff]  }
0x18e4   : > { %10637 = vmatprep.subr.bf16.mxu0 %v14045_v8  ;;  %v14097_v8 = vld [vmem:[%s19010_s8 + $0x428] ss:$16 sps:$4 sm:$0xff]  }
0x18e6   : > { %10490 = vmatpush1.bf16.msra.mxu1 %v14040_v12  ;;  %v14150_v12 = vld [vmem:[%s19010_s8 + $0x544] ss:$16 sps:$4 sm:$0xff]  }
0x18e7   : > { %10638 = vmatpush1.bf16.msra.mxu0 %v14043_v13  ;;  %10491 = vmatprep.subr.bf16.mxu1 %v14048_v55  ;;  %v14148_v13 = vld [vmem:[%s19010_s8 + $0x540] ss:$16 sps:$4 sm:$0xff]   ;;  %v14103_v55 = vld [vmem:[%s19010_s8 + $0x448] ss:$16 sps:$4 sm:$0xff]  }
0x18e8   : > { %10639 = vmatprep.subr.bf16.mxu0 %v14051_v59  ;;  %v14156_v59 = vld [vmem:[%s19010_s8 + $0x564] ss:$16 sps:$4 sm:$0xff]  }
0x18ea   : > { %10492 = vmatpush1.bf16.msra.mxu1 %v14046_v60  ;;  %v14111_v60 = vld [vmem:[%s19010_s8 + $0x46c] ss:$16 sps:$4 sm:$0xff]  }
0x18eb   : > { %10640 = vmatpush1.bf16.msra.mxu0 %v14049_v41  ;;  %10493 = vmatprep.subr.bf16.mxu1 %v14054_v21  ;;  %v14154_v41 = vld [vmem:[%s19010_s8 + $0x560] ss:$16 sps:$4 sm:$0xff]   ;;  %v14109_v21 = vld [vmem:[%s19010_s8 + $0x468] ss:$16 sps:$4 sm:$0xff]  }
0x18ec   : > { %10641 = vmatprep.subr.bf16.mxu0 %v14057_v19  ;;  %v14117_v19 = vld [vmem:[%s19010_s8 + $0x48c] ss:$16 sps:$4 sm:$0xff]  }
0x18ee   : > { %10494 = vmatpush1.bf16.msra.mxu1 %v14052_v14  ;;  %v14160_v14 = vld [vmem:[%s19010_s8 + $0x580] ss:$16 sps:$4 sm:$0xff]  }
0x18ef   : > { %10642 = vmatpush1.bf16.msra.mxu0 %v14055_v43  ;;  %10495 = vmatprep.subr.bf16.mxu1 %v14060_v24  ;;  %v14115_v43 = vld [vmem:[%s19010_s8 + $0x488] ss:$16 sps:$4 sm:$0xff]   ;;  %v14168_v24 = vld [vmem:[%s19010_s8 + $0x5a4] ss:$16 sps:$4 sm:$0xff]  }
0x18f0   : > { %10643 = vmatprep.subr.bf16.mxu0 %v14063_v30  ;;  %v14166_v30 = vld [vmem:[%s19010_s8 + $0x5a0] ss:$16 sps:$4 sm:$0xff]  }
0x18f2   : > { %10496 = vmatpush1.bf16.msra.mxu1 %v14058_v36  ;;  %v14121_v36 = vld [vmem:[%s19010_s8 + $0x4a8] ss:$16 sps:$4 sm:$0xff]  }
0x18f3   : > { %10644 = vmatpush1.bf16.msra.mxu0 %v14061_v61  ;;  %10506 = vmatprep.subr.bf16.mxu1 %v14090_v25  ;;  %v14174_v61 = vld [vmem:[%s19010_s8 + $0x5c4] ss:$16 sps:$4 sm:$0xff]   ;;  %v14172_v25 = vld [vmem:[%s19010_s8 + $0x5c0] ss:$16 sps:$4 sm:$0xff]  }
0x18f4   : > { %10645 = vmatprep.subr.bf16.mxu0 %v14066_v26  ;;  %v14127_v26 = vld [vmem:[%s19010_s8 + $0x4c8] ss:$16 sps:$4 sm:$0xff]  }
0x18f5   : > { %10498 = vmatmul.mubr.bf16.vlgmr.msra.gmra.mrb[48].mxu1 %v18246_v28 }
0x18f6   : > { %10507 = vmatpush1.bf16.msra.mxu1 %v14088_v27  ;;  %v14180_v27 = vld [vmem:[%s19010_s8 + $0x5e4] ss:$16 sps:$4 sm:$0xff]  }
0x18f7   : > { %10646 = vmatpush1.bf16.msra.mxu0 %v14064_v33  ;;  %10508 = vmatprep.subr.bf16.mxu1 %v14096_v34  ;;  %v14178_v33 = vld [vmem:[%s19010_s8 + $0x5e0] ss:$16 sps:$4 sm:$0xff]   ;;  %v14133_v34 = vld [vmem:[%s19010_s8 + $0x4e8] ss:$16 sps:$4 sm:$0xff]  }
0x18f8   : > { %10647 = vmatprep.subr.bf16.mxu0 %v14069_v9  ;;  %v14186_v9 = vld [vmem:[%s19010_s8 + $0x604] ss:$16 sps:$4 sm:$0xff]  }
0x18fa   : > { %10509 = vmatpush1.bf16.msra.mxu1 %v14094_v57  ;;  %v14141_v57 = vld [vmem:[%s19010_s8 + $0x50c] ss:$16 sps:$4 sm:$0xff]  }
0x18fb   : > { %10648 = vmatpush1.bf16.msra.mxu0 %v14067_v37  ;;  %10510 = vmatprep.subr.bf16.mxu1 %v14102_v38  ;;  %v14139_v37 = vld [vmem:[%s19010_s8 + $0x508] ss:$16 sps:$4 sm:$0xff]   ;;  %v14147_v38 = vld [vmem:[%s19010_s8 + $0x52c] ss:$16 sps:$4 sm:$0xff]  }
0x18fc   : > { %10649 = vmatprep.subr.bf16.mxu0 %v14072_v51  ;;  %v14145_v51 = vld [vmem:[%s19010_s8 + $0x528] ss:$16 sps:$4 sm:$0xff]  }
0x18fe   : > { %10511 = vmatpush1.bf16.msra.mxu1 %v14100_v40  ;;  %v14153_v40 = vld [vmem:[%s19010_s8 + $0x54c] ss:$16 sps:$4 sm:$0xff]  }
0x18ff   : > { %10650 = vmatpush1.bf16.msra.mxu0 %v14070_v17  ;;  %10512 = vmatprep.subr.bf16.mxu1 %v14108_v48  ;;  %v14151_v17 = vld [vmem:[%s19010_s8 + $0x548] ss:$16 sps:$4 sm:$0xff]   ;;  %v14159_v48 = vld [vmem:[%s19010_s8 + $0x56c] ss:$16 sps:$4 sm:$0xff]  }
0x1900   : > { %10651 = vmatprep.subr.bf16.mxu0 %v14075_v49  ;;  %v14157_v49 = vld [vmem:[%s19010_s8 + $0x568] ss:$16 sps:$4 sm:$0xff]  }
0x1902   : > { %10513 = vmatpush1.bf16.msra.mxu1 %v14106_v54  ;;  %v14165_v54 = vld [vmem:[%s19010_s8 + $0x58c] ss:$16 sps:$4 sm:$0xff]  }
0x1903   : > { %10652 = vmatpush1.bf16.msra.mxu0 %v14073_v35  ;;  %10514 = vmatprep.subr.bf16.mxu1 %v14114_v20  ;;  %v4672_v35 = vsub.s32 4, %v14803_v56  ;;  %v4676_v20 = vsub.s32 5, %v14803_v56 }
0x1904   : > { %10653 = vmatprep.subr.bf16.mxu0 %v14078_v16  ;;  %v14163_v16 = vld [vmem:[%s19010_s8 + $0x588] ss:$16 sps:$4 sm:$0xff]  }
0x1906   : > { %10515 = vmatpush1.bf16.msra.mxu1 %v14112_v52  ;;  %v14171_v52 = vld [vmem:[%s19010_s8 + $0x5ac] ss:$16 sps:$4 sm:$0xff]  }
0x1907   : > { %10654 = vmatpush1.bf16.msra.mxu0 %v14076_v53  ;;  %10516 = vmatprep.subr.bf16.mxu1 %v14120_v44  ;;  %v18474_v53 = vld [vmem:[%s19009_s7] sm:$0xff] }
0x1908   : > { %10655 = vmatprep.subr.bf16.mxu0 %v14081_v45  ;;  %v4673_v44 = vrot.slane %v18474_v53, %v4672_v35  ;;  %v4677_v45 = vrot.slane %v18474_v53, %v4676_v20  ;;  %v14204_v35 = vld [vmem:[%s19010_s8 + $0x664] ss:$16 sps:$4 sm:$0xff]   ;;  %v14207_v20 = vld [vmem:[%s19010_s8 + $0x66c] ss:$16 sps:$4 sm:$0xff]  }
0x190a   : > { %10517 = vmatpush1.bf16.msra.mxu1 %v14118_v10  ;;  %v14169_v10 = vld [vmem:[%s19010_s8 + $0x5a8] ss:$16 sps:$4 sm:$0xff]  }
0x190b   : > { %10656 = vmatpush1.bf16.msra.mxu0 %v14079_v62  ;;  %10518 = vmatprep.subr.bf16.mxu1 %v14126_v32  ;;  %v14177_v32 = vld [vmem:[%s19010_s8 + $0x5cc] ss:$16 sps:$4 sm:$0xff]  }
0x190c   : > { %10657 = vmatprep.subr.bf16.mxu0 %v14084_v50 }
0x190e   : > { %10519 = vmatpush1.bf16.msra.mxu1 %v14124_v18 }
0x190f   : > { %10658 = vmatpush1.bf16.msra.mxu0 %v14082_v46  ;;  %10520 = vmatprep.subr.bf16.mxu1 %v14132_v47 }
0x1910   : > { %10659 = vmatprep.subr.bf16.mxu0 %v14087_v63 }
0x1912   : > { %10521 = vmatpush1.bf16.msra.mxu1 %v14130_v0 }
0x1913   : > { %10660 = vmatpush1.bf16.msra.mxu0 %v14085_v1  ;;  %10522 = vmatprep.subr.bf16.mxu1 %v14138_v15  ;;  %v14175_v15 = vld [vmem:[%s19010_s8 + $0x5c8] ss:$16 sps:$4 sm:$0xff]  }
0x1914   : > { %10670 = vmatprep.subr.bf16.mxu0 %v14093_v23 }
0x1916   : > { %10662 = vmatmul.mubr.bf16.vlgmr.msra.gmra.mrb[64].mxu0 %v18246_v28  ;;  %10523 = vmatpush1.bf16.msra.mxu1 %v14136_v2  ;;  %v14135_v28 = vld [vmem:[%s19010_s8 + $0x4ec] ss:$16 sps:$4 sm:$0xff]  }
0x1917   : > { %10671 = vmatpush1.bf16.msra.mxu0 %v14091_v3  ;;  %10524 = vmatprep.subr.bf16.mxu1 %v14144_v4  ;;  %v14183_v3 = vld [vmem:[%s19010_s8 + $0x5ec] ss:$16 sps:$4 sm:$0xff]  }
0x1918   : > { %10672 = vmatprep.subr.bf16.mxu0 %v14099_v7 }
0x191a   : > { %10525 = vmatpush1.bf16.msra.mxu1 %v14142_v39 }
0x191b   : > { %10673 = vmatpush1.bf16.msra.mxu0 %v14097_v8  ;;  %10526 = vmatprep.subr.bf16.mxu1 %v14150_v12  ;;  %v14181_v12 = vld [vmem:[%s19010_s8 + $0x5e8] ss:$16 sps:$4 sm:$0xff]  }
0x191c   : > { %10674 = vmatprep.subr.bf16.mxu0 %v14105_v11 }
0x191e   : > { %10527 = vmatpush1.bf16.msra.mxu1 %v14148_v13 }
0x191f   : > { %10675 = vmatpush1.bf16.msra.mxu0 %v14103_v55  ;;  %10528 = vmatprep.subr.bf16.mxu1 %v14156_v59  ;;  %v14189_v59 = vld [vmem:[%s19010_s8 + $0x60c] ss:$16 sps:$4 sm:$0xff]  }
0x1920   : > { %10676 = vmatprep.subr.bf16.mxu0 %v14111_v60 }
0x1922   : > { %10529 = vmatpush1.bf16.msra.mxu1 %v14154_v41 }
0x1923   : > { %10677 = vmatpush1.bf16.msra.mxu0 %v14109_v21  ;;  %10530 = vmatprep.subr.bf16.mxu1 %v14162_v22 }
0x1924   : > { %10678 = vmatprep.subr.bf16.mxu0 %v14117_v19 }
0x1926   : > { %10531 = vmatpush1.bf16.msra.mxu1 %v14160_v14 }
0x1927   : > { %10679 = vmatpush1.bf16.msra.mxu0 %v14115_v43  ;;  %10532 = vmatprep.subr.bf16.mxu1 %v14168_v24 }
0x1928   : > { %10680 = vmatprep.subr.bf16.mxu0 %v14123_v29 }
0x192a   : > { %10533 = vmatpush1.bf16.msra.mxu1 %v14166_v30 }
0x192b   : > { %10681 = vmatpush1.bf16.msra.mxu0 %v14121_v36  ;;  %10534 = vmatprep.subr.bf16.mxu1 %v14174_v61 }
0x192c   : > { %10682 = vmatprep.subr.bf16.mxu0 %v14129_v31 }
0x192e   : > { %10535 = vmatpush1.bf16.msra.mxu1 %v14172_v25 }
0x192f   : > { %10683 = vmatpush1.bf16.msra.mxu0 %v14127_v26  ;;  %10536 = vmatprep.subr.bf16.mxu1 %v14180_v27  ;;  %v14184_v26 = vld [vmem:[%s19010_s8 + $0x600] ss:$16 sps:$4 sm:$0xff]   ;;  %v14187_v27 = vld [vmem:[%s19010_s8 + $0x608] ss:$16 sps:$4 sm:$0xff]  }
0x1930   : > { %10684 = vmatprep.subr.bf16.mxu0 %v14135_v28 }
0x1932   : > { %10537 = vmatpush1.bf16.msra.mxu1 %v14178_v33  ;;  %v14192_v33 = vld [vmem:[%s19010_s8 + $0x624] ss:$16 sps:$4 sm:$0xff]  }
0x1933   : > { %10685 = vmatpush1.bf16.msra.mxu0 %v14133_v34  ;;  %10547 = vmatprep.subr.bf16.mxu1 %v14186_v9  ;;  %v14195_v34 = vld [vmem:[%s19010_s8 + $0x62c] ss:$16 sps:$4 sm:$0xff]   ;;  %v4680_v9 = vsub.s32 6, %v14803_v56 }
0x1934   : > { %10686 = vmatprep.subr.bf16.mxu0 %v14141_v57  ;;  %v14190_v57 = vld [vmem:[%s19010_s8 + $0x620] ss:$16 sps:$4 sm:$0xff]  }
0x1937   : > { %10687 = vmatpush1.bf16.msra.mxu0 %v14139_v37  ;;  %v14193_v37 = vld [vmem:[%s19010_s8 + $0x628] ss:$16 sps:$4 sm:$0xff]  }
0x1938   : > { %10688 = vmatprep.subr.bf16.mxu0 %v14147_v38  ;;  %v4684_v38 = vsub.s32 7, %v14803_v56 }
0x193b   : > { %10689 = vmatpush1.bf16.msra.mxu0 %v14145_v51  ;;  %v14198_v51 = vld [vmem:[%s19010_s8 + $0x644] ss:$16 sps:$4 sm:$0xff]  }
0x193c   : > { %10690 = vmatprep.subr.bf16.mxu0 %v14153_v40  ;;  %v14201_v40 = vld [vmem:[%s19010_s8 + $0x64c] ss:$16 sps:$4 sm:$0xff]  }
0x193f   : > { %10691 = vmatpush1.bf16.msra.mxu0 %v14151_v17  ;;  %v4681_v17 = vrot.slane %v18474_v53, %v4680_v9  ;;  %v14240_v9 = vld [vmem:[%s19010_s8 + $0x724] ss:$16 sps:$4 sm:$0xff]  }
0x1940   : > { %10692 = vmatprep.subr.bf16.mxu0 %v14159_v48  ;;  %v4685_v48 = vrot.slane %v18474_v53, %v4684_v38  ;;  %v14241_v38 = vld [vmem:[%s19010_s8 + $0x728] ss:$16 sps:$4 sm:$0xff]  }
0x1943   : > { %10693 = vmatpush1.bf16.msra.mxu0 %v14157_v49  ;;  %v14196_v49 = vld [vmem:[%s19010_s8 + $0x640] ss:$16 sps:$4 sm:$0xff]  }
0x1944   : > { %10694 = vmatprep.subr.bf16.mxu0 %v14165_v54  ;;  %v14199_v54 = vld [vmem:[%s19010_s8 + $0x648] ss:$16 sps:$4 sm:$0xff]  }
0x1947   : > { %10695 = vmatpush1.bf16.msra.mxu0 %v14163_v16 }
0x1948   : > { %v8530_v62 = vpop.f32.mrb[44].mxu1  ;;  %10696 = vmatprep.subr.bf16.mxu0 %v14171_v52 }
0x1949   : > { %v13297_v50 = vadd.f32 %v8530_v62, %v4673_v44  ;;  %v8532_v18 = vpop.f32.mrb[45].mxu1  ;;  %v14205_v62 = vld [vmem:[%s19010_s8 + $0x668] ss:$16 sps:$4 sm:$0xff]  }
0x194a   : > { %v13298_v46 = vadd.f32 %v8532_v18, %v4677_v45  ;;  %v8534_v47 = vpop.f32.mrb[46].mxu1 }
0x194b   : > { %v8774_v63 = vmul.f32 0.2, %v13297_v50  ;;  %v13299_v0 = vadd.f32 %v8534_v47, %v4673_v44  ;;  %v8536_v1 = vpop.f32.mrb[47].mxu1  ;;  %10697 = vmatpush1.bf16.msra.mxu0 %v14169_v10  ;;  %vm8758_vm10 = vcmp.ge.f32.partialorder %v13297_v50, 0.0  ;;  %v14202_v44 = vld [vmem:[%s19010_s8 + $0x660] ss:$16 sps:$4 sm:$0xff]  }
0x194c   : > { %v8775_v23 = vmul.f32 0.2, %v13298_v46  ;;  %v13300_v2 = vadd.f32 %v8536_v1, %v4677_v45  ;;  %10698 = vmatprep.subr.bf16.mxu0 %v14177_v32  ;;  %vm8759_vm11 = vcmp.ge.f32.partialorder %v13298_v46, 0.0  ;;  %v14210_v32 = vld [vmem:[%s19010_s8 + $0x684] ss:$16 sps:$4 sm:$0xff]  }
0x194d   : > { %vm8766_vm12 = vcmp.ge.f32.partialorder %v13299_v0, 0.0  ;;  %v8782_v4 = vmul.f32 0.2, %v13299_v0  ;;  %v8790_v39 = vsel %vm8758_vm10, %v13297_v50, %v8774_v63  ;;  %v14213_v47 = vld [vmem:[%s19010_s8 + $0x68c] ss:$16 sps:$4 sm:$0xff]  }
0x194e   : > { %vm8767_vm13 = vcmp.ge.f32.partialorder %v13300_v2, 0.0  ;;  %v8783_v7 = vmul.f32 0.2, %v13300_v2  ;;  %v8791_v11 = vsel %vm8759_vm11, %v13298_v46, %v8775_v23 }
0x194f   : > { %v8798_v8 = vsel %vm8766_vm12, %v13299_v0, %v8782_v4  ;;  %10699 = vmatpush1.bf16.msra.mxu0 %v14175_v15  ;;  %v14208_v15 = vld [vmem:[%s19010_s8 + $0x680] ss:$16 sps:$4 sm:$0xff]  }
0x1950   : > { %v8830_v13 = vmax.f32 %v8790_v39, %v8798_v8  ;;  %v8799_v55 = vsel %vm8767_vm13, %v13300_v2, %v8783_v7  ;;  %10700 = vmatprep.subr.bf16.mxu0 %v14183_v3  ;;  %v14211_v2 = vld [vmem:[%s19010_s8 + $0x688] ss:$16 sps:$4 sm:$0xff]   ;;  %v14216_v7 = vld [vmem:[%s19010_s8 + $0x6a4] ss:$16 sps:$4 sm:$0xff]   ;;  %v14219_v39 = vld [vmem:[%s19010_s8 + $0x6ac] ss:$16 sps:$4 sm:$0xff]  }
0x1951   : > { %v8837_v60 = vmax.f32 %v8791_v11, %v8799_v55  ;;  %v14214_v55 = vld [vmem:[%s19010_s8 + $0x6a0] ss:$16 sps:$4 sm:$0xff]  }
0x1952   : > { %v8831_v41 = vrot.slane %v8830_v13, 4 }
0x1953   : > { %v8838_v21 = vrot.slane %v8837_v60, 4  ;;  %10701 = vmatpush1.bf16.msra.mxu0 %v14181_v12 }
0x1954   : > { %v8832_v22 = vmax.f32 %v8830_v13, %v8831_v41  ;;  %10711 = vmatprep.subr.bf16.mxu0 %v14189_v59  ;;  %v14217_v59 = vld [vmem:[%s19010_s8 + $0x6a8] ss:$16 sps:$4 sm:$0xff]   ;;  %v14222_v41 = vld [vmem:[%s19010_s8 + $0x6c4] ss:$16 sps:$4 sm:$0xff]  }
0x1955   : > { %v8839_v19 = vmax.f32 %v8837_v60, %v8838_v21  ;;  %v14225_v21 = vld [vmem:[%s19010_s8 + $0x6cc] ss:$16 sps:$4 sm:$0xff]  }
0x1956   : > { %v8833_v14 = vrot.slane %v8832_v22, 2 }
0x1957   : > { %v8840_v43 = vrot.slane %v8839_v19, 2 }
0x1958   : > { %v8834_v24 = vmax.f32 %v8832_v22, %v8833_v14  ;;  %v14223_v14 = vld [vmem:[%s19010_s8 + $0x6c8] ss:$16 sps:$4 sm:$0xff]  }
0x1959   : > { %v8841_v29 = vmax.f32 %v8839_v19, %v8840_v43  ;;  %v14220_v19 = vld [vmem:[%s19010_s8 + $0x6c0] ss:$16 sps:$4 sm:$0xff]   ;;  %v14228_v43 = vld [vmem:[%s19010_s8 + $0x6e4] ss:$16 sps:$4 sm:$0xff]  }
0x195a   : > { %v8835_v30 = vrot.slane %v8834_v24, 1 }
0x195b   : > { %v8842_v36 = vrot.slane %v8841_v29, 1 }
0x195c   : > { %v8836_v61 = vmax.f32 %v8834_v24, %v8835_v30  ;;  %v14231_v24 = vld [vmem:[%s19010_s8 + $0x6ec] ss:$16 sps:$4 sm:$0xff]  }
0x195d   : > { %v8843_v31 = vmax.f32 %v8841_v29, %v8842_v36  ;;  %v14226_v36 = vld [vmem:[%s19010_s8 + $0x6e0] ss:$16 sps:$4 sm:$0xff]  }
0x195e   : > { %v8862_v28 = vpack.c.bf16 %v8836_v61, %v8836_v61  ;;  %v14229_v61 = vld [vmem:[%s19010_s8 + $0x6e8] ss:$16 sps:$4 sm:$0xff]  }
0x195f   : > { %v8863_v25 = vpack.c.bf16 %v8843_v31, %v8843_v31  ;;  %v14234_v31 = vld [vmem:[%s19010_s8 + $0x704] ss:$16 sps:$4 sm:$0xff]  }
0x1961   : > { %10538 = vmatprep.mubr.bf16.mxu1 %v8863_v25  ;;  %10702 = vmatprep.mubr.bf16.mxu0 %v8863_v25 }
0x1962   : > { %10539 = vmatmul.mubr.bf16.vlgmr.msra.gmra.mrb[48].mxu1 %v8862_v28  ;;  %10703 = vmatmul.mubr.bf16.vlgmr.msra.gmra.mrb[64].mxu0 %v8862_v28  ;;  %v14232_v28 = vld [vmem:[%s19010_s8 + $0x700] ss:$16 sps:$4 sm:$0xff]  }
0x1963   : > { %10548 = vmatpush1.bf16.msra.mxu1 %v14184_v26  ;;  %10712 = vmatpush1.bf16.msra.mxu0 %v14187_v27  ;;  %v14237_v26 = vld [vmem:[%s19010_s8 + $0x70c] ss:$16 sps:$4 sm:$0xff]  }
0x1964   : > { %10549 = vmatprep.subr.bf16.mxu1 %v14192_v33  ;;  %10713 = vmatprep.subr.bf16.mxu0 %v14195_v34  ;;  %v14235_v33 = vld [vmem:[%s19010_s8 + $0x708] ss:$16 sps:$4 sm:$0xff]  }
0x1967   : > { %10550 = vmatpush1.bf16.msra.mxu1 %v14190_v57  ;;  %10714 = vmatpush1.bf16.msra.mxu0 %v14193_v37  ;;  %v14243_v57 = vld [vmem:[%s19010_s8 + $0x72c] ss:$16 sps:$4 sm:$0xff]   ;;  %v14238_v37 = vld [vmem:[%s19010_s8 + $0x720] ss:$16 sps:$4 sm:$0xff]  }
0x1968   : > { %10551 = vmatprep.subr.bf16.mxu1 %v14198_v51  ;;  %10715 = vmatprep.subr.bf16.mxu0 %v14201_v40  ;;  %v14246_v51 = vld [vmem:[%s19010_s8 + $0x744] ss:$16 sps:$4 sm:$0xff]   ;;  %v14249_v40 = vld [vmem:[%s19010_s8 + $0x74c] ss:$16 sps:$4 sm:$0xff]  }
0x1969   : > { %v8745_v16 = vpop.f32.mrb[60].mxu0 }
0x196a   : > { %v13301_v52 = vadd.f32 %v8745_v16, %v4681_v17  ;;  %v8747_v53 = vpop.f32.mrb[61].mxu0  ;;  %v14253_v16 = vld [vmem:[%s19010_s8 + $0x768] ss:$16 sps:$4 sm:$0xff]  }
0x196b   : > { %v13302_v45 = vadd.f32 %v8747_v53, %v4685_v48  ;;  %v8749_v10 = vpop.f32.mrb[62].mxu0  ;;  %10552 = vmatpush1.bf16.msra.mxu1 %v14196_v49  ;;  %10716 = vmatpush1.bf16.msra.mxu0 %v14199_v54  ;;  %v14252_v54 = vld [vmem:[%s19010_s8 + $0x764] ss:$16 sps:$4 sm:$0xff]  }
0x196c   : > { %v8776_v50 = vmul.f32 0.2, %v13301_v52  ;;  %v13303_v18 = vadd.f32 %v8749_v10, %v4681_v17  ;;  %v8751_v46 = vpop.f32.mrb[63].mxu0  ;;  %10553 = vmatprep.subr.bf16.mxu1 %v14204_v35  ;;  %10717 = vmatprep.subr.bf16.mxu0 %v14207_v20  ;;  %vm8760_vm14 = vcmp.ge.f32.partialorder %v13301_v52, 0.0  ;;  %v14244_v17 = vld [vmem:[%s19010_s8 + $0x740] ss:$16 sps:$4 sm:$0xff]  }
0x196d   : > { %v8777_v63 = vmul.f32 0.2, %v13302_v45  ;;  %v13304_v0 = vadd.f32 %v8751_v46, %v4685_v48  ;;  %vm8761_vm15 = vcmp.ge.f32.partialorder %v13302_v45, 0.0  ;;  %v14247_v48 = vld [vmem:[%s19010_s8 + $0x748] ss:$16 sps:$4 sm:$0xff]  }
0x196e   : > { %vm8768_vm0 = vcmp.ge.f32.partialorder %v13303_v18, 0.0  ;;  %v8784_v1 = vmul.f32 0.2, %v13303_v18  ;;  %v8792_v3 = vsel %vm8760_vm14, %v13301_v52, %v8776_v50  ;;  %v14255_v35 = vld [vmem:[%s19010_s8 + $0x76c] ss:$16 sps:$4 sm:$0xff]  }
0x196f   : > { %vm8769_vm1 = vcmp.ge.f32.partialorder %v13304_v0, 0.0  ;;  %v8785_v23 = vmul.f32 0.2, %v13304_v0  ;;  %10554 = vmatpush1.bf16.msra.mxu1 %v14202_v44  ;;  %10718 = vmatpush1.bf16.msra.mxu0 %v14205_v62  ;;  %v8793_v8 = vsel %vm8761_vm15, %v13302_v45, %v8777_v63  ;;  %v14250_v20 = vld [vmem:[%s19010_s8 + $0x760] ss:$16 sps:$4 sm:$0xff]  }
0x1970   : > { %v8800_v4 = vsel %vm8768_vm0, %v13303_v18, %v8784_v1  ;;  %10555 = vmatprep.subr.bf16.mxu1 %v14210_v32  ;;  %10719 = vmatprep.subr.bf16.mxu0 %v14213_v47  ;;  %v14258_v53 = vld [vmem:[%s19010_s8 + $0x784] ss:$16 sps:$4 sm:$0xff]   ;;  %v14261_v44 = vld [vmem:[%s19010_s8 + $0x78c] ss:$16 sps:$4 sm:$0xff]   ;;  %v14256_v45 = vld [vmem:[%s19010_s8 + $0x780] ss:$16 sps:$4 sm:$0xff]  }
0x1971   : > { %v18560_v12 = vmax.f32 %v8792_v3, %v8800_v4  ;;  %v8801_v11 = vsel %vm8769_vm1, %v13304_v0, %v8785_v23  ;;  %v14259_v10 = vld [vmem:[%s19010_s8 + $0x788] ss:$16 sps:$4 sm:$0xff]   ;;  %v14264_v32 = vld [vmem:[%s19010_s8 + $0x7a4] ss:$16 sps:$4 sm:$0xff]   ;;  %v14267_v50 = vld [vmem:[%s19010_s8 + $0x7ac] ss:$16 sps:$4 sm:$0xff]  }
0x1972   : > { %v8851_v13 = vmax.f32 %v8793_v8, %v8801_v11  ;;  %v14262_v18 = vld [vmem:[%s19010_s8 + $0x7a0] ss:$16 sps:$4 sm:$0xff]   ;;  %v14265_v46 = vld [vmem:[%s19010_s8 + $0x7a8] ss:$16 sps:$4 sm:$0xff]   ;;  %v14270_v47 = vld [vmem:[%s19010_s8 + $0x7c4] ss:$16 sps:$4 sm:$0xff]  }
0x1973   : > { %10556 = vmatpush1.bf16.msra.mxu1 %v14208_v15  ;;  %10720 = vmatpush1.bf16.msra.mxu0 %v14211_v2  ;;  %v8845_v49 = vrot.slane %v18560_v12, 4  ;;  %v14273_v63 = vld [vmem:[%s19010_s8 + $0x7cc] ss:$16 sps:$4 sm:$0xff]   ;;  %v14268_v1 = vld [vmem:[%s19010_s8 + $0x7c0] ss:$16 sps:$4 sm:$0xff]  }
0x1974   : > { %v8852_v60 = vrot.slane %v8851_v13, 4  ;;  %10557 = vmatprep.subr.bf16.mxu1 %v14216_v7  ;;  %10721 = vmatprep.subr.bf16.mxu0 %v14219_v39  ;;  %v14271_v15 = vld [vmem:[%s19010_s8 + $0x7c8] ss:$16 sps:$4 sm:$0xff]   ;;  %v14276_v23 = vld [vmem:[%s19010_s8 + $0x7e4] ss:$16 sps:$4 sm:$0xff]  }
0x1975   : > { %v8846_v52 = vmax.f32 %v18560_v12, %v8845_v49  ;;  %v14279_v2 = vld [vmem:[%s19010_s8 + $0x7ec] ss:$16 sps:$4 sm:$0xff]   ;;  %v14274_v4 = vld [vmem:[%s19010_s8 + $0x7e0] ss:$16 sps:$4 sm:$0xff]   ;;  %v14277_v7 = vld [vmem:[%s19010_s8 + $0x7e8] ss:$16 sps:$4 sm:$0xff]  }
0x1976   : > { %v8853_v22 = vmax.f32 %v8851_v13, %v8852_v60  ;;  %v14282_v8 = vld [vmem:[%s19012_s10 + $0x4] ss:$8 sps:$4 sm:$0xff]   ;;  %v14280_v12 = vld [vmem:[%s19012_s10] ss:$8 sps:$4 sm:$0xff]   ;;  %v14285_v13 = vld [vmem:[%s19012_s10 + $0x14] ss:$8 sps:$4 sm:$0xff]  }
0x1977   : > { %10558 = vmatpush1.bf16.msra.mxu1 %v14214_v55  ;;  %10722 = vmatpush1.bf16.msra.mxu0 %v14217_v59  ;;  %v8847_v62 = vrot.slane %v8846_v52, 2  ;;  %v14283_v55 = vld [vmem:[%s19012_s10 + $0x10] ss:$8 sps:$4 sm:$0xff]   ;;  %v14288_v59 = vld [vmem:[%s19012_s10 + $0x24] ss:$8 sps:$4 sm:$0xff]  }
0x1978   : > { %10559 = vmatprep.subr.bf16.mxu1 %v14222_v41  ;;  %10723 = vmatprep.subr.bf16.mxu0 %v14225_v21  ;;  %v8854_v29 = vrot.slane %v8853_v22, 2  ;;  %v14286_v60 = vld [vmem:[%s19012_s10 + $0x20] ss:$8 sps:$4 sm:$0xff]   ;;  %v14291_v41 = vld [vmem:[%s19012_s10 + $0x34] ss:$8 sps:$4 sm:$0xff]  }
0x1979   : > { %v8848_v0 = vmax.f32 %v8846_v52, %v8847_v62  ;;  %v14289_v21 = vld [vmem:[%s19012_s10 + $0x30] ss:$8 sps:$4 sm:$0xff]   ;;  %v14330_v49 = vld [vmem:[%s19012_s10 + $0x104] ss:$8 sps:$4 sm:$0xff]  }
0x197a   : > { %v8855_v30 = vmax.f32 %v8853_v22, %v8854_v29  ;;  %v14294_v22 = vld [vmem:[%s19012_s10 + $0x44] ss:$8 sps:$4 sm:$0xff]   ;;  %v14298_v29 = vld [vmem:[%s19012_s10 + $0x60] ss:$8 sps:$4 sm:$0xff]   ;;  %v14380_v52 = vld [vmem:[%s19014_s12 + $0x50] sm:$0xff]  }
0x197b   : > { %10560 = vmatpush1.bf16.msra.mxu1 %v14220_v19  ;;  %10724 = vmatpush1.bf16.msra.mxu0 %v14223_v14  ;;  %v8849_v3 = vrot.slane %v8848_v0, 1  ;;  %v14292_v19 = vld [vmem:[%s19012_s10 + $0x40] ss:$8 sps:$4 sm:$0xff]   ;;  %v14297_v14 = vld [vmem:[%s19012_s10 + $0x54] ss:$8 sps:$4 sm:$0xff]  }
0x197c   : > { %10561 = vmatprep.subr.bf16.mxu1 %v14228_v43  ;;  %10725 = vmatprep.subr.bf16.mxu0 %v14231_v24  ;;  %v8856_v25 = vrot.slane %v8855_v30, 1  ;;  %v14295_v43 = vld [vmem:[%s19012_s10 + $0x50] ss:$8 sps:$4 sm:$0xff]   ;;  %v14300_v24 = vld [vmem:[%s19012_s10 + $0x64] ss:$8 sps:$4 sm:$0xff]  }
0x197d   : > { %v8850_v39 = vmax.f32 %v8848_v0, %v8849_v3  ;;  %v14385_v62 = vld [vmem:[%s19014_s12 + $0x20] sm:$0xff]  }
0x197e   : > { %v8857_v27 = vmax.f32 %v8855_v30, %v8856_v25  ;;  %v14303_v30 = vld [vmem:[%s19012_s10 + $0x74] ss:$8 sps:$4 sm:$0xff]  }
0x197f   : > { %10562 = vmatpush1.bf16.msra.mxu1 %v14226_v36  ;;  %10726 = vmatpush1.bf16.msra.mxu0 %v14229_v61  ;;  %v8864_v11 = vpack.c.bf16 %v8850_v39, %v8850_v39  ;;  %v14301_v36 = vld [vmem:[%s19012_s10 + $0x70] ss:$8 sps:$4 sm:$0xff]   ;;  %v14306_v61 = vld [vmem:[%s19012_s10 + $0x84] ss:$8 sps:$4 sm:$0xff]   ;;  %v14309_v25 = vld [vmem:[%s19012_s10 + $0x94] ss:$8 sps:$4 sm:$0xff]  }
0x1980   : > { %10563 = vmatprep.subr.bf16.mxu1 %v14234_v31  ;;  %v8865_v34 = vpack.c.bf16 %v8857_v27, %v8857_v27  ;;  %10727 = vmatprep.subr.bf16.mxu0 %v14237_v26  ;;  %v14304_v31 = vld [vmem:[%s19012_s10 + $0x80] ss:$8 sps:$4 sm:$0xff]   ;;  %v14307_v26 = vld [vmem:[%s19012_s10 + $0x90] ss:$8 sps:$4 sm:$0xff]   ;;  %v14312_v27 = vld [vmem:[%s19012_s10 + $0xa4] ss:$8 sps:$4 sm:$0xff]  }
0x1982   : > { %10579 = vmatprep.mubr.bf16.mxu1 %v8865_v34  ;;  %10743 = vmatprep.mubr.bf16.mxu0 %v8865_v34  ;;  %v14313_v34 = vld [vmem:[%s19012_s10 + $0xb0] ss:$8 sps:$4 sm:$0xff]  }
0x1983   : > { %10564 = vmatpush1.bf16.msra.mxu1 %v14232_v28  ;;  %10728 = vmatpush1.bf16.msra.mxu0 %v14235_v33  ;;  %v14310_v28 = vld [vmem:[%s19012_s10 + $0xa0] ss:$8 sps:$4 sm:$0xff]   ;;  %v14315_v33 = vld [vmem:[%s19012_s10 + $0xb4] ss:$8 sps:$4 sm:$0xff]  }
0x1984   : > { %10565 = vmatprep.subr.bf16.mxu1 %v14240_v9  ;;  %10729 = vmatprep.subr.bf16.mxu0 %v14243_v57  ;;  %v14318_v9 = vld [vmem:[%s19012_s10 + $0xc4] ss:$8 sps:$4 sm:$0xff]   ;;  %v14316_v57 = vld [vmem:[%s19012_s10 + $0xc0] ss:$8 sps:$4 sm:$0xff]  }
0x1987   : > { %10566 = vmatpush1.bf16.msra.mxu1 %v14238_v37  ;;  %10730 = vmatpush1.bf16.msra.mxu0 %v14241_v38  ;;  %v14321_v37 = vld [vmem:[%s19012_s10 + $0xd4] ss:$8 sps:$4 sm:$0xff]   ;;  %v14319_v38 = vld [vmem:[%s19012_s10 + $0xd0] ss:$8 sps:$4 sm:$0xff]  }
0x1988   : > { %10567 = vmatprep.subr.bf16.mxu1 %v14246_v51  ;;  %10731 = vmatprep.subr.bf16.mxu0 %v14249_v40  ;;  %v14324_v51 = vld [vmem:[%s19012_s10 + $0xe4] ss:$8 sps:$4 sm:$0xff]   ;;  %v14322_v40 = vld [vmem:[%s19012_s10 + $0xe0] ss:$8 sps:$4 sm:$0xff]  }
0x198b   : > { %10568 = vmatpush1.bf16.msra.mxu1 %v14244_v17  ;;  %10732 = vmatpush1.bf16.msra.mxu0 %v14247_v48  ;;  %v14327_v17 = vld [vmem:[%s19012_s10 + $0xf4] ss:$8 sps:$4 sm:$0xff]   ;;  %v14325_v48 = vld [vmem:[%s19012_s10 + $0xf0] ss:$8 sps:$4 sm:$0xff]  }
0x198c   : > { %10569 = vmatprep.subr.bf16.mxu1 %v14252_v54  ;;  %10733 = vmatprep.subr.bf16.mxu0 %v14255_v35  ;;  %v14376_v54 = vld [vmem:[%s19014_s12 + $0x40] sm:$0xff]  }
0x198d   : > { %v14377_v35 = vld [vmem:[%s19014_s12] sm:$0xff]  }
0x198f   : > { %10570 = vmatpush1.bf16.msra.mxu1 %v14250_v20  ;;  %10734 = vmatpush1.bf16.msra.mxu0 %v14253_v16  ;;  %v14378_v20 = vld [vmem:[%s19014_s12 + $0x48] sm:$0xff]  }
0x1990   : > { %10571 = vmatprep.subr.bf16.mxu1 %v14258_v53  ;;  %10735 = vmatprep.subr.bf16.mxu0 %v14261_v44  ;;  %v14379_v16 = vld [vmem:[%s19014_s12 + $0x8] sm:$0xff]   ;;  %v14381_v53 = vld [vmem:[%s19014_s12 + $0x10] sm:$0xff]   ;;  %v14382_v44 = vld [vmem:[%s19014_s12 + $0x58] sm:$0xff]  }
0x1993   : > { %10572 = vmatpush1.bf16.msra.mxu1 %v14256_v45  ;;  %10736 = vmatpush1.bf16.msra.mxu0 %v14259_v10  ;;  %v14383_v45 = vld [vmem:[%s19014_s12 + $0x18] sm:$0xff]   ;;  %v14384_v10 = vld [vmem:[%s19014_s12 + $0x60] sm:$0xff]  }
0x1994   : > { %10573 = vmatprep.subr.bf16.mxu1 %v14264_v32  ;;  %10737 = vmatprep.subr.bf16.mxu0 %v14267_v50  ;;  %v14386_v32 = vld [vmem:[%s19014_s12 + $0x68] sm:$0xff]  }
0x1995   : > { %v14387_v50 = vld [vmem:[%s19014_s12 + $0x28] sm:$0xff]  }
0x1997   : > { %10574 = vmatpush1.bf16.msra.mxu1 %v14262_v18  ;;  %10738 = vmatpush1.bf16.msra.mxu0 %v14265_v46  ;;  %v18828_v18 = vld [vmem:[%s19011_s9] sm:$0xf] }
0x1998   : > { %10575 = vmatprep.subr.bf16.mxu1 %v14270_v47  ;;  %10739 = vmatprep.subr.bf16.mxu0 %v14273_v63  ;;  %v10407_v46 = vrot.slane %v18828_v18, %v14813_v5  ;;  %v10411_v47 = vrot.slane %v18828_v18, %v14816_v6  ;;  %v10419_v63 = vrot.slane %v18828_v18, %v4668_v42 }
0x199b   : > { %10576 = vmatpush1.bf16.msra.mxu1 %v14268_v1  ;;  %10740 = vmatpush1.bf16.msra.mxu0 %v14271_v15 }
0x199c   : > { %10577 = vmatprep.subr.bf16.mxu1 %v14276_v23  ;;  %10741 = vmatprep.subr.bf16.mxu0 %v14279_v2 }
0x199f   : > { %10578 = vmatpush1.bf16.msra.mxu1 %v14274_v4  ;;  %10742 = vmatpush1.bf16.msra.mxu0 %v14277_v7 }
0x19a0   : > { %11164 = vmatprep.subr.bf16.mxu1 %v14282_v8  ;;  %13219 = vmatprep.subr.bf16.mxu0 %v14376_v54  ;;  %v14369_v54 = vld [vmem:[%s19012_s10 + $0x1d4] ss:$8 sps:$4 sm:$0xff]  }
0x19a2   : > { %10580 = vmatmul.mubr.bf16.vlgmr.msra.gmra.mrb[48].mxu1 %v8864_v11  ;;  %10744 = vmatmul.mubr.bf16.vlgmr.msra.gmra.mrb[64].mxu0 %v8864_v11 }
0x19a3   : > { %11165 = vmatpush1.bf16.msra.mxu1 %v14280_v12  ;;  %13220 = vmatpush3.bf16.msra.mxu0 %v14377_v35  ;;  %v10415_v35 = vrot.slane %v18828_v18, %v14809_v58  ;;  %v14375_v58 = vld [vmem:[%s19012_s10 + $0x1f4] ss:$8 sps:$4 sm:$0xff]  }
0x19a4   : > { %11166 = vmatprep.subr.bf16.mxu1 %v14285_v13  ;;  %13221 = vmatprep.subr.bf16.mxu0 %v14378_v20  ;;  %v14367_v20 = vld [vmem:[%s19012_s10 + $0x1d0] ss:$8 sps:$4 sm:$0xff]  }
0x19a5   : > { %v14390_v18 = vld [vmem:[%s19014_s12 + $0x78] sm:$0xff]  }
0x19a7   : > { %11167 = vmatpush1.bf16.msra.mxu1 %v14283_v55  ;;  %13222 = vmatpush3.bf16.msra.mxu0 %v14379_v16  ;;  %v14372_v16 = vld [vmem:[%s19012_s10 + $0x1e4] ss:$8 sps:$4 sm:$0xff]  }
0x19a8   : > { %11168 = vmatprep.subr.bf16.mxu1 %v14288_v59  ;;  %13223 = vmatprep.subr.bf16.mxu0 %v14380_v52 }
0x19ab   : > { %11169 = vmatpush1.bf16.msra.mxu1 %v14286_v60  ;;  %13224 = vmatpush3.bf16.msra.mxu0 %v14381_v53  ;;  %v14370_v53 = vld [vmem:[%s19012_s10 + $0x1e0] ss:$8 sps:$4 sm:$0xff]  }
0x19ac   : > { %11170 = vmatprep.subr.bf16.mxu1 %v14291_v41  ;;  %13225 = vmatprep.subr.bf16.mxu0 %v14382_v44  ;;  %v14328_v41 = vld [vmem:[%s19012_s10 + $0x100] ss:$8 sps:$4 sm:$0xff]  }
0x19af   : > { %11171 = vmatpush1.bf16.msra.mxu1 %v14289_v21  ;;  %13226 = vmatpush3.bf16.msra.mxu0 %v14383_v45  ;;  %v14373_v45 = vld [vmem:[%s19012_s10 + $0x1f0] ss:$8 sps:$4 sm:$0xff]  }
0x19b0   : > { %11172 = vmatprep.subr.bf16.mxu1 %v14294_v22  ;;  %13227 = vmatprep.subr.bf16.mxu0 %v14384_v10  ;;  %v14333_v22 = vld [vmem:[%s19012_s10 + $0x114] ss:$8 sps:$4 sm:$0xff]  }
0x19b3   : > { %11173 = vmatpush1.bf16.msra.mxu1 %v14292_v19  ;;  %13228 = vmatpush3.bf16.msra.mxu0 %v14385_v62 }
0x19b4   : > { %11174 = vmatprep.subr.bf16.mxu1 %v14297_v14  ;;  %13229 = vmatprep.subr.bf16.mxu0 %v14386_v32  ;;  %v14331_v14 = vld [vmem:[%s19012_s10 + $0x110] ss:$8 sps:$4 sm:$0xff]  }
0x19b5   : > { %v14388_v32 = vld [vmem:[%s19014_s12 + $0x70] sm:$0xff]  }
0x19b7   : > { %11175 = vmatpush1.bf16.msra.mxu1 %v14295_v43  ;;  %13230 = vmatpush3.bf16.msra.mxu0 %v14387_v50  ;;  %v14336_v43 = vld [vmem:[%s19012_s10 + $0x124] ss:$8 sps:$4 sm:$0xff]   ;;  %v14389_v50 = vld [vmem:[%s19014_s12 + $0x30] sm:$0xff]  }
0x19b8   : > { %11176 = vmatprep.subr.bf16.mxu1 %v14300_v24  ;;  %v14334_v24 = vld [vmem:[%s19012_s10 + $0x120] ss:$8 sps:$4 sm:$0xff]   ;;  %13231 = vmatprep.subr.bf16.mxu0 %v14388_v32 }
0x19bb   : > { %11177 = vmatpush1.bf16.msra.mxu1 %v14298_v29  ;;  %v14339_v29 = vld [vmem:[%s19012_s10 + $0x134] ss:$8 sps:$4 sm:$0xff]   ;;  %13232 = vmatpush3.bf16.msra.mxu0 %v14389_v50 }
0x19bc   : > { %11178 = vmatprep.subr.bf16.mxu1 %v14303_v30  ;;  %v14337_v30 = vld [vmem:[%s19012_s10 + $0x130] ss:$8 sps:$4 sm:$0xff]   ;;  %13233 = vmatprep.subr.bf16.mxu0 %v14390_v18 }
0x19bf   : > { %11179 = vmatpush1.bf16.msra.mxu1 %v14301_v36  ;;  %v14342_v36 = vld [vmem:[%s19012_s10 + $0x144] ss:$8 sps:$4 sm:$0xff]  }
0x19c0   : > { %11180 = vmatprep.subr.bf16.mxu1 %v14306_v61  ;;  %v14340_v61 = vld [vmem:[%s19012_s10 + $0x140] ss:$8 sps:$4 sm:$0xff]  }
0x19c3   : > { %11181 = vmatpush1.bf16.msra.mxu1 %v14304_v31  ;;  %v14345_v31 = vld [vmem:[%s19012_s10 + $0x154] ss:$8 sps:$4 sm:$0xff]  }
0x19c4   : > { %11182 = vmatprep.subr.bf16.mxu1 %v14309_v25  ;;  %v14343_v25 = vld [vmem:[%s19012_s10 + $0x150] ss:$8 sps:$4 sm:$0xff]  }
0x19c7   : > { %11183 = vmatpush1.bf16.msra.mxu1 %v14307_v26  ;;  %v14348_v26 = vld [vmem:[%s19012_s10 + $0x164] ss:$8 sps:$4 sm:$0xff]  }
0x19c8   : > { %11184 = vmatprep.subr.bf16.mxu1 %v14312_v27  ;;  %v14346_v27 = vld [vmem:[%s19012_s10 + $0x160] ss:$8 sps:$4 sm:$0xff]  }
0x19cb   : > { %11185 = vmatpush1.bf16.msra.mxu1 %v14310_v28  ;;  %v14351_v28 = vld [vmem:[%s19012_s10 + $0x174] ss:$8 sps:$4 sm:$0xff]  }
0x19cc   : > { %11186 = vmatprep.subr.bf16.mxu1 %v14315_v33  ;;  %v14349_v33 = vld [vmem:[%s19012_s10 + $0x170] ss:$8 sps:$4 sm:$0xff]  }
0x19cf   : > { %11187 = vmatpush1.bf16.msra.mxu1 %v14313_v34  ;;  %v14354_v34 = vld [vmem:[%s19012_s10 + $0x184] ss:$8 sps:$4 sm:$0xff]  }
0x19d0   : > { %11188 = vmatprep.subr.bf16.mxu1 %v14318_v9  ;;  %v14352_v9 = vld [vmem:[%s19012_s10 + $0x180] ss:$8 sps:$4 sm:$0xff]  }
0x19d3   : > { %11189 = vmatpush1.bf16.msra.mxu1 %v14316_v57  ;;  %v14357_v57 = vld [vmem:[%s19012_s10 + $0x194] ss:$8 sps:$4 sm:$0xff]  }
0x19d4   : > { %11190 = vmatprep.subr.bf16.mxu1 %v14321_v37  ;;  %v14355_v37 = vld [vmem:[%s19012_s10 + $0x190] ss:$8 sps:$4 sm:$0xff]  }
0x19d7   : > { %11191 = vmatpush1.bf16.msra.mxu1 %v14319_v38  ;;  %v14360_v38 = vld [vmem:[%s19012_s10 + $0x1a4] ss:$8 sps:$4 sm:$0xff]  }
0x19d8   : > { %11192 = vmatprep.subr.bf16.mxu1 %v14324_v51  ;;  %v14358_v51 = vld [vmem:[%s19012_s10 + $0x1a0] ss:$8 sps:$4 sm:$0xff]  }
0x19db   : > { %11193 = vmatpush1.bf16.msra.mxu1 %v14322_v40  ;;  %v14363_v40 = vld [vmem:[%s19012_s10 + $0x1b4] ss:$8 sps:$4 sm:$0xff]  }
0x19dc   : > { %11194 = vmatprep.subr.bf16.mxu1 %v14327_v17  ;;  %v14361_v17 = vld [vmem:[%s19012_s10 + $0x1b0] ss:$8 sps:$4 sm:$0xff]  }
0x19df   : > { %11195 = vmatpush1.bf16.msra.mxu1 %v14325_v48  ;;  %v14366_v48 = vld [vmem:[%s19012_s10 + $0x1c4] ss:$8 sps:$4 sm:$0xff]  }
0x19e0   : > { %11205 = vmatprep.subr.bf16.mxu1 %v14330_v49  ;;  %v14364_v49 = vld [vmem:[%s19012_s10 + $0x1c0] ss:$8 sps:$4 sm:$0xff]  }
0x1a75   : > { %v10581_v0 = vpop.f32.mrb[48].mxu1  ;;  %v18837_v1 = vpop.f32.mrb[64].mxu0 }
0x1a76   : > { %v13305_v15 = vadd.f32 %v10581_v0, %v10407_v46  ;;  %v10583_v23 = vpop.f32.mrb[49].mxu1  ;;  %v10747_v2 = vpop.f32.mrb[65].mxu0  ;;  %v13307_v52 = vadd.f32 %v18837_v1, %v10415_v35  ;;  %v14391_v46 = vld [vmem:[%s19014_s12 + $0x38] sm:$0xff]  }
0x1a77   : > { %v13306_v3 = vadd.f32 %v10583_v23, %v10411_v47  ;;  %v13308_v4 = vadd.f32 %v10747_v2, %v10419_v63  ;;  %v10585_v7 = vpop.f32.mrb[50].mxu1  ;;  %v10749_v39 = vpop.f32.mrb[66].mxu0  ;;  %13234 = vmatpush3.bf16.msra.mxu0 %v14391_v46  ;;  %v10832_v47 = vld [vmem:[%s19013_s11] sm:$0x3] }
0x1a78   : > { %vm10752_vm2 = vcmp.ge.f32.partialorder %v13305_v15, 0.0  ;;  %v10756_v8 = vmul.f32 0.2, %v13305_v15  ;;  %v10586_v56 = vpop.f32.mrb[51].mxu1  ;;  %v10750_v55 = vpop.f32.mrb[67].mxu0  ;;  %vm10754_vm5 = vcmp.ge.f32.partialorder %v13307_v52, 0.0  ;;  %v11157_v63 = vrot.slane %v10832_v47, %v14813_v5 }
0x1a79   : > { %vm10753_vm3 = vcmp.ge.f32.partialorder %v13306_v3, 0.0  ;;  %v10757_v12 = vmul.f32 0.2, %v13306_v3  ;;  %vm10755_vm4 = vcmp.ge.f32.partialorder %v13308_v4, 0.0  ;;  %v10759_v11 = vmul.f32 0.2, %v13308_v4 }
0x1a7a   : > { %v10760_v13 = vsel %vm10752_vm2, %v13305_v15, %v10756_v8  ;;  %v10758_v44 = vmul.f32 0.2, %v13307_v52  ;;  %v11161_v0 = vrot.slane %v10832_v47, %v14816_v6  ;;  %v11286_v6 = vld [vmem:[%s19015_s13] sm:$0x1] }
0x1a7b   : > { %v10761_v42 = vsel %vm10753_vm3, %v13306_v3, %v10757_v12  ;;  %v10763_v59 = vsel %vm10755_vm4, %v13308_v4, %v10759_v11  ;;  %v10764_v21 = vpack.c.bf16 %v10760_v13, %v10760_v13 }
0x1a7c   : > { %v10765_v60 = vpack.c.bf16 %v10761_v42, %v10761_v42  ;;  %v10767_v19 = vpack.c.bf16 %v10763_v59, %v10763_v59  ;;  %v10762_v10 = vsel %vm10754_vm5, %v13307_v52, %v10758_v44 }
0x1a7d   : > { %v10766_v62 = vpack.c.bf16 %v10762_v10, %v10762_v10 }
0x1a7e   : > { %11196 = vmatprep.mubr.bf16.mxu1 %v10765_v60 }
0x1a7f   : > { %11197 = vmatmul.mubr.bf16.vlgmr.msra.gmra.mrb[52].mxu1 %v10764_v21 }
0x1a80   : > { %11206 = vmatpush1.bf16.msra.mxu1 %v14328_v41  ;;  %11237 = vmatprep.mubr.bf16.mxu1 %v10767_v19 }
0x1a81   : > { %11207 = vmatprep.subr.bf16.mxu1 %v14333_v22 }
0x1a84   : > { %11208 = vmatpush1.bf16.msra.mxu1 %v14331_v14 }
0x1a85   : > { %11209 = vmatprep.subr.bf16.mxu1 %v14336_v43 }
0x1a88   : > { %11210 = vmatpush1.bf16.msra.mxu1 %v14334_v24 }
0x1a89   : > { %11211 = vmatprep.subr.bf16.mxu1 %v14339_v29 }
0x1a8c   : > { %11212 = vmatpush1.bf16.msra.mxu1 %v14337_v30 }
0x1a8d   : > { %11213 = vmatprep.subr.bf16.mxu1 %v14342_v36 }
0x1a90   : > { %11214 = vmatpush1.bf16.msra.mxu1 %v14340_v61 }
0x1a91   : > { %11215 = vmatprep.subr.bf16.mxu1 %v14345_v31 }
0x1a94   : > { %11216 = vmatpush1.bf16.msra.mxu1 %v14343_v25 }
0x1a95   : > { %11217 = vmatprep.subr.bf16.mxu1 %v14348_v26 }
0x1a98   : > { %11218 = vmatpush1.bf16.msra.mxu1 %v14346_v27 }
0x1a99   : > { %11219 = vmatprep.subr.bf16.mxu1 %v14351_v28 }
0x1a9c   : > { %11220 = vmatpush1.bf16.msra.mxu1 %v14349_v33 }
0x1a9d   : > { %11221 = vmatprep.subr.bf16.mxu1 %v14354_v34 }
0x1aa0   : > { %11222 = vmatpush1.bf16.msra.mxu1 %v14352_v9 }
0x1aa1   : > { %11223 = vmatprep.subr.bf16.mxu1 %v14357_v57 }
0x1aa4   : > { %11224 = vmatpush1.bf16.msra.mxu1 %v14355_v37 }
0x1aa5   : > { %11225 = vmatprep.subr.bf16.mxu1 %v14360_v38 }
0x1aa8   : > { %11226 = vmatpush1.bf16.msra.mxu1 %v14358_v51 }
0x1aa9   : > { %11227 = vmatprep.subr.bf16.mxu1 %v14363_v40 }
0x1aac   : > { %11228 = vmatpush1.bf16.msra.mxu1 %v14361_v17 }
0x1aad   : > { %11229 = vmatprep.subr.bf16.mxu1 %v14366_v48 }
0x1ab0   : > { %11230 = vmatpush1.bf16.msra.mxu1 %v14364_v49 }
0x1ab1   : > { %11231 = vmatprep.subr.bf16.mxu1 %v14369_v54 }
0x1ab4   : > { %11232 = vmatpush1.bf16.msra.mxu1 %v14367_v20 }
0x1ab5   : > { %11233 = vmatprep.subr.bf16.mxu1 %v14372_v16 }
0x1ab8   : > { %11234 = vmatpush1.bf16.msra.mxu1 %v14370_v53 }
0x1ab9   : > { %11235 = vmatprep.subr.bf16.mxu1 %v14375_v58 }
0x1abc   : > { %11236 = vmatpush1.bf16.msra.mxu1 %v14373_v45 }
0x1abf   : > { %11238 = vmatmul.mubr.bf16.vlgmr.msra.gmra.mrb[52].mxu1 %v10766_v62 }
0x1b92   : > { %v11239_v1 = vpop.f32.mrb[52].mxu1 }
0x1b93   : > { %v13309_v15 = vadd.f32 %v11239_v1, %v11157_v63  ;;  %v11241_v23 = vpop.f32.mrb[53].mxu1 }
0x1b94   : > { %v13310_v2 = vadd.f32 %v11241_v23, %v11161_v0  ;;  %v11243_v3 = vpop.f32.mrb[54].mxu1 }
0x1b95   : > { %vm11246_vm6 = vcmp.ge.f32.partialorder %v13309_v15, 0.0  ;;  %v11248_v4 = vmul.f32 0.2, %v13309_v15  ;;  %v11244_v7 = vpop.f32.mrb[55].mxu1 }
0x1b96   : > { %vm11247_vm7 = vcmp.ge.f32.partialorder %v13310_v2, 0.0  ;;  %v11249_v39 = vmul.f32 0.2, %v13310_v2 }
0x1b97   : > { %v11250_v8 = vsel %vm11246_vm6, %v13309_v15, %v11248_v4 }
0x1b98   : > { %v11251_v12 = vsel %vm11247_vm7, %v13310_v2, %v11249_v39  ;;  %v11252_v13 = vpack.c.bf16 %v11250_v8, %v11250_v8 }
0x1b99   : > { %v11253_v11 = vpack.c.bf16 %v11251_v12, %v11251_v12 }
0x1b9b   : > { %11415 = vmatprep.mubr.bf16.mxu0 %v11253_v11 }
0x1b9c   : > { %11416 = vmatmul.mubr.bf16.vlgmr.msra.gmra.mrb[68].mxu0 %v11252_v13 }
0x1c6f   : > { %v13235_v5 = vpop.f32.mrb[68].mxu0 }
0x1c70   : > { %v13236_v56 = vpop.f32.mrb[69].mxu0 }
0x1c71   : > { %v13237_v55 = vadd.f32 %v13236_v56, %v13235_v5  ;;  %v13238_v42 = vpop.f32.mrb[70].mxu0 }
0x1c72   : > { %v13239_v59 = vpop.f32.mrb[71].mxu0 }
0x1c73   : > { %v11418_v60 = vadd.f32 %v13237_v55, %v11286_v6 }
0x1c75   : > { %11423 = vst [vmem:[%s474_s27] sm:$0x1] %v11418_v60 }
0x1c76   : > { %14458 = shalt.err (!%p14455_p3)
}
0x1c77   : > { %s14459_s18 = scalar_lea.hbm %s18960_s22, 16  ;;  %s14463_s27 = scalar_lea.hbm %s19016_s14, 32 }
0x1c78   : > { %p14460_p4 = scmp.ne.s32.totalorder %s18960_s22, %s14459_s18  ;;  %p14464_p9 = scmp.lt.u32.totalorder %s18960_s22, %s19016_s14 }
0x1c79   : > { %p14465_p10 = scmp.lt.u32.totalorder %s14463_s27, %s14459_s18  ;;  %p14467_p12 = scmp.lt.u32.totalorder %s14459_s18, %s18960_s22 }
0x1c7a   : > { %p14461_p7 = pnand %p14460_p4, %p14627_p5 }
0x1c7b   : > { %p14466_p11 = por %p14465_p10, %p14464_p9 }
0x1c7c   : > { %p14462_p8 = pneg %p14461_p7 }
0x1c7d   : > { %p14468_p13 = por %p14467_p12, %p14466_p11 }
0x1c7f   : > { %p14469_p0 = pnand %p14468_p13, %p14462_p8 }
0x1c81   : > { %14472 = shalt.err (!%p14469_p0)
}
0x1c82   : > { %13403 = dma.vmem_to_hbm [thread:$0]  (%p14627_p5), %s18962_s28, 16, %s18960_s22, %s11425_s20  }
0x1c83 PF: > { %p13409_p1 = scmp.ge.s32.totalorder %s14507_s16, 2  ;;  %s11449_s17 = sand.u32 1, %s14495_s29  }
0x1c84   : > { %s11450_s0 = scalar_lea.sflag [#allocation4], %s11449_s17 }
0x1c85   : > { %p13406_p2 = pnand %p13409_p1, %p14631_p6 }
0x1c87   : > { %14490 = dma.done.wait (!%p13406_p2), %s11450_s0, 16  }
0x1c88   : > { %14492 = vsyncadd (!%p13406_p2), %s11450_s0, 4294967280  ;;  %s19032_s16 = sld [smem:[#allocation7_spill]]  ;;  %s19033_s21 = sld [smem:[#allocation6_spill]] }
0x1c89   : > { %s19034_s15 = sld [smem:[#allocation8_spill]]  ;;  %s19035_s29 = smov %s14499_s30 }
0x1c8e   : > { %p24_p3 = scmp.ge.s32.totalorder %s19032_s16, 4   ;;  %s19036_s30 = smov %s19033_s21 }
0x1c90   :  { %26 = sbr.rel (!%p24_p3) target bundleno = 5 (0x5), region = 126 }
0x1c97   :  { %11454 = vsyncpa [#allocation4], 1 }
0x1c98   :  { %11456 = vsyncpa [#allocation4 + $0x1], 1 }

</bundles_post_ra>
